<compile_context>
chip_gen: v6e
topology: v6e:2x2x1
jax: 0.10.0
libtpu: 0.0.40
codegen_flags: <defaults>
</compile_context>

<pallas_src>
import functools

import jax
import jax.numpy as jnp
import numpy as np
from jax.experimental import pallas as pl
from jax.experimental.pallas import tpu as pltpu

GN_GROUPS = 4
GN_EPS = 1e-5


# ----------------------------------------------------------------------------
# Pallas kernel: fused conv (accumulated shifted matmuls) + GroupNorm(4) + ReLU
# ----------------------------------------------------------------------------
def conv_gn_relu_kernel(x_ref, w_ref, gmat_ref, gamma_ref, beta_ref, mask_ref,
                        o_ref, *, taps, wp, out_len):
    # x_ref:     (1, Cin_eff, Lin)   bf16  padded input, channel-major, flat spatial
    # w_ref:     (T, Cout, Cin_eff)  bf16  per-tap conv weights
    # gmat_ref:  (Cout, Cout)        f32   group-averaging matrix (1/(Cpg*Ho*Wo))
    # gamma_ref: (Cout, 1) f32, beta_ref: (Cout, 1) f32
    # mask_ref:  (1, out_len)        f32   1.0 for valid spatial columns
    # o_ref:     (1, Cout, out_len)  bf16
    acc = None
    for t, (dy, dx) in enumerate(taps):
        off = dy * wp + dx                                  # static Python int
        xs = x_ref[0, :, pl.ds(off, out_len)]               # (Cin_eff, L) bf16
        y_t = jnp.dot(w_ref[t], xs, preferred_element_type=jnp.float32)
        acc = y_t if acc is None else acc + y_t             # (Cout, L) f32

    mask = mask_ref[...]                                    # (1, L)
    # Two-pass GroupNorm statistics over the valid spatial columns only.
    s = jnp.sum(acc * mask, axis=1, keepdims=True)          # (Cout, 1) channel sums
    mean = jnp.dot(gmat_ref[...], s,
                   preferred_element_type=jnp.float32)      # (Cout, 1) group mean
    d = (acc - mean) * mask
    var = jnp.dot(gmat_ref[...], jnp.sum(d * d, axis=1, keepdims=True),
                  preferred_element_type=jnp.float32)       # (Cout, 1) group var
    inv = jax.lax.rsqrt(var + GN_EPS)
    out = jnp.maximum((acc - mean) * inv * gamma_ref[...] + beta_ref[...], 0.0)
    o_ref[0] = out.astype(o_ref.dtype)


# ----------------------------------------------------------------------------
# One Encoder.Block on a channel-major (N, Cin, H, W) bf16 activation
# ----------------------------------------------------------------------------
def conv_gn_relu_block(x, w_taps, gamma, beta, kernel_size, stride):
    n, cin, h, w_sp = x.shape
    cout = w_taps.shape[1]

    if stride == 1:                     # 3x3, pad 1 (+1 extra zero row so every
        xp = jnp.pad(x, ((0, 0), (0, 0), (1, 2), (1, 1)))   # shifted view fits)
        cin_eff, kh, kw = cin, 3, 3
        ho, wo = h, w_sp
        wp = w_sp + 2
    else:                               # 4x4 stride-2 -> space-to-depth + 2x2 stride-1
        assert h % 2 == 0 and w_sp % 2 == 0
        xp = jnp.pad(x, ((0, 0), (0, 0), (1, 1), (1, 1)))
        hp, wpad = h + 2, w_sp + 2
        xp = xp.reshape(n, cin, hp // 2, 2, wpad // 2, 2)
        xp = xp.transpose(0, 3, 5, 1, 2, 4).reshape(n, 4 * cin, hp // 2, wpad // 2)
        xp = jnp.pad(xp, ((0, 0), (0, 0), (0, 1), (0, 0)))  # extra zero row
        cin_eff, kh, kw = 4 * cin, 2, 2
        ho, wo = h // 2, w_sp // 2
        wp = wpad // 2

    x_flat = xp.reshape(n, cin_eff, -1)                     # (N, Cin_eff, Lin)
    lin = x_flat.shape[-1]
    out_len = ho * wp
    taps = tuple((dy, dx) for dy in range(kh) for dx in range(kw))

    # Tiny constant side inputs (host-built).
    mask = (np.arange(out_len) % wp < wo).astype(np.float32).reshape(1, out_len)
    cpg = cout // GN_GROUPS
    gid = np.arange(cout) // cpg
    gmat = (gid[:, None] == gid[None, :]).astype(np.float32) / float(cpg * ho * wo)

    kernel = functools.partial(conv_gn_relu_kernel, taps=taps, wp=wp, out_len=out_len)
    out = pl.pallas_call(
        kernel,
        out_shape=jax.ShapeDtypeStruct((n, cout, out_len), jnp.bfloat16),
        grid=(n,),
        in_specs=[
            pl.BlockSpec((1, cin_eff, lin), lambda i: (i, 0, 0)),
            pl.BlockSpec((len(taps), cout, cin_eff), lambda i: (0, 0, 0)),
            pl.BlockSpec((cout, cout), lambda i: (0, 0)),
            pl.BlockSpec((cout, 1), lambda i: (0, 0)),
            pl.BlockSpec((cout, 1), lambda i: (0, 0)),
            pl.BlockSpec((1, out_len), lambda i: (0, 0)),
        ],
        out_specs=pl.BlockSpec((1, cout, out_len), lambda i: (i, 0, 0)),
        compiler_params=pltpu.CompilerParams(
            dimension_semantics=("parallel",),
            vmem_limit_bytes=64 * 1024 * 1024),
    )(x_flat, w_taps, jnp.asarray(gmat), gamma, beta, jnp.asarray(mask))

    # Drop the padded/garbage columns; result is already NCHW (channel-major).
    return out.reshape(n, cout, ho, wp)[:, :, :, :wo]


# ----------------------------------------------------------------------------
# Parameter construction (deterministic, synthetic)
# ----------------------------------------------------------------------------
def encoder_block_plan(dim):
    return [
        (3, dim // 2, 3),
        (dim // 2, dim * 1, 4),
        (dim * 1, dim * 1, 3),
        (dim * 1, dim * 2, 4),
        (dim * 2, dim * 2, 3),
        (dim * 2, dim * 4, 4),
        (dim * 4, dim * 4, 3),
        (dim * 4, dim * 8, 4),
        (dim * 8, dim * 8, 3),
    ]


def _prep_conv_weight(w_oihw, kernel_size, stride):
    """PyTorch (Cout, Cin, kh, kw) -> per-tap (T, Cout, Cin_eff) bf16 weights."""
    cout, cin = w_oihw.shape[0], w_oihw.shape[1]
    w_t = jnp.transpose(w_oihw, (2, 3, 1, 0))               # (kh, kw, Cin, Cout)
    if stride == 1:
        w_taps = w_t.reshape(kernel_size * kernel_size, cin, cout)
    else:
        # Match the space-to-depth channel order (ry, rx, ci).
        w2 = w_t.reshape(2, 2, 2, 2, cin, cout)             # (dy2, ry, dx2, rx, ci, co)
        w2 = jnp.transpose(w2, (0, 2, 1, 3, 4, 5))          # (dy2, dx2, ry, rx, ci, co)
        w_taps = w2.reshape(4, 4 * cin, cout)
    return jnp.transpose(w_taps, (0, 2, 1)).astype(jnp.bfloat16)  # (T, Cout, Cin_eff)


def init_encoder_params(key, dim):
    params = []
    for (cin, cout, k) in encoder_block_plan(dim):
        key, wk = jax.random.split(key)
        stride = 1 if k == 3 else 2
        w = jax.random.normal(wk, (cout, cin, k, k), jnp.float32) * 0.05
        w_taps = _prep_conv_weight(w, k, stride)
        gamma = jnp.ones((cout, 1), jnp.float32)            # GroupNorm defaults
        beta = jnp.zeros((cout, 1), jnp.float32)
        params.append((w_taps, gamma, beta, k, stride))
    return params


def encoder_forward(x_nchw, params):
    # NCHW (channel-major) is kept end-to-end; no layout transposes needed.
    x = x_nchw.astype(jnp.bfloat16)
    for (w_taps, gamma, beta, k, stride) in params:
        x = conv_gn_relu_block(x, w_taps, gamma, beta, k, stride)
    return x.astype(jnp.float32)


if __name__ == "__main__":
    dim = 8  # multiple of 8 so every out_channels is divisible by the 4 GN groups
    key = jax.random.PRNGKey(0)
    key, xk = jax.random.split(key)

    x = jax.random.normal(xk, (2, 3, 32, 32), jnp.float32)  # NCHW like PyTorch
    params = init_encoder_params(key, dim)

    out = jax.jit(functools.partial(encoder_forward, params=params))(x)
    out = jax.block_until_ready(out)

    # 4 stride-2 convs => 32 -> 2 spatial; channels = dim*8 = 64
    assert out.shape == (2, dim * 8, 2, 2), out.shape
    assert bool(jnp.all(jnp.isfinite(out)))
    print("KERNEL_OK")
</pallas_src>

<mosaic_0001>
module attributes {stable_mosaic.version = 11 : i64} {
  func.func @conv_gn_relu_kernel(%arg0: i32, %arg1: memref<1x3x1190xbf16, #tpu.memory_space<vmem>>, %arg2: memref<9x4x3xbf16, #tpu.memory_space<vmem>>, %arg3: memref<4x4xf32, #tpu.memory_space<vmem>>, %arg4: memref<4x1xf32, #tpu.memory_space<vmem>>, %arg5: memref<4x1xf32, #tpu.memory_space<vmem>>, %arg6: memref<1x1088xf32, #tpu.memory_space<vmem>>, %arg7: memref<1x4x1088xbf16, #tpu.memory_space<vmem>>) attributes {dimension_semantics = [#tpu.dimension_semantics<parallel>], iteration_bounds = array<i64: 2>, scalar_prefetch = 0 : i64, scratch_operands = 0 : i64, tpu.core_type = #tpu.core_type<tc>, window_params = [{transform_indices = @transform_0, window_bounds = array<i64: 1, 3, 1190>}, {pipeline_mode = #tpu.pipeline_mode<synchronous>, transform_indices = @transform_1, window_bounds = array<i64: 9, 4, 3>}, {pipeline_mode = #tpu.pipeline_mode<synchronous>, transform_indices = @transform_2, window_bounds = array<i64: 4, 4>}, {pipeline_mode = #tpu.pipeline_mode<synchronous>, transform_indices = @transform_3, window_bounds = array<i64: 4, 1>}, {pipeline_mode = #tpu.pipeline_mode<synchronous>, transform_indices = @transform_4, window_bounds = array<i64: 4, 1>}, {pipeline_mode = #tpu.pipeline_mode<synchronous>, transform_indices = @transform_5, window_bounds = array<i64: 1, 1088>}, {transform_indices = @transform_6, window_bounds = array<i64: 1, 4, 1088>}]} {
    %c0 = arith.constant 0 : index
    %c0_0 = arith.constant 0 : index
    %c0_1 = arith.constant 0 : index
    %0 = vector.load %arg1[%c0, %c0_0, %c0_1] : memref<1x3x1190xbf16, #tpu.memory_space<vmem>>, vector<1x3x1088xbf16>
    %1 = vector.shape_cast %0 : vector<1x3x1088xbf16> to vector<3x1088xbf16>
    %c0_2 = arith.constant 0 : index
    %c0_3 = arith.constant 0 : index
    %c0_4 = arith.constant 0 : index
    %2 = vector.load %arg2[%c0_2, %c0_3, %c0_4] : memref<9x4x3xbf16, #tpu.memory_space<vmem>>, vector<1x4x3xbf16>
    %3 = vector.shape_cast %2 : vector<1x4x3xbf16> to vector<4x3xbf16>
    %cst = arith.constant dense<0.000000e+00> : vector<4x1088xf32>
    %4 = tpu.matmul %3, %1, %cst {dimension_numbers = #tpu.dot_dimension_numbers<[1], [0], [0], [1], [0, 0, 1, 1], [], []>} : vector<4x3xbf16>, vector<3x1088xbf16>, vector<4x1088xf32> -> vector<4x1088xf32>
    %c0_5 = arith.constant 0 : index
    %c0_6 = arith.constant 0 : index
    %c1 = arith.constant 1 : index
    %5 = vector.load %arg1[%c0_5, %c0_6, %c1] : memref<1x3x1190xbf16, #tpu.memory_space<vmem>>, vector<1x3x1088xbf16>
    %6 = vector.shape_cast %5 : vector<1x3x1088xbf16> to vector<3x1088xbf16>
    %c1_7 = arith.constant 1 : index
    %c0_8 = arith.constant 0 : index
    %c0_9 = arith.constant 0 : index
    %7 = vector.load %arg2[%c1_7, %c0_8, %c0_9] : memref<9x4x3xbf16, #tpu.memory_space<vmem>>, vector<1x4x3xbf16>
    %8 = vector.shape_cast %7 : vector<1x4x3xbf16> to vector<4x3xbf16>
    %cst_10 = arith.constant dense<0.000000e+00> : vector<4x1088xf32>
    %9 = tpu.matmul %8, %6, %cst_10 {dimension_numbers = #tpu.dot_dimension_numbers<[1], [0], [0], [1], [0, 0, 1, 1], [], []>} : vector<4x3xbf16>, vector<3x1088xbf16>, vector<4x1088xf32> -> vector<4x1088xf32>
    %10 = arith.addf %4, %9 : vector<4x1088xf32>
    %c0_11 = arith.constant 0 : index
    %c0_12 = arith.constant 0 : index
    %c2 = arith.constant 2 : index
    %11 = vector.load %arg1[%c0_11, %c0_12, %c2] : memref<1x3x1190xbf16, #tpu.memory_space<vmem>>, vector<1x3x1088xbf16>
    %12 = vector.shape_cast %11 : vector<1x3x1088xbf16> to vector<3x1088xbf16>
    %c2_13 = arith.constant 2 : index
    %c0_14 = arith.constant 0 : index
    %c0_15 = arith.constant 0 : index
    %13 = vector.load %arg2[%c2_13, %c0_14, %c0_15] : memref<9x4x3xbf16, #tpu.memory_space<vmem>>, vector<1x4x3xbf16>
    %14 = vector.shape_cast %13 : vector<1x4x3xbf16> to vector<4x3xbf16>
    %cst_16 = arith.constant dense<0.000000e+00> : vector<4x1088xf32>
    %15 = tpu.matmul %14, %12, %cst_16 {dimension_numbers = #tpu.dot_dimension_numbers<[1], [0], [0], [1], [0, 0, 1, 1], [], []>} : vector<4x3xbf16>, vector<3x1088xbf16>, vector<4x1088xf32> -> vector<4x1088xf32>
    %16 = arith.addf %10, %15 : vector<4x1088xf32>
    %c0_17 = arith.constant 0 : index
    %c0_18 = arith.constant 0 : index
    %c34 = arith.constant 34 : index
    %17 = vector.load %arg1[%c0_17, %c0_18, %c34] : memref<1x3x1190xbf16, #tpu.memory_space<vmem>>, vector<1x3x1088xbf16>
    %18 = vector.shape_cast %17 : vector<1x3x1088xbf16> to vector<3x1088xbf16>
    %c3 = arith.constant 3 : index
    %c0_19 = arith.constant 0 : index
    %c0_20 = arith.constant 0 : index
    %19 = vector.load %arg2[%c3, %c0_19, %c0_20] : memref<9x4x3xbf16, #tpu.memory_space<vmem>>, vector<1x4x3xbf16>
    %20 = vector.shape_cast %19 : vector<1x4x3xbf16> to vector<4x3xbf16>
    %cst_21 = arith.constant dense<0.000000e+00> : vector<4x1088xf32>
    %21 = tpu.matmul %20, %18, %cst_21 {dimension_numbers = #tpu.dot_dimension_numbers<[1], [0], [0], [1], [0, 0, 1, 1], [], []>} : vector<4x3xbf16>, vector<3x1088xbf16>, vector<4x1088xf32> -> vector<4x1088xf32>
    %22 = arith.addf %16, %21 : vector<4x1088xf32>
    %c0_22 = arith.constant 0 : index
    %c0_23 = arith.constant 0 : index
    %c35 = arith.constant 35 : index
    %23 = vector.load %arg1[%c0_22, %c0_23, %c35] : memref<1x3x1190xbf16, #tpu.memory_space<vmem>>, vector<1x3x1088xbf16>
    %24 = vector.shape_cast %23 : vector<1x3x1088xbf16> to vector<3x1088xbf16>
    %c4 = arith.constant 4 : index
    %c0_24 = arith.constant 0 : index
    %c0_25 = arith.constant 0 : index
    %25 = vector.load %arg2[%c4, %c0_24, %c0_25] : memref<9x4x3xbf16, #tpu.memory_space<vmem>>, vector<1x4x3xbf16>
    %26 = vector.shape_cast %25 : vector<1x4x3xbf16> to vector<4x3xbf16>
    %cst_26 = arith.constant dense<0.000000e+00> : vector<4x1088xf32>
    %27 = tpu.matmul %26, %24, %cst_26 {dimension_numbers = #tpu.dot_dimension_numbers<[1], [0], [0], [1], [0, 0, 1, 1], [], []>} : vector<4x3xbf16>, vector<3x1088xbf16>, vector<4x1088xf32> -> vector<4x1088xf32>
    %28 = arith.addf %22, %27 : vector<4x1088xf32>
    %c0_27 = arith.constant 0 : index
    %c0_28 = arith.constant 0 : index
    %c36 = arith.constant 36 : index
    %29 = vector.load %arg1[%c0_27, %c0_28, %c36] : memref<1x3x1190xbf16, #tpu.memory_space<vmem>>, vector<1x3x1088xbf16>
    %30 = vector.shape_cast %29 : vector<1x3x1088xbf16> to vector<3x1088xbf16>
    %c5 = arith.constant 5 : index
    %c0_29 = arith.constant 0 : index
    %c0_30 = arith.constant 0 : index
    %31 = vector.load %arg2[%c5, %c0_29, %c0_30] : memref<9x4x3xbf16, #tpu.memory_space<vmem>>, vector<1x4x3xbf16>
    %32 = vector.shape_cast %31 : vector<1x4x3xbf16> to vector<4x3xbf16>
    %cst_31 = arith.constant dense<0.000000e+00> : vector<4x1088xf32>
    %33 = tpu.matmul %32, %30, %cst_31 {dimension_numbers = #tpu.dot_dimension_numbers<[1], [0], [0], [1], [0, 0, 1, 1], [], []>} : vector<4x3xbf16>, vector<3x1088xbf16>, vector<4x1088xf32> -> vector<4x1088xf32>
    %34 = arith.addf %28, %33 : vector<4x1088xf32>
    %c0_32 = arith.constant 0 : index
    %c0_33 = arith.constant 0 : index
    %c68 = arith.constant 68 : index
    %35 = vector.load %arg1[%c0_32, %c0_33, %c68] : memref<1x3x1190xbf16, #tpu.memory_space<vmem>>, vector<1x3x1088xbf16>
    %36 = vector.shape_cast %35 : vector<1x3x1088xbf16> to vector<3x1088xbf16>
    %c6 = arith.constant 6 : index
    %c0_34 = arith.constant 0 : index
    %c0_35 = arith.constant 0 : index
    %37 = vector.load %arg2[%c6, %c0_34, %c0_35] : memref<9x4x3xbf16, #tpu.memory_space<vmem>>, vector<1x4x3xbf16>
    %38 = vector.shape_cast %37 : vector<1x4x3xbf16> to vector<4x3xbf16>
    %cst_36 = arith.constant dense<0.000000e+00> : vector<4x1088xf32>
    %39 = tpu.matmul %38, %36, %cst_36 {dimension_numbers = #tpu.dot_dimension_numbers<[1], [0], [0], [1], [0, 0, 1, 1], [], []>} : vector<4x3xbf16>, vector<3x1088xbf16>, vector<4x1088xf32> -> vector<4x1088xf32>
    %40 = arith.addf %34, %39 : vector<4x1088xf32>
    %c0_37 = arith.constant 0 : index
    %c0_38 = arith.constant 0 : index
    %c69 = arith.constant 69 : index
    %41 = vector.load %arg1[%c0_37, %c0_38, %c69] : memref<1x3x1190xbf16, #tpu.memory_space<vmem>>, vector<1x3x1088xbf16>
    %42 = vector.shape_cast %41 : vector<1x3x1088xbf16> to vector<3x1088xbf16>
    %c7 = arith.constant 7 : index
    %c0_39 = arith.constant 0 : index
    %c0_40 = arith.constant 0 : index
    %43 = vector.load %arg2[%c7, %c0_39, %c0_40] : memref<9x4x3xbf16, #tpu.memory_space<vmem>>, vector<1x4x3xbf16>
    %44 = vector.shape_cast %43 : vector<1x4x3xbf16> to vector<4x3xbf16>
    %cst_41 = arith.constant dense<0.000000e+00> : vector<4x1088xf32>
    %45 = tpu.matmul %44, %42, %cst_41 {dimension_numbers = #tpu.dot_dimension_numbers<[1], [0], [0], [1], [0, 0, 1, 1], [], []>} : vector<4x3xbf16>, vector<3x1088xbf16>, vector<4x1088xf32> -> vector<4x1088xf32>
    %46 = arith.addf %40, %45 : vector<4x1088xf32>
    %c0_42 = arith.constant 0 : index
    %c0_43 = arith.constant 0 : index
    %c70 = arith.constant 70 : index
    %47 = vector.load %arg1[%c0_42, %c0_43, %c70] : memref<1x3x1190xbf16, #tpu.memory_space<vmem>>, vector<1x3x1088xbf16>
    %48 = vector.shape_cast %47 : vector<1x3x1088xbf16> to vector<3x1088xbf16>
    %c8 = arith.constant 8 : index
    %c0_44 = arith.constant 0 : index
    %c0_45 = arith.constant 0 : index
    %49 = vector.load %arg2[%c8, %c0_44, %c0_45] : memref<9x4x3xbf16, #tpu.memory_space<vmem>>, vector<1x4x3xbf16>
    %50 = vector.shape_cast %49 : vector<1x4x3xbf16> to vector<4x3xbf16>
    %cst_46 = arith.constant dense<0.000000e+00> : vector<4x1088xf32>
    %51 = tpu.matmul %50, %48, %cst_46 {dimension_numbers = #tpu.dot_dimension_numbers<[1], [0], [0], [1], [0, 0, 1, 1], [], []>} : vector<4x3xbf16>, vector<3x1088xbf16>, vector<4x1088xf32> -> vector<4x1088xf32>
    %52 = arith.addf %46, %51 : vector<4x1088xf32>
    %c0_47 = arith.constant 0 : index
    %c0_48 = arith.constant 0 : index
    %53 = vector.load %arg6[%c0_47, %c0_48] : memref<1x1088xf32, #tpu.memory_space<vmem>>, vector<1x1088xf32>
    %54 = vector.broadcast %53 : vector<1x1088xf32> to vector<4x1088xf32>
    %55 = arith.mulf %52, %54 : vector<4x1088xf32>
    %cst_49 = arith.constant dense<0.000000e+00> : vector<4xf32>
    %56 = vector.multi_reduction <add>, %55, %cst_49 [1] : vector<4x1088xf32> to vector<4xf32>
    %57 = vector.shape_cast %56 : vector<4xf32> to vector<4x1xf32>
    %c0_50 = arith.constant 0 : index
    %c0_51 = arith.constant 0 : index
    %58 = vector.load %arg3[%c0_50, %c0_51] : memref<4x4xf32, #tpu.memory_space<vmem>>, vector<4x4xf32>
    %cst_52 = arith.constant dense<0.000000e+00> : vector<4x1xf32>
    %59 = tpu.matmul %58, %57, %cst_52 {dimension_numbers = #tpu.dot_dimension_numbers<[1], [0], [0], [1], [0, 0, 1, 1], [], []>} : vector<4x4xf32>, vector<4x1xf32>, vector<4x1xf32> -> vector<4x1xf32>
    %60 = vector.broadcast %59 : vector<4x1xf32> to vector<4x1088xf32>
    %61 = arith.subf %52, %60 : vector<4x1088xf32>
    %62 = vector.broadcast %53 : vector<1x1088xf32> to vector<4x1088xf32>
    %63 = arith.mulf %61, %62 : vector<4x1088xf32>
    %c0_53 = arith.constant 0 : index
    %c0_54 = arith.constant 0 : index
    %64 = vector.load %arg3[%c0_53, %c0_54] : memref<4x4xf32, #tpu.memory_space<vmem>>, vector<4x4xf32>
    %65 = arith.mulf %63, %63 : vector<4x1088xf32>
    %cst_55 = arith.constant dense<0.000000e+00> : vector<4xf32>
    %66 = vector.multi_reduction <add>, %65, %cst_55 [1] : vector<4x1088xf32> to vector<4xf32>
    %67 = vector.shape_cast %66 : vector<4xf32> to vector<4x1xf32>
    %cst_56 = arith.constant dense<0.000000e+00> : vector<4x1xf32>
    %68 = tpu.matmul %64, %67, %cst_56 {dimension_numbers = #tpu.dot_dimension_numbers<[1], [0], [0], [1], [0, 0, 1, 1], [], []>} : vector<4x4xf32>, vector<4x1xf32>, vector<4x1xf32> -> vector<4x1xf32>
    %cst_57 = arith.constant 9.99999974E-6 : f32
    %69 = vector.broadcast %cst_57 : f32 to vector<4x1xf32>
    %70 = arith.addf %68, %69 : vector<4x1xf32>
    %71 = math.rsqrt %70 : vector<4x1xf32>
    %72 = vector.broadcast %59 : vector<4x1xf32> to vector<4x1088xf32>
    %73 = arith.subf %52, %72 : vector<4x1088xf32>
    %74 = vector.broadcast %71 : vector<4x1xf32> to vector<4x1088xf32>
    %75 = arith.mulf %73, %74 : vector<4x1088xf32>
    %c0_58 = arith.constant 0 : index
    %c0_59 = arith.constant 0 : index
    %76 = vector.load %arg4[%c0_58, %c0_59] : memref<4x1xf32, #tpu.memory_space<vmem>>, vector<4x1xf32>
    %77 = vector.broadcast %76 : vector<4x1xf32> to vector<4x1088xf32>
    %78 = arith.mulf %75, %77 : vector<4x1088xf32>
    %c0_60 = arith.constant 0 : index
    %c0_61 = arith.constant 0 : index
    %79 = vector.load %arg5[%c0_60, %c0_61] : memref<4x1xf32, #tpu.memory_space<vmem>>, vector<4x1xf32>
    %80 = vector.broadcast %79 : vector<4x1xf32> to vector<4x1088xf32>
    %81 = arith.addf %78, %80 : vector<4x1088xf32>
    %cst_62 = arith.constant 0.000000e+00 : f32
    %82 = vector.broadcast %cst_62 : f32 to vector<4x1088xf32>
    %83 = arith.maximumf %81, %82 : vector<4x1088xf32>
    %84 = arith.truncf %83 : vector<4x1088xf32> to vector<4x1088xbf16>
    %c0_63 = arith.constant 0 : index
    %c0_64 = arith.constant 0 : index
    %c0_65 = arith.constant 0 : index
    %85 = vector.load %arg7[%c0_63, %c0_64, %c0_65] : memref<1x4x1088xbf16, #tpu.memory_space<vmem>>, vector<1x4x1088xbf16>
    %86 = vector.shape_cast %85 : vector<1x4x1088xbf16> to vector<4x1088xbf16>
    %87 = vector.shape_cast %84 : vector<4x1088xbf16> to vector<1x4x1088xbf16>
    tpu.vector_store %arg7[%c0_63, %c0_64, %c0_65], %87 {strides = array<i32>} : memref<1x4x1088xbf16, #tpu.memory_space<vmem>>, vector<1x4x1088xbf16>,
    return
  }
  func.func @transform_0(%arg0: i32) -> (i32, i32, i32) {
    %c0_i32 = arith.constant 0 : i32
    %c0_i32_0 = arith.constant 0 : i32
    %c0_i32_1 = arith.constant 0 : i32
    return %arg0, %c0_i32, %c0_i32_0 : i32, i32, i32
  }
  func.func @transform_1(%arg0: i32) -> (i32, i32, i32) {
    %c0_i32 = arith.constant 0 : i32
    %c0_i32_0 = arith.constant 0 : i32
    %c0_i32_1 = arith.constant 0 : i32
    %c0_i32_2 = arith.constant 0 : i32
    return %c0_i32, %c0_i32_0, %c0_i32_1 : i32, i32, i32
  }
  func.func @transform_2(%arg0: i32) -> (i32, i32) {
    %c0_i32 = arith.constant 0 : i32
    %c0_i32_0 = arith.constant 0 : i32
    %c0_i32_1 = arith.constant 0 : i32
    return %c0_i32, %c0_i32_0 : i32, i32
  }
  func.func @transform_3(%arg0: i32) -> (i32, i32) {
    %c0_i32 = arith.constant 0 : i32
    %c0_i32_0 = arith.constant 0 : i32
    %c0_i32_1 = arith.constant 0 : i32
    return %c0_i32, %c0_i32_0 : i32, i32
  }
  func.func @transform_4(%arg0: i32) -> (i32, i32) {
    %c0_i32 = arith.constant 0 : i32
    %c0_i32_0 = arith.constant 0 : i32
    %c0_i32_1 = arith.constant 0 : i32
    return %c0_i32, %c0_i32_0 : i32, i32
  }
  func.func @transform_5(%arg0: i32) -> (i32, i32) {
    %c0_i32 = arith.constant 0 : i32
    %c0_i32_0 = arith.constant 0 : i32
    %c0_i32_1 = arith.constant 0 : i32
    return %c0_i32, %c0_i32_0 : i32, i32
  }
  func.func @transform_6(%arg0: i32) -> (i32, i32, i32) {
    %c0_i32 = arith.constant 0 : i32
    %c0_i32_0 = arith.constant 0 : i32
    %c0_i32_1 = arith.constant 0 : i32
    return %arg0, %c0_i32, %c0_i32_0 : i32, i32, i32
  }
}

module attributes {stable_mosaic.version = 11 : i64} {
  func.func @conv_gn_relu_kernel(%arg0: i32, %arg1: memref<1x16x306xbf16, #tpu.memory_space<vmem>>, %arg2: memref<4x8x16xbf16, #tpu.memory_space<vmem>>, %arg3: memref<8x8xf32, #tpu.memory_space<vmem>>, %arg4: memref<8x1xf32, #tpu.memory_space<vmem>>, %arg5: memref<8x1xf32, #tpu.memory_space<vmem>>, %arg6: memref<1x272xf32, #tpu.memory_space<vmem>>, %arg7: memref<1x8x272xbf16, #tpu.memory_space<vmem>>) attributes {dimension_semantics = [#tpu.dimension_semantics<parallel>], iteration_bounds = array<i64: 2>, scalar_prefetch = 0 : i64, scratch_operands = 0 : i64, tpu.core_type = #tpu.core_type<tc>, window_params = [{transform_indices = @transform_0, window_bounds = array<i64: 1, 16, 306>}, {pipeline_mode = #tpu.pipeline_mode<synchronous>, transform_indices = @transform_1, window_bounds = array<i64: 4, 8, 16>}, {pipeline_mode = #tpu.pipeline_mode<synchronous>, transform_indices = @transform_2, window_bounds = array<i64: 8, 8>}, {pipeline_mode = #tpu.pipeline_mode<synchronous>, transform_indices = @transform_3, window_bounds = array<i64: 8, 1>}, {pipeline_mode = #tpu.pipeline_mode<synchronous>, transform_indices = @transform_4, window_bounds = array<i64: 8, 1>}, {pipeline_mode = #tpu.pipeline_mode<synchronous>, transform_indices = @transform_5, window_bounds = array<i64: 1, 272>}, {transform_indices = @transform_6, window_bounds = array<i64: 1, 8, 272>}]} {
    %c0 = arith.constant 0 : index
    %c0_0 = arith.constant 0 : index
    %c0_1 = arith.constant 0 : index
    %0 = vector.load %arg1[%c0, %c0_0, %c0_1] : memref<1x16x306xbf16, #tpu.memory_space<vmem>>, vector<1x16x272xbf16>
    %1 = vector.shape_cast %0 : vector<1x16x272xbf16> to vector<16x272xbf16>
    %c0_2 = arith.constant 0 : index
    %c0_3 = arith.constant 0 : index
    %c0_4 = arith.constant 0 : index
    %2 = vector.load %arg2[%c0_2, %c0_3, %c0_4] : memref<4x8x16xbf16, #tpu.memory_space<vmem>>, vector<1x8x16xbf16>
    %3 = vector.shape_cast %2 : vector<1x8x16xbf16> to vector<8x16xbf16>
    %cst = arith.constant dense<0.000000e+00> : vector<8x272xf32>
    %4 = tpu.matmul %3, %1, %cst {dimension_numbers = #tpu.dot_dimension_numbers<[1], [0], [0], [1], [0, 0, 1, 1], [], []>} : vector<8x16xbf16>, vector<16x272xbf16>, vector<8x272xf32> -> vector<8x272xf32>
    %c0_5 = arith.constant 0 : index
    %c0_6 = arith.constant 0 : index
    %c1 = arith.constant 1 : index
    %5 = vector.load %arg1[%c0_5, %c0_6, %c1] : memref<1x16x306xbf16, #tpu.memory_space<vmem>>, vector<1x16x272xbf16>
    %6 = vector.shape_cast %5 : vector<1x16x272xbf16> to vector<16x272xbf16>
    %c1_7 = arith.constant 1 : index
    %c0_8 = arith.constant 0 : index
    %c0_9 = arith.constant 0 : index
    %7 = vector.load %arg2[%c1_7, %c0_8, %c0_9] : memref<4x8x16xbf16, #tpu.memory_space<vmem>>, vector<1x8x16xbf16>
    %8 = vector.shape_cast %7 : vector<1x8x16xbf16> to vector<8x16xbf16>
    %cst_10 = arith.constant dense<0.000000e+00> : vector<8x272xf32>
    %9 = tpu.matmul %8, %6, %cst_10 {dimension_numbers = #tpu.dot_dimension_numbers<[1], [0], [0], [1], [0, 0, 1, 1], [], []>} : vector<8x16xbf16>, vector<16x272xbf16>, vector<8x272xf32> -> vector<8x272xf32>
    %10 = arith.addf %4, %9 : vector<8x272xf32>
    %c0_11 = arith.constant 0 : index
    %c0_12 = arith.constant 0 : index
    %c17 = arith.constant 17 : index
    %11 = vector.load %arg1[%c0_11, %c0_12, %c17] : memref<1x16x306xbf16, #tpu.memory_space<vmem>>, vector<1x16x272xbf16>
    %12 = vector.shape_cast %11 : vector<1x16x272xbf16> to vector<16x272xbf16>
    %c2 = arith.constant 2 : index
    %c0_13 = arith.constant 0 : index
    %c0_14 = arith.constant 0 : index
    %13 = vector.load %arg2[%c2, %c0_13, %c0_14] : memref<4x8x16xbf16, #tpu.memory_space<vmem>>, vector<1x8x16xbf16>
    %14 = vector.shape_cast %13 : vector<1x8x16xbf16> to vector<8x16xbf16>
    %cst_15 = arith.constant dense<0.000000e+00> : vector<8x272xf32>
    %15 = tpu.matmul %14, %12, %cst_15 {dimension_numbers = #tpu.dot_dimension_numbers<[1], [0], [0], [1], [0, 0, 1, 1], [], []>} : vector<8x16xbf16>, vector<16x272xbf16>, vector<8x272xf32> -> vector<8x272xf32>
    %16 = arith.addf %10, %15 : vector<8x272xf32>
    %c0_16 = arith.constant 0 : index
    %c0_17 = arith.constant 0 : index
    %c18 = arith.constant 18 : index
    %17 = vector.load %arg1[%c0_16, %c0_17, %c18] : memref<1x16x306xbf16, #tpu.memory_space<vmem>>, vector<1x16x272xbf16>
    %18 = vector.shape_cast %17 : vector<1x16x272xbf16> to vector<16x272xbf16>
    %c3 = arith.constant 3 : index
    %c0_18 = arith.constant 0 : index
    %c0_19 = arith.constant 0 : index
    %19 = vector.load %arg2[%c3, %c0_18, %c0_19] : memref<4x8x16xbf16, #tpu.memory_space<vmem>>, vector<1x8x16xbf16>
    %20 = vector.shape_cast %19 : vector<1x8x16xbf16> to vector<8x16xbf16>
    %cst_20 = arith.constant dense<0.000000e+00> : vector<8x272xf32>
    %21 = tpu.matmul %20, %18, %cst_20 {dimension_numbers = #tpu.dot_dimension_numbers<[1], [0], [0], [1], [0, 0, 1, 1], [], []>} : vector<8x16xbf16>, vector<16x272xbf16>, vector<8x272xf32> -> vector<8x272xf32>
    %22 = arith.addf %16, %21 : vector<8x272xf32>
    %c0_21 = arith.constant 0 : index
    %c0_22 = arith.constant 0 : index
    %23 = vector.load %arg6[%c0_21, %c0_22] : memref<1x272xf32, #tpu.memory_space<vmem>>, vector<1x272xf32>
    %24 = vector.broadcast %23 : vector<1x272xf32> to vector<8x272xf32>
    %25 = arith.mulf %22, %24 : vector<8x272xf32>
    %cst_23 = arith.constant dense<0.000000e+00> : vector<8xf32>
    %26 = vector.multi_reduction <add>, %25, %cst_23 [1] : vector<8x272xf32> to vector<8xf32>
    %27 = vector.shape_cast %26 : vector<8xf32> to vector<8x1xf32>
    %c0_24 = arith.constant 0 : index
    %c0_25 = arith.constant 0 : index
    %28 = vector.load %arg3[%c0_24, %c0_25] : memref<8x8xf32, #tpu.memory_space<vmem>>, vector<8x8xf32>
    %cst_26 = arith.constant dense<0.000000e+00> : vector<8x1xf32>
    %29 = tpu.matmul %28, %27, %cst_26 {dimension_numbers = #tpu.dot_dimension_numbers<[1], [0], [0], [1], [0, 0, 1, 1], [], []>} : vector<8x8xf32>, vector<8x1xf32>, vector<8x1xf32> -> vector<8x1xf32>
    %30 = vector.broadcast %29 : vector<8x1xf32> to vector<8x272xf32>
    %31 = arith.subf %22, %30 : vector<8x272xf32>
    %32 = vector.broadcast %23 : vector<1x272xf32> to vector<8x272xf32>
    %33 = arith.mulf %31, %32 : vector<8x272xf32>
    %c0_27 = arith.constant 0 : index
    %c0_28 = arith.constant 0 : index
    %34 = vector.load %arg3[%c0_27, %c0_28] : memref<8x8xf32, #tpu.memory_space<vmem>>, vector<8x8xf32>
    %35 = arith.mulf %33, %33 : vector<8x272xf32>
    %cst_29 = arith.constant dense<0.000000e+00> : vector<8xf32>
    %36 = vector.multi_reduction <add>, %35, %cst_29 [1] : vector<8x272xf32> to vector<8xf32>
    %37 = vector.shape_cast %36 : vector<8xf32> to vector<8x1xf32>
    %cst_30 = arith.constant dense<0.000000e+00> : vector<8x1xf32>
    %38 = tpu.matmul %34, %37, %cst_30 {dimension_numbers = #tpu.dot_dimension_numbers<[1], [0], [0], [1], [0, 0, 1, 1], [], []>} : vector<8x8xf32>, vector<8x1xf32>, vector<8x1xf32> -> vector<8x1xf32>
    %cst_31 = arith.constant 9.99999974E-6 : f32
    %39 = vector.broadcast %cst_31 : f32 to vector<8x1xf32>
    %40 = arith.addf %38, %39 : vector<8x1xf32>
    %41 = math.rsqrt %40 : vector<8x1xf32>
    %42 = vector.broadcast %29 : vector<8x1xf32> to vector<8x272xf32>
    %43 = arith.subf %22, %42 : vector<8x272xf32>
    %44 = vector.broadcast %41 : vector<8x1xf32> to vector<8x272xf32>
    %45 = arith.mulf %43, %44 : vector<8x272xf32>
    %c0_32 = arith.constant 0 : index
    %c0_33 = arith.constant 0 : index
    %46 = vector.load %arg4[%c0_32, %c0_33] : memref<8x1xf32, #tpu.memory_space<vmem>>, vector<8x1xf32>
    %47 = vector.broadcast %46 : vector<8x1xf32> to vector<8x272xf32>
    %48 = arith.mulf %45, %47 : vector<8x272xf32>
    %c0_34 = arith.constant 0 : index
    %c0_35 = arith.constant 0 : index
    %49 = vector.load %arg5[%c0_34, %c0_35] : memref<8x1xf32, #tpu.memory_space<vmem>>, vector<8x1xf32>
    %50 = vector.broadcast %49 : vector<8x1xf32> to vector<8x272xf32>
    %51 = arith.addf %48, %50 : vector<8x272xf32>
    %cst_36 = arith.constant 0.000000e+00 : f32
    %52 = vector.broadcast %cst_36 : f32 to vector<8x272xf32>
    %53 = arith.maximumf %51, %52 : vector<8x272xf32>
    %54 = arith.truncf %53 : vector<8x272xf32> to vector<8x272xbf16>
    %c0_37 = arith.constant 0 : index
    %c0_38 = arith.constant 0 : index
    %c0_39 = arith.constant 0 : index
    %55 = vector.load %arg7[%c0_37, %c0_38, %c0_39] : memref<1x8x272xbf16, #tpu.memory_space<vmem>>, vector<1x8x272xbf16>
    %56 = vector.shape_cast %55 : vector<1x8x272xbf16> to vector<8x272xbf16>
    %57 = vector.shape_cast %54 : vector<8x272xbf16> to vector<1x8x272xbf16>
    tpu.vector_store %arg7[%c0_37, %c0_38, %c0_39], %57 {strides = array<i32>} : memref<1x8x272xbf16, #tpu.memory_space<vmem>>, vector<1x8x272xbf16>,
    return
  }
  func.func @transform_0(%arg0: i32) -> (i32, i32, i32) {
    %c0_i32 = arith.constant 0 : i32
    %c0_i32_0 = arith.constant 0 : i32
    %c0_i32_1 = arith.constant 0 : i32
    return %arg0, %c0_i32, %c0_i32_0 : i32, i32, i32
  }
  func.func @transform_1(%arg0: i32) -> (i32, i32, i32) {
    %c0_i32 = arith.constant 0 : i32
    %c0_i32_0 = arith.constant 0 : i32
    %c0_i32_1 = arith.constant 0 : i32
    %c0_i32_2 = arith.constant 0 : i32
    return %c0_i32, %c0_i32_0, %c0_i32_1 : i32, i32, i32
  }
  func.func @transform_2(%arg0: i32) -> (i32, i32) {
    %c0_i32 = arith.constant 0 : i32
    %c0_i32_0 = arith.constant 0 : i32
    %c0_i32_1 = arith.constant 0 : i32
    return %c0_i32, %c0_i32_0 : i32, i32
  }
  func.func @transform_3(%arg0: i32) -> (i32, i32) {
    %c0_i32 = arith.constant 0 : i32
    %c0_i32_0 = arith.constant 0 : i32
    %c0_i32_1 = arith.constant 0 : i32
    return %c0_i32, %c0_i32_0 : i32, i32
  }
  func.func @transform_4(%arg0: i32) -> (i32, i32) {
    %c0_i32 = arith.constant 0 : i32
    %c0_i32_0 = arith.constant 0 : i32
    %c0_i32_1 = arith.constant 0 : i32
    return %c0_i32, %c0_i32_0 : i32, i32
  }
  func.func @transform_5(%arg0: i32) -> (i32, i32) {
    %c0_i32 = arith.constant 0 : i32
    %c0_i32_0 = arith.constant 0 : i32
    %c0_i32_1 = arith.constant 0 : i32
    return %c0_i32, %c0_i32_0 : i32, i32
  }
  func.func @transform_6(%arg0: i32) -> (i32, i32, i32) {
    %c0_i32 = arith.constant 0 : i32
    %c0_i32_0 = arith.constant 0 : i32
    %c0_i32_1 = arith.constant 0 : i32
    return %arg0, %c0_i32, %c0_i32_0 : i32, i32, i32
  }
}

module attributes {stable_mosaic.version = 11 : i64} {
  func.func @conv_gn_relu_kernel(%arg0: i32, %arg1: memref<1x8x342xbf16, #tpu.memory_space<vmem>>, %arg2: memref<9x8x8xbf16, #tpu.memory_space<vmem>>, %arg3: memref<8x8xf32, #tpu.memory_space<vmem>>, %arg4: memref<8x1xf32, #tpu.memory_space<vmem>>, %arg5: memref<8x1xf32, #tpu.memory_space<vmem>>, %arg6: memref<1x288xf32, #tpu.memory_space<vmem>>, %arg7: memref<1x8x288xbf16, #tpu.memory_space<vmem>>) attributes {dimension_semantics = [#tpu.dimension_semantics<parallel>], iteration_bounds = array<i64: 2>, scalar_prefetch = 0 : i64, scratch_operands = 0 : i64, tpu.core_type = #tpu.core_type<tc>, window_params = [{transform_indices = @transform_0, window_bounds = array<i64: 1, 8, 342>}, {pipeline_mode = #tpu.pipeline_mode<synchronous>, transform_indices = @transform_1, window_bounds = array<i64: 9, 8, 8>}, {pipeline_mode = #tpu.pipeline_mode<synchronous>, transform_indices = @transform_2, window_bounds = array<i64: 8, 8>}, {pipeline_mode = #tpu.pipeline_mode<synchronous>, transform_indices = @transform_3, window_bounds = array<i64: 8, 1>}, {pipeline_mode = #tpu.pipeline_mode<synchronous>, transform_indices = @transform_4, window_bounds = array<i64: 8, 1>}, {pipeline_mode = #tpu.pipeline_mode<synchronous>, transform_indices = @transform_5, window_bounds = array<i64: 1, 288>}, {transform_indices = @transform_6, window_bounds = array<i64: 1, 8, 288>}]} {
    %c0 = arith.constant 0 : index
    %c0_0 = arith.constant 0 : index
    %c0_1 = arith.constant 0 : index
    %0 = vector.load %arg1[%c0, %c0_0, %c0_1] : memref<1x8x342xbf16, #tpu.memory_space<vmem>>, vector<1x8x288xbf16>
    %1 = vector.shape_cast %0 : vector<1x8x288xbf16> to vector<8x288xbf16>
    %c0_2 = arith.constant 0 : index
    %c0_3 = arith.constant 0 : index
    %c0_4 = arith.constant 0 : index
    %2 = vector.load %arg2[%c0_2, %c0_3, %c0_4] : memref<9x8x8xbf16, #tpu.memory_space<vmem>>, vector<1x8x8xbf16>
    %3 = vector.shape_cast %2 : vector<1x8x8xbf16> to vector<8x8xbf16>
    %cst = arith.constant dense<0.000000e+00> : vector<8x288xf32>
    %4 = tpu.matmul %3, %1, %cst {dimension_numbers = #tpu.dot_dimension_numbers<[1], [0], [0], [1], [0, 0, 1, 1], [], []>} : vector<8x8xbf16>, vector<8x288xbf16>, vector<8x288xf32> -> vector<8x288xf32>
    %c0_5 = arith.constant 0 : index
    %c0_6 = arith.constant 0 : index
    %c1 = arith.constant 1 : index
    %5 = vector.load %arg1[%c0_5, %c0_6, %c1] : memref<1x8x342xbf16, #tpu.memory_space<vmem>>, vector<1x8x288xbf16>
    %6 = vector.shape_cast %5 : vector<1x8x288xbf16> to vector<8x288xbf16>
    %c1_7 = arith.constant 1 : index
    %c0_8 = arith.constant 0 : index
    %c0_9 = arith.constant 0 : index
    %7 = vector.load %arg2[%c1_7, %c0_8, %c0_9] : memref<9x8x8xbf16, #tpu.memory_space<vmem>>, vector<1x8x8xbf16>
    %8 = vector.shape_cast %7 : vector<1x8x8xbf16> to vector<8x8xbf16>
    %cst_10 = arith.constant dense<0.000000e+00> : vector<8x288xf32>
    %9 = tpu.matmul %8, %6, %cst_10 {dimension_numbers = #tpu.dot_dimension_numbers<[1], [0], [0], [1], [0, 0, 1, 1], [], []>} : vector<8x8xbf16>, vector<8x288xbf16>, vector<8x288xf32> -> vector<8x288xf32>
    %10 = arith.addf %4, %9 : vector<8x288xf32>
    %c0_11 = arith.constant 0 : index
    %c0_12 = arith.constant 0 : index
    %c2 = arith.constant 2 : index
    %11 = vector.load %arg1[%c0_11, %c0_12, %c2] : memref<1x8x342xbf16, #tpu.memory_space<vmem>>, vector<1x8x288xbf16>
    %12 = vector.shape_cast %11 : vector<1x8x288xbf16> to vector<8x288xbf16>
    %c2_13 = arith.constant 2 : index
    %c0_14 = arith.constant 0 : index
    %c0_15 = arith.constant 0 : index
    %13 = vector.load %arg2[%c2_13, %c0_14, %c0_15] : memref<9x8x8xbf16, #tpu.memory_space<vmem>>, vector<1x8x8xbf16>
    %14 = vector.shape_cast %13 : vector<1x8x8xbf16> to vector<8x8xbf16>
    %cst_16 = arith.constant dense<0.000000e+00> : vector<8x288xf32>
    %15 = tpu.matmul %14, %12, %cst_16 {dimension_numbers = #tpu.dot_dimension_numbers<[1], [0], [0], [1], [0, 0, 1, 1], [], []>} : vector<8x8xbf16>, vector<8x288xbf16>, vector<8x288xf32> -> vector<8x288xf32>
    %16 = arith.addf %10, %15 : vector<8x288xf32>
    %c0_17 = arith.constant 0 : index
    %c0_18 = arith.constant 0 : index
    %c18 = arith.constant 18 : index
    %17 = vector.load %arg1[%c0_17, %c0_18, %c18] : memref<1x8x342xbf16, #tpu.memory_space<vmem>>, vector<1x8x288xbf16>
    %18 = vector.shape_cast %17 : vector<1x8x288xbf16> to vector<8x288xbf16>
    %c3 = arith.constant 3 : index
    %c0_19 = arith.constant 0 : index
    %c0_20 = arith.constant 0 : index
    %19 = vector.load %arg2[%c3, %c0_19, %c0_20] : memref<9x8x8xbf16, #tpu.memory_space<vmem>>, vector<1x8x8xbf16>
    %20 = vector.shape_cast %19 : vector<1x8x8xbf16> to vector<8x8xbf16>
    %cst_21 = arith.constant dense<0.000000e+00> : vector<8x288xf32>
    %21 = tpu.matmul %20, %18, %cst_21 {dimension_numbers = #tpu.dot_dimension_numbers<[1], [0], [0], [1], [0, 0, 1, 1], [], []>} : vector<8x8xbf16>, vector<8x288xbf16>, vector<8x288xf32> -> vector<8x288xf32>
    %22 = arith.addf %16, %21 : vector<8x288xf32>
    %c0_22 = arith.constant 0 : index
    %c0_23 = arith.constant 0 : index
    %c19 = arith.constant 19 : index
    %23 = vector.load %arg1[%c0_22, %c0_23, %c19] : memref<1x8x342xbf16, #tpu.memory_space<vmem>>, vector<1x8x288xbf16>
    %24 = vector.shape_cast %23 : vector<1x8x288xbf16> to vector<8x288xbf16>
    %c4 = arith.constant 4 : index
    %c0_24 = arith.constant 0 : index
    %c0_25 = arith.constant 0 : index
    %25 = vector.load %arg2[%c4, %c0_24, %c0_25] : memref<9x8x8xbf16, #tpu.memory_space<vmem>>, vector<1x8x8xbf16>
    %26 = vector.shape_cast %25 : vector<1x8x8xbf16> to vector<8x8xbf16>
    %cst_26 = arith.constant dense<0.000000e+00> : vector<8x288xf32>
    %27 = tpu.matmul %26, %24, %cst_26 {dimension_numbers = #tpu.dot_dimension_numbers<[1], [0], [0], [1], [0, 0, 1, 1], [], []>} : vector<8x8xbf16>, vector<8x288xbf16>, vector<8x288xf32> -> vector<8x288xf32>
    %28 = arith.addf %22, %27 : vector<8x288xf32>
    %c0_27 = arith.constant 0 : index
    %c0_28 = arith.constant 0 : index
    %c20 = arith.constant 20 : index
    %29 = vector.load %arg1[%c0_27, %c0_28, %c20] : memref<1x8x342xbf16, #tpu.memory_space<vmem>>, vector<1x8x288xbf16>
    %30 = vector.shape_cast %29 : vector<1x8x288xbf16> to vector<8x288xbf16>
    %c5 = arith.constant 5 : index
    %c0_29 = arith.constant 0 : index
    %c0_30 = arith.constant 0 : index
    %31 = vector.load %arg2[%c5, %c0_29, %c0_30] : memref<9x8x8xbf16, #tpu.memory_space<vmem>>, vector<1x8x8xbf16>
    %32 = vector.shape_cast %31 : vector<1x8x8xbf16> to vector<8x8xbf16>
    %cst_31 = arith.constant dense<0.000000e+00> : vector<8x288xf32>
    %33 = tpu.matmul %32, %30, %cst_31 {dimension_numbers = #tpu.dot_dimension_numbers<[1], [0], [0], [1], [0, 0, 1, 1], [], []>} : vector<8x8xbf16>, vector<8x288xbf16>, vector<8x288xf32> -> vector<8x288xf32>
    %34 = arith.addf %28, %33 : vector<8x288xf32>
    %c0_32 = arith.constant 0 : index
    %c0_33 = arith.constant 0 : index
    %c36 = arith.constant 36 : index
    %35 = vector.load %arg1[%c0_32, %c0_33, %c36] : memref<1x8x342xbf16, #tpu.memory_space<vmem>>, vector<1x8x288xbf16>
    %36 = vector.shape_cast %35 : vector<1x8x288xbf16> to vector<8x288xbf16>
    %c6 = arith.constant 6 : index
    %c0_34 = arith.constant 0 : index
    %c0_35 = arith.constant 0 : index
    %37 = vector.load %arg2[%c6, %c0_34, %c0_35] : memref<9x8x8xbf16, #tpu.memory_space<vmem>>, vector<1x8x8xbf16>
    %38 = vector.shape_cast %37 : vector<1x8x8xbf16> to vector<8x8xbf16>
    %cst_36 = arith.constant dense<0.000000e+00> : vector<8x288xf32>
    %39 = tpu.matmul %38, %36, %cst_36 {dimension_numbers = #tpu.dot_dimension_numbers<[1], [0], [0], [1], [0, 0, 1, 1], [], []>} : vector<8x8xbf16>, vector<8x288xbf16>, vector<8x288xf32> -> vector<8x288xf32>
    %40 = arith.addf %34, %39 : vector<8x288xf32>
    %c0_37 = arith.constant 0 : index
    %c0_38 = arith.constant 0 : index
    %c37 = arith.constant 37 : index
    %41 = vector.load %arg1[%c0_37, %c0_38, %c37] : memref<1x8x342xbf16, #tpu.memory_space<vmem>>, vector<1x8x288xbf16>
    %42 = vector.shape_cast %41 : vector<1x8x288xbf16> to vector<8x288xbf16>
    %c7 = arith.constant 7 : index
    %c0_39 = arith.constant 0 : index
    %c0_40 = arith.constant 0 : index
    %43 = vector.load %arg2[%c7, %c0_39, %c0_40] : memref<9x8x8xbf16, #tpu.memory_space<vmem>>, vector<1x8x8xbf16>
    %44 = vector.shape_cast %43 : vector<1x8x8xbf16> to vector<8x8xbf16>
    %cst_41 = arith.constant dense<0.000000e+00> : vector<8x288xf32>
    %45 = tpu.matmul %44, %42, %cst_41 {dimension_numbers = #tpu.dot_dimension_numbers<[1], [0], [0], [1], [0, 0, 1, 1], [], []>} : vector<8x8xbf16>, vector<8x288xbf16>, vector<8x288xf32> -> vector<8x288xf32>
    %46 = arith.addf %40, %45 : vector<8x288xf32>
    %c0_42 = arith.constant 0 : index
    %c0_43 = arith.constant 0 : index
    %c38 = arith.constant 38 : index
    %47 = vector.load %arg1[%c0_42, %c0_43, %c38] : memref<1x8x342xbf16, #tpu.memory_space<vmem>>, vector<1x8x288xbf16>
    %48 = vector.shape_cast %47 : vector<1x8x288xbf16> to vector<8x288xbf16>
    %c8 = arith.constant 8 : index
    %c0_44 = arith.constant 0 : index
    %c0_45 = arith.constant 0 : index
    %49 = vector.load %arg2[%c8, %c0_44, %c0_45] : memref<9x8x8xbf16, #tpu.memory_space<vmem>>, vector<1x8x8xbf16>
    %50 = vector.shape_cast %49 : vector<1x8x8xbf16> to vector<8x8xbf16>
    %cst_46 = arith.constant dense<0.000000e+00> : vector<8x288xf32>
    %51 = tpu.matmul %50, %48, %cst_46 {dimension_numbers = #tpu.dot_dimension_numbers<[1], [0], [0], [1], [0, 0, 1, 1], [], []>} : vector<8x8xbf16>, vector<8x288xbf16>, vector<8x288xf32> -> vector<8x288xf32>
    %52 = arith.addf %46, %51 : vector<8x288xf32>
    %c0_47 = arith.constant 0 : index
    %c0_48 = arith.constant 0 : index
    %53 = vector.load %arg6[%c0_47, %c0_48] : memref<1x288xf32, #tpu.memory_space<vmem>>, vector<1x288xf32>
    %54 = vector.broadcast %53 : vector<1x288xf32> to vector<8x288xf32>
    %55 = arith.mulf %52, %54 : vector<8x288xf32>
    %cst_49 = arith.constant dense<0.000000e+00> : vector<8xf32>
    %56 = vector.multi_reduction <add>, %55, %cst_49 [1] : vector<8x288xf32> to vector<8xf32>
    %57 = vector.shape_cast %56 : vector<8xf32> to vector<8x1xf32>
    %c0_50 = arith.constant 0 : index
    %c0_51 = arith.constant 0 : index
    %58 = vector.load %arg3[%c0_50, %c0_51] : memref<8x8xf32, #tpu.memory_space<vmem>>, vector<8x8xf32>
    %cst_52 = arith.constant dense<0.000000e+00> : vector<8x1xf32>
    %59 = tpu.matmul %58, %57, %cst_52 {dimension_numbers = #tpu.dot_dimension_numbers<[1], [0], [0], [1], [0, 0, 1, 1], [], []>} : vector<8x8xf32>, vector<8x1xf32>, vector<8x1xf32> -> vector<8x1xf32>
    %60 = vector.broadcast %59 : vector<8x1xf32> to vector<8x288xf32>
    %61 = arith.subf %52, %60 : vector<8x288xf32>
    %62 = vector.broadcast %53 : vector<1x288xf32> to vector<8x288xf32>
    %63 = arith.mulf %61, %62 : vector<8x288xf32>
    %c0_53 = arith.constant 0 : index
    %c0_54 = arith.constant 0 : index
    %64 = vector.load %arg3[%c0_53, %c0_54] : memref<8x8xf32, #tpu.memory_space<vmem>>, vector<8x8xf32>
    %65 = arith.mulf %63, %63 : vector<8x288xf32>
    %cst_55 = arith.constant dense<0.000000e+00> : vector<8xf32>
    %66 = vector.multi_reduction <add>, %65, %cst_55 [1] : vector<8x288xf32> to vector<8xf32>
    %67 = vector.shape_cast %66 : vector<8xf32> to vector<8x1xf32>
    %cst_56 = arith.constant dense<0.000000e+00> : vector<8x1xf32>
    %68 = tpu.matmul %64, %67, %cst_56 {dimension_numbers = #tpu.dot_dimension_numbers<[1], [0], [0], [1], [0, 0, 1, 1], [], []>} : vector<8x8xf32>, vector<8x1xf32>, vector<8x1xf32> -> vector<8x1xf32>
    %cst_57 = arith.constant 9.99999974E-6 : f32
    %69 = vector.broadcast %cst_57 : f32 to vector<8x1xf32>
    %70 = arith.addf %68, %69 : vector<8x1xf32>
    %71 = math.rsqrt %70 : vector<8x1xf32>
    %72 = vector.broadcast %59 : vector<8x1xf32> to vector<8x288xf32>
    %73 = arith.subf %52, %72 : vector<8x288xf32>
    %74 = vector.broadcast %71 : vector<8x1xf32> to vector<8x288xf32>
    %75 = arith.mulf %73, %74 : vector<8x288xf32>
    %c0_58 = arith.constant 0 : index
    %c0_59 = arith.constant 0 : index
    %76 = vector.load %arg4[%c0_58, %c0_59] : memref<8x1xf32, #tpu.memory_space<vmem>>, vector<8x1xf32>
    %77 = vector.broadcast %76 : vector<8x1xf32> to vector<8x288xf32>
    %78 = arith.mulf %75, %77 : vector<8x288xf32>
    %c0_60 = arith.constant 0 : index
    %c0_61 = arith.constant 0 : index
    %79 = vector.load %arg5[%c0_60, %c0_61] : memref<8x1xf32, #tpu.memory_space<vmem>>, vector<8x1xf32>
    %80 = vector.broadcast %79 : vector<8x1xf32> to vector<8x288xf32>
    %81 = arith.addf %78, %80 : vector<8x288xf32>
    %cst_62 = arith.constant 0.000000e+00 : f32
    %82 = vector.broadcast %cst_62 : f32 to vector<8x288xf32>
    %83 = arith.maximumf %81, %82 : vector<8x288xf32>
    %84 = arith.truncf %83 : vector<8x288xf32> to vector<8x288xbf16>
    %c0_63 = arith.constant 0 : index
    %c0_64 = arith.constant 0 : index
    %c0_65 = arith.constant 0 : index
    %85 = vector.load %arg7[%c0_63, %c0_64, %c0_65] : memref<1x8x288xbf16, #tpu.memory_space<vmem>>, vector<1x8x288xbf16>
    %86 = vector.shape_cast %85 : vector<1x8x288xbf16> to vector<8x288xbf16>
    %87 = vector.shape_cast %84 : vector<8x288xbf16> to vector<1x8x288xbf16>
    tpu.vector_store %arg7[%c0_63, %c0_64, %c0_65], %87 {strides = array<i32>} : memref<1x8x288xbf16, #tpu.memory_space<vmem>>, vector<1x8x288xbf16>,
    return
  }
  func.func @transform_0(%arg0: i32) -> (i32, i32, i32) {
    %c0_i32 = arith.constant 0 : i32
    %c0_i32_0 = arith.constant 0 : i32
    %c0_i32_1 = arith.constant 0 : i32
    return %arg0, %c0_i32, %c0_i32_0 : i32, i32, i32
  }
  func.func @transform_1(%arg0: i32) -> (i32, i32, i32) {
    %c0_i32 = arith.constant 0 : i32
    %c0_i32_0 = arith.constant 0 : i32
    %c0_i32_1 = arith.constant 0 : i32
    %c0_i32_2 = arith.constant 0 : i32
    return %c0_i32, %c0_i32_0, %c0_i32_1 : i32, i32, i32
  }
  func.func @transform_2(%arg0: i32) -> (i32, i32) {
    %c0_i32 = arith.constant 0 : i32
    %c0_i32_0 = arith.constant 0 : i32
    %c0_i32_1 = arith.constant 0 : i32
    return %c0_i32, %c0_i32_0 : i32, i32
  }
  func.func @transform_3(%arg0: i32) -> (i32, i32) {
    %c0_i32 = arith.constant 0 : i32
    %c0_i32_0 = arith.constant 0 : i32
    %c0_i32_1 = arith.constant 0 : i32
    return %c0_i32, %c0_i32_0 : i32, i32
  }
  func.func @transform_4(%arg0: i32) -> (i32, i32) {
    %c0_i32 = arith.constant 0 : i32
    %c0_i32_0 = arith.constant 0 : i32
    %c0_i32_1 = arith.constant 0 : i32
    return %c0_i32, %c0_i32_0 : i32, i32
  }
  func.func @transform_5(%arg0: i32) -> (i32, i32) {
    %c0_i32 = arith.constant 0 : i32
    %c0_i32_0 = arith.constant 0 : i32
    %c0_i32_1 = arith.constant 0 : i32
    return %c0_i32, %c0_i32_0 : i32, i32
  }
  func.func @transform_6(%arg0: i32) -> (i32, i32, i32) {
    %c0_i32 = arith.constant 0 : i32
    %c0_i32_0 = arith.constant 0 : i32
    %c0_i32_1 = arith.constant 0 : i32
    return %arg0, %c0_i32, %c0_i32_0 : i32, i32, i32
  }
}

module attributes {stable_mosaic.version = 11 : i64} {
  func.func @conv_gn_relu_kernel(%arg0: i32, %arg1: memref<1x32x90xbf16, #tpu.memory_space<vmem>>, %arg2: memref<4x16x32xbf16, #tpu.memory_space<vmem>>, %arg3: memref<16x16xf32, #tpu.memory_space<vmem>>, %arg4: memref<16x1xf32, #tpu.memory_space<vmem>>, %arg5: memref<16x1xf32, #tpu.memory_space<vmem>>, %arg6: memref<1x72xf32, #tpu.memory_space<vmem>>, %arg7: memref<1x16x72xbf16, #tpu.memory_space<vmem>>) attributes {dimension_semantics = [#tpu.dimension_semantics<parallel>], iteration_bounds = array<i64: 2>, scalar_prefetch = 0 : i64, scratch_operands = 0 : i64, tpu.core_type = #tpu.core_type<tc>, window_params = [{transform_indices = @transform_0, window_bounds = array<i64: 1, 32, 90>}, {pipeline_mode = #tpu.pipeline_mode<synchronous>, transform_indices = @transform_1, window_bounds = array<i64: 4, 16, 32>}, {pipeline_mode = #tpu.pipeline_mode<synchronous>, transform_indices = @transform_2, window_bounds = array<i64: 16, 16>}, {pipeline_mode = #tpu.pipeline_mode<synchronous>, transform_indices = @transform_3, window_bounds = array<i64: 16, 1>}, {pipeline_mode = #tpu.pipeline_mode<synchronous>, transform_indices = @transform_4, window_bounds = array<i64: 16, 1>}, {pipeline_mode = #tpu.pipeline_mode<synchronous>, transform_indices = @transform_5, window_bounds = array<i64: 1, 72>}, {transform_indices = @transform_6, window_bounds = array<i64: 1, 16, 72>}]} {
    %c0 = arith.constant 0 : index
    %c0_0 = arith.constant 0 : index
    %c0_1 = arith.constant 0 : index
    %0 = vector.load %arg1[%c0, %c0_0, %c0_1] : memref<1x32x90xbf16, #tpu.memory_space<vmem>>, vector<1x32x72xbf16>
    %1 = vector.shape_cast %0 : vector<1x32x72xbf16> to vector<32x72xbf16>
    %c0_2 = arith.constant 0 : index
    %c0_3 = arith.constant 0 : index
    %c0_4 = arith.constant 0 : index
    %2 = vector.load %arg2[%c0_2, %c0_3, %c0_4] : memref<4x16x32xbf16, #tpu.memory_space<vmem>>, vector<1x16x32xbf16>
    %3 = vector.shape_cast %2 : vector<1x16x32xbf16> to vector<16x32xbf16>
    %cst = arith.constant dense<0.000000e+00> : vector<16x72xf32>
    %4 = tpu.matmul %3, %1, %cst {dimension_numbers = #tpu.dot_dimension_numbers<[1], [0], [0], [1], [0, 0, 1, 1], [], []>} : vector<16x32xbf16>, vector<32x72xbf16>, vector<16x72xf32> -> vector<16x72xf32>
    %c0_5 = arith.constant 0 : index
    %c0_6 = arith.constant 0 : index
    %c1 = arith.constant 1 : index
    %5 = vector.load %arg1[%c0_5, %c0_6, %c1] : memref<1x32x90xbf16, #tpu.memory_space<vmem>>, vector<1x32x72xbf16>
    %6 = vector.shape_cast %5 : vector<1x32x72xbf16> to vector<32x72xbf16>
    %c1_7 = arith.constant 1 : index
    %c0_8 = arith.constant 0 : index
    %c0_9 = arith.constant 0 : index
    %7 = vector.load %arg2[%c1_7, %c0_8, %c0_9] : memref<4x16x32xbf16, #tpu.memory_space<vmem>>, vector<1x16x32xbf16>
    %8 = vector.shape_cast %7 : vector<1x16x32xbf16> to vector<16x32xbf16>
    %cst_10 = arith.constant dense<0.000000e+00> : vector<16x72xf32>
    %9 = tpu.matmul %8, %6, %cst_10 {dimension_numbers = #tpu.dot_dimension_numbers<[1], [0], [0], [1], [0, 0, 1, 1], [], []>} : vector<16x32xbf16>, vector<32x72xbf16>, vector<16x72xf32> -> vector<16x72xf32>
    %10 = arith.addf %4, %9 : vector<16x72xf32>
    %c0_11 = arith.constant 0 : index
    %c0_12 = arith.constant 0 : index
    %c9 = arith.constant 9 : index
    %11 = vector.load %arg1[%c0_11, %c0_12, %c9] : memref<1x32x90xbf16, #tpu.memory_space<vmem>>, vector<1x32x72xbf16>
    %12 = vector.shape_cast %11 : vector<1x32x72xbf16> to vector<32x72xbf16>
    %c2 = arith.constant 2 : index
    %c0_13 = arith.constant 0 : index
    %c0_14 = arith.constant 0 : index
    %13 = vector.load %arg2[%c2, %c0_13, %c0_14] : memref<4x16x32xbf16, #tpu.memory_space<vmem>>, vector<1x16x32xbf16>
    %14 = vector.shape_cast %13 : vector<1x16x32xbf16> to vector<16x32xbf16>
    %cst_15 = arith.constant dense<0.000000e+00> : vector<16x72xf32>
    %15 = tpu.matmul %14, %12, %cst_15 {dimension_numbers = #tpu.dot_dimension_numbers<[1], [0], [0], [1], [0, 0, 1, 1], [], []>} : vector<16x32xbf16>, vector<32x72xbf16>, vector<16x72xf32> -> vector<16x72xf32>
    %16 = arith.addf %10, %15 : vector<16x72xf32>
    %c0_16 = arith.constant 0 : index
    %c0_17 = arith.constant 0 : index
    %c10 = arith.constant 10 : index
    %17 = vector.load %arg1[%c0_16, %c0_17, %c10] : memref<1x32x90xbf16, #tpu.memory_space<vmem>>, vector<1x32x72xbf16>
    %18 = vector.shape_cast %17 : vector<1x32x72xbf16> to vector<32x72xbf16>
    %c3 = arith.constant 3 : index
    %c0_18 = arith.constant 0 : index
    %c0_19 = arith.constant 0 : index
    %19 = vector.load %arg2[%c3, %c0_18, %c0_19] : memref<4x16x32xbf16, #tpu.memory_space<vmem>>, vector<1x16x32xbf16>
    %20 = vector.shape_cast %19 : vector<1x16x32xbf16> to vector<16x32xbf16>
    %cst_20 = arith.constant dense<0.000000e+00> : vector<16x72xf32>
    %21 = tpu.matmul %20, %18, %cst_20 {dimension_numbers = #tpu.dot_dimension_numbers<[1], [0], [0], [1], [0, 0, 1, 1], [], []>} : vector<16x32xbf16>, vector<32x72xbf16>, vector<16x72xf32> -> vector<16x72xf32>
    %22 = arith.addf %16, %21 : vector<16x72xf32>
    %c0_21 = arith.constant 0 : index
    %c0_22 = arith.constant 0 : index
    %23 = vector.load %arg6[%c0_21, %c0_22] : memref<1x72xf32, #tpu.memory_space<vmem>>, vector<1x72xf32>
    %24 = vector.broadcast %23 : vector<1x72xf32> to vector<16x72xf32>
    %25 = arith.mulf %22, %24 : vector<16x72xf32>
    %cst_23 = arith.constant dense<0.000000e+00> : vector<16xf32>
    %26 = vector.multi_reduction <add>, %25, %cst_23 [1] : vector<16x72xf32> to vector<16xf32>
    %27 = vector.shape_cast %26 : vector<16xf32> to vector<16x1xf32>
    %c0_24 = arith.constant 0 : index
    %c0_25 = arith.constant 0 : index
    %28 = vector.load %arg3[%c0_24, %c0_25] : memref<16x16xf32, #tpu.memory_space<vmem>>, vector<16x16xf32>
    %cst_26 = arith.constant dense<0.000000e+00> : vector<16x1xf32>
    %29 = tpu.matmul %28, %27, %cst_26 {dimension_numbers = #tpu.dot_dimension_numbers<[1], [0], [0], [1], [0, 0, 1, 1], [], []>} : vector<16x16xf32>, vector<16x1xf32>, vector<16x1xf32> -> vector<16x1xf32>
    %30 = vector.broadcast %29 : vector<16x1xf32> to vector<16x72xf32>
    %31 = arith.subf %22, %30 : vector<16x72xf32>
    %32 = vector.broadcast %23 : vector<1x72xf32> to vector<16x72xf32>
    %33 = arith.mulf %31, %32 : vector<16x72xf32>
    %c0_27 = arith.constant 0 : index
    %c0_28 = arith.constant 0 : index
    %34 = vector.load %arg3[%c0_27, %c0_28] : memref<16x16xf32, #tpu.memory_space<vmem>>, vector<16x16xf32>
    %35 = arith.mulf %33, %33 : vector<16x72xf32>
    %cst_29 = arith.constant dense<0.000000e+00> : vector<16xf32>
    %36 = vector.multi_reduction <add>, %35, %cst_29 [1] : vector<16x72xf32> to vector<16xf32>
    %37 = vector.shape_cast %36 : vector<16xf32> to vector<16x1xf32>
    %cst_30 = arith.constant dense<0.000000e+00> : vector<16x1xf32>
    %38 = tpu.matmul %34, %37, %cst_30 {dimension_numbers = #tpu.dot_dimension_numbers<[1], [0], [0], [1], [0, 0, 1, 1], [], []>} : vector<16x16xf32>, vector<16x1xf32>, vector<16x1xf32> -> vector<16x1xf32>
    %cst_31 = arith.constant 9.99999974E-6 : f32
    %39 = vector.broadcast %cst_31 : f32 to vector<16x1xf32>
    %40 = arith.addf %38, %39 : vector<16x1xf32>
    %41 = math.rsqrt %40 : vector<16x1xf32>
    %42 = vector.broadcast %29 : vector<16x1xf32> to vector<16x72xf32>
    %43 = arith.subf %22, %42 : vector<16x72xf32>
    %44 = vector.broadcast %41 : vector<16x1xf32> to vector<16x72xf32>
    %45 = arith.mulf %43, %44 : vector<16x72xf32>
    %c0_32 = arith.constant 0 : index
    %c0_33 = arith.constant 0 : index
    %46 = vector.load %arg4[%c0_32, %c0_33] : memref<16x1xf32, #tpu.memory_space<vmem>>, vector<16x1xf32>
    %47 = vector.broadcast %46 : vector<16x1xf32> to vector<16x72xf32>
    %48 = arith.mulf %45, %47 : vector<16x72xf32>
    %c0_34 = arith.constant 0 : index
    %c0_35 = arith.constant 0 : index
    %49 = vector.load %arg5[%c0_34, %c0_35] : memref<16x1xf32, #tpu.memory_space<vmem>>, vector<16x1xf32>
    %50 = vector.broadcast %49 : vector<16x1xf32> to vector<16x72xf32>
    %51 = arith.addf %48, %50 : vector<16x72xf32>
    %cst_36 = arith.constant 0.000000e+00 : f32
    %52 = vector.broadcast %cst_36 : f32 to vector<16x72xf32>
    %53 = arith.maximumf %51, %52 : vector<16x72xf32>
    %54 = arith.truncf %53 : vector<16x72xf32> to vector<16x72xbf16>
    %c0_37 = arith.constant 0 : index
    %c0_38 = arith.constant 0 : index
    %c0_39 = arith.constant 0 : index
    %55 = vector.load %arg7[%c0_37, %c0_38, %c0_39] : memref<1x16x72xbf16, #tpu.memory_space<vmem>>, vector<1x16x72xbf16>
    %56 = vector.shape_cast %55 : vector<1x16x72xbf16> to vector<16x72xbf16>
    %57 = vector.shape_cast %54 : vector<16x72xbf16> to vector<1x16x72xbf16>
    tpu.vector_store %arg7[%c0_37, %c0_38, %c0_39], %57 {strides = array<i32>} : memref<1x16x72xbf16, #tpu.memory_space<vmem>>, vector<1x16x72xbf16>,
    return
  }
  func.func @transform_0(%arg0: i32) -> (i32, i32, i32) {
    %c0_i32 = arith.constant 0 : i32
    %c0_i32_0 = arith.constant 0 : i32
    %c0_i32_1 = arith.constant 0 : i32
    return %arg0, %c0_i32, %c0_i32_0 : i32, i32, i32
  }
  func.func @transform_1(%arg0: i32) -> (i32, i32, i32) {
    %c0_i32 = arith.constant 0 : i32
    %c0_i32_0 = arith.constant 0 : i32
    %c0_i32_1 = arith.constant 0 : i32
    %c0_i32_2 = arith.constant 0 : i32
    return %c0_i32, %c0_i32_0, %c0_i32_1 : i32, i32, i32
  }
  func.func @transform_2(%arg0: i32) -> (i32, i32) {
    %c0_i32 = arith.constant 0 : i32
    %c0_i32_0 = arith.constant 0 : i32
    %c0_i32_1 = arith.constant 0 : i32
    return %c0_i32, %c0_i32_0 : i32, i32
  }
  func.func @transform_3(%arg0: i32) -> (i32, i32) {
    %c0_i32 = arith.constant 0 : i32
    %c0_i32_0 = arith.constant 0 : i32
    %c0_i32_1 = arith.constant 0 : i32
    return %c0_i32, %c0_i32_0 : i32, i32
  }
  func.func @transform_4(%arg0: i32) -> (i32, i32) {
    %c0_i32 = arith.constant 0 : i32
    %c0_i32_0 = arith.constant 0 : i32
    %c0_i32_1 = arith.constant 0 : i32
    return %c0_i32, %c0_i32_0 : i32, i32
  }
  func.func @transform_5(%arg0: i32) -> (i32, i32) {
    %c0_i32 = arith.constant 0 : i32
    %c0_i32_0 = arith.constant 0 : i32
    %c0_i32_1 = arith.constant 0 : i32
    return %c0_i32, %c0_i32_0 : i32, i32
  }
  func.func @transform_6(%arg0: i32) -> (i32, i32, i32) {
    %c0_i32 = arith.constant 0 : i32
    %c0_i32_0 = arith.constant 0 : i32
    %c0_i32_1 = arith.constant 0 : i32
    return %arg0, %c0_i32, %c0_i32_0 : i32, i32, i32
  }
}

module attributes {stable_mosaic.version = 11 : i64} {
  func.func @conv_gn_relu_kernel(%arg0: i32, %arg1: memref<1x16x110xbf16, #tpu.memory_space<vmem>>, %arg2: memref<9x16x16xbf16, #tpu.memory_space<vmem>>, %arg3: memref<16x16xf32, #tpu.memory_space<vmem>>, %arg4: memref<16x1xf32, #tpu.memory_space<vmem>>, %arg5: memref<16x1xf32, #tpu.memory_space<vmem>>, %arg6: memref<1x80xf32, #tpu.memory_space<vmem>>, %arg7: memref<1x16x80xbf16, #tpu.memory_space<vmem>>) attributes {dimension_semantics = [#tpu.dimension_semantics<parallel>], iteration_bounds = array<i64: 2>, scalar_prefetch = 0 : i64, scratch_operands = 0 : i64, tpu.core_type = #tpu.core_type<tc>, window_params = [{transform_indices = @transform_0, window_bounds = array<i64: 1, 16, 110>}, {pipeline_mode = #tpu.pipeline_mode<synchronous>, transform_indices = @transform_1, window_bounds = array<i64: 9, 16, 16>}, {pipeline_mode = #tpu.pipeline_mode<synchronous>, transform_indices = @transform_2, window_bounds = array<i64: 16, 16>}, {pipeline_mode = #tpu.pipeline_mode<synchronous>, transform_indices = @transform_3, window_bounds = array<i64: 16, 1>}, {pipeline_mode = #tpu.pipeline_mode<synchronous>, transform_indices = @transform_4, window_bounds = array<i64: 16, 1>}, {pipeline_mode = #tpu.pipeline_mode<synchronous>, transform_indices = @transform_5, window_bounds = array<i64: 1, 80>}, {transform_indices = @transform_6, window_bounds = array<i64: 1, 16, 80>}]} {
    %c0 = arith.constant 0 : index
    %c0_0 = arith.constant 0 : index
    %c0_1 = arith.constant 0 : index
    %0 = vector.load %arg1[%c0, %c0_0, %c0_1] : memref<1x16x110xbf16, #tpu.memory_space<vmem>>, vector<1x16x80xbf16>
    %1 = vector.shape_cast %0 : vector<1x16x80xbf16> to vector<16x80xbf16>
    %c0_2 = arith.constant 0 : index
    %c0_3 = arith.constant 0 : index
    %c0_4 = arith.constant 0 : index
    %2 = vector.load %arg2[%c0_2, %c0_3, %c0_4] : memref<9x16x16xbf16, #tpu.memory_space<vmem>>, vector<1x16x16xbf16>
    %3 = vector.shape_cast %2 : vector<1x16x16xbf16> to vector<16x16xbf16>
    %cst = arith.constant dense<0.000000e+00> : vector<16x80xf32>
    %4 = tpu.matmul %3, %1, %cst {dimension_numbers = #tpu.dot_dimension_numbers<[1], [0], [0], [1], [0, 0, 1, 1], [], []>} : vector<16x16xbf16>, vector<16x80xbf16>, vector<16x80xf32> -> vector<16x80xf32>
    %c0_5 = arith.constant 0 : index
    %c0_6 = arith.constant 0 : index
    %c1 = arith.constant 1 : index
    %5 = vector.load %arg1[%c0_5, %c0_6, %c1] : memref<1x16x110xbf16, #tpu.memory_space<vmem>>, vector<1x16x80xbf16>
    %6 = vector.shape_cast %5 : vector<1x16x80xbf16> to vector<16x80xbf16>
    %c1_7 = arith.constant 1 : index
    %c0_8 = arith.constant 0 : index
    %c0_9 = arith.constant 0 : index
    %7 = vector.load %arg2[%c1_7, %c0_8, %c0_9] : memref<9x16x16xbf16, #tpu.memory_space<vmem>>, vector<1x16x16xbf16>
    %8 = vector.shape_cast %7 : vector<1x16x16xbf16> to vector<16x16xbf16>
    %cst_10 = arith.constant dense<0.000000e+00> : vector<16x80xf32>
    %9 = tpu.matmul %8, %6, %cst_10 {dimension_numbers = #tpu.dot_dimension_numbers<[1], [0], [0], [1], [0, 0, 1, 1], [], []>} : vector<16x16xbf16>, vector<16x80xbf16>, vector<16x80xf32> -> vector<16x80xf32>
    %10 = arith.addf %4, %9 : vector<16x80xf32>
    %c0_11 = arith.constant 0 : index
    %c0_12 = arith.constant 0 : index
    %c2 = arith.constant 2 : index
    %11 = vector.load %arg1[%c0_11, %c0_12, %c2] : memref<1x16x110xbf16, #tpu.memory_space<vmem>>, vector<1x16x80xbf16>
    %12 = vector.shape_cast %11 : vector<1x16x80xbf16> to vector<16x80xbf16>
    %c2_13 = arith.constant 2 : index
    %c0_14 = arith.constant 0 : index
    %c0_15 = arith.constant 0 : index
    %13 = vector.load %arg2[%c2_13, %c0_14, %c0_15] : memref<9x16x16xbf16, #tpu.memory_space<vmem>>, vector<1x16x16xbf16>
    %14 = vector.shape_cast %13 : vector<1x16x16xbf16> to vector<16x16xbf16>
    %cst_16 = arith.constant dense<0.000000e+00> : vector<16x80xf32>
    %15 = tpu.matmul %14, %12, %cst_16 {dimension_numbers = #tpu.dot_dimension_numbers<[1], [0], [0], [1], [0, 0, 1, 1], [], []>} : vector<16x16xbf16>, vector<16x80xbf16>, vector<16x80xf32> -> vector<16x80xf32>
    %16 = arith.addf %10, %15 : vector<16x80xf32>
    %c0_17 = arith.constant 0 : index
    %c0_18 = arith.constant 0 : index
    %c10 = arith.constant 10 : index
    %17 = vector.load %arg1[%c0_17, %c0_18, %c10] : memref<1x16x110xbf16, #tpu.memory_space<vmem>>, vector<1x16x80xbf16>
    %18 = vector.shape_cast %17 : vector<1x16x80xbf16> to vector<16x80xbf16>
    %c3 = arith.constant 3 : index
    %c0_19 = arith.constant 0 : index
    %c0_20 = arith.constant 0 : index
    %19 = vector.load %arg2[%c3, %c0_19, %c0_20] : memref<9x16x16xbf16, #tpu.memory_space<vmem>>, vector<1x16x16xbf16>
    %20 = vector.shape_cast %19 : vector<1x16x16xbf16> to vector<16x16xbf16>
    %cst_21 = arith.constant dense<0.000000e+00> : vector<16x80xf32>
    %21 = tpu.matmul %20, %18, %cst_21 {dimension_numbers = #tpu.dot_dimension_numbers<[1], [0], [0], [1], [0, 0, 1, 1], [], []>} : vector<16x16xbf16>, vector<16x80xbf16>, vector<16x80xf32> -> vector<16x80xf32>
    %22 = arith.addf %16, %21 : vector<16x80xf32>
    %c0_22 = arith.constant 0 : index
    %c0_23 = arith.constant 0 : index
    %c11 = arith.constant 11 : index
    %23 = vector.load %arg1[%c0_22, %c0_23, %c11] : memref<1x16x110xbf16, #tpu.memory_space<vmem>>, vector<1x16x80xbf16>
    %24 = vector.shape_cast %23 : vector<1x16x80xbf16> to vector<16x80xbf16>
    %c4 = arith.constant 4 : index
    %c0_24 = arith.constant 0 : index
    %c0_25 = arith.constant 0 : index
    %25 = vector.load %arg2[%c4, %c0_24, %c0_25] : memref<9x16x16xbf16, #tpu.memory_space<vmem>>, vector<1x16x16xbf16>
    %26 = vector.shape_cast %25 : vector<1x16x16xbf16> to vector<16x16xbf16>
    %cst_26 = arith.constant dense<0.000000e+00> : vector<16x80xf32>
    %27 = tpu.matmul %26, %24, %cst_26 {dimension_numbers = #tpu.dot_dimension_numbers<[1], [0], [0], [1], [0, 0, 1, 1], [], []>} : vector<16x16xbf16>, vector<16x80xbf16>, vector<16x80xf32> -> vector<16x80xf32>
    %28 = arith.addf %22, %27 : vector<16x80xf32>
    %c0_27 = arith.constant 0 : index
    %c0_28 = arith.constant 0 : index
    %c12 = arith.constant 12 : index
    %29 = vector.load %arg1[%c0_27, %c0_28, %c12] : memref<1x16x110xbf16, #tpu.memory_space<vmem>>, vector<1x16x80xbf16>
    %30 = vector.shape_cast %29 : vector<1x16x80xbf16> to vector<16x80xbf16>
    %c5 = arith.constant 5 : index
    %c0_29 = arith.constant 0 : index
    %c0_30 = arith.constant 0 : index
    %31 = vector.load %arg2[%c5, %c0_29, %c0_30] : memref<9x16x16xbf16, #tpu.memory_space<vmem>>, vector<1x16x16xbf16>
    %32 = vector.shape_cast %31 : vector<1x16x16xbf16> to vector<16x16xbf16>
    %cst_31 = arith.constant dense<0.000000e+00> : vector<16x80xf32>
    %33 = tpu.matmul %32, %30, %cst_31 {dimension_numbers = #tpu.dot_dimension_numbers<[1], [0], [0], [1], [0, 0, 1, 1], [], []>} : vector<16x16xbf16>, vector<16x80xbf16>, vector<16x80xf32> -> vector<16x80xf32>
    %34 = arith.addf %28, %33 : vector<16x80xf32>
    %c0_32 = arith.constant 0 : index
    %c0_33 = arith.constant 0 : index
    %c20 = arith.constant 20 : index
    %35 = vector.load %arg1[%c0_32, %c0_33, %c20] : memref<1x16x110xbf16, #tpu.memory_space<vmem>>, vector<1x16x80xbf16>
    %36 = vector.shape_cast %35 : vector<1x16x80xbf16> to vector<16x80xbf16>
    %c6 = arith.constant 6 : index
    %c0_34 = arith.constant 0 : index
    %c0_35 = arith.constant 0 : index
    %37 = vector.load %arg2[%c6, %c0_34, %c0_35] : memref<9x16x16xbf16, #tpu.memory_space<vmem>>, vector<1x16x16xbf16>
    %38 = vector.shape_cast %37 : vector<1x16x16xbf16> to vector<16x16xbf16>
    %cst_36 = arith.constant dense<0.000000e+00> : vector<16x80xf32>
    %39 = tpu.matmul %38, %36, %cst_36 {dimension_numbers = #tpu.dot_dimension_numbers<[1], [0], [0], [1], [0, 0, 1, 1], [], []>} : vector<16x16xbf16>, vector<16x80xbf16>, vector<16x80xf32> -> vector<16x80xf32>
    %40 = arith.addf %34, %39 : vector<16x80xf32>
    %c0_37 = arith.constant 0 : index
    %c0_38 = arith.constant 0 : index
    %c21 = arith.constant 21 : index
    %41 = vector.load %arg1[%c0_37, %c0_38, %c21] : memref<1x16x110xbf16, #tpu.memory_space<vmem>>, vector<1x16x80xbf16>
    %42 = vector.shape_cast %41 : vector<1x16x80xbf16> to vector<16x80xbf16>
    %c7 = arith.constant 7 : index
    %c0_39 = arith.constant 0 : index
    %c0_40 = arith.constant 0 : index
    %43 = vector.load %arg2[%c7, %c0_39, %c0_40] : memref<9x16x16xbf16, #tpu.memory_space<vmem>>, vector<1x16x16xbf16>
    %44 = vector.shape_cast %43 : vector<1x16x16xbf16> to vector<16x16xbf16>
    %cst_41 = arith.constant dense<0.000000e+00> : vector<16x80xf32>
    %45 = tpu.matmul %44, %42, %cst_41 {dimension_numbers = #tpu.dot_dimension_numbers<[1], [0], [0], [1], [0, 0, 1, 1], [], []>} : vector<16x16xbf16>, vector<16x80xbf16>, vector<16x80xf32> -> vector<16x80xf32>
    %46 = arith.addf %40, %45 : vector<16x80xf32>
    %c0_42 = arith.constant 0 : index
    %c0_43 = arith.constant 0 : index
    %c22 = arith.constant 22 : index
    %47 = vector.load %arg1[%c0_42, %c0_43, %c22] : memref<1x16x110xbf16, #tpu.memory_space<vmem>>, vector<1x16x80xbf16>
    %48 = vector.shape_cast %47 : vector<1x16x80xbf16> to vector<16x80xbf16>
    %c8 = arith.constant 8 : index
    %c0_44 = arith.constant 0 : index
    %c0_45 = arith.constant 0 : index
    %49 = vector.load %arg2[%c8, %c0_44, %c0_45] : memref<9x16x16xbf16, #tpu.memory_space<vmem>>, vector<1x16x16xbf16>
    %50 = vector.shape_cast %49 : vector<1x16x16xbf16> to vector<16x16xbf16>
    %cst_46 = arith.constant dense<0.000000e+00> : vector<16x80xf32>
    %51 = tpu.matmul %50, %48, %cst_46 {dimension_numbers = #tpu.dot_dimension_numbers<[1], [0], [0], [1], [0, 0, 1, 1], [], []>} : vector<16x16xbf16>, vector<16x80xbf16>, vector<16x80xf32> -> vector<16x80xf32>
    %52 = arith.addf %46, %51 : vector<16x80xf32>
    %c0_47 = arith.constant 0 : index
    %c0_48 = arith.constant 0 : index
    %53 = vector.load %arg6[%c0_47, %c0_48] : memref<1x80xf32, #tpu.memory_space<vmem>>, vector<1x80xf32>
    %54 = vector.broadcast %53 : vector<1x80xf32> to vector<16x80xf32>
    %55 = arith.mulf %52, %54 : vector<16x80xf32>
    %cst_49 = arith.constant dense<0.000000e+00> : vector<16xf32>
    %56 = vector.multi_reduction <add>, %55, %cst_49 [1] : vector<16x80xf32> to vector<16xf32>
    %57 = vector.shape_cast %56 : vector<16xf32> to vector<16x1xf32>
    %c0_50 = arith.constant 0 : index
    %c0_51 = arith.constant 0 : index
    %58 = vector.load %arg3[%c0_50, %c0_51] : memref<16x16xf32, #tpu.memory_space<vmem>>, vector<16x16xf32>
    %cst_52 = arith.constant dense<0.000000e+00> : vector<16x1xf32>
    %59 = tpu.matmul %58, %57, %cst_52 {dimension_numbers = #tpu.dot_dimension_numbers<[1], [0], [0], [1], [0, 0, 1, 1], [], []>} : vector<16x16xf32>, vector<16x1xf32>, vector<16x1xf32> -> vector<16x1xf32>
    %60 = vector.broadcast %59 : vector<16x1xf32> to vector<16x80xf32>
    %61 = arith.subf %52, %60 : vector<16x80xf32>
    %62 = vector.broadcast %53 : vector<1x80xf32> to vector<16x80xf32>
    %63 = arith.mulf %61, %62 : vector<16x80xf32>
    %c0_53 = arith.constant 0 : index
    %c0_54 = arith.constant 0 : index
    %64 = vector.load %arg3[%c0_53, %c0_54] : memref<16x16xf32, #tpu.memory_space<vmem>>, vector<16x16xf32>
    %65 = arith.mulf %63, %63 : vector<16x80xf32>
    %cst_55 = arith.constant dense<0.000000e+00> : vector<16xf32>
    %66 = vector.multi_reduction <add>, %65, %cst_55 [1] : vector<16x80xf32> to vector<16xf32>
    %67 = vector.shape_cast %66 : vector<16xf32> to vector<16x1xf32>
    %cst_56 = arith.constant dense<0.000000e+00> : vector<16x1xf32>
    %68 = tpu.matmul %64, %67, %cst_56 {dimension_numbers = #tpu.dot_dimension_numbers<[1], [0], [0], [1], [0, 0, 1, 1], [], []>} : vector<16x16xf32>, vector<16x1xf32>, vector<16x1xf32> -> vector<16x1xf32>
    %cst_57 = arith.constant 9.99999974E-6 : f32
    %69 = vector.broadcast %cst_57 : f32 to vector<16x1xf32>
    %70 = arith.addf %68, %69 : vector<16x1xf32>
    %71 = math.rsqrt %70 : vector<16x1xf32>
    %72 = vector.broadcast %59 : vector<16x1xf32> to vector<16x80xf32>
    %73 = arith.subf %52, %72 : vector<16x80xf32>
    %74 = vector.broadcast %71 : vector<16x1xf32> to vector<16x80xf32>
    %75 = arith.mulf %73, %74 : vector<16x80xf32>
    %c0_58 = arith.constant 0 : index
    %c0_59 = arith.constant 0 : index
    %76 = vector.load %arg4[%c0_58, %c0_59] : memref<16x1xf32, #tpu.memory_space<vmem>>, vector<16x1xf32>
    %77 = vector.broadcast %76 : vector<16x1xf32> to vector<16x80xf32>
    %78 = arith.mulf %75, %77 : vector<16x80xf32>
    %c0_60 = arith.constant 0 : index
    %c0_61 = arith.constant 0 : index
    %79 = vector.load %arg5[%c0_60, %c0_61] : memref<16x1xf32, #tpu.memory_space<vmem>>, vector<16x1xf32>
    %80 = vector.broadcast %79 : vector<16x1xf32> to vector<16x80xf32>
    %81 = arith.addf %78, %80 : vector<16x80xf32>
    %cst_62 = arith.constant 0.000000e+00 : f32
    %82 = vector.broadcast %cst_62 : f32 to vector<16x80xf32>
    %83 = arith.maximumf %81, %82 : vector<16x80xf32>
    %84 = arith.truncf %83 : vector<16x80xf32> to vector<16x80xbf16>
    %c0_63 = arith.constant 0 : index
    %c0_64 = arith.constant 0 : index
    %c0_65 = arith.constant 0 : index
    %85 = vector.load %arg7[%c0_63, %c0_64, %c0_65] : memref<1x16x80xbf16, #tpu.memory_space<vmem>>, vector<1x16x80xbf16>
    %86 = vector.shape_cast %85 : vector<1x16x80xbf16> to vector<16x80xbf16>
    %87 = vector.shape_cast %84 : vector<16x80xbf16> to vector<1x16x80xbf16>
    tpu.vector_store %arg7[%c0_63, %c0_64, %c0_65], %87 {strides = array<i32>} : memref<1x16x80xbf16, #tpu.memory_space<vmem>>, vector<1x16x80xbf16>,
    return
  }
  func.func @transform_0(%arg0: i32) -> (i32, i32, i32) {
    %c0_i32 = arith.constant 0 : i32
    %c0_i32_0 = arith.constant 0 : i32
    %c0_i32_1 = arith.constant 0 : i32
    return %arg0, %c0_i32, %c0_i32_0 : i32, i32, i32
  }
  func.func @transform_1(%arg0: i32) -> (i32, i32, i32) {
    %c0_i32 = arith.constant 0 : i32
    %c0_i32_0 = arith.constant 0 : i32
    %c0_i32_1 = arith.constant 0 : i32
    %c0_i32_2 = arith.constant 0 : i32
    return %c0_i32, %c0_i32_0, %c0_i32_1 : i32, i32, i32
  }
  func.func @transform_2(%arg0: i32) -> (i32, i32) {
    %c0_i32 = arith.constant 0 : i32
    %c0_i32_0 = arith.constant 0 : i32
    %c0_i32_1 = arith.constant 0 : i32
    return %c0_i32, %c0_i32_0 : i32, i32
  }
  func.func @transform_3(%arg0: i32) -> (i32, i32) {
    %c0_i32 = arith.constant 0 : i32
    %c0_i32_0 = arith.constant 0 : i32
    %c0_i32_1 = arith.constant 0 : i32
    return %c0_i32, %c0_i32_0 : i32, i32
  }
  func.func @transform_4(%arg0: i32) -> (i32, i32) {
    %c0_i32 = arith.constant 0 : i32
    %c0_i32_0 = arith.constant 0 : i32
    %c0_i32_1 = arith.constant 0 : i32
    return %c0_i32, %c0_i32_0 : i32, i32
  }
  func.func @transform_5(%arg0: i32) -> (i32, i32) {
    %c0_i32 = arith.constant 0 : i32
    %c0_i32_0 = arith.constant 0 : i32
    %c0_i32_1 = arith.constant 0 : i32
    return %c0_i32, %c0_i32_0 : i32, i32
  }
  func.func @transform_6(%arg0: i32) -> (i32, i32, i32) {
    %c0_i32 = arith.constant 0 : i32
    %c0_i32_0 = arith.constant 0 : i32
    %c0_i32_1 = arith.constant 0 : i32
    return %arg0, %c0_i32, %c0_i32_0 : i32, i32, i32
  }
}

module attributes {stable_mosaic.version = 11 : i64} {
  func.func @conv_gn_relu_kernel(%arg0: i32, %arg1: memref<1x64x30xbf16, #tpu.memory_space<vmem>>, %arg2: memref<4x32x64xbf16, #tpu.memory_space<vmem>>, %arg3: memref<32x32xf32, #tpu.memory_space<vmem>>, %arg4: memref<32x1xf32, #tpu.memory_space<vmem>>, %arg5: memref<32x1xf32, #tpu.memory_space<vmem>>, %arg6: memref<1x20xf32, #tpu.memory_space<vmem>>, %arg7: memref<1x32x20xbf16, #tpu.memory_space<vmem>>) attributes {dimension_semantics = [#tpu.dimension_semantics<parallel>], iteration_bounds = array<i64: 2>, scalar_prefetch = 0 : i64, scratch_operands = 0 : i64, tpu.core_type = #tpu.core_type<tc>, window_params = [{transform_indices = @transform_0, window_bounds = array<i64: 1, 64, 30>}, {pipeline_mode = #tpu.pipeline_mode<synchronous>, transform_indices = @transform_1, window_bounds = array<i64: 4, 32, 64>}, {pipeline_mode = #tpu.pipeline_mode<synchronous>, transform_indices = @transform_2, window_bounds = array<i64: 32, 32>}, {pipeline_mode = #tpu.pipeline_mode<synchronous>, transform_indices = @transform_3, window_bounds = array<i64: 32, 1>}, {pipeline_mode = #tpu.pipeline_mode<synchronous>, transform_indices = @transform_4, window_bounds = array<i64: 32, 1>}, {pipeline_mode = #tpu.pipeline_mode<synchronous>, transform_indices = @transform_5, window_bounds = array<i64: 1, 20>}, {transform_indices = @transform_6, window_bounds = array<i64: 1, 32, 20>}]} {
    %c0 = arith.constant 0 : index
    %c0_0 = arith.constant 0 : index
    %c0_1 = arith.constant 0 : index
    %0 = vector.load %arg1[%c0, %c0_0, %c0_1] : memref<1x64x30xbf16, #tpu.memory_space<vmem>>, vector<1x64x20xbf16>
    %1 = vector.shape_cast %0 : vector<1x64x20xbf16> to vector<64x20xbf16>
    %c0_2 = arith.constant 0 : index
    %c0_3 = arith.constant 0 : index
    %c0_4 = arith.constant 0 : index
    %2 = vector.load %arg2[%c0_2, %c0_3, %c0_4] : memref<4x32x64xbf16, #tpu.memory_space<vmem>>, vector<1x32x64xbf16>
    %3 = vector.shape_cast %2 : vector<1x32x64xbf16> to vector<32x64xbf16>
    %cst = arith.constant dense<0.000000e+00> : vector<32x20xf32>
    %4 = tpu.matmul %3, %1, %cst {dimension_numbers = #tpu.dot_dimension_numbers<[1], [0], [0], [1], [0, 0, 1, 1], [], []>} : vector<32x64xbf16>, vector<64x20xbf16>, vector<32x20xf32> -> vector<32x20xf32>
    %c0_5 = arith.constant 0 : index
    %c0_6 = arith.constant 0 : index
    %c1 = arith.constant 1 : index
    %5 = vector.load %arg1[%c0_5, %c0_6, %c1] : memref<1x64x30xbf16, #tpu.memory_space<vmem>>, vector<1x64x20xbf16>
    %6 = vector.shape_cast %5 : vector<1x64x20xbf16> to vector<64x20xbf16>
    %c1_7 = arith.constant 1 : index
    %c0_8 = arith.constant 0 : index
    %c0_9 = arith.constant 0 : index
    %7 = vector.load %arg2[%c1_7, %c0_8, %c0_9] : memref<4x32x64xbf16, #tpu.memory_space<vmem>>, vector<1x32x64xbf16>
    %8 = vector.shape_cast %7 : vector<1x32x64xbf16> to vector<32x64xbf16>
    %cst_10 = arith.constant dense<0.000000e+00> : vector<32x20xf32>
    %9 = tpu.matmul %8, %6, %cst_10 {dimension_numbers = #tpu.dot_dimension_numbers<[1], [0], [0], [1], [0, 0, 1, 1], [], []>} : vector<32x64xbf16>, vector<64x20xbf16>, vector<32x20xf32> -> vector<32x20xf32>
    %10 = arith.addf %4, %9 : vector<32x20xf32>
    %c0_11 = arith.constant 0 : index
    %c0_12 = arith.constant 0 : index
    %c5 = arith.constant 5 : index
    %11 = vector.load %arg1[%c0_11, %c0_12, %c5] : memref<1x64x30xbf16, #tpu.memory_space<vmem>>, vector<1x64x20xbf16>
    %12 = vector.shape_cast %11 : vector<1x64x20xbf16> to vector<64x20xbf16>
    %c2 = arith.constant 2 : index
    %c0_13 = arith.constant 0 : index
    %c0_14 = arith.constant 0 : index
    %13 = vector.load %arg2[%c2, %c0_13, %c0_14] : memref<4x32x64xbf16, #tpu.memory_space<vmem>>, vector<1x32x64xbf16>
    %14 = vector.shape_cast %13 : vector<1x32x64xbf16> to vector<32x64xbf16>
    %cst_15 = arith.constant dense<0.000000e+00> : vector<32x20xf32>
    %15 = tpu.matmul %14, %12, %cst_15 {dimension_numbers = #tpu.dot_dimension_numbers<[1], [0], [0], [1], [0, 0, 1, 1], [], []>} : vector<32x64xbf16>, vector<64x20xbf16>, vector<32x20xf32> -> vector<32x20xf32>
    %16 = arith.addf %10, %15 : vector<32x20xf32>
    %c0_16 = arith.constant 0 : index
    %c0_17 = arith.constant 0 : index
    %c6 = arith.constant 6 : index
    %17 = vector.load %arg1[%c0_16, %c0_17, %c6] : memref<1x64x30xbf16, #tpu.memory_space<vmem>>, vector<1x64x20xbf16>
    %18 = vector.shape_cast %17 : vector<1x64x20xbf16> to vector<64x20xbf16>
    %c3 = arith.constant 3 : index
    %c0_18 = arith.constant 0 : index
    %c0_19 = arith.constant 0 : index
    %19 = vector.load %arg2[%c3, %c0_18, %c0_19] : memref<4x32x64xbf16, #tpu.memory_space<vmem>>, vector<1x32x64xbf16>
    %20 = vector.shape_cast %19 : vector<1x32x64xbf16> to vector<32x64xbf16>
    %cst_20 = arith.constant dense<0.000000e+00> : vector<32x20xf32>
    %21 = tpu.matmul %20, %18, %cst_20 {dimension_numbers = #tpu.dot_dimension_numbers<[1], [0], [0], [1], [0, 0, 1, 1], [], []>} : vector<32x64xbf16>, vector<64x20xbf16>, vector<32x20xf32> -> vector<32x20xf32>
    %22 = arith.addf %16, %21 : vector<32x20xf32>
    %c0_21 = arith.constant 0 : index
    %c0_22 = arith.constant 0 : index
    %23 = vector.load %arg6[%c0_21, %c0_22] : memref<1x20xf32, #tpu.memory_space<vmem>>, vector<1x20xf32>
    %24 = vector.broadcast %23 : vector<1x20xf32> to vector<32x20xf32>
    %25 = arith.mulf %22, %24 : vector<32x20xf32>
    %cst_23 = arith.constant dense<0.000000e+00> : vector<32xf32>
    %26 = vector.multi_reduction <add>, %25, %cst_23 [1] : vector<32x20xf32> to vector<32xf32>
    %27 = vector.shape_cast %26 : vector<32xf32> to vector<32x1xf32>
    %c0_24 = arith.constant 0 : index
    %c0_25 = arith.constant 0 : index
    %28 = vector.load %arg3[%c0_24, %c0_25] : memref<32x32xf32, #tpu.memory_space<vmem>>, vector<32x32xf32>
    %cst_26 = arith.constant dense<0.000000e+00> : vector<32x1xf32>
    %29 = tpu.matmul %28, %27, %cst_26 {dimension_numbers = #tpu.dot_dimension_numbers<[1], [0], [0], [1], [0, 0, 1, 1], [], []>} : vector<32x32xf32>, vector<32x1xf32>, vector<32x1xf32> -> vector<32x1xf32>
    %30 = vector.broadcast %29 : vector<32x1xf32> to vector<32x20xf32>
    %31 = arith.subf %22, %30 : vector<32x20xf32>
    %32 = vector.broadcast %23 : vector<1x20xf32> to vector<32x20xf32>
    %33 = arith.mulf %31, %32 : vector<32x20xf32>
    %c0_27 = arith.constant 0 : index
    %c0_28 = arith.constant 0 : index
    %34 = vector.load %arg3[%c0_27, %c0_28] : memref<32x32xf32, #tpu.memory_space<vmem>>, vector<32x32xf32>
    %35 = arith.mulf %33, %33 : vector<32x20xf32>
    %cst_29 = arith.constant dense<0.000000e+00> : vector<32xf32>
    %36 = vector.multi_reduction <add>, %35, %cst_29 [1] : vector<32x20xf32> to vector<32xf32>
    %37 = vector.shape_cast %36 : vector<32xf32> to vector<32x1xf32>
    %cst_30 = arith.constant dense<0.000000e+00> : vector<32x1xf32>
    %38 = tpu.matmul %34, %37, %cst_30 {dimension_numbers = #tpu.dot_dimension_numbers<[1], [0], [0], [1], [0, 0, 1, 1], [], []>} : vector<32x32xf32>, vector<32x1xf32>, vector<32x1xf32> -> vector<32x1xf32>
    %cst_31 = arith.constant 9.99999974E-6 : f32
    %39 = vector.broadcast %cst_31 : f32 to vector<32x1xf32>
    %40 = arith.addf %38, %39 : vector<32x1xf32>
    %41 = math.rsqrt %40 : vector<32x1xf32>
    %42 = vector.broadcast %29 : vector<32x1xf32> to vector<32x20xf32>
    %43 = arith.subf %22, %42 : vector<32x20xf32>
    %44 = vector.broadcast %41 : vector<32x1xf32> to vector<32x20xf32>
    %45 = arith.mulf %43, %44 : vector<32x20xf32>
    %c0_32 = arith.constant 0 : index
    %c0_33 = arith.constant 0 : index
    %46 = vector.load %arg4[%c0_32, %c0_33] : memref<32x1xf32, #tpu.memory_space<vmem>>, vector<32x1xf32>
    %47 = vector.broadcast %46 : vector<32x1xf32> to vector<32x20xf32>
    %48 = arith.mulf %45, %47 : vector<32x20xf32>
    %c0_34 = arith.constant 0 : index
    %c0_35 = arith.constant 0 : index
    %49 = vector.load %arg5[%c0_34, %c0_35] : memref<32x1xf32, #tpu.memory_space<vmem>>, vector<32x1xf32>
    %50 = vector.broadcast %49 : vector<32x1xf32> to vector<32x20xf32>
    %51 = arith.addf %48, %50 : vector<32x20xf32>
    %cst_36 = arith.constant 0.000000e+00 : f32
    %52 = vector.broadcast %cst_36 : f32 to vector<32x20xf32>
    %53 = arith.maximumf %51, %52 : vector<32x20xf32>
    %54 = arith.truncf %53 : vector<32x20xf32> to vector<32x20xbf16>
    %c0_37 = arith.constant 0 : index
    %c0_38 = arith.constant 0 : index
    %c0_39 = arith.constant 0 : index
    %55 = vector.load %arg7[%c0_37, %c0_38, %c0_39] : memref<1x32x20xbf16, #tpu.memory_space<vmem>>, vector<1x32x20xbf16>
    %56 = vector.shape_cast %55 : vector<1x32x20xbf16> to vector<32x20xbf16>
    %57 = vector.shape_cast %54 : vector<32x20xbf16> to vector<1x32x20xbf16>
    tpu.vector_store %arg7[%c0_37, %c0_38, %c0_39], %57 {strides = array<i32>} : memref<1x32x20xbf16, #tpu.memory_space<vmem>>, vector<1x32x20xbf16>,
    return
  }
  func.func @transform_0(%arg0: i32) -> (i32, i32, i32) {
    %c0_i32 = arith.constant 0 : i32
    %c0_i32_0 = arith.constant 0 : i32
    %c0_i32_1 = arith.constant 0 : i32
    return %arg0, %c0_i32, %c0_i32_0 : i32, i32, i32
  }
  func.func @transform_1(%arg0: i32) -> (i32, i32, i32) {
    %c0_i32 = arith.constant 0 : i32
    %c0_i32_0 = arith.constant 0 : i32
    %c0_i32_1 = arith.constant 0 : i32
    %c0_i32_2 = arith.constant 0 : i32
    return %c0_i32, %c0_i32_0, %c0_i32_1 : i32, i32, i32
  }
  func.func @transform_2(%arg0: i32) -> (i32, i32) {
    %c0_i32 = arith.constant 0 : i32
    %c0_i32_0 = arith.constant 0 : i32
    %c0_i32_1 = arith.constant 0 : i32
    return %c0_i32, %c0_i32_0 : i32, i32
  }
  func.func @transform_3(%arg0: i32) -> (i32, i32) {
    %c0_i32 = arith.constant 0 : i32
    %c0_i32_0 = arith.constant 0 : i32
    %c0_i32_1 = arith.constant 0 : i32
    return %c0_i32, %c0_i32_0 : i32, i32
  }
  func.func @transform_4(%arg0: i32) -> (i32, i32) {
    %c0_i32 = arith.constant 0 : i32
    %c0_i32_0 = arith.constant 0 : i32
    %c0_i32_1 = arith.constant 0 : i32
    return %c0_i32, %c0_i32_0 : i32, i32
  }
  func.func @transform_5(%arg0: i32) -> (i32, i32) {
    %c0_i32 = arith.constant 0 : i32
    %c0_i32_0 = arith.constant 0 : i32
    %c0_i32_1 = arith.constant 0 : i32
    return %c0_i32, %c0_i32_0 : i32, i32
  }
  func.func @transform_6(%arg0: i32) -> (i32, i32, i32) {
    %c0_i32 = arith.constant 0 : i32
    %c0_i32_0 = arith.constant 0 : i32
    %c0_i32_1 = arith.constant 0 : i32
    return %arg0, %c0_i32, %c0_i32_0 : i32, i32, i32
  }
}

module attributes {stable_mosaic.version = 11 : i64} {
  func.func @conv_gn_relu_kernel(%arg0: i32, %arg1: memref<1x32x42xbf16, #tpu.memory_space<vmem>>, %arg2: memref<9x32x32xbf16, #tpu.memory_space<vmem>>, %arg3: memref<32x32xf32, #tpu.memory_space<vmem>>, %arg4: memref<32x1xf32, #tpu.memory_space<vmem>>, %arg5: memref<32x1xf32, #tpu.memory_space<vmem>>, %arg6: memref<1x24xf32, #tpu.memory_space<vmem>>, %arg7: memref<1x32x24xbf16, #tpu.memory_space<vmem>>) attributes {dimension_semantics = [#tpu.dimension_semantics<parallel>], iteration_bounds = array<i64: 2>, scalar_prefetch = 0 : i64, scratch_operands = 0 : i64, tpu.core_type = #tpu.core_type<tc>, window_params = [{transform_indices = @transform_0, window_bounds = array<i64: 1, 32, 42>}, {pipeline_mode = #tpu.pipeline_mode<synchronous>, transform_indices = @transform_1, window_bounds = array<i64: 9, 32, 32>}, {pipeline_mode = #tpu.pipeline_mode<synchronous>, transform_indices = @transform_2, window_bounds = array<i64: 32, 32>}, {pipeline_mode = #tpu.pipeline_mode<synchronous>, transform_indices = @transform_3, window_bounds = array<i64: 32, 1>}, {pipeline_mode = #tpu.pipeline_mode<synchronous>, transform_indices = @transform_4, window_bounds = array<i64: 32, 1>}, {pipeline_mode = #tpu.pipeline_mode<synchronous>, transform_indices = @transform_5, window_bounds = array<i64: 1, 24>}, {transform_indices = @transform_6, window_bounds = array<i64: 1, 32, 24>}]} {
    %c0 = arith.constant 0 : index
    %c0_0 = arith.constant 0 : index
    %c0_1 = arith.constant 0 : index
    %0 = vector.load %arg1[%c0, %c0_0, %c0_1] : memref<1x32x42xbf16, #tpu.memory_space<vmem>>, vector<1x32x24xbf16>
    %1 = vector.shape_cast %0 : vector<1x32x24xbf16> to vector<32x24xbf16>
    %c0_2 = arith.constant 0 : index
    %c0_3 = arith.constant 0 : index
    %c0_4 = arith.constant 0 : index
    %2 = vector.load %arg2[%c0_2, %c0_3, %c0_4] : memref<9x32x32xbf16, #tpu.memory_space<vmem>>, vector<1x32x32xbf16>
    %3 = vector.shape_cast %2 : vector<1x32x32xbf16> to vector<32x32xbf16>
    %cst = arith.constant dense<0.000000e+00> : vector<32x24xf32>
    %4 = tpu.matmul %3, %1, %cst {dimension_numbers = #tpu.dot_dimension_numbers<[1], [0], [0], [1], [0, 0, 1, 1], [], []>} : vector<32x32xbf16>, vector<32x24xbf16>, vector<32x24xf32> -> vector<32x24xf32>
    %c0_5 = arith.constant 0 : index
    %c0_6 = arith.constant 0 : index
    %c1 = arith.constant 1 : index
    %5 = vector.load %arg1[%c0_5, %c0_6, %c1] : memref<1x32x42xbf16, #tpu.memory_space<vmem>>, vector<1x32x24xbf16>
    %6 = vector.shape_cast %5 : vector<1x32x24xbf16> to vector<32x24xbf16>
    %c1_7 = arith.constant 1 : index
    %c0_8 = arith.constant 0 : index
    %c0_9 = arith.constant 0 : index
    %7 = vector.load %arg2[%c1_7, %c0_8, %c0_9] : memref<9x32x32xbf16, #tpu.memory_space<vmem>>, vector<1x32x32xbf16>
    %8 = vector.shape_cast %7 : vector<1x32x32xbf16> to vector<32x32xbf16>
    %cst_10 = arith.constant dense<0.000000e+00> : vector<32x24xf32>
    %9 = tpu.matmul %8, %6, %cst_10 {dimension_numbers = #tpu.dot_dimension_numbers<[1], [0], [0], [1], [0, 0, 1, 1], [], []>} : vector<32x32xbf16>, vector<32x24xbf16>, vector<32x24xf32> -> vector<32x24xf32>
    %10 = arith.addf %4, %9 : vector<32x24xf32>
    %c0_11 = arith.constant 0 : index
    %c0_12 = arith.constant 0 : index
    %c2 = arith.constant 2 : index
    %11 = vector.load %arg1[%c0_11, %c0_12, %c2] : memref<1x32x42xbf16, #tpu.memory_space<vmem>>, vector<1x32x24xbf16>
    %12 = vector.shape_cast %11 : vector<1x32x24xbf16> to vector<32x24xbf16>
    %c2_13 = arith.constant 2 : index
    %c0_14 = arith.constant 0 : index
    %c0_15 = arith.constant 0 : index
    %13 = vector.load %arg2[%c2_13, %c0_14, %c0_15] : memref<9x32x32xbf16, #tpu.memory_space<vmem>>, vector<1x32x32xbf16>
    %14 = vector.shape_cast %13 : vector<1x32x32xbf16> to vector<32x32xbf16>
    %cst_16 = arith.constant dense<0.000000e+00> : vector<32x24xf32>
    %15 = tpu.matmul %14, %12, %cst_16 {dimension_numbers = #tpu.dot_dimension_numbers<[1], [0], [0], [1], [0, 0, 1, 1], [], []>} : vector<32x32xbf16>, vector<32x24xbf16>, vector<32x24xf32> -> vector<32x24xf32>
    %16 = arith.addf %10, %15 : vector<32x24xf32>
    %c0_17 = arith.constant 0 : index
    %c0_18 = arith.constant 0 : index
    %c6 = arith.constant 6 : index
    %17 = vector.load %arg1[%c0_17, %c0_18, %c6] : memref<1x32x42xbf16, #tpu.memory_space<vmem>>, vector<1x32x24xbf16>
    %18 = vector.shape_cast %17 : vector<1x32x24xbf16> to vector<32x24xbf16>
    %c3 = arith.constant 3 : index
    %c0_19 = arith.constant 0 : index
    %c0_20 = arith.constant 0 : index
    %19 = vector.load %arg2[%c3, %c0_19, %c0_20] : memref<9x32x32xbf16, #tpu.memory_space<vmem>>, vector<1x32x32xbf16>
    %20 = vector.shape_cast %19 : vector<1x32x32xbf16> to vector<32x32xbf16>
    %cst_21 = arith.constant dense<0.000000e+00> : vector<32x24xf32>
    %21 = tpu.matmul %20, %18, %cst_21 {dimension_numbers = #tpu.dot_dimension_numbers<[1], [0], [0], [1], [0, 0, 1, 1], [], []>} : vector<32x32xbf16>, vector<32x24xbf16>, vector<32x24xf32> -> vector<32x24xf32>
    %22 = arith.addf %16, %21 : vector<32x24xf32>
    %c0_22 = arith.constant 0 : index
    %c0_23 = arith.constant 0 : index
    %c7 = arith.constant 7 : index
    %23 = vector.load %arg1[%c0_22, %c0_23, %c7] : memref<1x32x42xbf16, #tpu.memory_space<vmem>>, vector<1x32x24xbf16>
    %24 = vector.shape_cast %23 : vector<1x32x24xbf16> to vector<32x24xbf16>
    %c4 = arith.constant 4 : index
    %c0_24 = arith.constant 0 : index
    %c0_25 = arith.constant 0 : index
    %25 = vector.load %arg2[%c4, %c0_24, %c0_25] : memref<9x32x32xbf16, #tpu.memory_space<vmem>>, vector<1x32x32xbf16>
    %26 = vector.shape_cast %25 : vector<1x32x32xbf16> to vector<32x32xbf16>
    %cst_26 = arith.constant dense<0.000000e+00> : vector<32x24xf32>
    %27 = tpu.matmul %26, %24, %cst_26 {dimension_numbers = #tpu.dot_dimension_numbers<[1], [0], [0], [1], [0, 0, 1, 1], [], []>} : vector<32x32xbf16>, vector<32x24xbf16>, vector<32x24xf32> -> vector<32x24xf32>
    %28 = arith.addf %22, %27 : vector<32x24xf32>
    %c0_27 = arith.constant 0 : index
    %c0_28 = arith.constant 0 : index
    %c8 = arith.constant 8 : index
    %29 = vector.load %arg1[%c0_27, %c0_28, %c8] : memref<1x32x42xbf16, #tpu.memory_space<vmem>>, vector<1x32x24xbf16>
    %30 = vector.shape_cast %29 : vector<1x32x24xbf16> to vector<32x24xbf16>
    %c5 = arith.constant 5 : index
    %c0_29 = arith.constant 0 : index
    %c0_30 = arith.constant 0 : index
    %31 = vector.load %arg2[%c5, %c0_29, %c0_30] : memref<9x32x32xbf16, #tpu.memory_space<vmem>>, vector<1x32x32xbf16>
    %32 = vector.shape_cast %31 : vector<1x32x32xbf16> to vector<32x32xbf16>
    %cst_31 = arith.constant dense<0.000000e+00> : vector<32x24xf32>
    %33 = tpu.matmul %32, %30, %cst_31 {dimension_numbers = #tpu.dot_dimension_numbers<[1], [0], [0], [1], [0, 0, 1, 1], [], []>} : vector<32x32xbf16>, vector<32x24xbf16>, vector<32x24xf32> -> vector<32x24xf32>
    %34 = arith.addf %28, %33 : vector<32x24xf32>
    %c0_32 = arith.constant 0 : index
    %c0_33 = arith.constant 0 : index
    %c12 = arith.constant 12 : index
    %35 = vector.load %arg1[%c0_32, %c0_33, %c12] : memref<1x32x42xbf16, #tpu.memory_space<vmem>>, vector<1x32x24xbf16>
    %36 = vector.shape_cast %35 : vector<1x32x24xbf16> to vector<32x24xbf16>
    %c6_34 = arith.constant 6 : index
    %c0_35 = arith.constant 0 : index
    %c0_36 = arith.constant 0 : index
    %37 = vector.load %arg2[%c6_34, %c0_35, %c0_36] : memref<9x32x32xbf16, #tpu.memory_space<vmem>>, vector<1x32x32xbf16>
    %38 = vector.shape_cast %37 : vector<1x32x32xbf16> to vector<32x32xbf16>
    %cst_37 = arith.constant dense<0.000000e+00> : vector<32x24xf32>
    %39 = tpu.matmul %38, %36, %cst_37 {dimension_numbers = #tpu.dot_dimension_numbers<[1], [0], [0], [1], [0, 0, 1, 1], [], []>} : vector<32x32xbf16>, vector<32x24xbf16>, vector<32x24xf32> -> vector<32x24xf32>
    %40 = arith.addf %34, %39 : vector<32x24xf32>
    %c0_38 = arith.constant 0 : index
    %c0_39 = arith.constant 0 : index
    %c13 = arith.constant 13 : index
    %41 = vector.load %arg1[%c0_38, %c0_39, %c13] : memref<1x32x42xbf16, #tpu.memory_space<vmem>>, vector<1x32x24xbf16>
    %42 = vector.shape_cast %41 : vector<1x32x24xbf16> to vector<32x24xbf16>
    %c7_40 = arith.constant 7 : index
    %c0_41 = arith.constant 0 : index
    %c0_42 = arith.constant 0 : index
    %43 = vector.load %arg2[%c7_40, %c0_41, %c0_42] : memref<9x32x32xbf16, #tpu.memory_space<vmem>>, vector<1x32x32xbf16>
    %44 = vector.shape_cast %43 : vector<1x32x32xbf16> to vector<32x32xbf16>
    %cst_43 = arith.constant dense<0.000000e+00> : vector<32x24xf32>
    %45 = tpu.matmul %44, %42, %cst_43 {dimension_numbers = #tpu.dot_dimension_numbers<[1], [0], [0], [1], [0, 0, 1, 1], [], []>} : vector<32x32xbf16>, vector<32x24xbf16>, vector<32x24xf32> -> vector<32x24xf32>
    %46 = arith.addf %40, %45 : vector<32x24xf32>
    %c0_44 = arith.constant 0 : index
    %c0_45 = arith.constant 0 : index
    %c14 = arith.constant 14 : index
    %47 = vector.load %arg1[%c0_44, %c0_45, %c14] : memref<1x32x42xbf16, #tpu.memory_space<vmem>>, vector<1x32x24xbf16>
    %48 = vector.shape_cast %47 : vector<1x32x24xbf16> to vector<32x24xbf16>
    %c8_46 = arith.constant 8 : index
    %c0_47 = arith.constant 0 : index
    %c0_48 = arith.constant 0 : index
    %49 = vector.load %arg2[%c8_46, %c0_47, %c0_48] : memref<9x32x32xbf16, #tpu.memory_space<vmem>>, vector<1x32x32xbf16>
    %50 = vector.shape_cast %49 : vector<1x32x32xbf16> to vector<32x32xbf16>
    %cst_49 = arith.constant dense<0.000000e+00> : vector<32x24xf32>
    %51 = tpu.matmul %50, %48, %cst_49 {dimension_numbers = #tpu.dot_dimension_numbers<[1], [0], [0], [1], [0, 0, 1, 1], [], []>} : vector<32x32xbf16>, vector<32x24xbf16>, vector<32x24xf32> -> vector<32x24xf32>
    %52 = arith.addf %46, %51 : vector<32x24xf32>
    %c0_50 = arith.constant 0 : index
    %c0_51 = arith.constant 0 : index
    %53 = vector.load %arg6[%c0_50, %c0_51] : memref<1x24xf32, #tpu.memory_space<vmem>>, vector<1x24xf32>
    %54 = vector.broadcast %53 : vector<1x24xf32> to vector<32x24xf32>
    %55 = arith.mulf %52, %54 : vector<32x24xf32>
    %cst_52 = arith.constant dense<0.000000e+00> : vector<32xf32>
    %56 = vector.multi_reduction <add>, %55, %cst_52 [1] : vector<32x24xf32> to vector<32xf32>
    %57 = vector.shape_cast %56 : vector<32xf32> to vector<32x1xf32>
    %c0_53 = arith.constant 0 : index
    %c0_54 = arith.constant 0 : index
    %58 = vector.load %arg3[%c0_53, %c0_54] : memref<32x32xf32, #tpu.memory_space<vmem>>, vector<32x32xf32>
    %cst_55 = arith.constant dense<0.000000e+00> : vector<32x1xf32>
    %59 = tpu.matmul %58, %57, %cst_55 {dimension_numbers = #tpu.dot_dimension_numbers<[1], [0], [0], [1], [0, 0, 1, 1], [], []>} : vector<32x32xf32>, vector<32x1xf32>, vector<32x1xf32> -> vector<32x1xf32>
    %60 = vector.broadcast %59 : vector<32x1xf32> to vector<32x24xf32>
    %61 = arith.subf %52, %60 : vector<32x24xf32>
    %62 = vector.broadcast %53 : vector<1x24xf32> to vector<32x24xf32>
    %63 = arith.mulf %61, %62 : vector<32x24xf32>
    %c0_56 = arith.constant 0 : index
    %c0_57 = arith.constant 0 : index
    %64 = vector.load %arg3[%c0_56, %c0_57] : memref<32x32xf32, #tpu.memory_space<vmem>>, vector<32x32xf32>
    %65 = arith.mulf %63, %63 : vector<32x24xf32>
    %cst_58 = arith.constant dense<0.000000e+00> : vector<32xf32>
    %66 = vector.multi_reduction <add>, %65, %cst_58 [1] : vector<32x24xf32> to vector<32xf32>
    %67 = vector.shape_cast %66 : vector<32xf32> to vector<32x1xf32>
    %cst_59 = arith.constant dense<0.000000e+00> : vector<32x1xf32>
    %68 = tpu.matmul %64, %67, %cst_59 {dimension_numbers = #tpu.dot_dimension_numbers<[1], [0], [0], [1], [0, 0, 1, 1], [], []>} : vector<32x32xf32>, vector<32x1xf32>, vector<32x1xf32> -> vector<32x1xf32>
    %cst_60 = arith.constant 9.99999974E-6 : f32
    %69 = vector.broadcast %cst_60 : f32 to vector<32x1xf32>
    %70 = arith.addf %68, %69 : vector<32x1xf32>
    %71 = math.rsqrt %70 : vector<32x1xf32>
    %72 = vector.broadcast %59 : vector<32x1xf32> to vector<32x24xf32>
    %73 = arith.subf %52, %72 : vector<32x24xf32>
    %74 = vector.broadcast %71 : vector<32x1xf32> to vector<32x24xf32>
    %75 = arith.mulf %73, %74 : vector<32x24xf32>
    %c0_61 = arith.constant 0 : index
    %c0_62 = arith.constant 0 : index
    %76 = vector.load %arg4[%c0_61, %c0_62] : memref<32x1xf32, #tpu.memory_space<vmem>>, vector<32x1xf32>
    %77 = vector.broadcast %76 : vector<32x1xf32> to vector<32x24xf32>
    %78 = arith.mulf %75, %77 : vector<32x24xf32>
    %c0_63 = arith.constant 0 : index
    %c0_64 = arith.constant 0 : index
    %79 = vector.load %arg5[%c0_63, %c0_64] : memref<32x1xf32, #tpu.memory_space<vmem>>, vector<32x1xf32>
    %80 = vector.broadcast %79 : vector<32x1xf32> to vector<32x24xf32>
    %81 = arith.addf %78, %80 : vector<32x24xf32>
    %cst_65 = arith.constant 0.000000e+00 : f32
    %82 = vector.broadcast %cst_65 : f32 to vector<32x24xf32>
    %83 = arith.maximumf %81, %82 : vector<32x24xf32>
    %84 = arith.truncf %83 : vector<32x24xf32> to vector<32x24xbf16>
    %c0_66 = arith.constant 0 : index
    %c0_67 = arith.constant 0 : index
    %c0_68 = arith.constant 0 : index
    %85 = vector.load %arg7[%c0_66, %c0_67, %c0_68] : memref<1x32x24xbf16, #tpu.memory_space<vmem>>, vector<1x32x24xbf16>
    %86 = vector.shape_cast %85 : vector<1x32x24xbf16> to vector<32x24xbf16>
    %87 = vector.shape_cast %84 : vector<32x24xbf16> to vector<1x32x24xbf16>
    tpu.vector_store %arg7[%c0_66, %c0_67, %c0_68], %87 {strides = array<i32>} : memref<1x32x24xbf16, #tpu.memory_space<vmem>>, vector<1x32x24xbf16>,
    return
  }
  func.func @transform_0(%arg0: i32) -> (i32, i32, i32) {
    %c0_i32 = arith.constant 0 : i32
    %c0_i32_0 = arith.constant 0 : i32
    %c0_i32_1 = arith.constant 0 : i32
    return %arg0, %c0_i32, %c0_i32_0 : i32, i32, i32
  }
  func.func @transform_1(%arg0: i32) -> (i32, i32, i32) {
    %c0_i32 = arith.constant 0 : i32
    %c0_i32_0 = arith.constant 0 : i32
    %c0_i32_1 = arith.constant 0 : i32
    %c0_i32_2 = arith.constant 0 : i32
    return %c0_i32, %c0_i32_0, %c0_i32_1 : i32, i32, i32
  }
  func.func @transform_2(%arg0: i32) -> (i32, i32) {
    %c0_i32 = arith.constant 0 : i32
    %c0_i32_0 = arith.constant 0 : i32
    %c0_i32_1 = arith.constant 0 : i32
    return %c0_i32, %c0_i32_0 : i32, i32
  }
  func.func @transform_3(%arg0: i32) -> (i32, i32) {
    %c0_i32 = arith.constant 0 : i32
    %c0_i32_0 = arith.constant 0 : i32
    %c0_i32_1 = arith.constant 0 : i32
    return %c0_i32, %c0_i32_0 : i32, i32
  }
  func.func @transform_4(%arg0: i32) -> (i32, i32) {
    %c0_i32 = arith.constant 0 : i32
    %c0_i32_0 = arith.constant 0 : i32
    %c0_i32_1 = arith.constant 0 : i32
    return %c0_i32, %c0_i32_0 : i32, i32
  }
  func.func @transform_5(%arg0: i32) -> (i32, i32) {
    %c0_i32 = arith.constant 0 : i32
    %c0_i32_0 = arith.constant 0 : i32
    %c0_i32_1 = arith.constant 0 : i32
    return %c0_i32, %c0_i32_0 : i32, i32
  }
  func.func @transform_6(%arg0: i32) -> (i32, i32, i32) {
    %c0_i32 = arith.constant 0 : i32
    %c0_i32_0 = arith.constant 0 : i32
    %c0_i32_1 = arith.constant 0 : i32
    return %arg0, %c0_i32, %c0_i32_0 : i32, i32, i32
  }
}

module attributes {stable_mosaic.version = 11 : i64} {
  func.func @conv_gn_relu_kernel(%arg0: i32, %arg1: memref<1x128x12xbf16, #tpu.memory_space<vmem>>, %arg2: memref<4x64x128xbf16, #tpu.memory_space<vmem>>, %arg3: memref<64x64xf32, #tpu.memory_space<vmem>>, %arg4: memref<64x1xf32, #tpu.memory_space<vmem>>, %arg5: memref<64x1xf32, #tpu.memory_space<vmem>>, %arg6: memref<1x6xf32, #tpu.memory_space<vmem>>, %arg7: memref<1x64x6xbf16, #tpu.memory_space<vmem>>) attributes {dimension_semantics = [#tpu.dimension_semantics<parallel>], iteration_bounds = array<i64: 2>, scalar_prefetch = 0 : i64, scratch_operands = 0 : i64, tpu.core_type = #tpu.core_type<tc>, window_params = [{transform_indices = @transform_0, window_bounds = array<i64: 1, 128, 12>}, {pipeline_mode = #tpu.pipeline_mode<synchronous>, transform_indices = @transform_1, window_bounds = array<i64: 4, 64, 128>}, {pipeline_mode = #tpu.pipeline_mode<synchronous>, transform_indices = @transform_2, window_bounds = array<i64: 64, 64>}, {pipeline_mode = #tpu.pipeline_mode<synchronous>, transform_indices = @transform_3, window_bounds = array<i64: 64, 1>}, {pipeline_mode = #tpu.pipeline_mode<synchronous>, transform_indices = @transform_4, window_bounds = array<i64: 64, 1>}, {pipeline_mode = #tpu.pipeline_mode<synchronous>, transform_indices = @transform_5, window_bounds = array<i64: 1, 6>}, {transform_indices = @transform_6, window_bounds = array<i64: 1, 64, 6>}]} {
    %c0 = arith.constant 0 : index
    %c0_0 = arith.constant 0 : index
    %c0_1 = arith.constant 0 : index
    %0 = vector.load %arg1[%c0, %c0_0, %c0_1] : memref<1x128x12xbf16, #tpu.memory_space<vmem>>, vector<1x128x6xbf16>
    %1 = vector.shape_cast %0 : vector<1x128x6xbf16> to vector<128x6xbf16>
    %c0_2 = arith.constant 0 : index
    %c0_3 = arith.constant 0 : index
    %c0_4 = arith.constant 0 : index
    %2 = vector.load %arg2[%c0_2, %c0_3, %c0_4] : memref<4x64x128xbf16, #tpu.memory_space<vmem>>, vector<1x64x128xbf16>
    %3 = vector.shape_cast %2 : vector<1x64x128xbf16> to vector<64x128xbf16>
    %cst = arith.constant dense<0.000000e+00> : vector<64x6xf32>
    %4 = tpu.matmul %3, %1, %cst {dimension_numbers = #tpu.dot_dimension_numbers<[1], [0], [0], [1], [0, 0, 1, 1], [], []>} : vector<64x128xbf16>, vector<128x6xbf16>, vector<64x6xf32> -> vector<64x6xf32>
    %c0_5 = arith.constant 0 : index
    %c0_6 = arith.constant 0 : index
    %c1 = arith.constant 1 : index
    %5 = vector.load %arg1[%c0_5, %c0_6, %c1] : memref<1x128x12xbf16, #tpu.memory_space<vmem>>, vector<1x128x6xbf16>
    %6 = vector.shape_cast %5 : vector<1x128x6xbf16> to vector<128x6xbf16>
    %c1_7 = arith.constant 1 : index
    %c0_8 = arith.constant 0 : index
    %c0_9 = arith.constant 0 : index
    %7 = vector.load %arg2[%c1_7, %c0_8, %c0_9] : memref<4x64x128xbf16, #tpu.memory_space<vmem>>, vector<1x64x128xbf16>
    %8 = vector.shape_cast %7 : vector<1x64x128xbf16> to vector<64x128xbf16>
    %cst_10 = arith.constant dense<0.000000e+00> : vector<64x6xf32>
    %9 = tpu.matmul %8, %6, %cst_10 {dimension_numbers = #tpu.dot_dimension_numbers<[1], [0], [0], [1], [0, 0, 1, 1], [], []>} : vector<64x128xbf16>, vector<128x6xbf16>, vector<64x6xf32> -> vector<64x6xf32>
    %10 = arith.addf %4, %9 : vector<64x6xf32>
    %c0_11 = arith.constant 0 : index
    %c0_12 = arith.constant 0 : index
    %c3 = arith.constant 3 : index
    %11 = vector.load %arg1[%c0_11, %c0_12, %c3] : memref<1x128x12xbf16, #tpu.memory_space<vmem>>, vector<1x128x6xbf16>
    %12 = vector.shape_cast %11 : vector<1x128x6xbf16> to vector<128x6xbf16>
    %c2 = arith.constant 2 : index
    %c0_13 = arith.constant 0 : index
    %c0_14 = arith.constant 0 : index
    %13 = vector.load %arg2[%c2, %c0_13, %c0_14] : memref<4x64x128xbf16, #tpu.memory_space<vmem>>, vector<1x64x128xbf16>
    %14 = vector.shape_cast %13 : vector<1x64x128xbf16> to vector<64x128xbf16>
    %cst_15 = arith.constant dense<0.000000e+00> : vector<64x6xf32>
    %15 = tpu.matmul %14, %12, %cst_15 {dimension_numbers = #tpu.dot_dimension_numbers<[1], [0], [0], [1], [0, 0, 1, 1], [], []>} : vector<64x128xbf16>, vector<128x6xbf16>, vector<64x6xf32> -> vector<64x6xf32>
    %16 = arith.addf %10, %15 : vector<64x6xf32>
    %c0_16 = arith.constant 0 : index
    %c0_17 = arith.constant 0 : index
    %c4 = arith.constant 4 : index
    %17 = vector.load %arg1[%c0_16, %c0_17, %c4] : memref<1x128x12xbf16, #tpu.memory_space<vmem>>, vector<1x128x6xbf16>
    %18 = vector.shape_cast %17 : vector<1x128x6xbf16> to vector<128x6xbf16>
    %c3_18 = arith.constant 3 : index
    %c0_19 = arith.constant 0 : index
    %c0_20 = arith.constant 0 : index
    %19 = vector.load %arg2[%c3_18, %c0_19, %c0_20] : memref<4x64x128xbf16, #tpu.memory_space<vmem>>, vector<1x64x128xbf16>
    %20 = vector.shape_cast %19 : vector<1x64x128xbf16> to vector<64x128xbf16>
    %cst_21 = arith.constant dense<0.000000e+00> : vector<64x6xf32>
    %21 = tpu.matmul %20, %18, %cst_21 {dimension_numbers = #tpu.dot_dimension_numbers<[1], [0], [0], [1], [0, 0, 1, 1], [], []>} : vector<64x128xbf16>, vector<128x6xbf16>, vector<64x6xf32> -> vector<64x6xf32>
    %22 = arith.addf %16, %21 : vector<64x6xf32>
    %c0_22 = arith.constant 0 : index
    %c0_23 = arith.constant 0 : index
    %23 = vector.load %arg6[%c0_22, %c0_23] : memref<1x6xf32, #tpu.memory_space<vmem>>, vector<1x6xf32>
    %24 = vector.broadcast %23 : vector<1x6xf32> to vector<64x6xf32>
    %25 = arith.mulf %22, %24 : vector<64x6xf32>
    %cst_24 = arith.constant dense<0.000000e+00> : vector<64xf32>
    %26 = vector.multi_reduction <add>, %25, %cst_24 [1] : vector<64x6xf32> to vector<64xf32>
    %27 = vector.shape_cast %26 : vector<64xf32> to vector<64x1xf32>
    %c0_25 = arith.constant 0 : index
    %c0_26 = arith.constant 0 : index
    %28 = vector.load %arg3[%c0_25, %c0_26] : memref<64x64xf32, #tpu.memory_space<vmem>>, vector<64x64xf32>
    %cst_27 = arith.constant dense<0.000000e+00> : vector<64x1xf32>
    %29 = tpu.matmul %28, %27, %cst_27 {dimension_numbers = #tpu.dot_dimension_numbers<[1], [0], [0], [1], [0, 0, 1, 1], [], []>} : vector<64x64xf32>, vector<64x1xf32>, vector<64x1xf32> -> vector<64x1xf32>
    %30 = vector.broadcast %29 : vector<64x1xf32> to vector<64x6xf32>
    %31 = arith.subf %22, %30 : vector<64x6xf32>
    %32 = vector.broadcast %23 : vector<1x6xf32> to vector<64x6xf32>
    %33 = arith.mulf %31, %32 : vector<64x6xf32>
    %c0_28 = arith.constant 0 : index
    %c0_29 = arith.constant 0 : index
    %34 = vector.load %arg3[%c0_28, %c0_29] : memref<64x64xf32, #tpu.memory_space<vmem>>, vector<64x64xf32>
    %35 = arith.mulf %33, %33 : vector<64x6xf32>
    %cst_30 = arith.constant dense<0.000000e+00> : vector<64xf32>
    %36 = vector.multi_reduction <add>, %35, %cst_30 [1] : vector<64x6xf32> to vector<64xf32>
    %37 = vector.shape_cast %36 : vector<64xf32> to vector<64x1xf32>
    %cst_31 = arith.constant dense<0.000000e+00> : vector<64x1xf32>
    %38 = tpu.matmul %34, %37, %cst_31 {dimension_numbers = #tpu.dot_dimension_numbers<[1], [0], [0], [1], [0, 0, 1, 1], [], []>} : vector<64x64xf32>, vector<64x1xf32>, vector<64x1xf32> -> vector<64x1xf32>
    %cst_32 = arith.constant 9.99999974E-6 : f32
    %39 = vector.broadcast %cst_32 : f32 to vector<64x1xf32>
    %40 = arith.addf %38, %39 : vector<64x1xf32>
    %41 = math.rsqrt %40 : vector<64x1xf32>
    %42 = vector.broadcast %29 : vector<64x1xf32> to vector<64x6xf32>
    %43 = arith.subf %22, %42 : vector<64x6xf32>
    %44 = vector.broadcast %41 : vector<64x1xf32> to vector<64x6xf32>
    %45 = arith.mulf %43, %44 : vector<64x6xf32>
    %c0_33 = arith.constant 0 : index
    %c0_34 = arith.constant 0 : index
    %46 = vector.load %arg4[%c0_33, %c0_34] : memref<64x1xf32, #tpu.memory_space<vmem>>, vector<64x1xf32>
    %47 = vector.broadcast %46 : vector<64x1xf32> to vector<64x6xf32>
    %48 = arith.mulf %45, %47 : vector<64x6xf32>
    %c0_35 = arith.constant 0 : index
    %c0_36 = arith.constant 0 : index
    %49 = vector.load %arg5[%c0_35, %c0_36] : memref<64x1xf32, #tpu.memory_space<vmem>>, vector<64x1xf32>
    %50 = vector.broadcast %49 : vector<64x1xf32> to vector<64x6xf32>
    %51 = arith.addf %48, %50 : vector<64x6xf32>
    %cst_37 = arith.constant 0.000000e+00 : f32
    %52 = vector.broadcast %cst_37 : f32 to vector<64x6xf32>
    %53 = arith.maximumf %51, %52 : vector<64x6xf32>
    %54 = arith.truncf %53 : vector<64x6xf32> to vector<64x6xbf16>
    %c0_38 = arith.constant 0 : index
    %c0_39 = arith.constant 0 : index
    %c0_40 = arith.constant 0 : index
    %55 = vector.load %arg7[%c0_38, %c0_39, %c0_40] : memref<1x64x6xbf16, #tpu.memory_space<vmem>>, vector<1x64x6xbf16>
    %56 = vector.shape_cast %55 : vector<1x64x6xbf16> to vector<64x6xbf16>
    %57 = vector.shape_cast %54 : vector<64x6xbf16> to vector<1x64x6xbf16>
    tpu.vector_store %arg7[%c0_38, %c0_39, %c0_40], %57 {strides = array<i32>} : memref<1x64x6xbf16, #tpu.memory_space<vmem>>, vector<1x64x6xbf16>,
    return
  }
  func.func @transform_0(%arg0: i32) -> (i32, i32, i32) {
    %c0_i32 = arith.constant 0 : i32
    %c0_i32_0 = arith.constant 0 : i32
    %c0_i32_1 = arith.constant 0 : i32
    return %arg0, %c0_i32, %c0_i32_0 : i32, i32, i32
  }
  func.func @transform_1(%arg0: i32) -> (i32, i32, i32) {
    %c0_i32 = arith.constant 0 : i32
    %c0_i32_0 = arith.constant 0 : i32
    %c0_i32_1 = arith.constant 0 : i32
    %c0_i32_2 = arith.constant 0 : i32
    return %c0_i32, %c0_i32_0, %c0_i32_1 : i32, i32, i32
  }
  func.func @transform_2(%arg0: i32) -> (i32, i32) {
    %c0_i32 = arith.constant 0 : i32
    %c0_i32_0 = arith.constant 0 : i32
    %c0_i32_1 = arith.constant 0 : i32
    return %c0_i32, %c0_i32_0 : i32, i32
  }
  func.func @transform_3(%arg0: i32) -> (i32, i32) {
    %c0_i32 = arith.constant 0 : i32
    %c0_i32_0 = arith.constant 0 : i32
    %c0_i32_1 = arith.constant 0 : i32
    return %c0_i32, %c0_i32_0 : i32, i32
  }
  func.func @transform_4(%arg0: i32) -> (i32, i32) {
    %c0_i32 = arith.constant 0 : i32
    %c0_i32_0 = arith.constant 0 : i32
    %c0_i32_1 = arith.constant 0 : i32
    return %c0_i32, %c0_i32_0 : i32, i32
  }
  func.func @transform_5(%arg0: i32) -> (i32, i32) {
    %c0_i32 = arith.constant 0 : i32
    %c0_i32_0 = arith.constant 0 : i32
    %c0_i32_1 = arith.constant 0 : i32
    return %c0_i32, %c0_i32_0 : i32, i32
  }
  func.func @transform_6(%arg0: i32) -> (i32, i32, i32) {
    %c0_i32 = arith.constant 0 : i32
    %c0_i32_0 = arith.constant 0 : i32
    %c0_i32_1 = arith.constant 0 : i32
    return %arg0, %c0_i32, %c0_i32_0 : i32, i32, i32
  }
}

module attributes {stable_mosaic.version = 11 : i64} {
  func.func @conv_gn_relu_kernel(%arg0: i32, %arg1: memref<1x64x20xbf16, #tpu.memory_space<vmem>>, %arg2: memref<9x64x64xbf16, #tpu.memory_space<vmem>>, %arg3: memref<64x64xf32, #tpu.memory_space<vmem>>, %arg4: memref<64x1xf32, #tpu.memory_space<vmem>>, %arg5: memref<64x1xf32, #tpu.memory_space<vmem>>, %arg6: memref<1x8xf32, #tpu.memory_space<vmem>>, %arg7: memref<1x64x8xbf16, #tpu.memory_space<vmem>>) attributes {dimension_semantics = [#tpu.dimension_semantics<parallel>], iteration_bounds = array<i64: 2>, scalar_prefetch = 0 : i64, scratch_operands = 0 : i64, tpu.core_type = #tpu.core_type<tc>, window_params = [{transform_indices = @transform_0, window_bounds = array<i64: 1, 64, 20>}, {pipeline_mode = #tpu.pipeline_mode<synchronous>, transform_indices = @transform_1, window_bounds = array<i64: 9, 64, 64>}, {pipeline_mode = #tpu.pipeline_mode<synchronous>, transform_indices = @transform_2, window_bounds = array<i64: 64, 64>}, {pipeline_mode = #tpu.pipeline_mode<synchronous>, transform_indices = @transform_3, window_bounds = array<i64: 64, 1>}, {pipeline_mode = #tpu.pipeline_mode<synchronous>, transform_indices = @transform_4, window_bounds = array<i64: 64, 1>}, {pipeline_mode = #tpu.pipeline_mode<synchronous>, transform_indices = @transform_5, window_bounds = array<i64: 1, 8>}, {transform_indices = @transform_6, window_bounds = array<i64: 1, 64, 8>}]} {
    %c0 = arith.constant 0 : index
    %c0_0 = arith.constant 0 : index
    %c0_1 = arith.constant 0 : index
    %0 = vector.load %arg1[%c0, %c0_0, %c0_1] : memref<1x64x20xbf16, #tpu.memory_space<vmem>>, vector<1x64x8xbf16>
    %1 = vector.shape_cast %0 : vector<1x64x8xbf16> to vector<64x8xbf16>
    %c0_2 = arith.constant 0 : index
    %c0_3 = arith.constant 0 : index
    %c0_4 = arith.constant 0 : index
    %2 = vector.load %arg2[%c0_2, %c0_3, %c0_4] : memref<9x64x64xbf16, #tpu.memory_space<vmem>>, vector<1x64x64xbf16>
    %3 = vector.shape_cast %2 : vector<1x64x64xbf16> to vector<64x64xbf16>
    %cst = arith.constant dense<0.000000e+00> : vector<64x8xf32>
    %4 = tpu.matmul %3, %1, %cst {dimension_numbers = #tpu.dot_dimension_numbers<[1], [0], [0], [1], [0, 0, 1, 1], [], []>} : vector<64x64xbf16>, vector<64x8xbf16>, vector<64x8xf32> -> vector<64x8xf32>
    %c0_5 = arith.constant 0 : index
    %c0_6 = arith.constant 0 : index
    %c1 = arith.constant 1 : index
    %5 = vector.load %arg1[%c0_5, %c0_6, %c1] : memref<1x64x20xbf16, #tpu.memory_space<vmem>>, vector<1x64x8xbf16>
    %6 = vector.shape_cast %5 : vector<1x64x8xbf16> to vector<64x8xbf16>
    %c1_7 = arith.constant 1 : index
    %c0_8 = arith.constant 0 : index
    %c0_9 = arith.constant 0 : index
    %7 = vector.load %arg2[%c1_7, %c0_8, %c0_9] : memref<9x64x64xbf16, #tpu.memory_space<vmem>>, vector<1x64x64xbf16>
    %8 = vector.shape_cast %7 : vector<1x64x64xbf16> to vector<64x64xbf16>
    %cst_10 = arith.constant dense<0.000000e+00> : vector<64x8xf32>
    %9 = tpu.matmul %8, %6, %cst_10 {dimension_numbers = #tpu.dot_dimension_numbers<[1], [0], [0], [1], [0, 0, 1, 1], [], []>} : vector<64x64xbf16>, vector<64x8xbf16>, vector<64x8xf32> -> vector<64x8xf32>
    %10 = arith.addf %4, %9 : vector<64x8xf32>
    %c0_11 = arith.constant 0 : index
    %c0_12 = arith.constant 0 : index
    %c2 = arith.constant 2 : index
    %11 = vector.load %arg1[%c0_11, %c0_12, %c2] : memref<1x64x20xbf16, #tpu.memory_space<vmem>>, vector<1x64x8xbf16>
    %12 = vector.shape_cast %11 : vector<1x64x8xbf16> to vector<64x8xbf16>
    %c2_13 = arith.constant 2 : index
    %c0_14 = arith.constant 0 : index
    %c0_15 = arith.constant 0 : index
    %13 = vector.load %arg2[%c2_13, %c0_14, %c0_15] : memref<9x64x64xbf16, #tpu.memory_space<vmem>>, vector<1x64x64xbf16>
    %14 = vector.shape_cast %13 : vector<1x64x64xbf16> to vector<64x64xbf16>
    %cst_16 = arith.constant dense<0.000000e+00> : vector<64x8xf32>
    %15 = tpu.matmul %14, %12, %cst_16 {dimension_numbers = #tpu.dot_dimension_numbers<[1], [0], [0], [1], [0, 0, 1, 1], [], []>} : vector<64x64xbf16>, vector<64x8xbf16>, vector<64x8xf32> -> vector<64x8xf32>
    %16 = arith.addf %10, %15 : vector<64x8xf32>
    %c0_17 = arith.constant 0 : index
    %c0_18 = arith.constant 0 : index
    %c4 = arith.constant 4 : index
    %17 = vector.load %arg1[%c0_17, %c0_18, %c4] : memref<1x64x20xbf16, #tpu.memory_space<vmem>>, vector<1x64x8xbf16>
    %18 = vector.shape_cast %17 : vector<1x64x8xbf16> to vector<64x8xbf16>
    %c3 = arith.constant 3 : index
    %c0_19 = arith.constant 0 : index
    %c0_20 = arith.constant 0 : index
    %19 = vector.load %arg2[%c3, %c0_19, %c0_20] : memref<9x64x64xbf16, #tpu.memory_space<vmem>>, vector<1x64x64xbf16>
    %20 = vector.shape_cast %19 : vector<1x64x64xbf16> to vector<64x64xbf16>
    %cst_21 = arith.constant dense<0.000000e+00> : vector<64x8xf32>
    %21 = tpu.matmul %20, %18, %cst_21 {dimension_numbers = #tpu.dot_dimension_numbers<[1], [0], [0], [1], [0, 0, 1, 1], [], []>} : vector<64x64xbf16>, vector<64x8xbf16>, vector<64x8xf32> -> vector<64x8xf32>
    %22 = arith.addf %16, %21 : vector<64x8xf32>
    %c0_22 = arith.constant 0 : index
    %c0_23 = arith.constant 0 : index
    %c5 = arith.constant 5 : index
    %23 = vector.load %arg1[%c0_22, %c0_23, %c5] : memref<1x64x20xbf16, #tpu.memory_space<vmem>>, vector<1x64x8xbf16>
    %24 = vector.shape_cast %23 : vector<1x64x8xbf16> to vector<64x8xbf16>
    %c4_24 = arith.constant 4 : index
    %c0_25 = arith.constant 0 : index
    %c0_26 = arith.constant 0 : index
    %25 = vector.load %arg2[%c4_24, %c0_25, %c0_26] : memref<9x64x64xbf16, #tpu.memory_space<vmem>>, vector<1x64x64xbf16>
    %26 = vector.shape_cast %25 : vector<1x64x64xbf16> to vector<64x64xbf16>
    %cst_27 = arith.constant dense<0.000000e+00> : vector<64x8xf32>
    %27 = tpu.matmul %26, %24, %cst_27 {dimension_numbers = #tpu.dot_dimension_numbers<[1], [0], [0], [1], [0, 0, 1, 1], [], []>} : vector<64x64xbf16>, vector<64x8xbf16>, vector<64x8xf32> -> vector<64x8xf32>
    %28 = arith.addf %22, %27 : vector<64x8xf32>
    %c0_28 = arith.constant 0 : index
    %c0_29 = arith.constant 0 : index
    %c6 = arith.constant 6 : index
    %29 = vector.load %arg1[%c0_28, %c0_29, %c6] : memref<1x64x20xbf16, #tpu.memory_space<vmem>>, vector<1x64x8xbf16>
    %30 = vector.shape_cast %29 : vector<1x64x8xbf16> to vector<64x8xbf16>
    %c5_30 = arith.constant 5 : index
    %c0_31 = arith.constant 0 : index
    %c0_32 = arith.constant 0 : index
    %31 = vector.load %arg2[%c5_30, %c0_31, %c0_32] : memref<9x64x64xbf16, #tpu.memory_space<vmem>>, vector<1x64x64xbf16>
    %32 = vector.shape_cast %31 : vector<1x64x64xbf16> to vector<64x64xbf16>
    %cst_33 = arith.constant dense<0.000000e+00> : vector<64x8xf32>
    %33 = tpu.matmul %32, %30, %cst_33 {dimension_numbers = #tpu.dot_dimension_numbers<[1], [0], [0], [1], [0, 0, 1, 1], [], []>} : vector<64x64xbf16>, vector<64x8xbf16>, vector<64x8xf32> -> vector<64x8xf32>
    %34 = arith.addf %28, %33 : vector<64x8xf32>
    %c0_34 = arith.constant 0 : index
    %c0_35 = arith.constant 0 : index
    %c8 = arith.constant 8 : index
    %35 = vector.load %arg1[%c0_34, %c0_35, %c8] : memref<1x64x20xbf16, #tpu.memory_space<vmem>>, vector<1x64x8xbf16>
    %36 = vector.shape_cast %35 : vector<1x64x8xbf16> to vector<64x8xbf16>
    %c6_36 = arith.constant 6 : index
    %c0_37 = arith.constant 0 : index
    %c0_38 = arith.constant 0 : index
    %37 = vector.load %arg2[%c6_36, %c0_37, %c0_38] : memref<9x64x64xbf16, #tpu.memory_space<vmem>>, vector<1x64x64xbf16>
    %38 = vector.shape_cast %37 : vector<1x64x64xbf16> to vector<64x64xbf16>
    %cst_39 = arith.constant dense<0.000000e+00> : vector<64x8xf32>
    %39 = tpu.matmul %38, %36, %cst_39 {dimension_numbers = #tpu.dot_dimension_numbers<[1], [0], [0], [1], [0, 0, 1, 1], [], []>} : vector<64x64xbf16>, vector<64x8xbf16>, vector<64x8xf32> -> vector<64x8xf32>
    %40 = arith.addf %34, %39 : vector<64x8xf32>
    %c0_40 = arith.constant 0 : index
    %c0_41 = arith.constant 0 : index
    %c9 = arith.constant 9 : index
    %41 = vector.load %arg1[%c0_40, %c0_41, %c9] : memref<1x64x20xbf16, #tpu.memory_space<vmem>>, vector<1x64x8xbf16>
    %42 = vector.shape_cast %41 : vector<1x64x8xbf16> to vector<64x8xbf16>
    %c7 = arith.constant 7 : index
    %c0_42 = arith.constant 0 : index
    %c0_43 = arith.constant 0 : index
    %43 = vector.load %arg2[%c7, %c0_42, %c0_43] : memref<9x64x64xbf16, #tpu.memory_space<vmem>>, vector<1x64x64xbf16>
    %44 = vector.shape_cast %43 : vector<1x64x64xbf16> to vector<64x64xbf16>
    %cst_44 = arith.constant dense<0.000000e+00> : vector<64x8xf32>
    %45 = tpu.matmul %44, %42, %cst_44 {dimension_numbers = #tpu.dot_dimension_numbers<[1], [0], [0], [1], [0, 0, 1, 1], [], []>} : vector<64x64xbf16>, vector<64x8xbf16>, vector<64x8xf32> -> vector<64x8xf32>
    %46 = arith.addf %40, %45 : vector<64x8xf32>
    %c0_45 = arith.constant 0 : index
    %c0_46 = arith.constant 0 : index
    %c10 = arith.constant 10 : index
    %47 = vector.load %arg1[%c0_45, %c0_46, %c10] : memref<1x64x20xbf16, #tpu.memory_space<vmem>>, vector<1x64x8xbf16>
    %48 = vector.shape_cast %47 : vector<1x64x8xbf16> to vector<64x8xbf16>
    %c8_47 = arith.constant 8 : index
    %c0_48 = arith.constant 0 : index
    %c0_49 = arith.constant 0 : index
    %49 = vector.load %arg2[%c8_47, %c0_48, %c0_49] : memref<9x64x64xbf16, #tpu.memory_space<vmem>>, vector<1x64x64xbf16>
    %50 = vector.shape_cast %49 : vector<1x64x64xbf16> to vector<64x64xbf16>
    %cst_50 = arith.constant dense<0.000000e+00> : vector<64x8xf32>
    %51 = tpu.matmul %50, %48, %cst_50 {dimension_numbers = #tpu.dot_dimension_numbers<[1], [0], [0], [1], [0, 0, 1, 1], [], []>} : vector<64x64xbf16>, vector<64x8xbf16>, vector<64x8xf32> -> vector<64x8xf32>
    %52 = arith.addf %46, %51 : vector<64x8xf32>
    %c0_51 = arith.constant 0 : index
    %c0_52 = arith.constant 0 : index
    %53 = vector.load %arg6[%c0_51, %c0_52] : memref<1x8xf32, #tpu.memory_space<vmem>>, vector<1x8xf32>
    %54 = vector.broadcast %53 : vector<1x8xf32> to vector<64x8xf32>
    %55 = arith.mulf %52, %54 : vector<64x8xf32>
    %cst_53 = arith.constant dense<0.000000e+00> : vector<64xf32>
    %56 = vector.multi_reduction <add>, %55, %cst_53 [1] : vector<64x8xf32> to vector<64xf32>
    %57 = vector.shape_cast %56 : vector<64xf32> to vector<64x1xf32>
    %c0_54 = arith.constant 0 : index
    %c0_55 = arith.constant 0 : index
    %58 = vector.load %arg3[%c0_54, %c0_55] : memref<64x64xf32, #tpu.memory_space<vmem>>, vector<64x64xf32>
    %cst_56 = arith.constant dense<0.000000e+00> : vector<64x1xf32>
    %59 = tpu.matmul %58, %57, %cst_56 {dimension_numbers = #tpu.dot_dimension_numbers<[1], [0], [0], [1], [0, 0, 1, 1], [], []>} : vector<64x64xf32>, vector<64x1xf32>, vector<64x1xf32> -> vector<64x1xf32>
    %60 = vector.broadcast %59 : vector<64x1xf32> to vector<64x8xf32>
    %61 = arith.subf %52, %60 : vector<64x8xf32>
    %62 = vector.broadcast %53 : vector<1x8xf32> to vector<64x8xf32>
    %63 = arith.mulf %61, %62 : vector<64x8xf32>
    %c0_57 = arith.constant 0 : index
    %c0_58 = arith.constant 0 : index
    %64 = vector.load %arg3[%c0_57, %c0_58] : memref<64x64xf32, #tpu.memory_space<vmem>>, vector<64x64xf32>
    %65 = arith.mulf %63, %63 : vector<64x8xf32>
    %cst_59 = arith.constant dense<0.000000e+00> : vector<64xf32>
    %66 = vector.multi_reduction <add>, %65, %cst_59 [1] : vector<64x8xf32> to vector<64xf32>
    %67 = vector.shape_cast %66 : vector<64xf32> to vector<64x1xf32>
    %cst_60 = arith.constant dense<0.000000e+00> : vector<64x1xf32>
    %68 = tpu.matmul %64, %67, %cst_60 {dimension_numbers = #tpu.dot_dimension_numbers<[1], [0], [0], [1], [0, 0, 1, 1], [], []>} : vector<64x64xf32>, vector<64x1xf32>, vector<64x1xf32> -> vector<64x1xf32>
    %cst_61 = arith.constant 9.99999974E-6 : f32
    %69 = vector.broadcast %cst_61 : f32 to vector<64x1xf32>
    %70 = arith.addf %68, %69 : vector<64x1xf32>
    %71 = math.rsqrt %70 : vector<64x1xf32>
    %72 = vector.broadcast %59 : vector<64x1xf32> to vector<64x8xf32>
    %73 = arith.subf %52, %72 : vector<64x8xf32>
    %74 = vector.broadcast %71 : vector<64x1xf32> to vector<64x8xf32>
    %75 = arith.mulf %73, %74 : vector<64x8xf32>
    %c0_62 = arith.constant 0 : index
    %c0_63 = arith.constant 0 : index
    %76 = vector.load %arg4[%c0_62, %c0_63] : memref<64x1xf32, #tpu.memory_space<vmem>>, vector<64x1xf32>
    %77 = vector.broadcast %76 : vector<64x1xf32> to vector<64x8xf32>
    %78 = arith.mulf %75, %77 : vector<64x8xf32>
    %c0_64 = arith.constant 0 : index
    %c0_65 = arith.constant 0 : index
    %79 = vector.load %arg5[%c0_64, %c0_65] : memref<64x1xf32, #tpu.memory_space<vmem>>, vector<64x1xf32>
    %80 = vector.broadcast %79 : vector<64x1xf32> to vector<64x8xf32>
    %81 = arith.addf %78, %80 : vector<64x8xf32>
    %cst_66 = arith.constant 0.000000e+00 : f32
    %82 = vector.broadcast %cst_66 : f32 to vector<64x8xf32>
    %83 = arith.maximumf %81, %82 : vector<64x8xf32>
    %84 = arith.truncf %83 : vector<64x8xf32> to vector<64x8xbf16>
    %c0_67 = arith.constant 0 : index
    %c0_68 = arith.constant 0 : index
    %c0_69 = arith.constant 0 : index
    %85 = vector.load %arg7[%c0_67, %c0_68, %c0_69] : memref<1x64x8xbf16, #tpu.memory_space<vmem>>, vector<1x64x8xbf16>
    %86 = vector.shape_cast %85 : vector<1x64x8xbf16> to vector<64x8xbf16>
    %87 = vector.shape_cast %84 : vector<64x8xbf16> to vector<1x64x8xbf16>
    tpu.vector_store %arg7[%c0_67, %c0_68, %c0_69], %87 {strides = array<i32>} : memref<1x64x8xbf16, #tpu.memory_space<vmem>>, vector<1x64x8xbf16>,
    return
  }
  func.func @transform_0(%arg0: i32) -> (i32, i32, i32) {
    %c0_i32 = arith.constant 0 : i32
    %c0_i32_0 = arith.constant 0 : i32
    %c0_i32_1 = arith.constant 0 : i32
    return %arg0, %c0_i32, %c0_i32_0 : i32, i32, i32
  }
  func.func @transform_1(%arg0: i32) -> (i32, i32, i32) {
    %c0_i32 = arith.constant 0 : i32
    %c0_i32_0 = arith.constant 0 : i32
    %c0_i32_1 = arith.constant 0 : i32
    %c0_i32_2 = arith.constant 0 : i32
    return %c0_i32, %c0_i32_0, %c0_i32_1 : i32, i32, i32
  }
  func.func @transform_2(%arg0: i32) -> (i32, i32) {
    %c0_i32 = arith.constant 0 : i32
    %c0_i32_0 = arith.constant 0 : i32
    %c0_i32_1 = arith.constant 0 : i32
    return %c0_i32, %c0_i32_0 : i32, i32
  }
  func.func @transform_3(%arg0: i32) -> (i32, i32) {
    %c0_i32 = arith.constant 0 : i32
    %c0_i32_0 = arith.constant 0 : i32
    %c0_i32_1 = arith.constant 0 : i32
    return %c0_i32, %c0_i32_0 : i32, i32
  }
  func.func @transform_4(%arg0: i32) -> (i32, i32) {
    %c0_i32 = arith.constant 0 : i32
    %c0_i32_0 = arith.constant 0 : i32
    %c0_i32_1 = arith.constant 0 : i32
    return %c0_i32, %c0_i32_0 : i32, i32
  }
  func.func @transform_5(%arg0: i32) -> (i32, i32) {
    %c0_i32 = arith.constant 0 : i32
    %c0_i32_0 = arith.constant 0 : i32
    %c0_i32_1 = arith.constant 0 : i32
    return %c0_i32, %c0_i32_0 : i32, i32
  }
  func.func @transform_6(%arg0: i32) -> (i32, i32, i32) {
    %c0_i32 = arith.constant 0 : i32
    %c0_i32_0 = arith.constant 0 : i32
    %c0_i32_1 = arith.constant 0 : i32
    return %arg0, %c0_i32, %c0_i32_0 : i32, i32, i32
  }
}

</mosaic_0001>

<bundles_post_ra>
// kernel: encoder_forward.9
= control target key start
LH: loop header
LB: loop body
LE: loop exit
PB: predicated region body
PF: predicated region fallthrough
CT: control target
= control target key end

     0   :  { %s3754_s21 = smov 0   ;;  %s4499_s0 = inlined_call_operand.vmem [shape: bf16[2,3,1190], index: 0, kind: input, shape index: {}]   ;;  %s4500_s1 = inlined_call_operand.vmem [shape: bf16[9,4,3], index: 1, kind: input, shape index: {}]   ;;  %s4501_s2 = inlined_call_operand.vmem [shape: f32[4,4], index: 2, kind: input, shape index: {}]   ;;  %s4502_s3 = inlined_call_operand.vmem [shape: f32[4,1], index: 3, kind: input, shape index: {}]   ;;  %s4503_s4 = inlined_call_operand.vmem [shape: f32[4,1], index: 4, kind: input, shape index: {}]   ;;  %s4504_s5 = inlined_call_operand.vmem [shape: f32[1,1088], index: 5, kind: input, shape index: {}]   ;;  %s4505_s6 = inlined_call_operand.vmem [shape: bf16[2,4,1088], index: 6, kind: output, shape index: {}]  }
   0x1 LB: > { %s3504_s22 = sadd.s32 4294967295, %s3704_s21   ;;  %p3508_p0 = scmp.ge.s32.totalorder %s3704_s21, 1  ;;  %s3704_s21 = sphi %s3754_s21, %s16_s21  }
   0x2   : > { %p212_p1 = scmp.lt.s32.totalorder %s3704_s21, 3 }
   0x4   : > { %p213_p2 = pnand %p3508_p0, %p212_p1 }
   0x5   : > { %p242_p3 = scmp.lt.s32.totalorder (!%p213_p2), %s3504_s22, 1  ;;  %s3707_s27 = smov (!%p213_p2), 127  }
   0x6   : > { %216 = sbr.rel (%p213_p2) target bundleno = 1492 (0x5d4), region = 44  ;;  %s3709_s28 = smov (!%p213_p2), 126  }
   0x7   : > { %s3710_s29 = smov (!%p213_p2), 94   ;;  %s3711_s30 = smov (!%p213_p2), 93  }
   0x8   : > { %s3712_s7 = smov (!%p213_p2), 92   ;;  %s3713_s8 = smov (!%p213_p2), 60  }
   0x9   : > { %s3714_s9 = smov (!%p213_p2), 59   ;;  %s3716_s12 = smov (!%p213_p2), 58  }
   0xb   : > { %v266_v0 = vlaneseq  ;;  %v3706_v1 = vmov 1983009808   ;;  %s4507_s22 = smov (!%p242_p3, %s3504_s22), 1  ;;  %v3708_v14 = vmov 0   ;;  %vm334_vm0 = vcmask 1040384  }
   0xc   : > { %v264_v2 = vunpack.c.l.s4 %v3706_v1  ;;  %s3669_s23 = smul.u32 20, %s4507_s22  ;;  %397 = vmatprep.mubr.bf16.mxu0 %v3708_v14  ;;  %438 = vmatprep.mubr.bf16.mxu1 %v3708_v14  ;;  %vm335_vm1 = vcmask 1041408   ;;  %v3715_v24 = vmov 65535   ;;  %vm321_vm2 = vcmask 1039360   ;;  %v3511_v36 = vld [vmem:[%s4500_s1 + $0x2] sm:$0x3] }
   0xd   : > { %v3764_v3 = vshrl.u32 %v266_v0, 7  ;;  %3693 = vset.pattern.permute.xlu1 %v3708_v14  ;;  %3692 = vset.pattern.permute.xlu0 %v3708_v14  ;;  %v336_v25 = vsel %vm334_vm0, 4294967295, %v3715_v24  ;;  %vm330_vm3 = vcmask 23552   ;;  %v3717_v52 = vmov 0.0   ;;  %s3670_s17 = smul.u32 18, %s4507_s22 }
   0xe   : > { %v265_v4 = vunpack.c.0.s8 %v264_v2  ;;  %s3773_s26 = scalar_lea.vmem %s4499_s0, %s3669_s23  ;;  %v3884_v27 = vsel %vm335_vm1, %v336_v25, 0  ;;  %vm3718_vm4 = vmmov 0   ;;  %vm870_vm5 = vcmask 1031168   ;;  %v256_v2 = vld [vmem:[%s4500_s1] sm:$0x3] }
   0xf   : > { %v253_v6 = vld [vmem:[%s3773_s26] sm:$0xff]  ;;  %v254_v7 = vld [vmem:[%s3773_s26 + $0x8] sm:$0xff]  ;;  %v3818_v19 = vld.sshfl [vmem:[%s3773_s26 + $0x10] sm:$0x3 pattern:$0x76325410]  ;;  %s251_s20 = scalar_lea.vmem %s4505_s6, %s3670_s17 }
  0x10   : > { %v3768_v5 = vsub.s32 %v265_v4, %v3764_v3  ;;  %v262_v9 = vcombine.high %v253_v6, %v253_v6  ;;  %v279_v13 = vcombine.high %v254_v7, %v254_v7  ;;  %v3864_v20 = vld.sshfl [vmem:[%s3773_s26 + $0x10] sm:$0x33 pattern:$0x76325410]  ;;  %vm1189_vm6 = vcmask 769024  }
  0x11   : > { %v3871_v21 = vcombine.high %v3864_v20, %v3864_v20  ;;  %vm1508_vm7 = vcmask 760832   ;;  %vm1827_vm8 = vcmask 752640   ;;  %vm2149_vm9 = vcmask 490496  }
  0x12   : > { %v3778_v8 = vrot.slane %v253_v6, %v3768_v5  ;;  %v3786_v11 = vrot.slane %v262_v9, %v3768_v5  ;;  %v3789_v12 = vrot.slane %v254_v7, %v3768_v5  ;;  %v3806_v17 = vrot.slane %v279_v13, %v3768_v5 }
  0x13   : > { %vm2472_vm10 = vcmask 482304   ;;  %vm2795_vm11 = vcmask 474112   ;;  %vm3106_vm12 = vcmask 1043456   ;;  %vm3122_vm13 = vcmask 519168  }
  0x14   : > { %303 = vrot.lane.b32.xlu1 %v3778_v8, %s3707_s27  ;;  %v3783_v10 = vcombine.high %v3778_v8, %v3778_v8  ;;  %v3796_v15 = vcombine.high %v3786_v11, %v3786_v11  ;;  %v3803_v16 = vcombine.high %v3789_v12, %v3789_v12  ;;  %v3812_v18 = vcombine.high %v3806_v17, %v3806_v17 }
  0x15   : > { %v573_v58 = vand.u32 %v3884_v27, %v3778_v8  ;;  %v579_v62 = vand.u32 %v3884_v27, %v3786_v11  ;;  %v585_v4 = vand.u32 %v3884_v27, %v3789_v12  ;;  %v591_v9 = vand.u32 %v3884_v27, %v3806_v17 }
  0x16   : > { %305 = vrot.lane.b32.xlu0 %v3783_v10, %s3707_s27  ;;  %v576_v50 = vand.u32 %v3884_v27, %v3783_v10  ;;  %v582_v56 = vand.u32 %v3884_v27, %v3796_v15  ;;  %v588_v59 = vand.u32 %v3884_v27, %v3803_v16  ;;  %v594_v63 = vand.u32 %v3884_v27, %v3812_v18 }
  0x17   : > { %vm3128_vm14 = vcmask 31744   ;;  %vm3447_vm15 = vcmask 517120  }
  0x18   : > { %309 = vrot.lane.b32.xlu1 %v3796_v15, %s3707_s27 }
  0x1a   : > { %307 = vrot.lane.b32.xlu0 %v3786_v11, %s3707_s27 }
  0x1c   : > { %313 = vrot.lane.b32.xlu1 %v3803_v16, %s3707_s27 }
  0x1e   : > { %311 = vrot.lane.b32.xlu0 %v3789_v12, %s3707_s27 }
  0x20   : > { %317 = vrot.lane.b32.xlu1 %v3812_v18, %s3707_s27 }
  0x22   : > { %315 = vrot.lane.b32.xlu0 %v3806_v17, %s3707_s27 }
  0x24   : > { %854 = vrot.lane.b32.xlu1 %v3783_v10, %s3709_s28 }
  0x26   : > { %319 = vrot.lane.b32.xlu0 %v3818_v19, %s3707_s27 }
  0x28   : > { %852 = vrot.lane.b32.xlu1 %v3778_v8, %s3709_s28 }
  0x2a   : > { %856 = vrot.lane.b32.xlu0 %v3786_v11, %s3709_s28 }
  0x2c   : > { %860 = vrot.lane.b32.xlu1 %v3789_v12, %s3709_s28 }
  0x2e   : > { %858 = vrot.lane.b32.xlu0 %v3796_v15, %s3709_s28 }
  0x30   : > { %864 = vrot.lane.b32.xlu1 %v3806_v17, %s3709_s28 }
  0x32   : > { %862 = vrot.lane.b32.xlu0 %v3803_v16, %s3709_s28 }
  0x34   : > { %868 = vrot.lane.b32.xlu1 %v3818_v19, %s3709_s28 }
  0x36   : > { %866 = vrot.lane.b32.xlu0 %v3812_v18, %s3709_s28 }
  0x38   : > { %1175 = vrot.lane.b32.xlu1 %v3786_v11, %s3710_s29 }
  0x3a   : > { %1173 = vrot.lane.b32.xlu0 %v3783_v10, %s3710_s29 }
  0x3c   : > { %1177 = vrot.lane.b32.xlu1 %v3796_v15, %s3710_s29 }
  0x3e   : > { %1171 = vrot.lane.b32.xlu0 %v3778_v8, %s3710_s29 }
  0x40   : > { %1181 = vrot.lane.b32.xlu1 %v3803_v16, %s3710_s29 }
  0x42   : > { %1179 = vrot.lane.b32.xlu0 %v3789_v12, %s3710_s29 }
  0x44   : > { %1185 = vrot.lane.b32.xlu1 %v3812_v18, %s3710_s29 }
  0x46   : > { %1183 = vrot.lane.b32.xlu0 %v3806_v17, %s3710_s29 }
  0x48   : > { %1492 = vrot.lane.b32.xlu1 %v3783_v10, %s3711_s30 }
  0x4a   : > { %1187 = vrot.lane.b32.xlu0 %v3818_v19, %s3710_s29 }
  0x4c   : > { %1490 = vrot.lane.b32.xlu1 %v3778_v8, %s3711_s30 }
  0x4e   : > { %1494 = vrot.lane.b32.xlu0 %v3786_v11, %s3711_s30 }
  0x50   : > { %1498 = vrot.lane.b32.xlu1 %v3789_v12, %s3711_s30 }
  0x52   : > { %1496 = vrot.lane.b32.xlu0 %v3796_v15, %s3711_s30 }
  0x54   : > { %1502 = vrot.lane.b32.xlu1 %v3806_v17, %s3711_s30 }
  0x56   : > { %1500 = vrot.lane.b32.xlu0 %v3803_v16, %s3711_s30 }
  0x58   : > { %1506 = vrot.lane.b32.xlu1 %v3818_v19, %s3711_s30 }
  0x5a   : > { %1504 = vrot.lane.b32.xlu0 %v3812_v18, %s3711_s30 }
  0x5c   : > { %1813 = vrot.lane.b32.xlu1 %v3786_v11, %s3712_s7 }
  0x5e   : > { %1811 = vrot.lane.b32.xlu0 %v3783_v10, %s3712_s7 }
  0x60   : > { %1815 = vrot.lane.b32.xlu1 %v3796_v15, %s3712_s7 }
  0x62   : > { %1809 = vrot.lane.b32.xlu0 %v3778_v8, %s3712_s7 }
  0x64   : > { %1819 = vrot.lane.b32.xlu1 %v3803_v16, %s3712_s7 }
  0x66   : > { %1817 = vrot.lane.b32.xlu0 %v3789_v12, %s3712_s7 }
  0x68   : > { %1823 = vrot.lane.b32.xlu1 %v3812_v18, %s3712_s7 }
  0x6a   : > { %1821 = vrot.lane.b32.xlu0 %v3806_v17, %s3712_s7 }
  0x6c   : > { %2131 = vrot.lane.b32.xlu1 %v3783_v10, %s3713_s8 }
  0x6e   : > { %1825 = vrot.lane.b32.xlu0 %v3818_v19, %s3712_s7 }
  0x70   : > { %2129 = vrot.lane.b32.xlu1 %v3778_v8, %s3713_s8 }
  0x72   : > { %2133 = vrot.lane.b32.xlu0 %v3786_v11, %s3713_s8 }
  0x74   : > { %2137 = vrot.lane.b32.xlu1 %v3789_v12, %s3713_s8 }
  0x76   : > { %2135 = vrot.lane.b32.xlu0 %v3796_v15, %s3713_s8 }
  0x78   : > { %2141 = vrot.lane.b32.xlu1 %v3806_v17, %s3713_s8 }
  0x7a   : > { %2139 = vrot.lane.b32.xlu0 %v3803_v16, %s3713_s8 }
  0x7c   : > { %2145 = vrot.lane.b32.xlu1 %v3864_v20, %s3713_s8 }
  0x7e   : > { %2143 = vrot.lane.b32.xlu0 %v3812_v18, %s3713_s8 }
  0x80   : > { %2454 = vrot.lane.b32.xlu1 %v3783_v10, %s3714_s9 }
  0x82   : > { %2147 = vrot.lane.b32.xlu0 %v3871_v21, %s3713_s8 }
  0x84   : > { %2452 = vrot.lane.b32.xlu1 %v3778_v8, %s3714_s9 }
  0x86   : > { %v304_v22 = vpop.permute.xlu1 %303  ;;  %2456 = vrot.lane.b32.xlu0 %v3786_v11, %s3714_s9 }
  0x88   : > { %v306_v23 = vpop.permute.xlu0 %305  ;;  %2460 = vrot.lane.b32.xlu1 %v3789_v12, %s3714_s9 }
  0x89   : > { %v322_v28 = vsel %vm321_vm2, %v304_v22, %v306_v23 }
  0x8a   : > { %v310_v26 = vpop.permute.xlu1 %309  ;;  %2458 = vrot.lane.b32.xlu0 %v3796_v15, %s3714_s9  ;;  %v339_v33 = vand.u32 %v3884_v27, %v322_v28 }
  0x8c   : > { %v308_v29 = vpop.permute.xlu0 %307  ;;  %2464 = vrot.lane.b32.xlu1 %v3806_v17, %s3714_s9 }
  0x8d   : > { %v323_v30 = vsel %vm321_vm2, %v306_v23, %v308_v29  ;;  %v324_v34 = vsel %vm321_vm2, %v308_v29, %v310_v26 }
  0x8e   : > { %v342_v31 = vand.u32 %v3884_v27, %v323_v30  ;;  %v314_v32 = vpop.permute.xlu1 %313  ;;  %2462 = vrot.lane.b32.xlu0 %v3803_v16, %s3714_s9  ;;  %v345_v40 = vand.u32 %v3884_v27, %v324_v34  ;;  %v3523_v34 = vld [vmem:[%s4500_s1 + $0x4] sm:$0x3] }
  0x90   : > { %379 = vmatprep.subr.bf16.mxu0 %v342_v31  ;;  %v312_v35 = vpop.permute.xlu0 %311  ;;  %2468 = vrot.lane.b32.xlu1 %v3864_v20, %s3714_s9 }
  0x91   : > { %380 = vmatpush1.bf16.msra.mxu0 %v339_v33  ;;  %v325_v37 = vsel %vm321_vm2, %v310_v26, %v312_v35  ;;  %v326_v41 = vsel %vm321_vm2, %v312_v35, %v314_v32 }
  0x92   : > { %v348_v38 = vand.u32 %v3884_v27, %v325_v37  ;;  %v318_v39 = vpop.permute.xlu1 %317  ;;  %2466 = vrot.lane.b32.xlu0 %v3812_v18, %s3714_s9  ;;  %v351_v46 = vand.u32 %v3884_v27, %v326_v41 }
  0x94   : > { %3513 = vmatmul.mubr.msk.bf16.vlgmr.msra.gmra.mxu0 %vm330_vm3, %v3511_v36  ;;  %v316_v42 = vpop.permute.xlu0 %315  ;;  %420 = vmatprep.subr.bf16.mxu1 %v348_v38 }
  0x95   : > { %v327_v43 = vsel %vm321_vm2, %v314_v32, %v316_v42  ;;  %421 = vmatpush1.bf16.msra.mxu1 %v345_v40  ;;  %479 = vmatprep.mubr.bf16.mxu0 %v3708_v14  ;;  %v328_v47 = vsel %vm321_vm2, %v316_v42, %v318_v39 }
  0x96   : > { %v354_v44 = vand.u32 %v3884_v27, %v327_v43  ;;  %v3910_v45 = vpop.permute.xlu1 %854  ;;  %2470 = vrot.lane.b32.xlu0 %v3871_v21, %s3714_s9  ;;  %2777 = vrot.lane.b32.xlu1 %v3783_v10, %s3716_s12  ;;  %v357_v54 = vand.u32 %v3884_v27, %v328_v47 }
  0x98   : > { %v320_v48 = vpop.permute.xlu0 %319  ;;  %3514 = vmatmul.mubr.msk.bf16.vlgmr.msra.gmra.mxu1 %vm330_vm3, %v3511_v36  ;;  %461 = vmatprep.subr.bf16.mxu0 %v354_v44 }
  0x99   : > { %v329_v49 = vsel %vm321_vm2, %v318_v39, %v320_v48  ;;  %462 = vmatpush1.bf16.msra.mxu0 %v351_v46  ;;  %520 = vmatprep.mubr.bf16.mxu1 %v3708_v14  ;;  %v363_v55 = vand.u32 %v3884_v27, %v320_v48 }
  0x9a   : > { %v360_v51 = vand.u32 %v3884_v27, %v329_v49  ;;  %3605 = vmatprep.subr.bf16.mxu0 %v3717_v52  ;;  %v853_v53 = vpop.permute.xlu1 %852  ;;  %2779 = vrot.lane.b32.xlu0 %v3786_v11, %s3716_s12 }
  0x9b   : > { %2775 = vrot.lane.b32.xlu1 %v3778_v8, %s3716_s12 }
  0x9c   : > { %3515 = vmatmul.mubr.msk.bf16.vlgmr.msra.gmra.mxu0 %vm330_vm3, %v3511_v36  ;;  %502 = vmatprep.subr.bf16.mxu1 %v360_v51  ;;  %v857_v57 = vpop.permute.xlu0 %856 }
  0x9d   : > { %503 = vmatpush1.bf16.msra.mxu1 %v357_v54  ;;  %3606 = vmatpush3.bf16.msra.mxu0 %v363_v55  ;;  %v872_v7 = vsel %vm870_vm5, %v3910_v45, %v857_v57 }
  0x9e   : > { %3607 = vmatprep.mubr.msk.bf16.mxu0 %vm3718_vm4, %v3717_v52  ;;  %613 = vmatprep.subr.bf16.mxu1 %v576_v50  ;;  %v861_v60 = vpop.permute.xlu1 %860  ;;  %v886_v10 = vand.u32 %v872_v7, %v3884_v27 }
  0x9f   : > { %654 = vmatprep.subr.bf16.mxu0 %v582_v56  ;;  %2781 = vrot.lane.b32.xlu0 %v3796_v15, %s3716_s12  ;;  %v597_v15 = vand.u32 %v3818_v19, %v3884_v27 }
  0xa0   : > { %3516 = vmatmul.mubr.msk.bf16.vlgmr.msra.gmra.mxu1 %vm330_vm3, %v3511_v36  ;;  %v859_v61 = vpop.permute.xlu0 %858  ;;  %2783 = vrot.lane.b32.xlu1 %v3789_v12, %s3716_s12 }
  0xa1   : > { %614 = vmatpush1.bf16.msra.mxu1 %v573_v58  ;;  %631 = vmatprep.mubr.bf16.mxu1 %v3708_v14  ;;  %v874_v12 = vsel %vm870_vm5, %v859_v61, %v861_v60  ;;  %v873_v19 = vsel %vm870_vm5, %v857_v57, %v859_v61 }
  0xa2   : > { %695 = vmatprep.subr.bf16.mxu1 %v588_v59  ;;  %v865_v0 = vpop.permute.xlu1 %864  ;;  %v889_v28 = vand.u32 %v873_v19, %v3884_v27 }
  0xa3   : > { %2785 = vrot.lane.b32.xlu0 %v3803_v16, %s3716_s12  ;;  %v871_v16 = vsel %vm870_vm5, %v853_v53, %v3910_v45 }
  0xa4   : > { %3608 = vmatmul.mubr.msk.bf16.vlgmr.msra.gmra.mxu0 %vm330_vm3, %v3511_v36  ;;  %v863_v1 = vpop.permute.xlu0 %862  ;;  %2787 = vrot.lane.b32.xlu1 %v3806_v17, %s3716_s12  ;;  %v892_v17 = vand.u32 %v874_v12, %v3884_v27  ;;  %v883_v22 = vand.u32 %v871_v16, %v3884_v27 }
  0xa5   : > { %655 = vmatpush1.bf16.msra.mxu0 %v579_v62  ;;  %672 = vmatprep.mubr.bf16.mxu0 %v3708_v14  ;;  %v875_v29 = vsel %vm870_vm5, %v861_v60, %v863_v1 }
  0xa6   : > { %736 = vmatprep.subr.bf16.mxu0 %v594_v63  ;;  %v3961_v6 = vpop.permute.xlu1 %868  ;;  %v895_v33 = vand.u32 %v875_v29, %v3884_v27  ;;  %v3530_v63 = vld [vmem:[%s4500_s1 + $0x6] sm:$0x3] }
  0xa7   : > { %2789 = vrot.lane.b32.xlu0 %v3812_v18, %s3716_s12  ;;  %v907_v44 = vand.u32 %v3961_v6, %v3884_v27 }
  0xa8   : > { %3518 = vmatmul.mubr.msk.bf16.vlgmr.msra.gmra.mxu1 %vm330_vm3, %v256_v2  ;;  %v867_v8 = vpop.permute.xlu0 %866  ;;  %2791 = vrot.lane.b32.xlu1 %v3864_v20, %s3716_s12  ;;  %v876_v20 = vsel %vm870_vm5, %v863_v1, %v865_v0 }
  0xa9   : > { %696 = vmatpush1.bf16.msra.mxu1 %v585_v4  ;;  %713 = vmatprep.mubr.bf16.mxu1 %v3708_v14  ;;  %v898_v23 = vand.u32 %v876_v20, %v3884_v27  ;;  %v878_v25 = vsel %vm870_vm5, %v867_v8, %v3961_v6  ;;  %v877_v35 = vsel %vm870_vm5, %v865_v0, %v867_v8 }
  0xaa   : > { %3611 = vmatprep.subr.bf16.mxu1 %v3717_v52  ;;  %v3975_v11 = vpop.permute.xlu1 %1175  ;;  %v904_v30 = vand.u32 %v878_v25, %v3884_v27  ;;  %v901_v39 = vand.u32 %v877_v35, %v3884_v27 }
  0xab   : > { %2793 = vrot.lane.b32.xlu0 %v3871_v21, %s3716_s12 }
  0xac   : > { %3519 = vmatmul.mubr.msk.bf16.vlgmr.msra.gmra.mxu0 %vm330_vm3, %v256_v2  ;;  %v1174_v13 = vpop.permute.xlu0 %1173 }
  0xad   : > { %737 = vmatpush1.bf16.msra.mxu0 %v591_v9  ;;  %754 = vmatprep.mubr.bf16.mxu0 %v3708_v14  ;;  %v1191_v37 = vsel %vm1189_vm6, %v1174_v13, %v3975_v11 }
  0xae   : > { %923 = vmatprep.subr.bf16.mxu0 %v886_v10  ;;  %v1178_v18 = vpop.permute.xlu1 %1177  ;;  %v1205_v40 = vand.u32 %v1191_v37, %v3884_v27 }
  0xaf   : > { %v1192_v51 = vsel %vm1189_vm6, %v3975_v11, %v1178_v18 }
  0xb0   : > { %3520 = vmatmul.mubr.msk.bf16.vlgmr.msra.gmra.mxu1 %vm330_vm3, %v256_v2  ;;  %v1172_v21 = vpop.permute.xlu0 %1171  ;;  %v1208_v57 = vand.u32 %v1192_v51, %v3884_v27 }
  0xb1   : > { %3612 = vmatpush3.bf16.msra.mxu1 %v597_v15  ;;  %3613 = vmatprep.mubr.msk.bf16.mxu1 %vm3718_vm4, %v3717_v52  ;;  %v1190_v45 = vsel %vm1189_vm6, %v1172_v21, %v1174_v13 }
  0xb2   : > { %964 = vmatprep.subr.bf16.mxu1 %v892_v17  ;;  %v1182_v24 = vpop.permute.xlu1 %1181  ;;  %v1202_v50 = vand.u32 %v1190_v45, %v3884_v27 }
  0xb4   : > { %3521 = vmatmul.mubr.msk.bf16.vlgmr.msra.gmra.mxu0 %vm330_vm3, %v256_v2  ;;  %v1180_v26 = vpop.permute.xlu0 %1179 }
  0xb5   : > { %924 = vmatpush1.bf16.msra.mxu0 %v883_v22  ;;  %941 = vmatprep.mubr.bf16.mxu0 %v3708_v14  ;;  %v1193_v42 = vsel %vm1189_vm6, %v1178_v18, %v1180_v26  ;;  %v1194_v58 = vsel %vm1189_vm6, %v1180_v26, %v1182_v24 }
  0xb6   : > { %1005 = vmatprep.subr.bf16.mxu0 %v898_v23  ;;  %v1186_v31 = vpop.permute.xlu1 %1185  ;;  %v1211_v46 = vand.u32 %v1193_v42, %v3884_v27  ;;  %v1214_v62 = vand.u32 %v1194_v58, %v3884_v27 }
  0xb8   : > { %3614 = vmatmul.mubr.msk.bf16.vlgmr.msra.gmra.mxu1 %vm330_vm3, %v256_v2  ;;  %v1184_v32 = vpop.permute.xlu0 %1183 }
  0xb9   : > { %965 = vmatpush1.bf16.msra.mxu1 %v889_v28  ;;  %982 = vmatprep.mubr.bf16.mxu1 %v3708_v14  ;;  %v1195_v48 = vsel %vm1189_vm6, %v1182_v24, %v1184_v32  ;;  %v1196_v0 = vsel %vm1189_vm6, %v1184_v32, %v1186_v31 }
  0xba   : > { %1046 = vmatprep.subr.bf16.mxu1 %v904_v30  ;;  %v4008_v36 = vpop.permute.xlu1 %1492  ;;  %v1217_v53 = vand.u32 %v1195_v48, %v3884_v27  ;;  %v1220_v6 = vand.u32 %v1196_v0, %v3884_v27 }
  0xbc   : > { %3525 = vmatmul.mubr.msk.bf16.vlgmr.msra.gmra.mxu0 %vm330_vm3, %v3523_v34  ;;  %v4013_v38 = vpop.permute.xlu0 %1187 }
  0xbd   : > { %1006 = vmatpush1.bf16.msra.mxu0 %v895_v33  ;;  %1023 = vmatprep.mubr.bf16.mxu0 %v3708_v14  ;;  %v1197_v55 = vsel %vm1189_vm6, %v1186_v31, %v4013_v38  ;;  %v1226_v11 = vand.u32 %v4013_v38, %v3884_v27  ;;  %v3537_v31 = vld [vmem:[%s4500_s1 + $0x8] sm:$0x3] }
  0xbe   : > { %3617 = vmatprep.subr.bf16.mxu0 %v3717_v52  ;;  %v1491_v41 = vpop.permute.xlu1 %1490  ;;  %v1223_v59 = vand.u32 %v1197_v55, %v3884_v27 }
  0xbf   : > { %v1509_v12 = vsel %vm1508_vm7, %v1491_v41, %v4008_v36 }
  0xc0   : > { %3526 = vmatmul.mubr.msk.bf16.vlgmr.msra.gmra.mxu1 %vm330_vm3, %v3523_v34  ;;  %v4021_v43 = vpop.permute.xlu0 %1494  ;;  %v1521_v18 = vand.u32 %v1509_v12, %v3884_v27 }
  0xc1   : > { %1047 = vmatpush1.bf16.msra.mxu1 %v901_v39  ;;  %1064 = vmatprep.mubr.bf16.mxu1 %v3708_v14  ;;  %v1510_v2 = vsel %vm1508_vm7, %v4008_v36, %v4021_v43 }
  0xc2   : > { %1242 = vmatprep.subr.bf16.mxu1 %v1205_v40  ;;  %v4028_v47 = vpop.permute.xlu1 %1498  ;;  %v1524_v7 = vand.u32 %v1510_v2, %v3884_v27 }
  0xc4   : > { %3527 = vmatmul.mubr.msk.bf16.vlgmr.msra.gmra.mxu0 %vm330_vm3, %v3523_v34  ;;  %v1497_v49 = vpop.permute.xlu0 %1496 }
  0xc5   : > { %3618 = vmatpush3.bf16.msra.mxu0 %v907_v44  ;;  %3619 = vmatprep.mubr.msk.bf16.mxu0 %vm3718_vm4, %v3717_v52  ;;  %v1512_v9 = vsel %vm1508_vm7, %v1497_v49, %v4028_v47  ;;  %v1511_v20 = vsel %vm1508_vm7, %v4021_v43, %v1497_v49 }
  0xc6   : > { %1283 = vmatprep.subr.bf16.mxu0 %v1211_v46  ;;  %v4038_v54 = vpop.permute.xlu1 %1502  ;;  %v1530_v13 = vand.u32 %v1512_v9, %v3884_v27  ;;  %v1527_v24 = vand.u32 %v1511_v20, %v3884_v27 }
  0xc8   : > { %3528 = vmatmul.mubr.msk.bf16.vlgmr.msra.gmra.mxu1 %vm330_vm3, %v3523_v34  ;;  %v1501_v56 = vpop.permute.xlu0 %1500 }
  0xc9   : > { %1243 = vmatpush1.bf16.msra.mxu1 %v1202_v50  ;;  %1260 = vmatprep.mubr.bf16.mxu1 %v3708_v14  ;;  %v1514_v16 = vsel %vm1508_vm7, %v1501_v56, %v4038_v54  ;;  %v1513_v25 = vsel %vm1508_vm7, %v4028_v47, %v1501_v56 }
  0xca   : > { %1324 = vmatprep.subr.bf16.mxu1 %v1217_v53  ;;  %v4047_v60 = vpop.permute.xlu1 %1506  ;;  %v1536_v21 = vand.u32 %v1514_v16, %v3884_v27  ;;  %v1533_v30 = vand.u32 %v1513_v25, %v3884_v27 }
  0xcb   : > { %v1545_v41 = vand.u32 %v4047_v60, %v3884_v27 }
  0xcc   : > { %3620 = vmatmul.mubr.msk.bf16.vlgmr.msra.gmra.mxu0 %vm330_vm3, %v3523_v34  ;;  %v1505_v61 = vpop.permute.xlu0 %1504 }
  0xcd   : > { %1284 = vmatpush1.bf16.msra.mxu0 %v1208_v57  ;;  %1301 = vmatprep.mubr.bf16.mxu0 %v3708_v14  ;;  %v1516_v19 = vsel %vm1508_vm7, %v1505_v61, %v4047_v60  ;;  %v1515_v32 = vsel %vm1508_vm7, %v4038_v54, %v1505_v61  ;;  %v3544_v60 = vld [vmem:[%s4500_s1 + $0xa] sm:$0x3] }
  0xce   : > { %1365 = vmatprep.subr.bf16.mxu0 %v1223_v59  ;;  %v4056_v1 = vpop.permute.xlu1 %1813  ;;  %v1542_v26 = vand.u32 %v1516_v19, %v3884_v27  ;;  %v1539_v36 = vand.u32 %v1515_v32, %v3884_v27 }
  0xd0   : > { %3532 = vmatmul.mubr.msk.bf16.vlgmr.msra.gmra.mxu1 %vm330_vm3, %v3530_v63  ;;  %v4062_v4 = vpop.permute.xlu0 %1811 }
  0xd1   : > { %1325 = vmatpush1.bf16.msra.mxu1 %v1214_v62  ;;  %1342 = vmatprep.mubr.bf16.mxu1 %v3708_v14  ;;  %v1829_v34 = vsel %vm1827_vm8, %v4062_v4, %v4056_v1 }
  0xd2   : > { %3623 = vmatprep.subr.bf16.mxu1 %v3717_v52  ;;  %v4068_v8 = vpop.permute.xlu1 %1815  ;;  %v1843_v37 = vand.u32 %v1829_v34, %v3884_v27 }
  0xd3   : > { %v1830_v48 = vsel %vm1827_vm8, %v4056_v1, %v4068_v8 }
  0xd4   : > { %3533 = vmatmul.mubr.msk.bf16.vlgmr.msra.gmra.mxu0 %vm330_vm3, %v3530_v63  ;;  %v1810_v10 = vpop.permute.xlu0 %1809  ;;  %v1846_v54 = vand.u32 %v1830_v48, %v3884_v27 }
  0xd5   : > { %1366 = vmatpush1.bf16.msra.mxu0 %v1220_v6  ;;  %1383 = vmatprep.mubr.bf16.mxu0 %v3708_v14  ;;  %v1828_v42 = vsel %vm1827_vm8, %v1810_v10, %v4062_v4 }
  0xd6   : > { %1561 = vmatprep.subr.bf16.mxu0 %v1524_v7  ;;  %v4079_v15 = vpop.permute.xlu1 %1819  ;;  %v1840_v47 = vand.u32 %v1828_v42, %v3884_v27 }
  0xd8   : > { %3534 = vmatmul.mubr.msk.bf16.vlgmr.msra.gmra.mxu1 %vm330_vm3, %v3530_v63  ;;  %v4084_v17 = vpop.permute.xlu0 %1817 }
  0xd9   : > { %3624 = vmatpush3.bf16.msra.mxu1 %v1226_v11  ;;  %3625 = vmatprep.mubr.msk.bf16.mxu1 %vm3718_vm4, %v3717_v52  ;;  %v1831_v39 = vsel %vm1827_vm8, %v4068_v8, %v4084_v17  ;;  %v1832_v55 = vsel %vm1827_vm8, %v4084_v17, %v4079_v15 }
  0xda   : > { %1602 = vmatprep.subr.bf16.mxu1 %v1530_v13  ;;  %v4092_v22 = vpop.permute.xlu1 %1823  ;;  %v1849_v43 = vand.u32 %v1831_v39, %v3884_v27  ;;  %v1852_v59 = vand.u32 %v1832_v55, %v3884_v27 }
  0xdc   : > { %3535 = vmatmul.mubr.msk.bf16.vlgmr.msra.gmra.mxu0 %vm330_vm3, %v3530_v63  ;;  %v4097_v23 = vpop.permute.xlu0 %1821 }
  0xdd   : > { %1562 = vmatpush1.bf16.msra.mxu0 %v1521_v18  ;;  %1579 = vmatprep.mubr.bf16.mxu0 %v3708_v14  ;;  %v1833_v45 = vsel %vm1827_vm8, %v4079_v15, %v4097_v23  ;;  %v1834_v61 = vsel %vm1827_vm8, %v4097_v23, %v4092_v22  ;;  %v3551_v23 = vld [vmem:[%s4500_s1 + $0xc] sm:$0x3] }
  0xde   : > { %1643 = vmatprep.subr.bf16.mxu0 %v1536_v21  ;;  %v4104_v28 = vpop.permute.xlu1 %2131  ;;  %v1855_v49 = vand.u32 %v1833_v45, %v3884_v27  ;;  %v1858_v1 = vand.u32 %v1834_v61, %v3884_v27 }
  0xe0   : > { %3626 = vmatmul.mubr.msk.bf16.vlgmr.msra.gmra.mxu1 %vm330_vm3, %v3530_v63  ;;  %v4107_v29 = vpop.permute.xlu0 %1825 }
  0xe1   : > { %1603 = vmatpush1.bf16.msra.mxu1 %v1527_v24  ;;  %1620 = vmatprep.mubr.bf16.mxu1 %v3708_v14  ;;  %v1835_v51 = vsel %vm1827_vm8, %v4092_v22, %v4107_v29  ;;  %v1864_v6 = vand.u32 %v4107_v29, %v3884_v27 }
  0xe2   : > { %1684 = vmatprep.subr.bf16.mxu1 %v1542_v26  ;;  %v4116_v33 = vpop.permute.xlu1 %2129  ;;  %v1861_v56 = vand.u32 %v1835_v51, %v3884_v27  ;;  %v3558_v51 = vld [vmem:[%s4500_s1 + $0xe] sm:$0x3] }
  0xe3   : > { %v2150_v7 = vsel %vm2149_vm9, %v4116_v33, %v4104_v28 }
  0xe4   : > { %3539 = vmatmul.mubr.msk.bf16.vlgmr.msra.gmra.mxu0 %vm330_vm3, %v3537_v31  ;;  %v4122_v35 = vpop.permute.xlu0 %2133  ;;  %v2163_v12 = vand.u32 %v2150_v7, %v3884_v27 }
  0xe5   : > { %1644 = vmatpush1.bf16.msra.mxu0 %v1533_v30  ;;  %1661 = vmatprep.mubr.bf16.mxu0 %v3708_v14  ;;  %v2151_v62 = vsel %vm2149_vm9, %v4104_v28, %v4122_v35 }
  0xe6   : > { %3629 = vmatprep.subr.bf16.mxu0 %v3717_v52  ;;  %v4128_v38 = vpop.permute.xlu1 %2137  ;;  %v2166_v2 = vand.u32 %v2151_v62, %v3884_v27 }
  0xe8   : > { %3540 = vmatmul.mubr.msk.bf16.vlgmr.msra.gmra.mxu1 %vm330_vm3, %v3537_v31  ;;  %v2136_v40 = vpop.permute.xlu0 %2135 }
  0xe9   : > { %1685 = vmatpush1.bf16.msra.mxu1 %v1539_v36  ;;  %1702 = vmatprep.mubr.bf16.mxu1 %v3708_v14  ;;  %v2153_v4 = vsel %vm2149_vm9, %v2136_v40, %v4128_v38  ;;  %v2152_v13 = vsel %vm2149_vm9, %v4122_v35, %v2136_v40 }
  0xea   : > { %1880 = vmatprep.subr.bf16.mxu1 %v1843_v37  ;;  %v4140_v44 = vpop.permute.xlu1 %2141  ;;  %v2172_v8 = vand.u32 %v2153_v4, %v3884_v27  ;;  %v2169_v20 = vand.u32 %v2152_v13, %v3884_v27  ;;  %v3565_v13 = vld [vmem:[%s4500_s1 + $0x10] sm:$0x3] }
  0xec   : > { %3541 = vmatmul.mubr.msk.bf16.vlgmr.msra.gmra.mxu0 %vm330_vm3, %v3537_v31  ;;  %v2140_v46 = vpop.permute.xlu0 %2139 }
  0xed   : > { %3630 = vmatpush3.bf16.msra.mxu0 %v1545_v41  ;;  %3631 = vmatprep.mubr.msk.bf16.mxu0 %vm3718_vm4, %v3717_v52  ;;  %v2155_v11 = vsel %vm2149_vm9, %v2140_v46, %v4140_v44  ;;  %v2154_v21 = vsel %vm2149_vm9, %v4128_v38, %v2140_v46 }
  0xee   : > { %1921 = vmatprep.subr.bf16.mxu0 %v1849_v43  ;;  %v4153_v50 = vpop.permute.xlu1 %2145  ;;  %v2178_v15 = vand.u32 %v2155_v11, %v3884_v27  ;;  %v2175_v19 = vand.u32 %v2154_v21, %v3884_v27 }
  0xf0   : > { %3542 = vmatmul.mubr.msk.bf16.vlgmr.msra.gmra.mxu1 %vm330_vm3, %v3537_v31  ;;  %v2144_v53 = vpop.permute.xlu0 %2143 }
  0xf1   : > { %1881 = vmatpush1.bf16.msra.mxu1 %v1840_v47  ;;  %1898 = vmatprep.mubr.bf16.mxu1 %v3708_v14  ;;  %v2157_v16 = vsel %vm2149_vm9, %v2144_v53, %v4153_v50  ;;  %v2156_v24 = vsel %vm2149_vm9, %v4140_v44, %v2144_v53 }
  0xf2   : > { %1962 = vmatprep.subr.bf16.mxu1 %v1855_v49  ;;  %v4165_v57 = vpop.permute.xlu1 %2454  ;;  %v2184_v22 = vand.u32 %v2157_v16, %v3884_v27  ;;  %v2181_v29 = vand.u32 %v2156_v24, %v3884_v27 }
  0xf4   : > { %3632 = vmatmul.mubr.msk.bf16.vlgmr.msra.gmra.mxu0 %vm330_vm3, %v3537_v31  ;;  %v2148_v58 = vpop.permute.xlu0 %2147 }
  0xf5   : > { %1922 = vmatpush1.bf16.msra.mxu0 %v1846_v54  ;;  %1939 = vmatprep.mubr.bf16.mxu0 %v3708_v14  ;;  %v2158_v30 = vsel %vm2149_vm9, %v4153_v50, %v2148_v58 }
  0xf6   : > { %2003 = vmatprep.subr.bf16.mxu0 %v1861_v56  ;;  %v2453_v0 = vpop.permute.xlu1 %2452  ;;  %v2187_v35 = vand.u32 %v2158_v30, %v3884_v27 }
  0xf7   : > { %v2473_v36 = vsel %vm2472_vm10, %v2453_v0, %v4165_v57 }
  0xf8   : > { %3546 = vmatmul.mubr.msk.bf16.vlgmr.msra.gmra.mxu1 %vm330_vm3, %v3544_v60  ;;  %v4180_v63 = vpop.permute.xlu0 %2456  ;;  %v2486_v39 = vand.u32 %v2473_v36, %v3884_v27 }
  0xf9   : > { %1963 = vmatpush1.bf16.msra.mxu1 %v1852_v59  ;;  %1980 = vmatprep.mubr.bf16.mxu1 %v3708_v14  ;;  %v2474_v28 = vsel %vm2472_vm10, %v4165_v57, %v4180_v63 }
  0xfa   : > { %3635 = vmatprep.subr.bf16.mxu1 %v3717_v52  ;;  %v4196_v10 = vpop.permute.xlu1 %2460  ;;  %v2489_v31 = vand.u32 %v2474_v28, %v3884_v27 }
  0xfc   : > { %3547 = vmatmul.mubr.msk.bf16.vlgmr.msra.gmra.mxu0 %vm330_vm3, %v3544_v60  ;;  %v2459_v9 = vpop.permute.xlu0 %2458 }
  0xfd   : > { %2004 = vmatpush1.bf16.msra.mxu0 %v1858_v1  ;;  %2021 = vmatprep.mubr.bf16.mxu0 %v3708_v14  ;;  %v2476_v32 = vsel %vm2472_vm10, %v2459_v9, %v4196_v10  ;;  %v2475_v40 = vsel %vm2472_vm10, %v4180_v63, %v2459_v9 }
  0xfe   : > { %2203 = vmatprep.subr.bf16.mxu0 %v2166_v2  ;;  %v2465_v18 = vpop.permute.xlu1 %2464  ;;  %v2495_v37 = vand.u32 %v2476_v32, %v3884_v27  ;;  %v2492_v45 = vand.u32 %v2475_v40, %v3884_v27 }
 0x100   : > { %3548 = vmatmul.mubr.msk.bf16.vlgmr.msra.gmra.mxu1 %vm330_vm3, %v3544_v60  ;;  %v2463_v17 = vpop.permute.xlu0 %2462 }
 0x101   : > { %3636 = vmatpush3.bf16.msra.mxu1 %v1864_v6  ;;  %3637 = vmatprep.mubr.msk.bf16.mxu1 %vm3718_vm4, %v3717_v52  ;;  %v2478_v38 = vsel %vm2472_vm10, %v2463_v17, %v2465_v18  ;;  %v2477_v46 = vsel %vm2472_vm10, %v4196_v10, %v2463_v17 }
 0x102   : > { %2244 = vmatprep.subr.bf16.mxu1 %v2172_v8  ;;  %v2469_v26 = vpop.permute.xlu1 %2468  ;;  %v2501_v41 = vand.u32 %v2478_v38, %v3884_v27  ;;  %v2498_v50 = vand.u32 %v2477_v46, %v3884_v27 }
 0x104   : > { %3549 = vmatmul.mubr.msk.bf16.vlgmr.msra.gmra.mxu0 %vm330_vm3, %v3544_v60  ;;  %v2467_v25 = vpop.permute.xlu0 %2466 }
 0x105   : > { %2204 = vmatpush1.bf16.msra.mxu0 %v2163_v12  ;;  %2221 = vmatprep.mubr.bf16.mxu0 %v3708_v14  ;;  %v2480_v44 = vsel %vm2472_vm10, %v2467_v25, %v2469_v26  ;;  %v2479_v53 = vsel %vm2472_vm10, %v2465_v18, %v2467_v25 }
 0x106   : > { %2285 = vmatprep.subr.bf16.mxu0 %v2178_v15  ;;  %v2507_v47 = vand.u32 %v2480_v44, %v3884_v27  ;;  %v2504_v55 = vand.u32 %v2479_v53, %v3884_v27 }
 0x108   : > { %3638 = vmatmul.mubr.msk.bf16.vlgmr.msra.gmra.mxu1 %vm330_vm3, %v3544_v60  ;;  %v2471_v33 = vpop.permute.xlu0 %2470  ;;  %v2778_v34 = vpop.permute.xlu1 %2777 }
 0x109   : > { %2245 = vmatpush1.bf16.msra.mxu1 %v2169_v20  ;;  %2262 = vmatprep.mubr.bf16.mxu1 %v3708_v14  ;;  %v2481_v56 = vsel %vm2472_vm10, %v2469_v26, %v2471_v33 }
 0x10a   : > { %2326 = vmatprep.subr.bf16.mxu1 %v2184_v22  ;;  %v2510_v61 = vand.u32 %v2481_v56, %v3884_v27 }
 0x10c   : > { %3553 = vmatmul.mubr.msk.bf16.vlgmr.msra.gmra.mxu0 %vm330_vm3, %v3551_v23  ;;  %v2780_v42 = vpop.permute.xlu0 %2779 }
 0x10d   : > { %2286 = vmatpush1.bf16.msra.mxu0 %v2175_v19  ;;  %2303 = vmatprep.mubr.bf16.mxu0 %v3708_v14  ;;  %v2776_v43 = vpop.permute.xlu1 %2775  ;;  %v2797_v54 = vsel %vm2795_vm11, %v2778_v34, %v2780_v42 }
 0x10e   : > { %3641 = vmatprep.subr.bf16.mxu0 %v3717_v52  ;;  %v2812_v57 = vand.u32 %v2797_v54, %v3884_v27  ;;  %v2796_v62 = vsel %vm2795_vm11, %v2776_v43, %v2778_v34 }
 0x10f   : > { %v2809_v4 = vand.u32 %v2796_v62, %v3884_v27 }
 0x110   : > { %3554 = vmatmul.mubr.msk.bf16.vlgmr.msra.gmra.mxu1 %vm330_vm3, %v3551_v23 }
 0x111   : > { %2327 = vmatpush1.bf16.msra.mxu1 %v2181_v29  ;;  %2344 = vmatprep.mubr.bf16.mxu1 %v3708_v14  ;;  %v2782_v48 = vpop.permute.xlu0 %2781 }
 0x112   : > { %2526 = vmatprep.subr.bf16.mxu1 %v2489_v31  ;;  %v2784_v49 = vpop.permute.xlu1 %2783  ;;  %v2798_v6 = vsel %vm2795_vm11, %v2780_v42, %v2782_v48 }
 0x113   : > { %v2799_v60 = vsel %vm2795_vm11, %v2782_v48, %v2784_v49  ;;  %v2815_v9 = vand.u32 %v2798_v6, %v3884_v27 }
 0x114   : > { %3555 = vmatmul.mubr.msk.bf16.vlgmr.msra.gmra.mxu0 %vm330_vm3, %v3551_v23  ;;  %v2818_v63 = vand.u32 %v2799_v60, %v3884_v27 }
 0x115   : > { %3642 = vmatpush3.bf16.msra.mxu0 %v2187_v35  ;;  %3643 = vmatprep.mubr.msk.bf16.mxu0 %vm3718_vm4, %v3717_v52  ;;  %v2786_v58 = vpop.permute.xlu0 %2785 }
 0x116   : > { %2567 = vmatprep.subr.bf16.mxu0 %v2495_v37  ;;  %v2788_v59 = vpop.permute.xlu1 %2787  ;;  %v2800_v10 = vsel %vm2795_vm11, %v2784_v49, %v2786_v58 }
 0x117   : > { %v2801_v0 = vsel %vm2795_vm11, %v2786_v58, %v2788_v59  ;;  %v2821_v12 = vand.u32 %v2800_v10, %v3884_v27 }
 0x118   : > { %3556 = vmatmul.mubr.msk.bf16.vlgmr.msra.gmra.mxu1 %vm330_vm3, %v3551_v23  ;;  %v2824_v7 = vand.u32 %v2801_v0, %v3884_v27 }
 0x119   : > { %2527 = vmatpush1.bf16.msra.mxu1 %v2486_v39  ;;  %2544 = vmatprep.mubr.bf16.mxu1 %v3708_v14  ;;  %v2790_v1 = vpop.permute.xlu0 %2789 }
 0x11a   : > { %2608 = vmatprep.subr.bf16.mxu1 %v2501_v41  ;;  %v2792_v2 = vpop.permute.xlu1 %2791  ;;  %v2802_v15 = vsel %vm2795_vm11, %v2788_v59, %v2790_v1 }
 0x11b   : > { %v2803_v8 = vsel %vm2795_vm11, %v2790_v1, %v2792_v2  ;;  %v2827_v17 = vand.u32 %v2802_v15, %v3884_v27 }
 0x11c   : > { %3644 = vmatmul.mubr.msk.bf16.vlgmr.msra.gmra.mxu0 %vm330_vm3, %v3551_v23  ;;  %v2830_v11 = vand.u32 %v2803_v8, %v3884_v27 }
 0x11d   : > { %2568 = vmatpush1.bf16.msra.mxu0 %v2492_v45  ;;  %2585 = vmatprep.mubr.bf16.mxu0 %v3708_v14  ;;  %v2794_v16 = vpop.permute.xlu0 %2793 }
 0x11e   : > { %2649 = vmatprep.subr.bf16.mxu0 %v2507_v47  ;;  %v2804_v18 = vsel %vm2795_vm11, %v2792_v2, %v2794_v16 }
 0x11f   : > { %v2833_v20 = vand.u32 %v2804_v18, %v3884_v27 }
 0x120   : > { %3560 = vmatmul.mubr.msk.bf16.vlgmr.msra.gmra.mxu1 %vm330_vm3, %v3558_v51 }
 0x121   : > { %2609 = vmatpush1.bf16.msra.mxu1 %v2498_v50  ;;  %2626 = vmatprep.mubr.bf16.mxu1 %v3708_v14 }
 0x122   : > { %3647 = vmatprep.subr.bf16.mxu1 %v3717_v52 }
 0x124   : > { %3561 = vmatmul.mubr.msk.bf16.vlgmr.msra.gmra.mxu0 %vm330_vm3, %v3558_v51 }
 0x125   : > { %2650 = vmatpush1.bf16.msra.mxu0 %v2504_v55  ;;  %2667 = vmatprep.mubr.bf16.mxu0 %v3708_v14 }
 0x126   : > { %2849 = vmatprep.subr.bf16.mxu0 %v2812_v57 }
 0x128   : > { %3562 = vmatmul.mubr.msk.bf16.vlgmr.msra.gmra.mxu1 %vm330_vm3, %v3558_v51 }
 0x129   : > { %3648 = vmatpush3.bf16.msra.mxu1 %v2510_v61  ;;  %3649 = vmatprep.mubr.msk.bf16.mxu1 %vm3718_vm4, %v3717_v52 }
 0x12a   : > { %2890 = vmatprep.subr.bf16.mxu1 %v2818_v63 }
 0x12c   : > { %3563 = vmatmul.mubr.msk.bf16.vlgmr.msra.gmra.mxu0 %vm330_vm3, %v3558_v51 }
 0x12d   : > { %2850 = vmatpush1.bf16.msra.mxu0 %v2809_v4  ;;  %2867 = vmatprep.mubr.bf16.mxu0 %v3708_v14 }
 0x12e   : > { %2931 = vmatprep.subr.bf16.mxu0 %v2824_v7 }
 0x130   : > { %3650 = vmatmul.mubr.msk.bf16.vlgmr.msra.gmra.mxu1 %vm330_vm3, %v3558_v51 }
 0x131   : > { %2891 = vmatpush1.bf16.msra.mxu1 %v2815_v9  ;;  %2908 = vmatprep.mubr.bf16.mxu1 %v3708_v14 }
 0x132   : > { %2972 = vmatprep.subr.bf16.mxu1 %v2830_v11 }
 0x134   : > { %3567 = vmatmul.mubr.msk.bf16.vlgmr.msra.gmra.mxu0 %vm330_vm3, %v3565_v13 }
 0x135   : > { %2932 = vmatpush1.bf16.msra.mxu0 %v2821_v12  ;;  %2949 = vmatprep.mubr.bf16.mxu0 %v3708_v14 }
 0x136   : > { %3653 = vmatprep.subr.bf16.mxu0 %v3717_v52 }
 0x138   : > { %3568 = vmatmul.mubr.msk.bf16.vlgmr.msra.gmra.mxu1 %vm330_vm3, %v3565_v13 }
 0x139   : > { %2973 = vmatpush1.bf16.msra.mxu1 %v2827_v17  ;;  %2990 = vmatprep.mubr.bf16.mxu1 %v3708_v14 }
 0x13a   : > { %3659 = vmatprep.subr.mxu1 %v3717_v52 }
 0x13c   : > { %3569 = vmatmul.mubr.msk.bf16.vlgmr.msra.gmra.mxu0 %vm330_vm3, %v3565_v13 }
 0x13d   : > { %3654 = vmatpush3.bf16.msra.mxu0 %v2833_v20  ;;  %3655 = vmatprep.mubr.msk.bf16.mxu0 %vm3718_vm4, %v3717_v52 }
 0x140   : > { %3570 = vmatmul.mubr.msk.bf16.vlgmr.msra.gmra.mxu1 %vm330_vm3, %v3565_v13 }
 0x141   : > { %3661 = vmatprep.mubr.msk.f32.mxu1 %vm3718_vm4, %v3717_v52 }
 0x144   : > { %3656 = vmatmul.mubr.msk.bf16.vlgmr.msra.gmra.mxu0 %vm330_vm3, %v3565_v13 }
 0x154   : > { %v399_v21 = vpop.f32.mrf.mxu0 }
 0x156   : > { %v401_v27 = vpop.f32.mrf.mxu0 }
 0x158   : > { %v403_v22 = vpop.f32.mrf.mxu0  ;;  %v440_v19 = vpop.f32.mrf.mxu1 }
 0x15a   : > { %v404_v14 = vpop.f32.mrf.mxu0  ;;  %v442_v23 = vpop.f32.mrf.mxu1 }
 0x15c   : > { %v444_v24 = vpop.f32.mrf.mxu1  ;;  %v481_v25 = vpop.f32.mrf.mxu0 }
 0x15e   : > { %v445_v26 = vpop.f32.mrf.mxu1  ;;  %v483_v28 = vpop.f32.mrf.mxu0 }
 0x160   : > { %v485_v29 = vpop.f32.mrf.mxu0  ;;  %v522_v30 = vpop.f32.mrf.mxu1 }
 0x162   : > { %v486_v31 = vpop.f32.mrf.mxu0  ;;  %v524_v32 = vpop.f32.mrf.mxu1 }
 0x164   : > { %v526_v33 = vpop.f32.mrf.mxu1  ;;  %v563_v34 = vpop.f32.mrf.mxu0 }
 0x166   : > { %v527_v35 = vpop.f32.mrf.mxu1  ;;  %v3609_v36 = vpop.f32.mrf.mxu0 }
 0x168   : > { %v566_v37 = vpop.f32.mrf.mxu0  ;;  %v633_v38 = vpop.f32.mrf.mxu1 }
 0x169   : > { %v634_v39 = vadd.f32 %v633_v38, %v399_v21 }
 0x16a   : > { %v3610_v40 = vpop.f32.mrf.mxu0  ;;  %v635_v41 = vpop.f32.mrf.mxu1 }
 0x16b   : > { %v636_v42 = vadd.f32 %v635_v41, %v401_v27 }
 0x16c   : > { %v637_v43 = vpop.f32.mrf.mxu1  ;;  %v674_v44 = vpop.f32.mrf.mxu0 }
 0x16d   : > { %v675_v45 = vadd.f32 %v674_v44, %v440_v19 }
 0x16e   : > { %v638_v46 = vpop.f32.mrf.mxu1  ;;  %v676_v47 = vpop.f32.mrf.mxu0 }
 0x16f   : > { %v677_v48 = vadd.f32 %v676_v47, %v442_v23 }
 0x170   : > { %v678_v49 = vpop.f32.mrf.mxu0  ;;  %v715_v50 = vpop.f32.mrf.mxu1 }
 0x171   : > { %v716_v51 = vadd.f32 %v715_v50, %v481_v25 }
 0x172   : > { %v679_v53 = vpop.f32.mrf.mxu0  ;;  %v717_v54 = vpop.f32.mrf.mxu1 }
 0x173   : > { %v718_v55 = vadd.f32 %v717_v54, %v483_v28 }
 0x174   : > { %v719_v56 = vpop.f32.mrf.mxu1  ;;  %v756_v57 = vpop.f32.mrf.mxu0 }
 0x175   : > { %v757_v58 = vadd.f32 %v756_v57, %v522_v30 }
 0x176   : > { %v720_v59 = vpop.f32.mrf.mxu1  ;;  %v758_v60 = vpop.f32.mrf.mxu0 }
 0x177   : > { %v759_v61 = vadd.f32 %v758_v60, %v524_v32 }
 0x178   : > { %v760_v62 = vpop.f32.mrf.mxu0  ;;  %v797_v63 = vpop.f32.mrf.mxu1 }
 0x179   : > { %v798_v0 = vadd.f32 %v797_v63, %v563_v34 }
 0x17a   : > { %v761_v1 = vpop.f32.mrf.mxu0  ;;  %v3615_v2 = vpop.f32.mrf.mxu1 }
 0x17c   : > { %v800_v4 = vpop.f32.mrf.mxu1  ;;  %v943_v6 = vpop.f32.mrf.mxu0 }
 0x17d   : > { %v1113_v7 = vadd.f32 %v943_v6, %v634_v39 }
 0x17e   : > { %v3616_v8 = vpop.f32.mrf.mxu1  ;;  %v945_v9 = vpop.f32.mrf.mxu0 }
 0x17f   : > { %v1114_v10 = vadd.f32 %v945_v9, %v636_v42 }
 0x180   : > { %v947_v11 = vpop.f32.mrf.mxu0  ;;  %v984_v12 = vpop.f32.mrf.mxu1 }
 0x181   : > { %v1115_v13 = vadd.f32 %v984_v12, %v675_v45 }
 0x182   : > { %v948_v15 = vpop.f32.mrf.mxu0  ;;  %v986_v16 = vpop.f32.mrf.mxu1 }
 0x183   : > { %v1116_v17 = vadd.f32 %v986_v16, %v677_v48 }
 0x184   : > { %v988_v18 = vpop.f32.mrf.mxu1  ;;  %v1025_v20 = vpop.f32.mrf.mxu0 }
 0x185   : > { %v1117_v21 = vadd.f32 %v1025_v20, %v716_v51 }
 0x186   : > { %v989_v27 = vpop.f32.mrf.mxu1  ;;  %v1027_v22 = vpop.f32.mrf.mxu0 }
 0x187   : > { %v1118_v19 = vadd.f32 %v1027_v22, %v718_v55 }
 0x188   : > { %v1029_v14 = vpop.f32.mrf.mxu0  ;;  %v1066_v23 = vpop.f32.mrf.mxu1 }
 0x189   : > { %v1119_v24 = vadd.f32 %v1066_v23, %v757_v58 }
 0x18a   : > { %v1030_v25 = vpop.f32.mrf.mxu0  ;;  %v1068_v26 = vpop.f32.mrf.mxu1 }
 0x18b   : > { %v1120_v28 = vadd.f32 %v1068_v26, %v759_v61 }
 0x18c   : > { %v1070_v29 = vpop.f32.mrf.mxu1  ;;  %v1107_v30 = vpop.f32.mrf.mxu0 }
 0x18d   : > { %v1121_v31 = vadd.f32 %v1107_v30, %v798_v0 }
 0x18e   : > { %v1071_v32 = vpop.f32.mrf.mxu1  ;;  %v3621_v33 = vpop.f32.mrf.mxu0 }
 0x190   : > { %v1110_v34 = vpop.f32.mrf.mxu0  ;;  %v1262_v35 = vpop.f32.mrf.mxu1 }
 0x191   : > { %v1432_v36 = vadd.f32 %v1262_v35, %v1113_v7 }
 0x192   : > { %v3622_v37 = vpop.f32.mrf.mxu0  ;;  %v1264_v38 = vpop.f32.mrf.mxu1 }
 0x193   : > { %v1433_v39 = vadd.f32 %v1264_v38, %v1114_v10 }
 0x194   : > { %v1266_v40 = vpop.f32.mrf.mxu1  ;;  %v1303_v41 = vpop.f32.mrf.mxu0 }
 0x195   : > { %v1434_v42 = vadd.f32 %v1303_v41, %v1115_v13 }
 0x196   : > { %v1267_v43 = vpop.f32.mrf.mxu1  ;;  %v1305_v44 = vpop.f32.mrf.mxu0 }
 0x197   : > { %v1435_v45 = vadd.f32 %v1305_v44, %v1116_v17 }
 0x198   : > { %v1307_v46 = vpop.f32.mrf.mxu0  ;;  %v1344_v47 = vpop.f32.mrf.mxu1 }
 0x199   : > { %v1436_v48 = vadd.f32 %v1344_v47, %v1117_v21 }
 0x19a   : > { %v1308_v49 = vpop.f32.mrf.mxu0  ;;  %v1346_v50 = vpop.f32.mrf.mxu1 }
 0x19b   : > { %v1437_v51 = vadd.f32 %v1346_v50, %v1118_v19 }
 0x19c   : > { %v1348_v53 = vpop.f32.mrf.mxu1  ;;  %v1385_v54 = vpop.f32.mrf.mxu0 }
 0x19d   : > { %v1438_v55 = vadd.f32 %v1385_v54, %v1119_v24 }
 0x19e   : > { %v1349_v56 = vpop.f32.mrf.mxu1  ;;  %v1387_v57 = vpop.f32.mrf.mxu0 }
 0x19f   : > { %v1439_v58 = vadd.f32 %v1387_v57, %v1120_v28 }
 0x1a0   : > { %v1389_v59 = vpop.f32.mrf.mxu0  ;;  %v1426_v60 = vpop.f32.mrf.mxu1 }
 0x1a1   : > { %v1440_v61 = vadd.f32 %v1426_v60, %v1121_v31 }
 0x1a2   : > { %v1390_v62 = vpop.f32.mrf.mxu0  ;;  %v3627_v63 = vpop.f32.mrf.mxu1 }
 0x1a4   : > { %v1429_v0 = vpop.f32.mrf.mxu1  ;;  %v1581_v1 = vpop.f32.mrf.mxu0 }
 0x1a5   : > { %v4312_v2 = vadd.f32 %v1581_v1, %v1432_v36 }
 0x1a6   : > { %v3628_v4 = vpop.f32.mrf.mxu1  ;;  %v1583_v6 = vpop.f32.mrf.mxu0 }
 0x1a7   : > { %v4314_v7 = vadd.f32 %v1583_v6, %v1433_v39 }
 0x1a8   : > { %v1585_v8 = vpop.f32.mrf.mxu0  ;;  %v1622_v9 = vpop.f32.mrf.mxu1 }
 0x1a9   : > { %v4316_v10 = vadd.f32 %v1622_v9, %v1434_v42 }
 0x1aa   : > { %v1586_v11 = vpop.f32.mrf.mxu0  ;;  %v1624_v12 = vpop.f32.mrf.mxu1 }
 0x1ab   : > { %v4318_v13 = vadd.f32 %v1624_v12, %v1435_v45 }
 0x1ac   : > { %v1626_v15 = vpop.f32.mrf.mxu1  ;;  %v1663_v16 = vpop.f32.mrf.mxu0 }
 0x1ad   : > { %v4320_v17 = vadd.f32 %v1663_v16, %v1436_v48 }
 0x1ae   : > { %v1627_v18 = vpop.f32.mrf.mxu1  ;;  %v1665_v20 = vpop.f32.mrf.mxu0 }
 0x1af   : > { %v4322_v21 = vadd.f32 %v1665_v20, %v1437_v51 }
 0x1b0   : > { %v1667_v27 = vpop.f32.mrf.mxu0  ;;  %v1704_v22 = vpop.f32.mrf.mxu1 }
 0x1b1   : > { %v4324_v19 = vadd.f32 %v1704_v22, %v1438_v55 }
 0x1b2   : > { %v1668_v14 = vpop.f32.mrf.mxu0  ;;  %v1706_v23 = vpop.f32.mrf.mxu1 }
 0x1b3   : > { %v4326_v24 = vadd.f32 %v1706_v23, %v1439_v58 }
 0x1b4   : > { %v1708_v25 = vpop.f32.mrf.mxu1  ;;  %v1745_v26 = vpop.f32.mrf.mxu0 }
 0x1b5   : > { %v4328_v28 = vadd.f32 %v1745_v26, %v1440_v61 }
 0x1b6   : > { %v1709_v29 = vpop.f32.mrf.mxu1  ;;  %v3633_v30 = vpop.f32.mrf.mxu0 }
 0x1b8   : > { %v1748_v31 = vpop.f32.mrf.mxu0  ;;  %v1900_v32 = vpop.f32.mrf.mxu1 }
 0x1ba   : > { %v3634_v33 = vpop.f32.mrf.mxu0  ;;  %v1902_v34 = vpop.f32.mrf.mxu1 }
 0x1bc   : > { %v1904_v35 = vpop.f32.mrf.mxu1  ;;  %v1941_v36 = vpop.f32.mrf.mxu0 }
 0x1be   : > { %v1905_v37 = vpop.f32.mrf.mxu1  ;;  %v4330_v38 = vpop.f32.mrf.mxu0 }
 0x1c0   : > { %v1945_v39 = vpop.f32.mrf.mxu0  ;;  %v4332_v40 = vpop.f32.mrf.mxu1 }
 0x1c1   : > { %v2070_v39 = vadd.f32 %v1900_v32, %v4312_v2  ;;  %v2072_v2 = vadd.f32 %v1941_v36, %v4316_v10 }
 0x1c2   : > { %v1946_v41 = vpop.f32.mrf.mxu0  ;;  %v4334_v42 = vpop.f32.mrf.mxu1 }
 0x1c3   : > { %v3054_v41 = vsub.s32 0, %v3764_v3 }
 0x1c4   : > { %v1986_v43 = vpop.f32.mrf.mxu1  ;;  %v4336_v44 = vpop.f32.mrf.mxu0 }
 0x1c6   : > { %v1987_v45 = vpop.f32.mrf.mxu1  ;;  %v4338_v46 = vpop.f32.mrf.mxu0 }
 0x1c8   : > { %v2027_v47 = vpop.f32.mrf.mxu0  ;;  %v4340_v48 = vpop.f32.mrf.mxu1 }
 0x1c9   : > { %v4363_v47 = vld [vmem:[%s4504_s5] sm:$0xff] }
 0x1ca   : > { %v2028_v49 = vpop.f32.mrf.mxu0  ;;  %v3639_v50 = vpop.f32.mrf.mxu1 }
 0x1cb   : > { %v3058_v49 = vsub.s32 1, %v3764_v3  ;;  %v2071_v50 = vadd.f32 %v1902_v34, %v4314_v7  ;;  %v3070_v7 = vsub.s32 4, %v3764_v3  ;;  %v3074_v34 = vsub.s32 5, %v3764_v3 }
 0x1cc   : > { %v2067_v51 = vpop.f32.mrf.mxu1  ;;  %v2223_v53 = vpop.f32.mrf.mxu0 }
 0x1cd   : > { %v2393_v51 = vadd.f32 %v2223_v53, %v2070_v39  ;;  %v2073_v53 = vadd.f32 %v4330_v38, %v4318_v13  ;;  %v2075_v13 = vadd.f32 %v4334_v42, %v4322_v21  ;;  %v2076_v21 = vadd.f32 %v4336_v44, %v4324_v19 }
 0x1ce   : > { %v3640_v54 = vpop.f32.mrf.mxu1  ;;  %v2225_v55 = vpop.f32.mrf.mxu0 }
 0x1cf   : > { %v2394_v32 = vadd.f32 %v2225_v55, %v2071_v50 }
 0x1d0   : > { %v2227_v56 = vpop.f32.mrf.mxu0  ;;  %v2264_v57 = vpop.f32.mrf.mxu1 }
 0x1d1   : > { %v2395_v10 = vadd.f32 %v2264_v57, %v2072_v2 }
 0x1d2   : > { %v2228_v58 = vpop.f32.mrf.mxu0  ;;  %v2266_v59 = vpop.f32.mrf.mxu1 }
 0x1d3   : > { %v3062_v58 = vsub.s32 2, %v3764_v3 }
 0x1d4   : > { %v2268_v60 = vpop.f32.mrf.mxu1  ;;  %v2305_v61 = vpop.f32.mrf.mxu0 }
 0x1d6   : > { %v2269_v62 = vpop.f32.mrf.mxu1  ;;  %v4342_v63 = vpop.f32.mrf.mxu0 }
 0x1d7   : > { %v4370_v62 = vrot.slane %v4363_v47, %v3054_v41  ;;  %v2398_v42 = vadd.f32 %v4342_v63, %v2075_v13 }
 0x1d8   : > { %v2309_v0 = vpop.f32.mrf.mxu0  ;;  %v4344_v1 = vpop.f32.mrf.mxu1 }
 0x1d9   : > { %v2399_v19 = vadd.f32 %v4344_v1, %v2076_v21 }
 0x1da   : > { %v2310_v4 = vpop.f32.mrf.mxu0  ;;  %v4346_v6 = vpop.f32.mrf.mxu1 }
 0x1dc   : > { %v2350_v8 = vpop.f32.mrf.mxu1  ;;  %v4348_v9 = vpop.f32.mrf.mxu0 }
 0x1dd   : > { %v4373_v8 = vrot.slane %v4363_v47, %v3058_v49 }
 0x1de   : > { %v2351_v11 = vpop.f32.mrf.mxu1  ;;  %v3645_v12 = vpop.f32.mrf.mxu0 }
 0x1df   : > { %v3066_v11 = vsub.s32 3, %v3764_v3  ;;  %v2074_v12 = vadd.f32 %v4332_v40, %v4320_v17  ;;  %v4397_v40 = vrot.slane %v4363_v47, %v3070_v7 }
 0x1e0   : > { %v2390_v15 = vpop.f32.mrf.mxu0  ;;  %v2546_v16 = vpop.f32.mrf.mxu1 }
 0x1e1   : > { %v2716_v60 = vadd.f32 %v2546_v16, %v2393_v51  ;;  %v2397_v38 = vadd.f32 %v2305_v61, %v2074_v12  ;;  %v4394_v17 = vrot.slane %v4363_v47, %v3066_v11 }
 0x1e2   : > { %v3646_v18 = vpop.f32.mrf.mxu0  ;;  %v2548_v20 = vpop.f32.mrf.mxu1 }
 0x1e3   : > { %v2717_v36 = vadd.f32 %v2548_v20, %v2394_v32  ;;  %v4385_v18 = vrot.slane %v4363_v47, %v3062_v58 }
 0x1e4   : > { %v2550_v27 = vpop.f32.mrf.mxu1  ;;  %v2587_v22 = vpop.f32.mrf.mxu0 }
 0x1e5   : > { %v2396_v27 = vadd.f32 %v2266_v59, %v2073_v53 }
 0x1e6   : > { %v2551_v14 = vpop.f32.mrf.mxu1  ;;  %v2589_v23 = vpop.f32.mrf.mxu0 }
 0x1e7   : > { %v2718_v14 = vadd.f32 %v2587_v22, %v2395_v10 }
 0x1e8   : > { %v2591_v25 = vpop.f32.mrf.mxu0  ;;  %v2628_v26 = vpop.f32.mrf.mxu1 }
 0x1e9   : > { %v2720_v61 = vadd.f32 %v2628_v26, %v2397_v38 }
 0x1ea   : > { %v2592_v29 = vpop.f32.mrf.mxu0  ;;  %v4350_v30 = vpop.f32.mrf.mxu1 }
 0x1eb   : > { %v2721_v58 = vadd.f32 %v4350_v30, %v2398_v42 }
 0x1ec   : > { %v2632_v31 = vpop.f32.mrf.mxu1  ;;  %v4352_v33 = vpop.f32.mrf.mxu0 }
 0x1ed   : > { %v2719_v31 = vadd.f32 %v2589_v23, %v2396_v27 }
 0x1ee   : > { %v2633_v35 = vpop.f32.mrf.mxu1  ;;  %v4354_v37 = vpop.f32.mrf.mxu0 }
 0x1ef   : > { %v4404_v35 = vrot.slane %v4363_v47, %v3074_v34 }
 0x1f0   : > { %v2673_v43 = vpop.f32.mrf.mxu0  ;;  %v4358_v45 = vpop.f32.mrf.mxu1 }
 0x1f1   : > { %v3078_v43 = vsub.s32 6, %v3764_v3 }
 0x1f2   : > { %v2674_v54 = vpop.f32.mrf.mxu0  ;;  %v3651_v56 = vpop.f32.mrf.mxu1 }
 0x1f3   : > { %v2077_v54 = vadd.f32 %v4338_v46, %v4326_v24  ;;  %v3082_v56 = vsub.s32 7, %v3764_v3  ;;  %v4428_v11 = vrot.slane %v4363_v47, %v3078_v43  ;;  %v2722_v3 = vadd.f32 %v4352_v33, %v2399_v19  ;;  %v3127_v19 = vld [vmem:[%s4501_s2] sm:$0xf] }
 0x1f4   : > { %v2713_v0 = vpop.f32.mrf.mxu1  ;;  %v2869_v4 = vpop.f32.mrf.mxu0 }
 0x1f5   : > { %v4380_v55 = vadd.f32 %v2869_v4, %v2716_v60  ;;  %v2078_v0 = vadd.f32 %v4340_v48, %v4328_v28  ;;  %v2400_v24 = vadd.f32 %v4346_v6, %v2077_v54  ;;  %v4435_v48 = vrot.slane %v4363_v47, %v3082_v56 }
 0x1f6   : > { %v3652_v15 = vpop.f32.mrf.mxu1  ;;  %v2871_v16 = vpop.f32.mrf.mxu0 }
 0x1f7   : > { %v3097_v25 = vmul.f32 %v4370_v62, %v4380_v55  ;;  %v4389_v29 = vadd.f32 %v2871_v16, %v2717_v36  ;;  %v2401_v53 = vadd.f32 %v4348_v9, %v2078_v0  ;;  %v2723_v6 = vadd.f32 %v4354_v37, %v2400_v24  ;;  %v3572_v37 = vld [vmem:[%s4504_s5 + $0x8] ss:$0 sm:$0xff] }
 0x1f8   : > { %v2873_v57 = vpop.f32.mrf.mxu0  ;;  %v2910_v20 = vpop.f32.mrf.mxu1 }
 0x1f9   : > { %v3098_v59 = vmul.f32 %v4373_v8, %v4389_v29  ;;  %v4401_v22 = vadd.f32 %v2910_v20, %v2718_v14  ;;  %v3107_v23 = vsel %vm3106_vm12, %v3097_v25, 0.0  ;;  %v2724_v25 = vadd.f32 %v4358_v45, %v2401_v53 }
 0x1fa   : > { %v2874_v39 = vpop.f32.mrf.mxu0  ;;  %v2912_v41 = vpop.f32.mrf.mxu1 }
 0x1fb   : > { %v3108_v49 = vsel %vm3106_vm12, %v3098_v59, 0.0  ;;  %v3099_v50 = vmul.f32 %v4385_v18, %v4401_v22  ;;  %v4414_v51 = vadd.f32 %v2912_v41, %v2719_v31 }
 0x1fc   : > { %v3109_v44 = vadd.f32 %v3108_v49, %v3107_v23  ;;  %v2914_v63 = vpop.f32.mrf.mxu1  ;;  %v2951_v26 = vpop.f32.mrf.mxu0 }
 0x1fd   : > { %v3110_v2 = vsel %vm3106_vm12, %v3099_v50, 0.0  ;;  %v3100_v32 = vmul.f32 %v4394_v17, %v4414_v51  ;;  %v3043_v60 = vadd.f32 %v2951_v26, %v2720_v61 }
 0x1fe   : > { %v3111_v46 = vadd.f32 %v3110_v2, %v3109_v44  ;;  %v2915_v1 = vpop.f32.mrf.mxu1  ;;  %v2953_v4 = vpop.f32.mrf.mxu0 }
 0x1ff   : > { %v3112_v30 = vsel %vm3106_vm12, %v3100_v32, 0.0  ;;  %v3101_v7 = vmul.f32 %v4397_v40, %v3043_v60  ;;  %v3044_v34 = vadd.f32 %v2953_v4, %v2721_v58 }
 0x200   : > { %v3113_v10 = vadd.f32 %v3112_v30, %v3111_v46  ;;  %v2955_v36 = vpop.f32.mrf.mxu0  ;;  %v2992_v28 = vpop.f32.mrf.mxu1 }
 0x201   : > { %v3114_v12 = vsel %vm3106_vm12, %v3101_v7, 0.0  ;;  %v3102_v15 = vmul.f32 %v4404_v35, %v3044_v34  ;;  %v3045_v33 = vadd.f32 %v2992_v28, %v2722_v3 }
 0x202   : > { %v3115_v16 = vadd.f32 %v3114_v12, %v3113_v10  ;;  %v2956_v27 = vpop.f32.mrf.mxu0  ;;  %v2994_v14 = vpop.f32.mrf.mxu1 }
 0x203   : > { %v3116_v9 = vsel %vm3106_vm12, %v3102_v15, 0.0  ;;  %v3103_v13 = vmul.f32 %v4428_v11, %v3045_v33  ;;  %v3046_v38 = vadd.f32 %v2994_v14, %v2723_v6 }
 0x204   : > { %v3117_v57 = vadd.f32 %v3116_v9, %v3115_v16  ;;  %v2996_v47 = vpop.f32.mrf.mxu1  ;;  %v3033_v20 = vpop.f32.mrf.mxu0 }
 0x205   : > { %v3118_v31 = vsel %vm3106_vm12, %v3103_v13, 0.0  ;;  %v3104_v59 = vmul.f32 %v4435_v48, %v3046_v38  ;;  %v3047_v21 = vadd.f32 %v3033_v20, %v2724_v25 }
 0x206   : > { %v2997_v42 = vpop.f32.mrf.mxu1  ;;  %v3657_v61 = vpop.f32.mrf.mxu0  ;;  %v3119_v45 = vadd.f32 %v3118_v31, %v3117_v57 }
 0x207   : > { %v3105_v39 = vmul.f32 %v3572_v37, %v3047_v21  ;;  %v3120_v41 = vsel %vm3106_vm12, %v3104_v59, 0.0 }
 0x208   : > { %v3036_v43 = vpop.f32.mrf.mxu0  ;;  %v3121_v23 = vadd.f32 %v3120_v41, %v3119_v45  ;;  %v3359_v45 = vld [vmem:[%s4503_s4] sm:$0xf] }
 0x209   : > { %v3123_v49 = vsel %vm3122_vm13, %v3105_v39, 0.0 }
 0x20a   : > { %v3658_v50 = vpop.f32.mrf.mxu0  ;;  %v3124_v54 = vadd.f32 %v3123_v49, %v3121_v23 }
 0x20c   : > { %3125 = vadd.xlane.f32.xlu1 %v3124_v54 }
 0x295   : > { %v3126_v44 = vpop.xlane.xlu1 %3125 }
 0x296   : > { %3660 = vmatpush3.msk.msra.mxu1 %vm3106_vm12, %v3126_v44 }
 0x297   : > { %3662 = vmatmul.mubr.msk.f32.vlgmr.msra.gmra.mxu1 %vm3128_vm14, %v3127_v19  ;;  %3664 = vmatprep.subr.mxu1 %v3717_v52 }
 0x298   : > { %3666 = vmatprep.mubr.msk.f32.mxu1 %vm3718_vm4, %v3717_v52 }
 0x357   : > { %v3201_v63 = vpop.f32.mrf.mxu1 }
 0x358   : > { %3207 = vperm.xlu0 %3692, %v3201_v63  }
 0x359   : > { %v3663_v26 = vpop.f32.mrf.mxu1 }
 0x3d3   : > { %v3208_v56 = vpop.permute.xlu0 %3207 }
 0x3d4   : > { %v3210_v58 = vsub.f32 %v4380_v55, %v3208_v56  ;;  %v3211_v2 = vsub.f32 %v4389_v29, %v3208_v56  ;;  %v3212_v32 = vsub.f32 %v4401_v22, %v3208_v56  ;;  %v3213_v0 = vsub.f32 %v4414_v51, %v3208_v56 }
 0x3d5   : > { %v3214_v24 = vsub.f32 %v3043_v60, %v3208_v56  ;;  %v3215_v52 = vsub.f32 %v3044_v34, %v3208_v56  ;;  %v3216_v53 = vsub.f32 %v3045_v33, %v3208_v56  ;;  %v3217_v10 = vsub.f32 %v3046_v38, %v3208_v56 }
 0x3d6   : > { %v3219_v46 = vmul.f32 %v3210_v58, %v4370_v62  ;;  %v3220_v1 = vmul.f32 %v3211_v2, %v4373_v8  ;;  %v3221_v4 = vmul.f32 %v3212_v32, %v4385_v18  ;;  %v3222_v3 = vmul.f32 %v3213_v0, %v4394_v17 }
 0x3d7   : > { %v3223_v55 = vmul.f32 %v3214_v24, %v4397_v40  ;;  %v3224_v51 = vmul.f32 %v3215_v52, %v4404_v35  ;;  %v3218_v36 = vsub.f32 %v3047_v21, %v3208_v56  ;;  %v3225_v18 = vmul.f32 %v3216_v53, %v4428_v11 }
 0x3d8   : > { %v3228_v30 = vmul.f32 %v3219_v46, %v3219_v46  ;;  %v3229_v7 = vmul.f32 %v3220_v1, %v3220_v1  ;;  %v3230_v29 = vmul.f32 %v3221_v4, %v3221_v4  ;;  %v3231_v60 = vmul.f32 %v3222_v3, %v3222_v3 }
 0x3d9   : > { %v3232_v34 = vmul.f32 %v3223_v55, %v3223_v55  ;;  %v3226_v6 = vmul.f32 %v3217_v10, %v4435_v48  ;;  %v3233_v40 = vmul.f32 %v3224_v51, %v3224_v51  ;;  %v3227_v33 = vmul.f32 %v3572_v37, %v3218_v36  ;;  %v3344_v37 = vld [vmem:[%s4502_s3] sm:$0xf] }
 0x3da   : > { %v3237_v22 = vsel %vm3106_vm12, %v3228_v30, 0.0  ;;  %v3238_v62 = vsel %vm3106_vm12, %v3229_v7, 0.0  ;;  %v3240_v17 = vsel %vm3106_vm12, %v3230_v29, 0.0  ;;  %v3242_v12 = vsel %vm3106_vm12, %v3231_v60, 0.0 }
 0x3db   : > { %v3239_v8 = vadd.f32 %v3238_v62, %v3237_v22  ;;  %v3234_v16 = vmul.f32 %v3225_v18, %v3225_v18  ;;  %v3244_v35 = vsel %vm3106_vm12, %v3232_v34, 0.0  ;;  %v3235_v14 = vmul.f32 %v3226_v6, %v3226_v6 }
 0x3dc   : > { %v3246_v25 = vsel %vm3106_vm12, %v3233_v40, 0.0  ;;  %v3236_v11 = vmul.f32 %v3227_v33, %v3227_v33 }
 0x3dd   : > { %v3241_v28 = vadd.f32 %v3240_v17, %v3239_v8  ;;  %v3248_v13 = vsel %vm3106_vm12, %v3234_v16, 0.0  ;;  %v3250_v57 = vsel %vm3106_vm12, %v3235_v14, 0.0 }
 0x3de   : > { %v3252_v47 = vsel %vm3122_vm13, %v3236_v11, 0.0 }
 0x3df   : > { %v3243_v15 = vadd.f32 %v3242_v12, %v3241_v28 }
 0x3e1   : > { %v3245_v27 = vadd.f32 %v3244_v35, %v3243_v15 }
 0x3e3   : > { %v3247_v9 = vadd.f32 %v3246_v25, %v3245_v27 }
 0x3e5   : > { %v3249_v38 = vadd.f32 %v3248_v13, %v3247_v9 }
 0x3e7   : > { %v3251_v48 = vadd.f32 %v3250_v57, %v3249_v38 }
 0x3e9   : > { %v3253_v20 = vadd.f32 %v3252_v47, %v3251_v48 }
 0x3eb   : > { %3254 = vadd.xlane.f32.xlu0 %v3253_v20 }
 0x401   : > { %3347 = vperm.xlu0 %3692, %v3344_v37  }
 0x474   : > { %v3255_v31 = vpop.xlane.xlu0 %3254 }
 0x475   : > { %3665 = vmatpush3.msk.msra.mxu1 %vm3106_vm12, %v3255_v31 }
 0x476   : > { %3667 = vmatmul.mubr.msk.f32.vlgmr.msra.gmra.mxu1 %vm3128_vm14, %v3127_v19 }
 0x47c   : > { %v3348_v50 = vpop.permute.xlu0 %3347 }
 0x536   : > { %v3325_v59 = vpop.f32.mrf.mxu1 }
 0x537   : > { %v3326_v21 = vadd.f32 1e-05, %v3325_v59 }
 0x538   : > { %v3668_v42 = vpop.f32.mrf.mxu1 }
 0x539   : > { %3696 = vrsqrt.f32 %v3326_v21 }
 0x546   : > { %v3697_v61 = vpop.eup %3696 }
 0x547   : > { %3332 = vperm.xlu1 %3693, %v3697_v61  }
 0x54b   : > { %3362 = vperm.xlu1 %3693, %v3359_v45  }
 0x5c2   : > { %v3333_v39 = vpop.permute.xlu1 %3332 }
 0x5c3   : > { %v3335_v41 = vmul.f32 %v3333_v39, %v3210_v58  ;;  %v3336_v43 = vmul.f32 %v3333_v39, %v3211_v2  ;;  %v3337_v23 = vmul.f32 %v3333_v39, %v3212_v32  ;;  %v3338_v49 = vmul.f32 %v3333_v39, %v3213_v0 }
 0x5c4   : > { %v3339_v54 = vmul.f32 %v3333_v39, %v3214_v24  ;;  %v3340_v44 = vmul.f32 %v3333_v39, %v3215_v52  ;;  %v3341_v19 = vmul.f32 %v3333_v39, %v3216_v53  ;;  %v3342_v63 = vmul.f32 %v3333_v39, %v3217_v10 }
 0x5c5   : > { %v3343_v26 = vmul.f32 %v3333_v39, %v3218_v36  ;;  %v3350_v56 = vmul.f32 %v3348_v50, %v3335_v41  ;;  %v3351_v46 = vmul.f32 %v3348_v50, %v3336_v43  ;;  %v3352_v1 = vmul.f32 %v3348_v50, %v3337_v23 }
 0x5c6   : > { %v3353_v4 = vmul.f32 %v3348_v50, %v3338_v49  ;;  %v3354_v3 = vmul.f32 %v3348_v50, %v3339_v54  ;;  %v3355_v30 = vmul.f32 %v3348_v50, %v3340_v44  ;;  %v3356_v7 = vmul.f32 %v3348_v50, %v3341_v19  ;;  %v3363_v55 = vpop.permute.xlu1 %3362 }
 0x5c7   : > { %v3357_v29 = vmul.f32 %v3348_v50, %v3342_v63  ;;  %v3358_v58 = vmul.f32 %v3348_v50, %v3343_v26  ;;  %v3365_v2 = vadd.f32 %v3363_v55, %v3350_v56  ;;  %v3366_v32 = vadd.f32 %v3363_v55, %v3351_v46 }
 0x5c8   : > { %v3367_v0 = vadd.f32 %v3363_v55, %v3352_v1  ;;  %v3368_v22 = vadd.f32 %v3363_v55, %v3353_v4  ;;  %v3369_v24 = vadd.f32 %v3363_v55, %v3354_v3  ;;  %v3370_v52 = vadd.f32 %v3363_v55, %v3355_v30 }
 0x5c9   : > { %v3371_v53 = vadd.f32 %v3363_v55, %v3356_v7  ;;  %v3372_v10 = vadd.f32 %v3363_v55, %v3357_v29  ;;  %v3373_v51 = vadd.f32 %v3363_v55, %v3358_v58  ;;  %v3374_v60 = vmax.f32 %v3365_v2, 0.0 }
 0x5ca   : > { %v3375_v62 = vmax.f32 %v3366_v32, 0.0  ;;  %v3376_v8 = vmax.f32 %v3367_v0, 0.0  ;;  %v3377_v36 = vmax.f32 %v3368_v22, 0.0  ;;  %v3378_v18 = vmax.f32 %v3369_v24, 0.0 }
 0x5cb   : > { %v3379_v34 = vmax.f32 %v3370_v52, 0.0  ;;  %v3380_v17 = vmax.f32 %v3371_v53, 0.0  ;;  %v3381_v28 = vmax.f32 %v3372_v10, 0.0  ;;  %v3382_v6 = vmax.f32 %v3373_v51, 0.0 }
 0x5cc   : > { %v3577_v40 = vpack.c.bf16 %v3375_v62, %v3374_v60  ;;  %v3578_v12 = vpack.c.bf16 %v3377_v36, %v3376_v8 }
 0x5cd   : > { %v3391_v15 = vpack.c.bf16 %v3382_v6, %v3382_v6  ;;  %v3579_v33 = vpack.c.bf16 %v3379_v34, %v3378_v18  ;;  %v3580_v16 = vpack.c.bf16 %v3381_v28, %v3380_v17 }
 0x5ce   : > { %v3409_v35 = vrot.slane %v3577_v40, %v3768_v5  ;;  %v3416_v27 = vrot.slane %v3578_v12, %v3768_v5 }
 0x5cf   : > { %v3426_v14 = vrot.slane %v3579_v33, %v3768_v5  ;;  %v3433_v25 = vrot.slane %v3580_v16, %v3768_v5  ;;  %v3441_v9 = vrot.slane %v3391_v15, %v3768_v5 }
 0x5d0   : > { %v3417_v11 = vcombine.low %v3409_v35, %v3416_v27 }
 0x5d1   : > { %v3434_v13 = vcombine.low %v3426_v14, %v3433_v25  ;;  %3448 = vst.msk [vmem:[%s251_s20 + $0x10] sm:$0x3] %vm3447_vm15, %v3441_v9 }
 0x5d2   : > { %3445 = vst [vmem:[%s251_s20] sm:$0xff] %v3417_v11 }
 0x5d3   : > { %3446 = vst [vmem:[%s251_s20 + $0x8] sm:$0xff] %v3434_v13 }
 0x5d4 PF: > { %s16_s21 = sadd.s32 1, %s3704_s21  }
 0x5d5   : > { %p13_p4 = scmp.ge.s32.totalorder %s16_s21, 4  }
 0x5d7   :  { %15 = sbr.rel (!%p13_p4) target bundleno = 1 (0x1), region = 82 }

// kernel: encoder_forward.10
= control target key start
LH: loop header
LB: loop body
LE: loop exit
PB: predicated region body
PF: predicated region fallthrough
CT: control target
= control target key end

     0   :  { %s1097_s21 = smov 0   ;;  %s1180_s0 = inlined_call_operand.vmem [shape: bf16[2,16,306], index: 0, kind: input, shape index: {}]   ;;  %s1181_s1 = inlined_call_operand.vmem [shape: bf16[4,8,16], index: 1, kind: input, shape index: {}]   ;;  %s1182_s2 = inlined_call_operand.vmem [shape: f32[8,8], index: 2, kind: input, shape index: {}]   ;;  %s1183_s3 = inlined_call_operand.vmem [shape: f32[8,1], index: 3, kind: input, shape index: {}]   ;;  %s1184_s4 = inlined_call_operand.vmem [shape: f32[8,1], index: 4, kind: input, shape index: {}]   ;;  %s1185_s5 = inlined_call_operand.vmem [shape: f32[1,272], index: 5, kind: input, shape index: {}]   ;;  %s1186_s6 = inlined_call_operand.vmem [shape: bf16[2,8,272], index: 6, kind: output, shape index: {}]  }
   0x1 LB: > { %s949_s22 = sadd.s32 4294967295, %s1054_s21   ;;  %p953_p0 = scmp.ge.s32.totalorder %s1054_s21, 1  ;;  %s1054_s21 = sphi %s1097_s21, %s16_s21  }
   0x2   : > { %p212_p1 = scmp.lt.s32.totalorder %s1054_s21, 3 }
   0x4   : > { %p213_p2 = pnand %p953_p0, %p212_p1 }
   0x5   : > { %p242_p3 = scmp.lt.s32.totalorder (!%p213_p2), %s949_s22, 1  ;;  %s1059_s27 = smov (!%p213_p2), 127  }
   0x6   : > { %216 = sbr.rel (%p213_p2) target bundleno = 1316 (0x524), region = 44  ;;  %s1060_s28 = smov (!%p213_p2), 111  }
   0x7   : > { %s1061_s29 = smov (!%p213_p2), 110  }
   0xb   : > { %v1056_v0 = vmov 0.0   ;;  %s1188_s22 = smov (!%p242_p3, %s949_s22), 1  ;;  %vm1057_vm0 = vmmov 0   ;;  %v1058_v1 = vmov 0   ;;  %vm279_vm1 = vcmask 1039360  }
   0xc   : > { %990 = vmatprep.subr.bf16.mxu1 %v1056_v0  ;;  %992 = vmatprep.mubr.msk.bf16.mxu1 %vm1057_vm0, %v1056_v0  ;;  %s1024_s23 = smul.u32 24, %s1188_s22  ;;  %v956_v9 = vld [vmem:[%s1181_s1 + $0x4] sm:$0xf]  ;;  %vm285_vm2 = vcmask 130048   ;;  %vm465_vm3 = vcmask 908288   ;;  %vm566_vm4 = vcmask 900096   ;;  %v661_v39 = vlaneseq }
   0xd   : > { %321 = vmatprep.mubr.bf16.mxu0 %v1058_v1  ;;  %1040 = vset.pattern.permute.xlu0 %v1058_v1  ;;  %v257_v15 = vld [vmem:[%s1181_s1] sm:$0xf]  ;;  %v964_v20 = vld [vmem:[%s1181_s1 + $0x8] sm:$0xf]  ;;  %v967_v23 = vld [vmem:[%s1181_s1 + $0xc] sm:$0xf] }
   0xe   : > { %1041 = vset.pattern.permute.xlu1 %v1058_v1  ;;  %s246_s26 = scalar_lea.vmem %s1180_s0, %s1024_s23  ;;  %v662_v44 = vshrl.u32 %v661_v39, 7  ;;  %v659_v52 = vld [vmem:[%s1185_s5] sm:$0x7]  ;;  %vm685_vm5 = vcmask 64512   ;;  %s1025_s24 = smul.u32 12, %s1188_s22  ;;  %vm892_vm6 = vcmask 125952  }
   0xf   : > { %v1042_v2 = vld [vmem:[%s246_s26 + $0x4] ss:$12 sps:$4 sm:$0xff]   ;;  %v1044_v3 = vld [vmem:[%s246_s26] ss:$12 sps:$4 sm:$0xff]   ;;  %v1045_v4 = vld [vmem:[%s246_s26 + $0x8] ss:$12 sps:$4 sm:$0xff]  }
  0x10   : > { %275 = vrot.lane.b32.xlu0 %v1042_v2, %s1059_s27  ;;  %273 = vrot.lane.b32.xlu1 %v1044_v3, %s1059_s27  ;;  %v671_v50 = vsub.s32 2, %v662_v44  ;;  %v663_v53 = vsub.s32 0, %v662_v44  ;;  %v667_v54 = vsub.s32 1, %v662_v44  ;;  %v866_v39 = vld [vmem:[%s1184_s4] sm:$0xff] }
  0x12   : > { %v672_v61 = vrot.slane %v659_v52, %v671_v50 }
  0x14   : > { %277 = vrot.lane.b32.xlu0 %v1045_v4, %s1059_s27  ;;  %461 = vrot.lane.b32.xlu1 %v1042_v2, %s1060_s28  ;;  %s251_s27 = scalar_lea.vmem %s1186_s6, %s1025_s24 }
  0x18   : > { %463 = vrot.lane.b32.xlu0 %v1045_v4, %s1060_s28  ;;  %459 = vrot.lane.b32.xlu1 %v1044_v3, %s1060_s28 }
  0x1c   : > { %562 = vrot.lane.b32.xlu0 %v1042_v2, %s1061_s29  ;;  %564 = vrot.lane.b32.xlu1 %v1045_v4, %s1061_s29 }
  0x20   : > { %560 = vrot.lane.b32.xlu0 %v1044_v3, %s1061_s29 }
  0x82   : > { %v276_v5 = vpop.permute.xlu0 %275  ;;  %v274_v6 = vpop.permute.xlu1 %273 }
  0x83   : > { %v280_v11 = vsel %vm279_vm1, %v274_v6, %v276_v5 }
  0x86   : > { %v278_v7 = vpop.permute.xlu0 %277  ;;  %v462_v10 = vpop.permute.xlu1 %461 }
  0x87   : > { %991 = vmatpush3.bf16.msra.mxu1 %v278_v7  ;;  %v281_v8 = vsel %vm279_vm1, %v276_v5, %v278_v7 }
  0x88   : > { %303 = vmatprep.subr.bf16.mxu0 %v281_v8  ;;  %996 = vmatprep.subr.bf16.mxu1 %v1056_v0 }
  0x89   : > { %304 = vmatpush1.bf16.msra.mxu0 %v280_v11 }
  0x8a   : > { %993 = vmatmul.mubr.msk.bf16.vlgmr.msra.gmra.mxu1 %vm285_vm2, %v956_v9  ;;  %390 = vmatprep.subr.bf16.mxu0 %v1042_v2  ;;  %v464_v12 = vpop.permute.xlu0 %463  ;;  %v460_v14 = vpop.permute.xlu1 %459  ;;  %v664_v2 = vrot.slane %v659_v52, %v663_v53 }
  0x8b   : > { %997 = vmatpush3.bf16.msra.mxu1 %v1045_v4  ;;  %998 = vmatprep.mubr.msk.bf16.mxu1 %vm1057_vm0, %v1056_v0  ;;  %v467_v13 = vsel %vm465_vm3, %v462_v10, %v464_v12  ;;  %v466_v18 = vsel %vm465_vm3, %v460_v14, %v462_v10 }
  0x8c   : > { %960 = vmatmul.mubr.msk.bf16.vlgmr.msra.gmra.mxu0 %vm285_vm2, %v956_v9  ;;  %1002 = vmatprep.subr.bf16.mxu1 %v1056_v0 }
  0x8d   : > { %391 = vmatpush1.bf16.msra.mxu0 %v1044_v3  ;;  %408 = vmatprep.mubr.bf16.mxu0 %v1058_v1  ;;  %v668_v3 = vrot.slane %v659_v52, %v667_v54 }
  0x8e   : > { %488 = vmatprep.subr.bf16.mxu0 %v467_v13  ;;  %v565_v16 = vpop.permute.xlu1 %564  ;;  %v563_v17 = vpop.permute.xlu0 %562 }
  0x8f   : > { %v568_v19 = vsel %vm566_vm4, %v563_v17, %v565_v16 }
  0x92   : > { %999 = vmatmul.mubr.msk.bf16.vlgmr.msra.gmra.mxu1 %vm285_vm2, %v257_v15  ;;  %v561_v21 = vpop.permute.xlu0 %560 }
  0x93   : > { %1003 = vmatpush3.bf16.msra.mxu1 %v464_v12  ;;  %1004 = vmatprep.mubr.msk.bf16.mxu1 %vm1057_vm0, %v1056_v0  ;;  %v567_v22 = vsel %vm566_vm4, %v561_v21, %v563_v17 }
  0x94   : > { %962 = vmatmul.mubr.msk.bf16.vlgmr.msra.gmra.mxu0 %vm285_vm2, %v257_v15  ;;  %1008 = vmatprep.subr.bf16.mxu1 %v1056_v0 }
  0x95   : > { %489 = vmatpush1.bf16.msra.mxu0 %v466_v18  ;;  %506 = vmatprep.mubr.bf16.mxu0 %v1058_v1 }
  0x96   : > { %589 = vmatprep.subr.bf16.mxu0 %v568_v19 }
  0x9a   : > { %1005 = vmatmul.mubr.msk.bf16.vlgmr.msra.gmra.mxu1 %vm285_vm2, %v964_v20 }
  0x9b   : > { %1009 = vmatpush3.bf16.msra.mxu1 %v565_v16  ;;  %1010 = vmatprep.mubr.msk.bf16.mxu1 %vm1057_vm0, %v1056_v0  ;;  %v684_v16 = vld [vmem:[%s1182_s2] sm:$0xff] }
  0x9c   : > { %965 = vmatmul.mubr.msk.bf16.vlgmr.msra.gmra.mxu0 %vm285_vm2, %v964_v20  ;;  %1019 = vmatprep.subr.mxu1 %v1056_v0 }
  0x9d   : > { %590 = vmatpush1.bf16.msra.mxu0 %v567_v22  ;;  %607 = vmatprep.mubr.bf16.mxu0 %v1058_v1 }
  0x9e   : > { %1014 = vmatprep.subr.mxu0 %v1056_v0 }
  0xa2   : > { %1011 = vmatmul.mubr.msk.bf16.vlgmr.msra.gmra.mxu1 %vm285_vm2, %v967_v23 }
  0xa3   : > { %1021 = vmatprep.mubr.msk.f32.mxu1 %vm1057_vm0, %v1056_v0 }
  0xa4   : > { %968 = vmatmul.mubr.msk.bf16.vlgmr.msra.gmra.mxu0 %vm285_vm2, %v967_v23 }
  0xa5   : > { %1016 = vmatprep.mubr.msk.f32.mxu0 %vm1057_vm0, %v1056_v0 }
 0x14a   : > { %v364_v24 = vpop.f32.mrf.mxu1 }
 0x14c   : > { %v323_v25 = vpop.f32.mrf.mxu0  ;;  %v994_v26 = vpop.f32.mrf.mxu1 }
 0x14e   : > { %v325_v27 = vpop.f32.mrf.mxu0  ;;  %v367_v28 = vpop.f32.mrf.mxu1 }
 0x150   : > { %v327_v29 = vpop.f32.mrf.mxu0  ;;  %v995_v30 = vpop.f32.mrf.mxu1 }
 0x152   : > { %v328_v31 = vpop.f32.mrf.mxu0  ;;  %v451_v32 = vpop.f32.mrf.mxu1 }
 0x153   : > { %v452_v47 = vadd.f32 %v451_v32, %v364_v24 }
 0x154   : > { %v410_v33 = vpop.f32.mrf.mxu0  ;;  %v1000_v34 = vpop.f32.mrf.mxu1 }
 0x155   : > { %v411_v51 = vadd.f32 %v410_v33, %v323_v25  ;;  %v857_v33 = vld [vmem:[%s1183_s3] sm:$0xff] }
 0x156   : > { %v412_v35 = vpop.f32.mrf.mxu0  ;;  %v454_v36 = vpop.f32.mrf.mxu1 }
 0x157   : > { %v413_v58 = vadd.f32 %v412_v35, %v325_v27 }
 0x158   : > { %v414_v37 = vpop.f32.mrf.mxu0  ;;  %v1001_v38 = vpop.f32.mrf.mxu1 }
 0x15a   : > { %v415_v40 = vpop.f32.mrf.mxu0  ;;  %v549_v41 = vpop.f32.mrf.mxu1 }
 0x15b   : > { %v557_v55 = vadd.f32 %v549_v41, %v452_v47 }
 0x15c   : > { %v508_v42 = vpop.f32.mrf.mxu0  ;;  %v1006_v43 = vpop.f32.mrf.mxu1 }
 0x15d   : > { %v555_v59 = vadd.f32 %v508_v42, %v411_v51 }
 0x15e   : > { %v510_v45 = vpop.f32.mrf.mxu0  ;;  %v552_v46 = vpop.f32.mrf.mxu1 }
 0x15f   : > { %v556_v0 = vadd.f32 %v510_v45, %v413_v58 }
 0x160   : > { %v512_v48 = vpop.f32.mrf.mxu0  ;;  %v1007_v49 = vpop.f32.mrf.mxu1 }
 0x162   : > { %v513_v56 = vpop.f32.mrf.mxu0  ;;  %v650_v57 = vpop.f32.mrf.mxu1 }
 0x163   : > { %v658_v60 = vadd.f32 %v650_v57, %v557_v55 }
 0x164   : > { %v609_v62 = vpop.f32.mrf.mxu0  ;;  %v1012_v63 = vpop.f32.mrf.mxu1 }
 0x165   : > { %v656_v1 = vadd.f32 %v609_v62, %v555_v59  ;;  %v678_v7 = vmul.f32 %v672_v61, %v658_v60 }
 0x166   : > { %v611_v4 = vpop.f32.mrf.mxu0  ;;  %v653_v5 = vpop.f32.mrf.mxu1 }
 0x167   : > { %v657_v6 = vadd.f32 %v611_v4, %v556_v0  ;;  %v676_v10 = vmul.f32 %v664_v2, %v656_v1  ;;  %v680_v14 = vsel %vm285_vm2, %v678_v7, 0.0 }
 0x168   : > { %v613_v8 = vpop.f32.mrf.mxu0  ;;  %v1013_v9 = vpop.f32.mrf.mxu1 }
 0x169   : > { %v677_v11 = vmul.f32 %v668_v3, %v657_v6 }
 0x16a   : > { %v614_v12 = vpop.f32.mrf.mxu0 }
 0x16b   : > { %v679_v13 = vadd.f32 %v677_v11, %v676_v10 }
 0x16d   : > { %v681_v15 = vadd.f32 %v680_v14, %v679_v13 }
 0x16f   : > { %682 = vadd.xlane.f32.xlu1 %v681_v15 }
 0x1f8   : > { %v683_v17 = vpop.xlane.xlu1 %682 }
 0x1f9   : > { %1015 = vmatpush3.msra.mxu0 %v683_v17 }
 0x1fa   : > { %1017 = vmatmul.mubr.msk.f32.vlgmr.msra.gmra.mxu0 %vm685_vm5, %v684_v16 }
 0x2ba   : > { %v755_v18 = vpop.f32.mrf.mxu0 }
 0x2bb   : > { %761 = vperm.xlu0 %1040, %v755_v18  }
 0x2bc   : > { %v1018_v19 = vpop.f32.mrf.mxu0 }
 0x336   : > { %v762_v20 = vpop.permute.xlu0 %761 }
 0x337   : > { %v764_v21 = vsub.f32 %v656_v1, %v762_v20  ;;  %v765_v22 = vsub.f32 %v657_v6, %v762_v20  ;;  %v766_v23 = vsub.f32 %v658_v60, %v762_v20 }
 0x339   : > { %v767_v24 = vmul.f32 %v764_v21, %v664_v2  ;;  %v768_v25 = vmul.f32 %v765_v22, %v668_v3  ;;  %v769_v26 = vmul.f32 %v766_v23, %v672_v61 }
 0x33b   : > { %v770_v27 = vmul.f32 %v767_v24, %v767_v24  ;;  %v771_v28 = vmul.f32 %v768_v25, %v768_v25  ;;  %v772_v29 = vmul.f32 %v769_v26, %v769_v26 }
 0x33d   : > { %v773_v30 = vadd.f32 %v771_v28, %v770_v27  ;;  %v774_v31 = vsel %vm285_vm2, %v772_v29, 0.0 }
 0x33f   : > { %v775_v32 = vadd.f32 %v774_v31, %v773_v30 }
 0x341   : > { %776 = vadd.xlane.f32.xlu0 %v775_v32 }
 0x357   : > { %860 = vperm.xlu0 %1040, %v857_v33  }
 0x3ca   : > { %v777_v34 = vpop.xlane.xlu0 %776 }
 0x3cb   : > { %1020 = vmatpush3.msra.mxu1 %v777_v34 }
 0x3cc   : > { %1022 = vmatmul.mubr.msk.f32.vlgmr.msra.gmra.mxu1 %vm685_vm5, %v684_v16 }
 0x3d2   : > { %v861_v44 = vpop.permute.xlu0 %860 }
 0x48c   : > { %v844_v35 = vpop.f32.mrf.mxu1 }
 0x48d   : > { %v845_v36 = vadd.f32 1e-05, %v844_v35 }
 0x48e   : > { %v1023_v37 = vpop.f32.mrf.mxu1 }
 0x48f   : > { %1046 = vrsqrt.f32 %v845_v36 }
 0x49c   : > { %v1047_v38 = vpop.eup %1046 }
 0x49d   : > { %851 = vperm.xlu1 %1041, %v1047_v38  }
 0x4a1   : > { %869 = vperm.xlu1 %1041, %v866_v39  }
 0x518   : > { %v852_v40 = vpop.permute.xlu1 %851 }
 0x519   : > { %v854_v41 = vmul.f32 %v852_v40, %v764_v21  ;;  %v855_v42 = vmul.f32 %v852_v40, %v765_v22  ;;  %v856_v43 = vmul.f32 %v852_v40, %v766_v23 }
 0x51b   : > { %v863_v45 = vmul.f32 %v861_v44, %v854_v41  ;;  %v864_v46 = vmul.f32 %v861_v44, %v855_v42  ;;  %v865_v47 = vmul.f32 %v861_v44, %v856_v43 }
 0x51c   : > { %v870_v48 = vpop.permute.xlu1 %869 }
 0x51d   : > { %v872_v49 = vadd.f32 %v870_v48, %v863_v45  ;;  %v873_v50 = vadd.f32 %v870_v48, %v864_v46  ;;  %v874_v51 = vadd.f32 %v870_v48, %v865_v47 }
 0x51f   : > { %v875_v52 = vmax.f32 %v872_v49, 0.0  ;;  %v876_v53 = vmax.f32 %v873_v50, 0.0  ;;  %v877_v54 = vmax.f32 %v874_v51, 0.0 }
 0x521   : > { %v976_v55 = vpack.c.bf16 %v876_v53, %v875_v52  ;;  %v977_v56 = vpack.c.bf16 %v877_v54, %v877_v54 }
 0x523   : > { %891 = vst [vmem:[%s251_s27] sm:$0xff] %v976_v55  ;;  %893 = vst.msk [vmem:[%s251_s27 + $0x8] sm:$0xf] %vm892_vm6, %v977_v56 }
 0x524 PF: > { %s16_s21 = sadd.s32 1, %s1054_s21  }
 0x525   : > { %p13_p4 = scmp.ge.s32.totalorder %s16_s21, 4  }
 0x527   :  { %15 = sbr.rel (!%p13_p4) target bundleno = 1 (0x1), region = 77 }

// kernel: encoder_forward.11
= control target key start
LH: loop header
LB: loop body
LE: loop exit
PB: predicated region body
PF: predicated region fallthrough
CT: control target
= control target key end

     0   :  { %s1722_s21 = smov 0   ;;  %s1880_s0 = inlined_call_operand.vmem [shape: bf16[2,8,342], index: 0, kind: input, shape index: {}]   ;;  %s1881_s1 = inlined_call_operand.vmem [shape: bf16[9,8,8], index: 1, kind: input, shape index: {}]   ;;  %s1882_s2 = inlined_call_operand.vmem [shape: f32[8,8], index: 2, kind: input, shape index: {}]   ;;  %s1883_s3 = inlined_call_operand.vmem [shape: f32[8,1], index: 3, kind: input, shape index: {}]   ;;  %s1884_s4 = inlined_call_operand.vmem [shape: f32[8,1], index: 4, kind: input, shape index: {}]   ;;  %s1885_s5 = inlined_call_operand.vmem [shape: f32[1,288], index: 5, kind: input, shape index: {}]   ;;  %s1886_s6 = inlined_call_operand.vmem [shape: bf16[2,8,288], index: 6, kind: output, shape index: {}]  }
   0x1 LB: > { %s1502_s22 = sadd.s32 4294967295, %s1674_s21   ;;  %p1506_p0 = scmp.ge.s32.totalorder %s1674_s21, 1  ;;  %s1674_s21 = sphi %s1722_s21, %s16_s21  }
   0x2   : > { %p212_p1 = scmp.lt.s32.totalorder %s1674_s21, 3 }
   0x4   : > { %p213_p2 = pnand %p1506_p0, %p212_p1 }
   0x5   : > { %p242_p3 = scmp.lt.s32.totalorder (!%p213_p2), %s1502_s22, 1  ;;  %s1679_s27 = smov (!%p213_p2), 127  }
   0x6   : > { %216 = sbr.rel (%p213_p2) target bundleno = 1358 (0x54e), region = 44  ;;  %s1680_s28 = smov (!%p213_p2), 126  }
   0x7   : > { %s1681_s29 = smov (!%p213_p2), 110   ;;  %s1682_s30 = smov (!%p213_p2), 109  }
   0x8   : > { %s1683_s7 = smov (!%p213_p2), 108   ;;  %s1684_s8 = smov (!%p213_p2), 92  }
   0x9   : > { %s1685_s9 = smov (!%p213_p2), 91   ;;  %s1686_s10 = smov (!%p213_p2), 90  }
   0xb   : > { %v1676_v0 = vmov 0.0   ;;  %vm1677_vm0 = vmmov 0   ;;  %s1888_s22 = smov (!%p242_p3, %s1502_s22), 1  ;;  %v1678_v1 = vmov 0   ;;  %vm279_vm1 = vcmask 1043456  }
   0xc   : > { %1577 = vmatprep.subr.bf16.mxu1 %v1676_v0  ;;  %1579 = vmatprep.mubr.msk.bf16.mxu1 %vm1677_vm0, %v1676_v0  ;;  %s1641_s23 = smul.u32 12, %s1888_s22  ;;  %v1509_v9 = vld [vmem:[%s1881_s1 + $0x4] sm:$0xf]  ;;  %vm275_vm2 = vcmask 64512   ;;  %vm272_vm3 = vcmask 1039360   ;;  %vm471_vm4 = vcmask 1031168  }
   0xd   : > { %321 = vmatprep.mubr.bf16.mxu0 %v1678_v1  ;;  %1661 = vset.pattern.permute.xlu1 %v1678_v1  ;;  %v255_v19 = vld [vmem:[%s1881_s1] sm:$0xf]  ;;  %vm578_vm5 = vcmask 900096   ;;  %v1519_v28 = vld [vmem:[%s1881_s1 + $0x8] sm:$0xf]  ;;  %vm685_vm6 = vcmask 891904  }
   0xe   : > { %1662 = vset.pattern.permute.xlu0 %v1678_v1  ;;  %s246_s26 = scalar_lea.vmem %s1880_s0, %s1641_s23  ;;  %v1523_v36 = vld [vmem:[%s1881_s1 + $0xc] sm:$0xf]  ;;  %vm792_vm7 = vcmask 883712   ;;  %v1527_v44 = vld [vmem:[%s1881_s1 + $0x10] sm:$0xf]  ;;  %vm899_vm8 = vcmask 752640   ;;  %s251_s18 = scalar_lea.vmem %s1886_s6, %s1641_s23 }
   0xf   : > { %v1663_v2 = vld [vmem:[%s246_s26 + $0x8] ss:$0 sps:$4 sm:$0xff]   ;;  %v253_v3 = vld [vmem:[%s246_s26] sm:$0xff]  ;;  %v1531_v52 = vld [vmem:[%s1881_s1 + $0x14] sm:$0xf]  ;;  %vm1006_vm9 = vcmask 744448  }
  0x10   : > { %v1510_v4 = vcombine.low %v253_v3, %v253_v3  ;;  %270 = vrot.lane.b32.xlu1 %v1663_v2, %s1679_s27  ;;  %v1511_v5 = vcombine.high %v253_v3, %v253_v3  ;;  %v380_v10 = vsel %vm279_vm1, %v1663_v2, 0  ;;  %v1535_v60 = vld [vmem:[%s1881_s1 + $0x18] sm:$0xf]  ;;  %vm1113_vm10 = vcmask 736256  }
  0x11   : > { %vm1233_vm11 = vcmask 261120   ;;  %vm1445_vm12 = vcmask 257024  }
  0x12   : > { %266 = vrot.lane.b32.xlu0 %v1510_v4, %s1679_s27  ;;  %v374_v17 = vsel %vm279_vm1, %v1510_v4, 0 }
  0x14   : > { %465 = vrot.lane.b32.xlu1 %v1510_v4, %s1680_s28 }
  0x16   : > { %268 = vrot.lane.b32.xlu0 %v1511_v5, %s1679_s27 }
  0x18   : > { %469 = vrot.lane.b32.xlu1 %v1663_v2, %s1680_s28 }
  0x1a   : > { %467 = vrot.lane.b32.xlu0 %v1511_v5, %s1680_s28 }
  0x1c   : > { %574 = vrot.lane.b32.xlu1 %v1511_v5, %s1681_s29 }
  0x1e   : > { %572 = vrot.lane.b32.xlu0 %v1510_v4, %s1681_s29 }
  0x20   : > { %679 = vrot.lane.b32.xlu1 %v1510_v4, %s1682_s30 }
  0x22   : > { %576 = vrot.lane.b32.xlu0 %v1663_v2, %s1681_s29 }
  0x24   : > { %683 = vrot.lane.b32.xlu1 %v1663_v2, %s1682_s30 }
  0x26   : > { %681 = vrot.lane.b32.xlu0 %v1511_v5, %s1682_s30 }
  0x28   : > { %788 = vrot.lane.b32.xlu1 %v1511_v5, %s1683_s7 }
  0x2a   : > { %786 = vrot.lane.b32.xlu0 %v1510_v4, %s1683_s7 }
  0x2c   : > { %893 = vrot.lane.b32.xlu1 %v1510_v4, %s1684_s8 }
  0x2e   : > { %790 = vrot.lane.b32.xlu0 %v1663_v2, %s1683_s7 }
  0x30   : > { %897 = vrot.lane.b32.xlu1 %v1663_v2, %s1684_s8 }
  0x32   : > { %895 = vrot.lane.b32.xlu0 %v1511_v5, %s1684_s8 }
  0x34   : > { %1002 = vrot.lane.b32.xlu1 %v1511_v5, %s1685_s9 }
  0x36   : > { %1000 = vrot.lane.b32.xlu0 %v1510_v4, %s1685_s9 }
  0x38   : > { %1107 = vrot.lane.b32.xlu1 %v1510_v4, %s1686_s10 }
  0x3a   : > { %1004 = vrot.lane.b32.xlu0 %v1663_v2, %s1685_s9 }
  0x3c   : > { %1111 = vrot.lane.b32.xlu1 %v1663_v2, %s1686_s10 }
  0x3e   : > { %1109 = vrot.lane.b32.xlu0 %v1511_v5, %s1686_s10 }
  0x82   : > { %v271_v6 = vpop.permute.xlu1 %270 }
  0x83   : > { %v287_v8 = vsel %vm279_vm1, %v271_v6, 0 }
  0x84   : > { %v267_v7 = vpop.permute.xlu0 %266  ;;  %1578 = vmatpush3.bf16.msra.mxu1 %v287_v8 }
  0x85   : > { %1583 = vmatprep.subr.bf16.mxu1 %v1676_v0 }
  0x86   : > { %v466_v11 = vpop.permute.xlu1 %465 }
  0x87   : > { %1580 = vmatmul.mubr.msk.bf16.vlgmr.msra.gmra.mxu1 %vm275_vm2, %v1509_v9 }
  0x88   : > { %v269_v12 = vpop.permute.xlu0 %268  ;;  %1584 = vmatpush3.bf16.msra.mxu1 %v380_v10  ;;  %1585 = vmatprep.mubr.msk.bf16.mxu1 %vm1677_vm0, %v1676_v0  ;;  %v1543_v10 = vld [vmem:[%s1881_s1 + $0x20] sm:$0xf] }
  0x89   : > { %v274_v13 = vsel %vm272_vm3, %v269_v12, %v271_v6  ;;  %v273_v14 = vsel %vm272_vm3, %v267_v7, %v269_v12  ;;  %1589 = vmatprep.subr.bf16.mxu1 %v1676_v0 }
  0x8a   : > { %1513 = vmatprep.subr.msk.bf16.mxu0 %vm279_vm1, %v274_v13  ;;  %v281_v15 = vsel %vm279_vm1, %v273_v14, 0  ;;  %v470_v16 = vpop.permute.xlu1 %469 }
  0x8b   : > { %304 = vmatpush1.bf16.msra.mxu0 %v281_v15  ;;  %v484_v21 = vsel %vm279_vm1, %v470_v16, 0 }
  0x8c   : > { %1516 = vmatprep.subr.msk.bf16.mxu0 %vm279_vm1, %v1511_v5  ;;  %v468_v18 = vpop.permute.xlu0 %467  ;;  %v1539_v5 = vld [vmem:[%s1881_s1 + $0x1c] sm:$0xf] }
  0x8d   : > { %v473_v20 = vsel %vm471_vm4, %v468_v18, %v470_v16  ;;  %v472_v24 = vsel %vm471_vm4, %v466_v11, %v468_v18 }
  0x8e   : > { %1514 = vmatmul.mubr.msk.bf16.vlgmr.msra.gmra.mxu0 %vm275_vm2, %v1509_v9  ;;  %v575_v22 = vpop.permute.xlu1 %574  ;;  %v478_v25 = vsel %vm279_vm1, %v472_v24, 0 }
  0x8f   : > { %397 = vmatpush1.bf16.msra.mxu0 %v374_v17  ;;  %414 = vmatprep.mubr.bf16.mxu0 %v1678_v1 }
  0x90   : > { %1586 = vmatmul.mubr.msk.bf16.vlgmr.msra.gmra.mxu1 %vm275_vm2, %v255_v19  ;;  %1520 = vmatprep.subr.msk.bf16.mxu0 %vm279_vm1, %v473_v20  ;;  %v573_v23 = vpop.permute.xlu0 %572 }
  0x91   : > { %1590 = vmatpush3.bf16.msra.mxu1 %v484_v21  ;;  %1591 = vmatprep.mubr.msk.bf16.mxu1 %vm1677_vm0, %v1676_v0  ;;  %v579_v32 = vsel %vm578_vm5, %v573_v23, %v575_v22 }
  0x92   : > { %1595 = vmatprep.subr.bf16.mxu1 %v1676_v0  ;;  %v680_v27 = vpop.permute.xlu1 %679  ;;  %v585_v34 = vsel %vm279_vm1, %v579_v32, 0 }
  0x94   : > { %v577_v26 = vpop.permute.xlu0 %576 }
  0x95   : > { %v580_v29 = vsel %vm578_vm5, %v575_v22, %v577_v26  ;;  %v591_v30 = vsel %vm279_vm1, %v577_v26, 0 }
  0x96   : > { %1517 = vmatmul.mubr.msk.bf16.vlgmr.msra.gmra.mxu0 %vm275_vm2, %v255_v19  ;;  %v684_v33 = vpop.permute.xlu1 %683 }
  0x97   : > { %501 = vmatpush1.bf16.msra.mxu0 %v478_v25  ;;  %518 = vmatprep.mubr.bf16.mxu0 %v1678_v1  ;;  %v698_v38 = vsel %vm279_vm1, %v684_v33, 0 }
  0x98   : > { %1592 = vmatmul.mubr.msk.bf16.vlgmr.msra.gmra.mxu1 %vm275_vm2, %v1519_v28  ;;  %1524 = vmatprep.subr.msk.bf16.mxu0 %vm279_vm1, %v580_v29  ;;  %v682_v31 = vpop.permute.xlu0 %681 }
  0x99   : > { %1596 = vmatpush3.bf16.msra.mxu1 %v591_v30  ;;  %1597 = vmatprep.mubr.msk.bf16.mxu1 %vm1677_vm0, %v1676_v0  ;;  %v687_v37 = vsel %vm685_vm6, %v682_v31, %v684_v33  ;;  %v686_v40 = vsel %vm685_vm6, %v680_v27, %v682_v31 }
  0x9a   : > { %1601 = vmatprep.subr.bf16.mxu1 %v1676_v0  ;;  %v789_v39 = vpop.permute.xlu1 %788  ;;  %v692_v42 = vsel %vm279_vm1, %v686_v40, 0 }
  0x9c   : > { %v787_v35 = vpop.permute.xlu0 %786 }
  0x9d   : > { %v793_v48 = vsel %vm792_vm7, %v787_v35, %v789_v39 }
  0x9e   : > { %1521 = vmatmul.mubr.msk.bf16.vlgmr.msra.gmra.mxu0 %vm275_vm2, %v1519_v28  ;;  %v894_v43 = vpop.permute.xlu1 %893  ;;  %v799_v50 = vsel %vm279_vm1, %v793_v48, 0 }
  0x9f   : > { %608 = vmatpush1.bf16.msra.mxu0 %v585_v34  ;;  %625 = vmatprep.mubr.bf16.mxu0 %v1678_v1 }
  0xa0   : > { %1598 = vmatmul.mubr.msk.bf16.vlgmr.msra.gmra.mxu1 %vm275_vm2, %v1523_v36  ;;  %1528 = vmatprep.subr.msk.bf16.mxu0 %vm279_vm1, %v687_v37  ;;  %v791_v41 = vpop.permute.xlu0 %790 }
  0xa1   : > { %1602 = vmatpush3.bf16.msra.mxu1 %v698_v38  ;;  %1603 = vmatprep.mubr.msk.bf16.mxu1 %vm1677_vm0, %v1676_v0  ;;  %v794_v45 = vsel %vm792_vm7, %v789_v39, %v791_v41  ;;  %v805_v46 = vsel %vm279_vm1, %v791_v41, 0 }
  0xa2   : > { %1607 = vmatprep.subr.bf16.mxu1 %v1676_v0  ;;  %v898_v49 = vpop.permute.xlu1 %897 }
  0xa3   : > { %v912_v54 = vsel %vm279_vm1, %v898_v49, 0 }
  0xa4   : > { %v896_v47 = vpop.permute.xlu0 %895 }
  0xa5   : > { %v901_v53 = vsel %vm899_vm8, %v896_v47, %v898_v49  ;;  %v900_v56 = vsel %vm899_vm8, %v894_v43, %v896_v47 }
  0xa6   : > { %1525 = vmatmul.mubr.msk.bf16.vlgmr.msra.gmra.mxu0 %vm275_vm2, %v1523_v36  ;;  %v1003_v55 = vpop.permute.xlu1 %1002  ;;  %v906_v58 = vsel %vm279_vm1, %v900_v56, 0 }
  0xa7   : > { %715 = vmatpush1.bf16.msra.mxu0 %v692_v42  ;;  %732 = vmatprep.mubr.bf16.mxu0 %v1678_v1 }
  0xa8   : > { %1604 = vmatmul.mubr.msk.bf16.vlgmr.msra.gmra.mxu1 %vm275_vm2, %v1527_v44  ;;  %1532 = vmatprep.subr.msk.bf16.mxu0 %vm279_vm1, %v794_v45  ;;  %v1001_v51 = vpop.permute.xlu0 %1000 }
  0xa9   : > { %1608 = vmatpush3.bf16.msra.mxu1 %v805_v46  ;;  %1609 = vmatprep.mubr.msk.bf16.mxu1 %vm1677_vm0, %v1676_v0  ;;  %v1007_v63 = vsel %vm1006_vm9, %v1001_v51, %v1003_v55 }
  0xaa   : > { %1613 = vmatprep.subr.bf16.mxu1 %v1676_v0  ;;  %v1108_v59 = vpop.permute.xlu1 %1107  ;;  %v1013_v4 = vsel %vm279_vm1, %v1007_v63, 0 }
  0xac   : > { %v1005_v57 = vpop.permute.xlu0 %1004 }
  0xad   : > { %v1008_v61 = vsel %vm1006_vm9, %v1003_v55, %v1005_v57  ;;  %v1019_v62 = vsel %vm279_vm1, %v1005_v57, 0 }
  0xae   : > { %1529 = vmatmul.mubr.msk.bf16.vlgmr.msra.gmra.mxu0 %vm275_vm2, %v1527_v44  ;;  %v1112_v2 = vpop.permute.xlu1 %1111 }
  0xaf   : > { %822 = vmatpush1.bf16.msra.mxu0 %v799_v50  ;;  %839 = vmatprep.mubr.bf16.mxu0 %v1678_v1  ;;  %v1126_v7 = vsel %vm279_vm1, %v1112_v2, 0 }
  0xb0   : > { %1610 = vmatmul.mubr.msk.bf16.vlgmr.msra.gmra.mxu1 %vm275_vm2, %v1531_v52  ;;  %1536 = vmatprep.subr.msk.bf16.mxu0 %vm279_vm1, %v901_v53  ;;  %v1110_v3 = vpop.permute.xlu0 %1109 }
  0xb1   : > { %1614 = vmatpush3.bf16.msra.mxu1 %v912_v54  ;;  %1615 = vmatprep.mubr.msk.bf16.mxu1 %vm1677_vm0, %v1676_v0  ;;  %v1115_v6 = vsel %vm1113_vm10, %v1110_v3, %v1112_v2  ;;  %v1114_v8 = vsel %vm1113_vm10, %v1108_v59, %v1110_v3 }
  0xb2   : > { %1619 = vmatprep.subr.bf16.mxu1 %v1676_v0  ;;  %v1120_v9 = vsel %vm279_vm1, %v1114_v8, 0 }
  0xb6   : > { %1533 = vmatmul.mubr.msk.bf16.vlgmr.msra.gmra.mxu0 %vm275_vm2, %v1531_v52 }
  0xb7   : > { %929 = vmatpush1.bf16.msra.mxu0 %v906_v58  ;;  %946 = vmatprep.mubr.bf16.mxu0 %v1678_v1 }
  0xb8   : > { %1616 = vmatmul.mubr.msk.bf16.vlgmr.msra.gmra.mxu1 %vm275_vm2, %v1535_v60  ;;  %1540 = vmatprep.subr.msk.bf16.mxu0 %vm279_vm1, %v1008_v61 }
  0xb9   : > { %1620 = vmatpush3.bf16.msra.mxu1 %v1019_v62  ;;  %1621 = vmatprep.mubr.msk.bf16.mxu1 %vm1677_vm0, %v1676_v0 }
  0xba   : > { %1625 = vmatprep.subr.bf16.mxu1 %v1676_v0 }
  0xbe   : > { %1537 = vmatmul.mubr.msk.bf16.vlgmr.msra.gmra.mxu0 %vm275_vm2, %v1535_v60 }
  0xbf   : > { %1036 = vmatpush1.bf16.msra.mxu0 %v1013_v4  ;;  %1053 = vmatprep.mubr.bf16.mxu0 %v1678_v1 }
  0xc0   : > { %1622 = vmatmul.mubr.msk.bf16.vlgmr.msra.gmra.mxu1 %vm275_vm2, %v1539_v5  ;;  %1544 = vmatprep.subr.msk.bf16.mxu0 %vm279_vm1, %v1115_v6 }
  0xc1   : > { %1626 = vmatpush3.bf16.msra.mxu1 %v1126_v7  ;;  %1627 = vmatprep.mubr.msk.bf16.mxu1 %vm1677_vm0, %v1676_v0  ;;  %v1214_v7 = vlaneseq }
  0xc2   : > { %1636 = vmatprep.subr.mxu1 %v1676_v0 }
  0xc6   : > { %1541 = vmatmul.mubr.msk.bf16.vlgmr.msra.gmra.mxu0 %vm275_vm2, %v1539_v5 }
  0xc7   : > { %1143 = vmatpush1.bf16.msra.mxu0 %v1120_v9  ;;  %1160 = vmatprep.mubr.bf16.mxu0 %v1678_v1 }
  0xc8   : > { %1628 = vmatmul.mubr.msk.bf16.vlgmr.msra.gmra.mxu1 %vm275_vm2, %v1543_v10  ;;  %1631 = vmatprep.subr.mxu0 %v1676_v0 }
  0xc9   : > { %1638 = vmatprep.mubr.msk.f32.mxu1 %vm1677_vm0, %v1676_v0 }
  0xce   : > { %1545 = vmatmul.mubr.msk.bf16.vlgmr.msra.gmra.mxu0 %vm275_vm2, %v1543_v10 }
  0xcf   : > { %1633 = vmatprep.mubr.msk.f32.mxu0 %vm1677_vm0, %v1676_v0 }
 0x147   : > { %v364_v11 = vpop.f32.mrf.mxu1 }
 0x149   : > { %v1581_v12 = vpop.f32.mrf.mxu1 }
 0x14b   : > { %v367_v13 = vpop.f32.mrf.mxu1 }
 0x14d   : > { %v1582_v15 = vpop.f32.mrf.mxu1 }
 0x14e   : > { %v323_v14 = vpop.f32.mrf.mxu0 }
 0x150   : > { %v325_v16 = vpop.f32.mrf.mxu0  ;;  %v457_v17 = vpop.f32.mrf.mxu1 }
 0x151   : > { %v458_v62 = vadd.f32 %v457_v17, %v364_v11 }
 0x152   : > { %v327_v1 = vpop.f32.mrf.mxu0  ;;  %v1587_v18 = vpop.f32.mrf.mxu1 }
 0x154   : > { %v328_v19 = vpop.f32.mrf.mxu0  ;;  %v460_v20 = vpop.f32.mrf.mxu1 }
 0x156   : > { %v416_v21 = vpop.f32.mrf.mxu0  ;;  %v1588_v22 = vpop.f32.mrf.mxu1 }
 0x157   : > { %v417_v3 = vadd.f32 %v416_v21, %v323_v14  ;;  %v1215_v22 = vshrl.u32 %v1214_v7, 7 }
 0x158   : > { %v418_v23 = vpop.f32.mrf.mxu0  ;;  %v561_v24 = vpop.f32.mrf.mxu1 }
 0x159   : > { %v569_v4 = vadd.f32 %v561_v24, %v458_v62  ;;  %v419_v8 = vadd.f32 %v418_v23, %v325_v16 }
 0x15a   : > { %v420_v25 = vpop.f32.mrf.mxu0  ;;  %v1593_v26 = vpop.f32.mrf.mxu1 }
 0x15c   : > { %v421_v27 = vpop.f32.mrf.mxu0  ;;  %v564_v28 = vpop.f32.mrf.mxu1 }
 0x15d   : > { %v1224_v28 = vsub.s32 2, %v1215_v22 }
 0x15e   : > { %v520_v0 = vpop.f32.mrf.mxu0  ;;  %v1594_v29 = vpop.f32.mrf.mxu1 }
 0x15f   : > { %v567_v9 = vadd.f32 %v520_v0, %v417_v3 }
 0x160   : > { %v522_v30 = vpop.f32.mrf.mxu0  ;;  %v668_v31 = vpop.f32.mrf.mxu1 }
 0x161   : > { %v676_v10 = vadd.f32 %v668_v31, %v569_v4  ;;  %v568_v15 = vadd.f32 %v522_v30, %v419_v8  ;;  %v1212_v30 = vld [vmem:[%s1885_s5] sm:$0x7]  ;;  %v1216_v31 = vsub.s32 0, %v1215_v22 }
 0x162   : > { %v524_v32 = vpop.f32.mrf.mxu0  ;;  %v1599_v33 = vpop.f32.mrf.mxu1 }
 0x163   : > { %v1220_v32 = vsub.s32 1, %v1215_v22 }
 0x164   : > { %v525_v34 = vpop.f32.mrf.mxu0  ;;  %v671_v35 = vpop.f32.mrf.mxu1 }
 0x166   : > { %v627_v36 = vpop.f32.mrf.mxu0  ;;  %v1600_v37 = vpop.f32.mrf.mxu1 }
 0x167   : > { %v674_v1 = vadd.f32 %v627_v36, %v567_v9 }
 0x168   : > { %v629_v38 = vpop.f32.mrf.mxu0  ;;  %v775_v39 = vpop.f32.mrf.mxu1 }
 0x169   : > { %v783_v18 = vadd.f32 %v775_v39, %v676_v10  ;;  %v675_v25 = vadd.f32 %v629_v38, %v568_v15  ;;  %v1225_v39 = vrot.slane %v1212_v30, %v1224_v28 }
 0x16a   : > { %v631_v40 = vpop.f32.mrf.mxu0  ;;  %v1605_v41 = vpop.f32.mrf.mxu1 }
 0x16c   : > { %v632_v42 = vpop.f32.mrf.mxu0  ;;  %v778_v43 = vpop.f32.mrf.mxu1 }
 0x16e   : > { %v734_v44 = vpop.f32.mrf.mxu0  ;;  %v1606_v45 = vpop.f32.mrf.mxu1 }
 0x16f   : > { %v781_v11 = vadd.f32 %v734_v44, %v674_v1  ;;  %v1217_v44 = vrot.slane %v1212_v30, %v1216_v31  ;;  %v1221_v45 = vrot.slane %v1212_v30, %v1220_v32 }
 0x170   : > { %v736_v46 = vpop.f32.mrf.mxu0  ;;  %v882_v47 = vpop.f32.mrf.mxu1 }
 0x171   : > { %v890_v17 = vadd.f32 %v882_v47, %v783_v18  ;;  %v782_v21 = vadd.f32 %v736_v46, %v675_v25 }
 0x172   : > { %v738_v48 = vpop.f32.mrf.mxu0  ;;  %v1611_v49 = vpop.f32.mrf.mxu1 }
 0x174   : > { %v739_v50 = vpop.f32.mrf.mxu0  ;;  %v885_v51 = vpop.f32.mrf.mxu1 }
 0x176   : > { %v841_v52 = vpop.f32.mrf.mxu0  ;;  %v1612_v53 = vpop.f32.mrf.mxu1 }
 0x177   : > { %v888_v24 = vadd.f32 %v841_v52, %v781_v11 }
 0x178   : > { %v843_v54 = vpop.f32.mrf.mxu0  ;;  %v989_v55 = vpop.f32.mrf.mxu1 }
 0x179   : > { %v997_v27 = vadd.f32 %v989_v55, %v890_v17  ;;  %v889_v0 = vadd.f32 %v843_v54, %v782_v21 }
 0x17a   : > { %v845_v56 = vpop.f32.mrf.mxu0  ;;  %v1617_v57 = vpop.f32.mrf.mxu1 }
 0x17b   : > { %v1238_v56 = vld [vmem:[%s1882_s2] sm:$0xff] }
 0x17c   : > { %v846_v58 = vpop.f32.mrf.mxu0  ;;  %v992_v59 = vpop.f32.mrf.mxu1 }
 0x17e   : > { %v948_v60 = vpop.f32.mrf.mxu0  ;;  %v1618_v61 = vpop.f32.mrf.mxu1 }
 0x17f   : > { %v995_v29 = vadd.f32 %v948_v60, %v888_v24 }
 0x180   : > { %v950_v63 = vpop.f32.mrf.mxu0  ;;  %v1096_v2 = vpop.f32.mrf.mxu1 }
 0x181   : > { %v1104_v33 = vadd.f32 %v1096_v2, %v997_v27  ;;  %v996_v36 = vadd.f32 %v950_v63, %v889_v0 }
 0x182   : > { %v952_v5 = vpop.f32.mrf.mxu0  ;;  %v1623_v6 = vpop.f32.mrf.mxu1 }
 0x184   : > { %v953_v12 = vpop.f32.mrf.mxu0  ;;  %v1099_v13 = vpop.f32.mrf.mxu1 }
 0x185   : > { %v1410_v12 = vld [vmem:[%s1883_s3] sm:$0xff] }
 0x186   : > { %v1055_v19 = vpop.f32.mrf.mxu0  ;;  %v1624_v20 = vpop.f32.mrf.mxu1  ;;  %v1419_v13 = vld [vmem:[%s1884_s4] sm:$0xff] }
 0x187   : > { %v1102_v37 = vadd.f32 %v1055_v19, %v995_v29 }
 0x188   : > { %v1057_v26 = vpop.f32.mrf.mxu0  ;;  %v1203_v14 = vpop.f32.mrf.mxu1 }
 0x189   : > { %v1211_v38 = vadd.f32 %v1203_v14, %v1104_v33  ;;  %v1103_v42 = vadd.f32 %v1057_v26, %v996_v36 }
 0x18a   : > { %v1059_v16 = vpop.f32.mrf.mxu0  ;;  %v1629_v23 = vpop.f32.mrf.mxu1 }
 0x18b   : > { %v1231_v48 = vmul.f32 %v1225_v39, %v1211_v38 }
 0x18c   : > { %v1060_v34 = vpop.f32.mrf.mxu0  ;;  %v1206_v35 = vpop.f32.mrf.mxu1 }
 0x18d   : > { %v1234_v54 = vsel %vm1233_vm11, %v1231_v48, 0.0 }
 0x18e   : > { %v1162_v40 = vpop.f32.mrf.mxu0  ;;  %v1630_v41 = vpop.f32.mrf.mxu1 }
 0x18f   : > { %v1209_v43 = vadd.f32 %v1162_v40, %v1102_v37 }
 0x190   : > { %v1164_v46 = vpop.f32.mrf.mxu0 }
 0x191   : > { %v1210_v47 = vadd.f32 %v1164_v46, %v1103_v42  ;;  %v1229_v50 = vmul.f32 %v1217_v44, %v1209_v43 }
 0x192   : > { %v1166_v49 = vpop.f32.mrf.mxu0 }
 0x193   : > { %v1230_v51 = vmul.f32 %v1221_v45, %v1210_v47 }
 0x194   : > { %v1167_v52 = vpop.f32.mrf.mxu0 }
 0x195   : > { %v1232_v53 = vadd.f32 %v1230_v51, %v1229_v50 }
 0x197   : > { %v1235_v55 = vadd.f32 %v1234_v54, %v1232_v53 }
 0x199   : > { %1236 = vadd.xlane.f32.xlu0 %v1235_v55 }
 0x222   : > { %v1237_v57 = vpop.xlane.xlu0 %1236 }
 0x223   : > { %1632 = vmatpush3.msra.mxu0 %v1237_v57 }
 0x224   : > { %1634 = vmatmul.mubr.msk.f32.vlgmr.msra.gmra.mxu0 %vm275_vm2, %v1238_v56 }
 0x2e4   : > { %v1308_v58 = vpop.f32.mrf.mxu0 }
 0x2e5   : > { %1314 = vperm.xlu1 %1661, %v1308_v58  }
 0x2e6   : > { %v1635_v59 = vpop.f32.mrf.mxu0 }
 0x360   : > { %v1315_v60 = vpop.permute.xlu1 %1314 }
 0x361   : > { %v1317_v61 = vsub.f32 %v1209_v43, %v1315_v60  ;;  %v1318_v62 = vsub.f32 %v1210_v47, %v1315_v60  ;;  %v1319_v63 = vsub.f32 %v1211_v38, %v1315_v60 }
 0x363   : > { %v1320_v2 = vmul.f32 %v1317_v61, %v1217_v44  ;;  %v1321_v3 = vmul.f32 %v1318_v62, %v1221_v45  ;;  %v1322_v4 = vmul.f32 %v1319_v63, %v1225_v39 }
 0x365   : > { %v1323_v5 = vmul.f32 %v1320_v2, %v1320_v2  ;;  %v1324_v6 = vmul.f32 %v1321_v3, %v1321_v3  ;;  %v1325_v7 = vmul.f32 %v1322_v4, %v1322_v4 }
 0x367   : > { %v1326_v8 = vadd.f32 %v1324_v6, %v1323_v5  ;;  %v1327_v9 = vsel %vm1233_vm11, %v1325_v7, 0.0 }
 0x369   : > { %v1328_v10 = vadd.f32 %v1327_v9, %v1326_v8 }
 0x36b   : > { %1329 = vadd.xlane.f32.xlu1 %v1328_v10 }
 0x37c   : > { %1413 = vperm.xlu1 %1661, %v1410_v12  }
 0x380   : > { %1422 = vperm.xlu1 %1661, %v1419_v13  }
 0x3f4   : > { %v1330_v15 = vpop.xlane.xlu1 %1329 }
 0x3f5   : > { %1637 = vmatpush3.msra.mxu1 %v1330_v15 }
 0x3f6   : > { %1639 = vmatmul.mubr.msk.f32.vlgmr.msra.gmra.mxu1 %vm275_vm2, %v1238_v56 }
 0x3f8   : > { %v1414_v22 = vpop.permute.xlu1 %1413 }
 0x3fc   : > { %v1423_v27 = vpop.permute.xlu1 %1422 }
 0x4b6   : > { %v1397_v1 = vpop.f32.mrf.mxu1 }
 0x4b7   : > { %v1398_v18 = vadd.f32 1e-05, %v1397_v1 }
 0x4b8   : > { %v1640_v19 = vpop.f32.mrf.mxu1 }
 0x4b9   : > { %1666 = vrsqrt.f32 %v1398_v18 }
 0x4c6   : > { %v1667_v20 = vpop.eup %1666 }
 0x4c7   : > { %1404 = vperm.xlu0 %1662, %v1667_v20  }
 0x542   : > { %v1405_v25 = vpop.permute.xlu0 %1404 }
 0x543   : > { %v1407_v11 = vmul.f32 %v1405_v25, %v1317_v61  ;;  %v1408_v17 = vmul.f32 %v1405_v25, %v1318_v62  ;;  %v1409_v26 = vmul.f32 %v1405_v25, %v1319_v63 }
 0x545   : > { %v1416_v14 = vmul.f32 %v1414_v22, %v1407_v11  ;;  %v1417_v21 = vmul.f32 %v1414_v22, %v1408_v17  ;;  %v1418_v24 = vmul.f32 %v1414_v22, %v1409_v26 }
 0x547   : > { %v1425_v28 = vadd.f32 %v1423_v27, %v1416_v14  ;;  %v1426_v16 = vadd.f32 %v1423_v27, %v1417_v21  ;;  %v1427_v23 = vadd.f32 %v1423_v27, %v1418_v24 }
 0x549   : > { %v1428_v0 = vmax.f32 %v1425_v28, 0.0  ;;  %v1429_v29 = vmax.f32 %v1426_v16, 0.0  ;;  %v1430_v30 = vmax.f32 %v1427_v23, 0.0 }
 0x54b   : > { %v1553_v31 = vpack.c.bf16 %v1429_v29, %v1428_v0  ;;  %v1554_v32 = vpack.c.bf16 %v1430_v30, %v1430_v30 }
 0x54d   : > { %1444 = vst [vmem:[%s251_s18] sm:$0xff] %v1553_v31  ;;  %1446 = vst.msk [vmem:[%s251_s18 + $0x8] sm:$0xf] %vm1445_vm12, %v1554_v32 }
 0x54e PF: > { %s16_s21 = sadd.s32 1, %s1674_s21  }
 0x54f   : > { %p13_p4 = scmp.ge.s32.totalorder %s16_s21, 4  }
 0x551   :  { %15 = sbr.rel (!%p13_p4) target bundleno = 1 (0x1), region = 82 }

// kernel: encoder_forward.12
= control target key start
LH: loop header
LB: loop body
LE: loop exit
PB: predicated region body
PF: predicated region fallthrough
CT: control target
= control target key end

     0   :  { %s985_s21 = smov 0   ;;  %s1055_s0 = inlined_call_operand.vmem [shape: bf16[2,32,90], index: 0, kind: input, shape index: {}]   ;;  %s1056_s1 = inlined_call_operand.vmem [shape: bf16[4,16,32], index: 1, kind: input, shape index: {}]   ;;  %s1057_s2 = inlined_call_operand.vmem [shape: f32[16,16], index: 2, kind: input, shape index: {}]   ;;  %s1058_s3 = inlined_call_operand.vmem [shape: f32[16,1], index: 3, kind: input, shape index: {}]   ;;  %s1059_s4 = inlined_call_operand.vmem [shape: f32[16,1], index: 4, kind: input, shape index: {}]   ;;  %s1060_s5 = inlined_call_operand.vmem [shape: f32[1,72], index: 5, kind: input, shape index: {}]   ;;  %s1061_s6 = inlined_call_operand.vmem [shape: bf16[2,16,72], index: 6, kind: output, shape index: {}]  }
   0x1 LB: > { %s806_s22 = sadd.s32 4294967295, %s942_s21   ;;  %p810_p0 = scmp.ge.s32.totalorder %s942_s21, 1  ;;  %s942_s21 = sphi %s985_s21, %s16_s21  }
   0x2   : > { %p212_p1 = scmp.lt.s32.totalorder %s942_s21, 3 }
   0x4   : > { %p213_p2 = pnand %p810_p0, %p212_p1 }
   0x5   : > { %p242_p3 = scmp.lt.s32.totalorder (!%p213_p2), %s806_s22, 1  ;;  %s946_s27 = smov (!%p213_p2), 119  }
   0x6   : > { %216 = sbr.rel (%p213_p2) target bundleno = 1303 (0x517), region = 44  ;;  %s947_s28 = smov (!%p213_p2), 127  }
   0x7   : > { %s948_s29 = smov (!%p213_p2), 118  }
   0xb   : > { %v944_v0 = vmov 0.0   ;;  %s1063_s22 = smov (!%p242_p3, %s806_s22), 1  ;;  %vm945_vm0 = vmmov 0   ;;  %v928_v3 = vld [vmem:[%s1056_s1] sm:$0xff]   ;;  %vm283_vm1 = vcmask 261120   ;;  %v929_v8 = vld [vmem:[%s1056_s1 + $0x8] sm:$0xff]  }
   0xc   : > { %872 = vmatprep.subr.bf16.mxu1 %v944_v0  ;;  %864 = vmatprep.subr.bf16.mxu0 %v944_v0  ;;  %s840_s23 = sshll.u32 %s1063_s22, 4  ;;  %v930_v10 = vld [vmem:[%s1056_s1 + $0x18] sm:$0xff]   ;;  %v931_v12 = vld [vmem:[%s1056_s1 + $0x10] sm:$0xff]   ;;  %v831_v29 = vld [vmem:[%s1060_s5] ss:$0 sm:$0xff]  ;;  %vm508_vm2 = vcmask 588800  }
   0xd   : > { %876 = vmatprep.mubr.msk.bf16.mxu1 %vm945_vm0, %v944_v0  ;;  %868 = vmatprep.mubr.msk.bf16.mxu0 %vm945_vm0, %v944_v0  ;;  %s246_s26 = scalar_lea.vmem %s1055_s0, %s840_s23  ;;  %v515_v40 = vld [vmem:[%s1057_s2] sm:$0xff]  ;;  %vm517_vm3 = vcmask 130048   ;;  %v949_v41 = vmov 0   ;;  %v516_v44 = vld [vmem:[%s1057_s2 + $0x8] sm:$0xff]  ;;  %s841_s30 = sshll.u32 %s1063_s22, 3  ;;  %vm748_vm4 = vcmask 584704  }
   0xe   : > { %v926_v1 = vld [vmem:[%s246_s26 + $0x8] sm:$0xff]   ;;  %v927_v2 = vld [vmem:[%s246_s26] sm:$0xff]   ;;  %924 = vset.pattern.permute.xlu0 %v949_v41  ;;  %925 = vset.pattern.permute.xlu1 %v949_v41  ;;  %s251_s9 = scalar_lea.vmem %s1061_s6, %s841_s30 }
   0xf   : > { %389 = vrot.lane.b32.xlu1 %v926_v1, %s946_s27  ;;  %279 = vrot.lane.b32.xlu0 %v926_v1, %s947_s28  ;;  %v710_v57 = vld [vmem:[%s1058_s3] sm:$0xff]  ;;  %v711_v58 = vld [vmem:[%s1058_s3 + $0x8] sm:$0xff] }
  0x10   : > { %873 = vmatpush3.bf16.msra.mxu1 %v926_v1  ;;  %v724_v59 = vld [vmem:[%s1059_s4] sm:$0xff] }
  0x11   : > { %874 = vmatprep.subr.bf16.mxu1 %v944_v0 }
  0x13   : > { %449 = vrot.lane.b32.xlu1 %v926_v1, %s948_s29  ;;  %277 = vrot.lane.b32.xlu0 %v927_v2, %s947_s28 }
  0x14   : > { %875 = vmatpush3.bf16.msra.mxu1 %v927_v2 }
  0x15   : > { %888 = vmatprep.subr.bf16.mxu1 %v944_v0 }
  0x17   : > { %447 = vrot.lane.b32.xlu1 %v927_v2, %s948_s29  ;;  %387 = vrot.lane.b32.xlu0 %v927_v2, %s946_s27 }
  0x18   : > { %877 = vmatmul.mubr.msk.bf16.vlgmr.msra.gmra.mxu1 %vm283_vm1, %v928_v3 }
  0x19   : > { %892 = vmatprep.mubr.msk.bf16.mxu1 %vm945_vm0, %v944_v0 }
  0x81   : > { %v390_v4 = vpop.permute.xlu1 %389  ;;  %v280_v5 = vpop.permute.xlu0 %279 }
  0x82   : > { %865 = vmatpush3.bf16.msra.mxu0 %v280_v5 }
  0x83   : > { %866 = vmatprep.subr.bf16.mxu0 %v944_v0 }
  0x85   : > { %v450_v6 = vpop.permute.xlu1 %449  ;;  %v278_v7 = vpop.permute.xlu0 %277 }
  0x86   : > { %867 = vmatpush3.bf16.msra.mxu0 %v278_v7  ;;  %889 = vmatpush3.bf16.msra.mxu1 %v450_v6 }
  0x87   : > { %880 = vmatprep.subr.bf16.mxu0 %v944_v0  ;;  %890 = vmatprep.subr.bf16.mxu1 %v944_v0 }
  0x89   : > { %v448_v9 = vpop.permute.xlu1 %447  ;;  %869 = vmatmul.mubr.msk.bf16.vlgmr.msra.gmra.mxu0 %vm283_vm1, %v929_v8  ;;  %v388_v11 = vpop.permute.xlu0 %387 }
  0x8a   : > { %881 = vmatpush3.bf16.msra.mxu0 %v390_v4  ;;  %891 = vmatpush3.bf16.msra.mxu1 %v448_v9  ;;  %v725_v4 = vld [vmem:[%s1059_s4 + $0x8] sm:$0xff] }
  0x8b   : > { %882 = vmatprep.subr.bf16.mxu0 %v944_v0  ;;  %884 = vmatprep.mubr.msk.bf16.mxu0 %vm945_vm0, %v944_v0 }
  0x8d   : > { %893 = vmatmul.mubr.msk.bf16.vlgmr.msra.gmra.mxu1 %vm283_vm1, %v930_v10 }
  0x8e   : > { %883 = vmatpush3.bf16.msra.mxu0 %v388_v11  ;;  %907 = vmatprep.mubr.msk.f32.mxu1 %vm517_vm3, %v515_v40 }
  0x91   : > { %885 = vmatmul.mubr.msk.bf16.vlgmr.msra.gmra.mxu0 %vm283_vm1, %v931_v12 }
  0x92   : > { %900 = vmatprep.mubr.msk.f32.mxu0 %vm517_vm3, %v515_v40 }
  0xd8   : > { %v372_v13 = vpop.f32.mrf.mxu1 }
  0xda   : > { %v878_v14 = vpop.f32.mrf.mxu1 }
  0xdc   : > { %v375_v15 = vpop.f32.mrf.mxu1 }
  0xde   : > { %v879_v16 = vpop.f32.mrf.mxu1 }
 0x149   : > { %v321_v17 = vpop.f32.mrf.mxu0 }
 0x14a   : > { %v373_v23 = vadd.f32 %v372_v13, %v321_v17 }
 0x14b   : > { %v870_v18 = vpop.f32.mrf.mxu0 }
 0x14d   : > { %v324_v19 = vpop.f32.mrf.mxu0  ;;  %v490_v20 = vpop.f32.mrf.mxu1 }
 0x14e   : > { %v376_v30 = vadd.f32 %v375_v15, %v324_v19 }
 0x14f   : > { %v871_v21 = vpop.f32.mrf.mxu0  ;;  %v894_v22 = vpop.f32.mrf.mxu1 }
 0x151   : > { %v430_v24 = vpop.f32.mrf.mxu0  ;;  %v493_v25 = vpop.f32.mrf.mxu1 }
 0x152   : > { %v437_v26 = vadd.f32 %v430_v24, %v373_v23 }
 0x153   : > { %v886_v27 = vpop.f32.mrf.mxu0  ;;  %v895_v28 = vpop.f32.mrf.mxu1 }
 0x154   : > { %v497_v31 = vadd.f32 %v490_v20, %v437_v26 }
 0x155   : > { %v433_v32 = vpop.f32.mrf.mxu0 }
 0x156   : > { %v438_v33 = vadd.f32 %v433_v32, %v376_v30  ;;  %v506_v34 = vmul.f32 %v831_v29, %v497_v31 }
 0x157   : > { %v887_v35 = vpop.f32.mrf.mxu0 }
 0x158   : > { %v498_v36 = vadd.f32 %v493_v25, %v438_v33  ;;  %v509_v37 = vsel %vm508_vm2, %v506_v34, 0.0 }
 0x159   : > { %510 = vadd.xlane.f32.xlu1 %v509_v37 }
 0x15a   : > { %v507_v38 = vmul.f32 %v831_v29, %v498_v36 }
 0x15c   : > { %v512_v39 = vsel %vm508_vm2, %v507_v38, 0.0 }
 0x15d   : > { %513 = vadd.xlane.f32.xlu0 %v512_v39 }
 0x1e2   : > { %v511_v43 = vpop.xlane.xlu1 %510 }
 0x1e6   : > { %v514_v42 = vpop.xlane.xlu0 %513 }
 0x1e7   : > { %896 = vmatprep.subr.mxu0 %v514_v42 }
 0x1e8   : > { %897 = vmatpush3.msra.mxu0 %v514_v42 }
 0x1e9   : > { %898 = vmatprep.subr.mxu0 %v511_v43 }
 0x1ea   : > { %899 = vmatpush3.msra.mxu0 %v511_v43 }
 0x1eb   : > { %901 = vmatmul.mubr.msk.f32.vlgmr.msra.gmra.mxu0 %vm517_vm3, %v516_v44 }
 0x2ab   : > { %v902_v45 = vpop.f32.mrf.mxu0 }
 0x2ac   : > { %606 = vperm.xlu0 %924, %v902_v45  }
 0x2ad   : > { %v590_v46 = vpop.f32.mrf.mxu0 }
 0x2ae   : > { %601 = vperm.xlu1 %925, %v590_v46  }
 0x327   : > { %v607_v47 = vpop.permute.xlu0 %606 }
 0x328   : > { %v610_v48 = vsub.f32 %v498_v36, %v607_v47 }
 0x329   : > { %v602_v49 = vpop.permute.xlu1 %601 }
 0x32a   : > { %v612_v50 = vmul.f32 %v831_v29, %v610_v48  ;;  %v609_v51 = vsub.f32 %v497_v31, %v602_v49 }
 0x32c   : > { %v611_v52 = vmul.f32 %v831_v29, %v609_v51  ;;  %v614_v53 = vmul.f32 %v612_v50, %v612_v50 }
 0x32e   : > { %v618_v54 = vsel %vm508_vm2, %v614_v53, 0.0  ;;  %v613_v55 = vmul.f32 %v611_v52, %v611_v52 }
 0x32f   : > { %619 = vadd.xlane.f32.xlu1 %v618_v54 }
 0x330   : > { %v615_v56 = vsel %vm508_vm2, %v613_v55, 0.0 }
 0x331   : > { %616 = vadd.xlane.f32.xlu0 %v615_v56 }
 0x340   : > { %714 = vperm.xlu1 %925, %v710_v57  }
 0x344   : > { %719 = vperm.xlu1 %925, %v711_v58  }
 0x348   : > { %728 = vperm.xlu1 %925, %v724_v59  }
 0x3b8   : > { %v620_v60 = vpop.xlane.xlu1 %619 }
 0x3b9   : > { %903 = vmatprep.subr.mxu1 %v620_v60 }
 0x3ba   : > { %v617_v61 = vpop.xlane.xlu0 %616  ;;  %904 = vmatpush3.msra.mxu1 %v620_v60 }
 0x3bb   : > { %905 = vmatprep.subr.mxu1 %v617_v61 }
 0x3bc   : > { %906 = vmatpush3.msra.mxu1 %v617_v61  ;;  %v715_v5 = vpop.permute.xlu1 %714 }
 0x3bd   : > { %908 = vmatmul.mubr.msk.f32.vlgmr.msra.gmra.mxu1 %vm517_vm3, %v516_v44 }
 0x3c0   : > { %v720_v6 = vpop.permute.xlu1 %719 }
 0x3c4   : > { %v729_v7 = vpop.permute.xlu1 %728 }
 0x47d   : > { %v909_v62 = vpop.f32.mrf.mxu1 }
 0x47e   : > { %v693_v63 = vadd.f32 1e-05, %v909_v62 }
 0x47f   : > { %v687_v0 = vpop.f32.mrf.mxu1 }
 0x480   : > { %932 = vrsqrt.f32 %v693_v63  ;;  %v688_v1 = vadd.f32 1e-05, %v687_v0 }
 0x482   : > { %934 = vrsqrt.f32 %v688_v1 }
 0x48d   : > { %v933_v2 = vpop.eup %932 }
 0x48e   : > { %705 = vperm.xlu0 %924, %v933_v2  }
 0x48f   : > { %v935_v3 = vpop.eup %934 }
 0x490   : > { %700 = vperm.xlu1 %925, %v935_v3  }
 0x494   : > { %733 = vperm.xlu1 %925, %v725_v4  }
 0x509   : > { %v706_v8 = vpop.permute.xlu0 %705 }
 0x50a   : > { %v709_v9 = vmul.f32 %v706_v8, %v610_v48 }
 0x50b   : > { %v701_v10 = vpop.permute.xlu1 %700 }
 0x50c   : > { %v708_v11 = vmul.f32 %v701_v10, %v609_v51  ;;  %v723_v13 = vmul.f32 %v720_v6, %v709_v9 }
 0x50e   : > { %v722_v12 = vmul.f32 %v715_v5, %v708_v11 }
 0x50f   : > { %v734_v14 = vpop.permute.xlu1 %733 }
 0x510   : > { %v736_v15 = vadd.f32 %v729_v7, %v722_v12  ;;  %v737_v16 = vadd.f32 %v734_v14, %v723_v13 }
 0x512   : > { %v738_v17 = vmax.f32 %v736_v15, 0.0  ;;  %v739_v18 = vmax.f32 %v737_v16, 0.0 }
 0x514   : > { %v842_v19 = vpack.c.bf16 %v738_v17, %v738_v17  ;;  %v843_v20 = vpack.c.bf16 %v739_v18, %v739_v18 }
 0x516   : > { %749 = vst.msk [vmem:[%s251_s9] sm:$0xf] %vm748_vm4, %v842_v19  ;;  %750 = vst.msk [vmem:[%s251_s9 + $0x4] sm:$0xf] %vm748_vm4, %v843_v20 }
 0x517 PF: > { %s16_s21 = sadd.s32 1, %s942_s21  }
 0x518   : > { %p13_p4 = scmp.ge.s32.totalorder %s16_s21, 4  }
 0x51a   :  { %15 = sbr.rel (!%p13_p4) target bundleno = 1 (0x1), region = 77 }

// kernel: encoder_forward.13
= control target key start
LH: loop header
LB: loop body
LE: loop exit
PB: predicated region body
PF: predicated region fallthrough
CT: control target
= control target key end

     0   :  { %s1313_s21 = smov 0   ;;  %s1429_s0 = inlined_call_operand.vmem [shape: bf16[2,16,110], index: 0, kind: input, shape index: {}]   ;;  %s1430_s1 = inlined_call_operand.vmem [shape: bf16[9,16,16], index: 1, kind: input, shape index: {}]   ;;  %s1431_s2 = inlined_call_operand.vmem [shape: f32[16,16], index: 2, kind: input, shape index: {}]   ;;  %s1432_s3 = inlined_call_operand.vmem [shape: f32[16,1], index: 3, kind: input, shape index: {}]   ;;  %s1433_s4 = inlined_call_operand.vmem [shape: f32[16,1], index: 4, kind: input, shape index: {}]   ;;  %s1434_s5 = inlined_call_operand.vmem [shape: f32[1,80], index: 5, kind: input, shape index: {}]   ;;  %s1435_s6 = inlined_call_operand.vmem [shape: bf16[2,16,80], index: 6, kind: output, shape index: {}]  }
   0x1 LB: > { %s1073_s22 = sadd.s32 4294967295, %s1265_s21   ;;  %p1077_p0 = scmp.ge.s32.totalorder %s1265_s21, 1  ;;  %s1265_s21 = sphi %s1313_s21, %s16_s21  }
   0x2   : > { %p212_p1 = scmp.lt.s32.totalorder %s1265_s21, 3 }
   0x4   : > { %p213_p2 = pnand %p1077_p0, %p212_p1 }
   0x5   : > { %p242_p3 = scmp.lt.s32.totalorder (!%p213_p2), %s1073_s22, 1  ;;  %s1269_s29 = smov (!%p213_p2), 127  }
   0x6   : > { %216 = sbr.rel (%p213_p2) target bundleno = 1321 (0x529), region = 44  ;;  %s1270_s30 = smov (!%p213_p2), 118  }
   0x7   : > { %s1271_s7 = smov (!%p213_p2), 126   ;;  %s1272_s8 = smov (!%p213_p2), 117  }
   0x8   : > { %s1273_s9 = smov (!%p213_p2), 116   ;;  %s1274_s10 = smov (!%p213_p2), 108  }
   0x9   : > { %s1275_s11 = smov (!%p213_p2), 107   ;;  %s1276_s12 = smov (!%p213_p2), 106  }
   0xb   : > { %v1267_v0 = vmov 0.0   ;;  %s1437_s22 = smov (!%p242_p3, %s1073_s22), 1  ;;  %vm1268_vm0 = vmmov 0   ;;  %v1247_v2 = vld [vmem:[%s1430_s1] sm:$0xff]   ;;  %vm273_vm1 = vcmask 130048   ;;  %v1246_v4 = vld [vmem:[%s1430_s1 + $0x8] sm:$0xff]  }
   0xc   : > { %1156 = vmatprep.subr.bf16.mxu0 %v1267_v0  ;;  %1162 = vmatprep.subr.bf16.mxu1 %v1267_v0  ;;  %s1126_s23 = sshll.u32 %s1437_s22, 3  ;;  %v1249_v6 = vld [vmem:[%s1430_s1 + $0x18] sm:$0xff]   ;;  %v1248_v8 = vld [vmem:[%s1430_s1 + $0x10] sm:$0xff]   ;;  %v1251_v10 = vld [vmem:[%s1430_s1 + $0x28] sm:$0xff]   ;;  %vm776_vm2 = vcmask 654336   ;;  %vm1015_vm3 = vcmask 650240  }
   0xd   : > { %1158 = vmatprep.mubr.msk.bf16.mxu0 %vm1268_vm0, %v1267_v0  ;;  %1164 = vmatprep.mubr.msk.bf16.mxu1 %vm1268_vm0, %v1267_v0  ;;  %s246_s26 = scalar_lea.vmem %s1429_s0, %s1126_s23  ;;  %v1250_v13 = vld [vmem:[%s1430_s1 + $0x20] sm:$0xff]   ;;  %v1253_v14 = vld [vmem:[%s1430_s1 + $0x38] sm:$0xff]   ;;  %v1252_v16 = vld [vmem:[%s1430_s1 + $0x30] sm:$0xff]   ;;  %s251_s27 = scalar_lea.vmem %s1435_s6, %s1126_s23 }
   0xe   : > { %v1245_v1 = vld [vmem:[%s246_s26] sm:$0xff]  }
   0xf   : > { %270 = vrot.lane.b32.xlu0 %v1245_v1, %s1269_s29  ;;  %433 = vrot.lane.b32.xlu1 %v1245_v1, %s1270_s30  ;;  %v1254_v18 = vld [vmem:[%s1430_s1 + $0x40] sm:$0xff]  }
  0x10   : > { %1163 = vmatpush3.bf16.msra.mxu1 %v1245_v1 }
  0x11   : > { %1174 = vmatprep.subr.bf16.mxu1 %v1267_v0 }
  0x13   : > { %376 = vrot.lane.b32.xlu0 %v1245_v1, %s1271_s7  ;;  %490 = vrot.lane.b32.xlu1 %v1245_v1, %s1272_s8 }
  0x14   : > { %1165 = vmatmul.mubr.msk.bf16.vlgmr.msra.gmra.mxu1 %vm273_vm1, %v1247_v2 }
  0x15   : > { %1176 = vmatprep.mubr.msk.bf16.mxu1 %vm1268_vm0, %v1267_v0 }
  0x17   : > { %547 = vrot.lane.b32.xlu0 %v1245_v1, %s1273_s9  ;;  %604 = vrot.lane.b32.xlu1 %v1245_v1, %s1274_s10 }
  0x1b   : > { %661 = vrot.lane.b32.xlu0 %v1245_v1, %s1275_s11  ;;  %718 = vrot.lane.b32.xlu1 %v1245_v1, %s1276_s12  ;;  %v1117_v1 = vld [vmem:[%s1434_s5] ss:$0 sm:$0xff] }
  0x81   : > { %v271_v3 = vpop.permute.xlu0 %270  ;;  %v434_v5 = vpop.permute.xlu1 %433 }
  0x82   : > { %1157 = vmatpush3.bf16.msra.mxu0 %v271_v3  ;;  %1175 = vmatpush3.bf16.msra.mxu1 %v434_v5 }
  0x83   : > { %1168 = vmatprep.subr.bf16.mxu0 %v1267_v0  ;;  %1186 = vmatprep.subr.bf16.mxu1 %v1267_v0 }
  0x85   : > { %1159 = vmatmul.mubr.msk.bf16.vlgmr.msra.gmra.mxu0 %vm273_vm1, %v1246_v4  ;;  %v377_v7 = vpop.permute.xlu0 %376  ;;  %1177 = vmatmul.mubr.msk.bf16.vlgmr.msra.gmra.mxu1 %vm273_vm1, %v1249_v6  ;;  %v491_v11 = vpop.permute.xlu1 %490 }
  0x86   : > { %1169 = vmatpush3.bf16.msra.mxu0 %v377_v7  ;;  %1170 = vmatprep.mubr.msk.bf16.mxu0 %vm1268_vm0, %v1267_v0 }
  0x87   : > { %1180 = vmatprep.subr.bf16.mxu0 %v1267_v0  ;;  %1188 = vmatprep.mubr.msk.bf16.mxu1 %vm1268_vm0, %v1267_v0 }
  0x89   : > { %v548_v9 = vpop.permute.xlu0 %547  ;;  %v605_v15 = vpop.permute.xlu1 %604 }
  0x8a   : > { %1187 = vmatpush3.bf16.msra.mxu1 %v548_v9 }
  0x8b   : > { %1198 = vmatprep.subr.bf16.mxu1 %v1267_v0 }
  0x8d   : > { %1171 = vmatmul.mubr.msk.bf16.vlgmr.msra.gmra.mxu0 %vm273_vm1, %v1248_v8  ;;  %1189 = vmatmul.mubr.msk.bf16.vlgmr.msra.gmra.mxu1 %vm273_vm1, %v1251_v10  ;;  %v662_v12 = vpop.permute.xlu0 %661  ;;  %v719_v17 = vpop.permute.xlu1 %718 }
  0x8e   : > { %1181 = vmatpush3.bf16.msra.mxu0 %v491_v11  ;;  %1182 = vmatprep.mubr.msk.bf16.mxu0 %vm1268_vm0, %v1267_v0 }
  0x8f   : > { %1192 = vmatprep.subr.bf16.mxu0 %v1267_v0  ;;  %1199 = vmatpush3.bf16.msra.mxu1 %v662_v12  ;;  %v783_v12 = vld [vmem:[%s1431_s2] sm:$0xff] }
  0x90   : > { %1200 = vmatprep.mubr.msk.bf16.mxu1 %vm1268_vm0, %v1267_v0 }
  0x95   : > { %1183 = vmatmul.mubr.msk.bf16.vlgmr.msra.gmra.mxu0 %vm273_vm1, %v1250_v13  ;;  %1201 = vmatmul.mubr.msk.bf16.vlgmr.msra.gmra.mxu1 %vm273_vm1, %v1253_v14  ;;  %v1277_v13 = vmov 0  }
  0x96   : > { %1193 = vmatpush3.bf16.msra.mxu0 %v605_v15  ;;  %1194 = vmatprep.mubr.msk.bf16.mxu0 %vm1268_vm0, %v1267_v0 }
  0x97   : > { %1204 = vmatprep.subr.bf16.mxu0 %v1267_v0  ;;  %1214 = vmatprep.mubr.msk.f32.mxu1 %vm273_vm1, %v783_v12 }
  0x98   : > { %1243 = vset.pattern.permute.xlu0 %v1277_v13  ;;  %1244 = vset.pattern.permute.xlu1 %v1277_v13 }
  0x9d   : > { %1195 = vmatmul.mubr.msk.bf16.vlgmr.msra.gmra.mxu0 %vm273_vm1, %v1252_v16  ;;  %v784_v16 = vld [vmem:[%s1431_s2 + $0x8] sm:$0xff] }
  0x9e   : > { %1205 = vmatpush3.bf16.msra.mxu0 %v719_v17  ;;  %1206 = vmatprep.mubr.msk.bf16.mxu0 %vm1268_vm0, %v1267_v0 }
  0xa5   : > { %1207 = vmatmul.mubr.msk.bf16.vlgmr.msra.gmra.mxu0 %vm273_vm1, %v1254_v18 }
  0xd4   : > { %v361_v19 = vpop.f32.mrf.mxu1 }
  0xd6   : > { %v1166_v20 = vpop.f32.mrf.mxu1 }
  0xd8   : > { %v364_v21 = vpop.f32.mrf.mxu1 }
  0xda   : > { %v1167_v22 = vpop.f32.mrf.mxu1 }
 0x145   : > { %v311_v23 = vpop.f32.mrf.mxu0  ;;  %v473_v24 = vpop.f32.mrf.mxu1 }
 0x146   : > { %v362_v37 = vadd.f32 %v361_v19, %v311_v23 }
 0x147   : > { %v1160_v25 = vpop.f32.mrf.mxu0  ;;  %v1178_v26 = vpop.f32.mrf.mxu1 }
 0x149   : > { %v314_v27 = vpop.f32.mrf.mxu0  ;;  %v476_v28 = vpop.f32.mrf.mxu1 }
 0x14a   : > { %v365_v43 = vadd.f32 %v364_v21, %v314_v27 }
 0x14b   : > { %v1161_v29 = vpop.f32.mrf.mxu0  ;;  %v1179_v30 = vpop.f32.mrf.mxu1 }
 0x14c   : > { %v977_v29 = vld [vmem:[%s1432_s3] sm:$0xff]  ;;  %v978_v30 = vld [vmem:[%s1432_s3 + $0x8] sm:$0xff] }
 0x14d   : > { %v416_v31 = vpop.f32.mrf.mxu0  ;;  %v587_v32 = vpop.f32.mrf.mxu1 }
 0x14e   : > { %v423_v40 = vadd.f32 %v416_v31, %v362_v37  ;;  %v991_v31 = vld [vmem:[%s1433_s4] sm:$0xff] }
 0x14f   : > { %v1172_v33 = vpop.f32.mrf.mxu0  ;;  %v1190_v34 = vpop.f32.mrf.mxu1 }
 0x150   : > { %v480_v46 = vadd.f32 %v473_v24, %v423_v40  ;;  %v992_v40 = vld [vmem:[%s1433_s4 + $0x8] sm:$0xff] }
 0x151   : > { %v419_v35 = vpop.f32.mrf.mxu0  ;;  %v590_v36 = vpop.f32.mrf.mxu1 }
 0x152   : > { %v424_v47 = vadd.f32 %v419_v35, %v365_v43 }
 0x153   : > { %v1173_v38 = vpop.f32.mrf.mxu0  ;;  %v1191_v39 = vpop.f32.mrf.mxu1 }
 0x154   : > { %v481_v53 = vadd.f32 %v476_v28, %v424_v47 }
 0x155   : > { %v530_v41 = vpop.f32.mrf.mxu0  ;;  %v701_v42 = vpop.f32.mrf.mxu1 }
 0x156   : > { %v537_v50 = vadd.f32 %v530_v41, %v480_v46 }
 0x157   : > { %v1184_v44 = vpop.f32.mrf.mxu0  ;;  %v1202_v45 = vpop.f32.mrf.mxu1 }
 0x158   : > { %v594_v55 = vadd.f32 %v587_v32, %v537_v50 }
 0x159   : > { %v533_v48 = vpop.f32.mrf.mxu0  ;;  %v704_v49 = vpop.f32.mrf.mxu1 }
 0x15a   : > { %v538_v56 = vadd.f32 %v533_v48, %v481_v53 }
 0x15b   : > { %v1185_v51 = vpop.f32.mrf.mxu0  ;;  %v1203_v52 = vpop.f32.mrf.mxu1 }
 0x15c   : > { %v595_v60 = vadd.f32 %v590_v36, %v538_v56 }
 0x15d   : > { %v644_v54 = vpop.f32.mrf.mxu0 }
 0x15e   : > { %v651_v58 = vadd.f32 %v644_v54, %v594_v55 }
 0x15f   : > { %v1196_v57 = vpop.f32.mrf.mxu0 }
 0x160   : > { %v708_v62 = vadd.f32 %v701_v42, %v651_v58 }
 0x161   : > { %v647_v59 = vpop.f32.mrf.mxu0 }
 0x162   : > { %v652_v63 = vadd.f32 %v647_v59, %v595_v60 }
 0x163   : > { %v1197_v61 = vpop.f32.mrf.mxu0 }
 0x164   : > { %v709_v4 = vadd.f32 %v704_v49, %v652_v63 }
 0x165   : > { %v758_v0 = vpop.f32.mrf.mxu0 }
 0x166   : > { %v765_v2 = vadd.f32 %v758_v0, %v708_v62 }
 0x167   : > { %v1208_v3 = vpop.f32.mrf.mxu0 }
 0x168   : > { %v774_v5 = vmul.f32 %v1117_v1, %v765_v2 }
 0x169   : > { %v761_v6 = vpop.f32.mrf.mxu0 }
 0x16a   : > { %v766_v7 = vadd.f32 %v761_v6, %v709_v4  ;;  %v777_v8 = vsel %vm776_vm2, %v774_v5, 0.0 }
 0x16b   : > { %v1209_v9 = vpop.f32.mrf.mxu0  ;;  %778 = vadd.xlane.f32.xlu1 %v777_v8 }
 0x16c   : > { %v775_v10 = vmul.f32 %v1117_v1, %v766_v7 }
 0x16e   : > { %v780_v11 = vsel %vm776_vm2, %v775_v10, 0.0 }
 0x16f   : > { %781 = vadd.xlane.f32.xlu0 %v780_v11 }
 0x1f4   : > { %v779_v15 = vpop.xlane.xlu1 %778 }
 0x1f8   : > { %v782_v14 = vpop.xlane.xlu0 %781 }
 0x1f9   : > { %1210 = vmatprep.subr.mxu1 %v782_v14 }
 0x1fa   : > { %1211 = vmatpush3.msra.mxu1 %v782_v14 }
 0x1fb   : > { %1212 = vmatprep.subr.mxu1 %v779_v15 }
 0x1fc   : > { %1213 = vmatpush3.msra.mxu1 %v779_v15 }
 0x1fd   : > { %1215 = vmatmul.mubr.msk.f32.vlgmr.msra.gmra.mxu1 %vm273_vm1, %v784_v16 }
 0x1fe   : > { %1221 = vmatprep.mubr.msk.f32.mxu1 %vm273_vm1, %v783_v12 }
 0x2bd   : > { %v1216_v17 = vpop.f32.mrf.mxu1 }
 0x2be   : > { %873 = vperm.xlu0 %1243, %v1216_v17  }
 0x2bf   : > { %v857_v18 = vpop.f32.mrf.mxu1 }
 0x2c0   : > { %868 = vperm.xlu1 %1244, %v857_v18  }
 0x339   : > { %v874_v19 = vpop.permute.xlu0 %873 }
 0x33a   : > { %v877_v20 = vsub.f32 %v766_v7, %v874_v19 }
 0x33b   : > { %v869_v21 = vpop.permute.xlu1 %868 }
 0x33c   : > { %v879_v22 = vmul.f32 %v1117_v1, %v877_v20  ;;  %v876_v23 = vsub.f32 %v765_v2, %v869_v21 }
 0x33e   : > { %v878_v24 = vmul.f32 %v1117_v1, %v876_v23  ;;  %v881_v25 = vmul.f32 %v879_v22, %v879_v22 }
 0x340   : > { %v885_v26 = vsel %vm776_vm2, %v881_v25, 0.0  ;;  %v880_v27 = vmul.f32 %v878_v24, %v878_v24 }
 0x341   : > { %886 = vadd.xlane.f32.xlu1 %v885_v26 }
 0x342   : > { %v882_v28 = vsel %vm776_vm2, %v880_v27, 0.0 }
 0x343   : > { %883 = vadd.xlane.f32.xlu0 %v882_v28 }
 0x352   : > { %981 = vperm.xlu1 %1244, %v977_v29  }
 0x356   : > { %986 = vperm.xlu1 %1244, %v978_v30  }
 0x35a   : > { %995 = vperm.xlu1 %1244, %v991_v31  }
 0x3ca   : > { %v887_v32 = vpop.xlane.xlu1 %886 }
 0x3cb   : > { %1217 = vmatprep.subr.mxu1 %v887_v32 }
 0x3cc   : > { %v884_v33 = vpop.xlane.xlu0 %883  ;;  %1218 = vmatpush3.msra.mxu1 %v887_v32 }
 0x3cd   : > { %1219 = vmatprep.subr.mxu1 %v884_v33 }
 0x3ce   : > { %1220 = vmatpush3.msra.mxu1 %v884_v33  ;;  %v982_v41 = vpop.permute.xlu1 %981 }
 0x3cf   : > { %1222 = vmatmul.mubr.msk.f32.vlgmr.msra.gmra.mxu1 %vm273_vm1, %v784_v16 }
 0x3d2   : > { %v987_v42 = vpop.permute.xlu1 %986 }
 0x3d6   : > { %v996_v43 = vpop.permute.xlu1 %995 }
 0x48f   : > { %v1223_v34 = vpop.f32.mrf.mxu1 }
 0x490   : > { %v960_v35 = vadd.f32 1e-05, %v1223_v34 }
 0x491   : > { %v954_v36 = vpop.f32.mrf.mxu1 }
 0x492   : > { %1255 = vrsqrt.f32 %v960_v35  ;;  %v955_v37 = vadd.f32 1e-05, %v954_v36 }
 0x494   : > { %1257 = vrsqrt.f32 %v955_v37 }
 0x49f   : > { %v1256_v38 = vpop.eup %1255 }
 0x4a0   : > { %972 = vperm.xlu0 %1243, %v1256_v38  }
 0x4a1   : > { %v1258_v39 = vpop.eup %1257 }
 0x4a2   : > { %967 = vperm.xlu1 %1244, %v1258_v39  }
 0x4a6   : > { %1000 = vperm.xlu1 %1244, %v992_v40  }
 0x51b   : > { %v973_v44 = vpop.permute.xlu0 %972 }
 0x51c   : > { %v976_v45 = vmul.f32 %v973_v44, %v877_v20 }
 0x51d   : > { %v968_v46 = vpop.permute.xlu1 %967 }
 0x51e   : > { %v975_v47 = vmul.f32 %v968_v46, %v876_v23  ;;  %v990_v49 = vmul.f32 %v987_v42, %v976_v45 }
 0x520   : > { %v989_v48 = vmul.f32 %v982_v41, %v975_v47 }
 0x521   : > { %v1001_v50 = vpop.permute.xlu1 %1000 }
 0x522   : > { %v1003_v51 = vadd.f32 %v996_v43, %v989_v48  ;;  %v1004_v52 = vadd.f32 %v1001_v50, %v990_v49 }
 0x524   : > { %v1005_v53 = vmax.f32 %v1003_v51, 0.0  ;;  %v1006_v54 = vmax.f32 %v1004_v52, 0.0 }
 0x526   : > { %v1128_v55 = vpack.c.bf16 %v1005_v53, %v1005_v53  ;;  %v1129_v56 = vpack.c.bf16 %v1006_v54, %v1006_v54 }
 0x528   : > { %1016 = vst.msk [vmem:[%s251_s27] sm:$0xf] %vm1015_vm3, %v1128_v55  ;;  %1017 = vst.msk [vmem:[%s251_s27 + $0x4] sm:$0xf] %vm1015_vm3, %v1129_v56 }
 0x529 PF: > { %s16_s21 = sadd.s32 1, %s1265_s21  }
 0x52a   : > { %p13_p4 = scmp.ge.s32.totalorder %s16_s21, 4  }
 0x52c   :  { %15 = sbr.rel (!%p13_p4) target bundleno = 1 (0x1), region = 82 }

// kernel: encoder_forward.14
= control target key start
LH: loop header
LB: loop body
LE: loop exit
PB: predicated region body
PF: predicated region fallthrough
CT: control target
= control target key end

     0   :  { %s1287_s21 = smov 0   ;;  %s1441_s0 = inlined_call_operand.vmem [shape: bf16[2,64,30], index: 0, kind: input, shape index: {}]   ;;  %s1442_s1 = inlined_call_operand.vmem [shape: bf16[4,32,64], index: 1, kind: input, shape index: {}]   ;;  %s1443_s2 = inlined_call_operand.vmem [shape: f32[32,32], index: 2, kind: input, shape index: {}]   ;;  %s1444_s3 = inlined_call_operand.vmem [shape: f32[32,1], index: 3, kind: input, shape index: {}]   ;;  %s1445_s4 = inlined_call_operand.vmem [shape: f32[32,1], index: 4, kind: input, shape index: {}]   ;;  %s1446_s5 = inlined_call_operand.vmem [shape: f32[1,20], index: 5, kind: input, shape index: {}]   ;;  %s1447_s6 = inlined_call_operand.vmem [shape: bf16[2,32,20], index: 6, kind: output, shape index: {}]  }
   0x1 LB: > { %s1028_s22 = sadd.s32 4294967295, %s1246_s21   ;;  %p1032_p0 = scmp.ge.s32.totalorder %s1246_s21, 1  ;;  %s1246_s21 = sphi %s1287_s21, %s16_s21  }
   0x2   : > { %p212_p1 = scmp.lt.s32.totalorder %s1246_s21, 3 }
   0x4   : > { %p213_p2 = pnand %p1032_p0, %p212_p1 }
   0x5   : > { %p242_p3 = scmp.lt.s32.totalorder (!%p213_p2), %s1028_s22, 1  ;;  %s1248_s29 = smov (!%p213_p2), 127  }
   0x6   : > { %216 = sbr.rel (%p213_p2) target bundleno = 1344 (0x540), region = 44  ;;  %s1249_s8 = smov (!%p213_p2), 123  }
   0x7   : > { %s1250_s9 = smov (!%p213_p2), 122  }
   0xb   : > { %s1449_s22 = smov (!%p242_p3, %s1028_s22), 1  ;;  %vm312_vm0 = vcmask 523264   ;;  %v1224_v0 = vld [vmem:[%s1442_s1] sm:$0xff]   ;;  %v1226_v5 = vld [vmem:[%s1442_s1 + $0x10] sm:$0xff]   ;;  %v1225_v6 = vld [vmem:[%s1442_s1 + $0x8] sm:$0xff]   ;;  %vm620_vm1 = vcmask 162816  }
   0xc   : > { %s1084_s23 = sshll.u32 %s1449_s22, 5  ;;  %1150 = vmatprep.mubr.msk.bf16.mxu1 %vm312_vm0, %v1224_v0  ;;  %1138 = vmatprep.mubr.msk.bf16.mxu0 %vm312_vm0, %v1226_v5  ;;  %v1228_v7 = vld [vmem:[%s1442_s1 + $0x30] sm:$0xff]   ;;  %v1227_v15 = vld [vmem:[%s1442_s1 + $0x18] sm:$0xff]   ;;  %v1230_v17 = vld [vmem:[%s1442_s1 + $0x20] sm:$0xff]   ;;  %vm637_vm2 = vcmask 261120   ;;  %v1251_v5 = vmov 0  }
   0xd   : > { %s246_s26 = scalar_lea.vmem %s1441_s0, %s1084_s23  ;;  %v1229_v21 = vld [vmem:[%s1442_s1 + $0x38] sm:$0xff]   ;;  %v1231_v23 = vld [vmem:[%s1442_s1 + $0x28] sm:$0xff]   ;;  %v1336_v38 = vld [vmem:[%s1446_s5] ss:$0 sm:$0xff]  ;;  %1218 = vset.pattern.permute.xlu1 %v1251_v5  ;;  %1219 = vset.pattern.permute.xlu0 %v1251_v5  ;;  %s1085_s28 = sshll.u32 %s1449_s22, 4  ;;  %vm968_vm3 = vcmask 158720  }
   0xe   : > { %v1220_v1 = vld [vmem:[%s246_s26 + $0x18] sm:$0xff]   ;;  %v1221_v2 = vld [vmem:[%s246_s26 + $0x10] sm:$0xff]   ;;  %v1222_v3 = vld [vmem:[%s246_s26 + $0x8] sm:$0xff]   ;;  %s251_s7 = scalar_lea.vmem %s1447_s6, %s1085_s28 }
   0xf   : > { %306 = vrot.lane.b32.xlu0 %v1220_v1, %s1248_s29  ;;  %1142 = vmatprep.subr.bf16.mxu1 %v1220_v1  ;;  %v1223_v4 = vld [vmem:[%s246_s26] sm:$0xff]  }
  0x10   : > { %1143 = vmatpush3.bf16.msra.mxu1 %v1220_v1  ;;  %302 = vrot.lane.b32.xlu1 %v1222_v3, %s1248_s29  ;;  %v633_v61 = vld [vmem:[%s1443_s2] sm:$0xff] }
  0x11   : > { %1144 = vmatprep.subr.bf16.mxu1 %v1221_v2 }
  0x13   : > { %304 = vrot.lane.b32.xlu0 %v1221_v2, %s1248_s29 }
  0x14   : > { %1145 = vmatpush3.bf16.msra.mxu1 %v1221_v2  ;;  %300 = vrot.lane.b32.xlu1 %v1223_v4, %s1248_s29 }
  0x15   : > { %1146 = vmatprep.subr.bf16.mxu1 %v1222_v3 }
  0x17   : > { %458 = vrot.lane.b32.xlu0 %v1220_v1, %s1249_s8 }
  0x18   : > { %1147 = vmatpush3.bf16.msra.mxu1 %v1222_v3  ;;  %544 = vrot.lane.b32.xlu1 %v1220_v1, %s1250_s9 }
  0x19   : > { %1148 = vmatprep.subr.bf16.mxu1 %v1223_v4 }
  0x1b   : > { %456 = vrot.lane.b32.xlu0 %v1221_v2, %s1249_s8 }
  0x1c   : > { %1149 = vmatpush3.bf16.msra.mxu1 %v1223_v4  ;;  %542 = vrot.lane.b32.xlu1 %v1221_v2, %s1250_s9  ;;  %v1357_v2 = vld [vmem:[%s1443_s2 + $0x8] sm:$0xff] }
  0x1f   : > { %454 = vrot.lane.b32.xlu0 %v1222_v3, %s1249_s8  ;;  %1151 = vmatmul.mubr.msk.bf16.vlgmr.msra.gmra.mxu1 %vm312_vm0, %v1225_v6 }
  0x20   : > { %1174 = vmatprep.mubr.msk.bf16.mxu1 %vm312_vm0, %v1228_v7  ;;  %540 = vrot.lane.b32.xlu1 %v1222_v3, %s1250_s9  ;;  %v1362_v3 = vld [vmem:[%s1443_s2 + $0x10] sm:$0xff] }
  0x23   : > { %452 = vrot.lane.b32.xlu0 %v1223_v4, %s1249_s8 }
  0x24   : > { %538 = vrot.lane.b32.xlu1 %v1223_v4, %s1250_s9  ;;  %v1371_v4 = vld [vmem:[%s1443_s2 + $0x18] sm:$0xff] }
  0x81   : > { %v307_v8 = vpop.permute.xlu0 %306 }
  0x82   : > { %1130 = vmatprep.subr.bf16.mxu0 %v307_v8  ;;  %v303_v9 = vpop.permute.xlu1 %302 }
  0x83   : > { %1131 = vmatpush3.bf16.msra.mxu0 %v307_v8 }
  0x85   : > { %v305_v10 = vpop.permute.xlu0 %304 }
  0x86   : > { %1132 = vmatprep.subr.bf16.mxu0 %v305_v10  ;;  %v301_v11 = vpop.permute.xlu1 %300 }
  0x87   : > { %1133 = vmatpush3.bf16.msra.mxu0 %v305_v10 }
  0x88   : > { %1134 = vmatprep.subr.bf16.mxu0 %v303_v9 }
  0x89   : > { %v459_v12 = vpop.permute.xlu0 %458 }
  0x8a   : > { %v545_v13 = vpop.permute.xlu1 %544 }
  0x8b   : > { %1135 = vmatpush3.bf16.msra.mxu0 %v303_v9  ;;  %1166 = vmatprep.subr.bf16.mxu1 %v545_v13 }
  0x8c   : > { %1136 = vmatprep.subr.bf16.mxu0 %v301_v11  ;;  %1167 = vmatpush3.bf16.msra.mxu1 %v545_v13 }
  0x8d   : > { %v457_v14 = vpop.permute.xlu0 %456 }
  0x8e   : > { %v543_v16 = vpop.permute.xlu1 %542 }
  0x8f   : > { %1137 = vmatpush3.bf16.msra.mxu0 %v301_v11  ;;  %1168 = vmatprep.subr.bf16.mxu1 %v543_v16 }
  0x90   : > { %1154 = vmatprep.subr.bf16.mxu0 %v459_v12  ;;  %1169 = vmatpush3.bf16.msra.mxu1 %v543_v16 }
  0x91   : > { %v455_v19 = vpop.permute.xlu0 %454 }
  0x92   : > { %1139 = vmatmul.mubr.msk.bf16.vlgmr.msra.gmra.mxu0 %vm312_vm0, %v1227_v15  ;;  %v541_v18 = vpop.permute.xlu1 %540 }
  0x93   : > { %1155 = vmatpush3.bf16.msra.mxu0 %v459_v12  ;;  %1162 = vmatprep.mubr.msk.bf16.mxu0 %vm312_vm0, %v1230_v17 }
  0x94   : > { %1156 = vmatprep.subr.bf16.mxu0 %v457_v14  ;;  %1170 = vmatprep.subr.bf16.mxu1 %v541_v18 }
  0x95   : > { %1171 = vmatpush3.bf16.msra.mxu1 %v541_v18  ;;  %v453_v22 = vpop.permute.xlu0 %452 }
  0x96   : > { %v539_v20 = vpop.permute.xlu1 %538 }
  0x97   : > { %1157 = vmatpush3.bf16.msra.mxu0 %v457_v14  ;;  %1172 = vmatprep.subr.bf16.mxu1 %v539_v20 }
  0x98   : > { %1158 = vmatprep.subr.bf16.mxu0 %v455_v19 }
  0x99   : > { %1173 = vmatpush3.bf16.msra.mxu1 %v539_v20 }
  0x9b   : > { %1159 = vmatpush3.bf16.msra.mxu0 %v455_v19 }
  0x9c   : > { %1160 = vmatprep.subr.bf16.mxu0 %v453_v22  ;;  %1175 = vmatmul.mubr.msk.bf16.vlgmr.msra.gmra.mxu1 %vm312_vm0, %v1229_v21 }
  0x9d   : > { %1200 = vmatprep.mubr.msk.f32.mxu1 %vm637_vm2, %v633_v61 }
  0x9f   : > { %1161 = vmatpush3.bf16.msra.mxu0 %v453_v22 }
  0xa2   : > { %1163 = vmatmul.mubr.msk.bf16.vlgmr.msra.gmra.mxu0 %vm312_vm0, %v1231_v23 }
  0xa3   : > { %1186 = vmatprep.mubr.msk.f32.mxu0 %vm637_vm2, %v633_v61 }
  0xdf   : > { %v1152_v24 = vpop.f32.mrf.mxu1 }
  0xe1   : > { %v422_v25 = vpop.f32.mrf.mxu1 }
  0xe3   : > { %v1153_v27 = vpop.f32.mrf.mxu1 }
  0xe5   : > { %v425_v29 = vpop.f32.mrf.mxu1 }
 0x152   : > { %v1140_v26 = vpop.f32.mrf.mxu0 }
 0x153   : > { %v431_v33 = vadd.f32 %v1152_v24, %v1140_v26 }
 0x154   : > { %v353_v28 = vpop.f32.mrf.mxu0 }
 0x155   : > { %v423_v43 = vadd.f32 %v422_v25, %v353_v28 }
 0x156   : > { %v1141_v30 = vpop.f32.mrf.mxu0 }
 0x157   : > { %v434_v39 = vadd.f32 %v1153_v27, %v1141_v30  ;;  %v894_v30 = vld [vmem:[%s1444_s3 + $0x10] sm:$0xff] }
 0x158   : > { %v356_v32 = vpop.f32.mrf.mxu0 }
 0x159   : > { %v426_v44 = vadd.f32 %v425_v29, %v356_v32  ;;  %v920_v32 = vld [vmem:[%s1445_s4] sm:$0xff] }
 0x15c   : > { %v1176_v31 = vpop.f32.mrf.mxu1 }
 0x15e   : > { %v590_v34 = vpop.f32.mrf.mxu1 }
 0x160   : > { %v1177_v41 = vpop.f32.mrf.mxu1 }
 0x162   : > { %v1164_v35 = vpop.f32.mrf.mxu0  ;;  %v593_v52 = vpop.f32.mrf.mxu1 }
 0x163   : > { %v521_v36 = vadd.f32 %v1164_v35, %v431_v33  ;;  %v893_v33 = vld [vmem:[%s1444_s3 + $0x8] sm:$0xff] }
 0x164   : > { %v504_v37 = vpop.f32.mrf.mxu0  ;;  %v921_v35 = vld [vmem:[%s1445_s4 + $0x8] sm:$0xff] }
 0x165   : > { %v1338_v40 = vadd.f32 %v1176_v31, %v521_v36  ;;  %v519_v48 = vadd.f32 %v504_v37, %v423_v43  ;;  %v892_v31 = vld [vmem:[%s1444_s3] sm:$0xff] }
 0x166   : > { %v1165_v42 = vpop.f32.mrf.mxu0 }
 0x167   : > { %v522_v45 = vadd.f32 %v1165_v42, %v434_v39  ;;  %v618_v46 = vmul.f32 %v1336_v38, %v1338_v40  ;;  %v605_v55 = vadd.f32 %v590_v34, %v519_v48  ;;  %v895_v34 = vld [vmem:[%s1444_s3 + $0x18] sm:$0xff] }
 0x168   : > { %v507_v47 = vpop.f32.mrf.mxu0 }
 0x169   : > { %v608_v49 = vadd.f32 %v1177_v41, %v522_v45  ;;  %v520_v50 = vadd.f32 %v507_v47, %v426_v44  ;;  %v627_v51 = vsel %vm620_vm1, %v618_v46, 0.0  ;;  %v616_v59 = vmul.f32 %v1336_v38, %v605_v55 }
 0x16a   : > { %628 = vadd.xlane.f32.xlu1 %v627_v51 }
 0x16b   : > { %v606_v53 = vadd.f32 %v593_v52, %v520_v50  ;;  %v619_v54 = vmul.f32 %v1336_v38, %v608_v49  ;;  %v621_v60 = vsel %vm620_vm1, %v616_v59, 0.0  ;;  %v922_v50 = vld [vmem:[%s1445_s4 + $0x10] sm:$0xff] }
 0x16d   : > { %v630_v56 = vsel %vm620_vm1, %v619_v54, 0.0  ;;  %v617_v57 = vmul.f32 %v1336_v38, %v606_v53 }
 0x16e   : > { %631 = vadd.xlane.f32.xlu0 %v630_v56 }
 0x16f   : > { %v624_v58 = vsel %vm620_vm1, %v617_v57, 0.0 }
 0x172   : > { %625 = vadd.xlane.f32.xlu0 %v624_v58 }
 0x176   : > { %622 = vadd.xlane.f32.xlu0 %v621_v60 }
 0x1f3   : > { %v629_v63 = vpop.xlane.xlu1 %628 }
 0x1f7   : > { %v632_v62 = vpop.xlane.xlu0 %631 }
 0x1f8   : > { %1178 = vmatprep.subr.mxu0 %v632_v62 }
 0x1f9   : > { %1179 = vmatpush3.msra.mxu0 %v632_v62 }
 0x1fa   : > { %1180 = vmatprep.subr.mxu0 %v629_v63 }
 0x1fb   : > { %1181 = vmatpush3.msra.mxu0 %v629_v63  ;;  %v626_v0 = vpop.xlane.xlu0 %625 }
 0x1fc   : > { %1182 = vmatprep.subr.mxu0 %v626_v0 }
 0x1fd   : > { %1183 = vmatpush3.msra.mxu0 %v626_v0 }
 0x1ff   : > { %v623_v1 = vpop.xlane.xlu0 %622 }
 0x200   : > { %1184 = vmatprep.subr.mxu0 %v623_v1 }
 0x201   : > { %1185 = vmatpush3.msra.mxu0 %v623_v1 }
 0x202   : > { %1187 = vmatmul.mubr.msk.f32.vlgmr.msra.gmra.mxu0 %vm637_vm2, %v1357_v2 }
 0x203   : > { %1189 = vmatprep.mubr.msk.f32.mxu0 %vm637_vm2, %v1362_v3 }
 0x206   : > { %1190 = vmatmul.mubr.msk.f32.gmra.mxu0 %vm637_vm2, %v1371_v4 }
 0x2c2   : > { %v1188_v6 = vpop.f32.mrf.mxu0 }
 0x2c4   : > { %v716_v7 = vpop.f32.mrf.mxu0 }
 0x2c6   : > { %v1191_v8 = vpop.f32.mrf.mxu0 }
 0x2c7   : > { %752 = vperm.xlu1 %1218, %v1191_v8  }
 0x2c8   : > { %v726_v9 = vpop.f32.mrf.mxu0 }
 0x2c9   : > { %747 = vperm.xlu0 %1219, %v726_v9  }
 0x2cb   : > { %742 = vperm.xlu1 %1218, %v1188_v6  }
 0x2cf   : > { %737 = vperm.xlu1 %1218, %v716_v7  }
 0x342   : > { %v753_v10 = vpop.permute.xlu1 %752 }
 0x343   : > { %v1375_v11 = vsub.f32 %v608_v49, %v753_v10 }
 0x344   : > { %v748_v12 = vpop.permute.xlu0 %747 }
 0x345   : > { %v762_v13 = vmul.f32 %v1336_v38, %v1375_v11  ;;  %v1380_v14 = vsub.f32 %v1338_v40, %v748_v12 }
 0x346   : > { %v743_v15 = vpop.permute.xlu1 %742 }
 0x347   : > { %v761_v16 = vmul.f32 %v1336_v38, %v1380_v14  ;;  %v1384_v17 = vsub.f32 %v606_v53, %v743_v15  ;;  %v766_v18 = vmul.f32 %v762_v13, %v762_v13  ;;  %v923_v53 = vld [vmem:[%s1445_s4 + $0x18] sm:$0xff] }
 0x349   : > { %v760_v19 = vmul.f32 %v1336_v38, %v1384_v17  ;;  %v776_v20 = vsel %vm620_vm1, %v766_v18, 0.0  ;;  %v765_v21 = vmul.f32 %v761_v16, %v761_v16 }
 0x34a   : > { %777 = vadd.xlane.f32.xlu1 %v776_v20  ;;  %v738_v22 = vpop.permute.xlu1 %737 }
 0x34b   : > { %v1389_v23 = vsub.f32 %v605_v55, %v738_v22  ;;  %v773_v24 = vsel %vm620_vm1, %v765_v21, 0.0  ;;  %v764_v25 = vmul.f32 %v760_v19, %v760_v19 }
 0x34c   : > { %774 = vadd.xlane.f32.xlu0 %v773_v24 }
 0x34d   : > { %v759_v26 = vmul.f32 %v1336_v38, %v1389_v23  ;;  %v770_v27 = vsel %vm620_vm1, %v764_v25, 0.0 }
 0x34e   : > { %771 = vadd.xlane.f32.xlu1 %v770_v27 }
 0x34f   : > { %v763_v28 = vmul.f32 %v759_v26, %v759_v26 }
 0x351   : > { %v767_v29 = vsel %vm620_vm1, %v763_v28, 0.0 }
 0x352   : > { %768 = vadd.xlane.f32.xlu1 %v767_v29 }
 0x362   : > { %908 = vperm.xlu0 %1219, %v894_v30  }
 0x363   : > { %898 = vperm.xlu1 %1218, %v892_v31  }
 0x366   : > { %926 = vperm.xlu0 %1219, %v920_v32  }
 0x367   : > { %903 = vperm.xlu1 %1218, %v893_v33  }
 0x36b   : > { %913 = vperm.xlu1 %1218, %v895_v34  }
 0x36f   : > { %931 = vperm.xlu1 %1218, %v921_v35  }
 0x3d3   : > { %v778_v36 = vpop.xlane.xlu1 %777 }
 0x3d4   : > { %1192 = vmatprep.subr.mxu1 %v778_v36 }
 0x3d5   : > { %1193 = vmatpush3.msra.mxu1 %v778_v36  ;;  %v775_v37 = vpop.xlane.xlu0 %774 }
 0x3d6   : > { %1194 = vmatprep.subr.mxu1 %v775_v37 }
 0x3d7   : > { %v772_v38 = vpop.xlane.xlu1 %771  ;;  %1195 = vmatpush3.msra.mxu1 %v775_v37 }
 0x3d8   : > { %1196 = vmatprep.subr.mxu1 %v772_v38 }
 0x3d9   : > { %1197 = vmatpush3.msra.mxu1 %v772_v38 }
 0x3db   : > { %v769_v39 = vpop.xlane.xlu1 %768 }
 0x3dc   : > { %1198 = vmatprep.subr.mxu1 %v769_v39 }
 0x3dd   : > { %1199 = vmatpush3.msra.mxu1 %v769_v39  ;;  %v909_v56 = vpop.permute.xlu0 %908 }
 0x3de   : > { %1201 = vmatmul.mubr.msk.f32.vlgmr.msra.gmra.mxu1 %vm637_vm2, %v1357_v2 }
 0x3df   : > { %1203 = vmatprep.mubr.msk.f32.mxu1 %vm637_vm2, %v1362_v3  ;;  %v899_v54 = vpop.permute.xlu1 %898 }
 0x3e1   : > { %v927_v58 = vpop.permute.xlu0 %926 }
 0x3e2   : > { %1204 = vmatmul.mubr.msk.f32.gmra.mxu1 %vm637_vm2, %v1371_v4 }
 0x3e3   : > { %v904_v55 = vpop.permute.xlu1 %903 }
 0x3e7   : > { %v914_v57 = vpop.permute.xlu1 %913 }
 0x3eb   : > { %v932_v59 = vpop.permute.xlu1 %931 }
 0x49e   : > { %v1202_v40 = vpop.f32.mrf.mxu1 }
 0x49f   : > { %v851_v41 = vadd.f32 1e-05, %v1202_v40 }
 0x4a0   : > { %v845_v42 = vpop.f32.mrf.mxu1 }
 0x4a1   : > { %1232 = vrsqrt.f32 %v851_v41  ;;  %v846_v43 = vadd.f32 1e-05, %v845_v42 }
 0x4a2   : > { %v1205_v44 = vpop.f32.mrf.mxu1 }
 0x4a3   : > { %1234 = vrsqrt.f32 %v846_v43  ;;  %v861_v45 = vadd.f32 1e-05, %v1205_v44 }
 0x4a4   : > { %v855_v46 = vpop.f32.mrf.mxu1 }
 0x4a5   : > { %1236 = vrsqrt.f32 %v861_v45  ;;  %v856_v47 = vadd.f32 1e-05, %v855_v46 }
 0x4a7   : > { %1238 = vrsqrt.f32 %v856_v47 }
 0x4ae   : > { %v1233_v48 = vpop.eup %1232 }
 0x4af   : > { %875 = vperm.xlu0 %1219, %v1233_v48  }
 0x4b0   : > { %v1235_v49 = vpop.eup %1234 }
 0x4b1   : > { %870 = vperm.xlu1 %1218, %v1235_v49  }
 0x4b2   : > { %v1237_v51 = vpop.eup %1236 }
 0x4b3   : > { %936 = vperm.xlu0 %1219, %v922_v50  }
 0x4b4   : > { %v1239_v52 = vpop.eup %1238 }
 0x4b5   : > { %885 = vperm.xlu1 %1218, %v1237_v51  }
 0x4b9   : > { %880 = vperm.xlu1 %1218, %v1239_v52  }
 0x4bd   : > { %941 = vperm.xlu1 %1218, %v923_v53  }
 0x52a   : > { %v876_v60 = vpop.permute.xlu0 %875 }
 0x52b   : > { %v889_v61 = vmul.f32 %v876_v60, %v1384_v17 }
 0x52c   : > { %v871_v62 = vpop.permute.xlu1 %870 }
 0x52d   : > { %v917_v63 = vmul.f32 %v904_v55, %v889_v61  ;;  %v888_v0 = vmul.f32 %v871_v62, %v1389_v23 }
 0x52e   : > { %v937_v16 = vpop.permute.xlu0 %936 }
 0x52f   : > { %v945_v1 = vadd.f32 %v932_v59, %v917_v63  ;;  %v916_v2 = vmul.f32 %v899_v54, %v888_v0 }
 0x530   : > { %v886_v3 = vpop.permute.xlu1 %885 }
 0x531   : > { %v949_v4 = vmax.f32 %v945_v1, 0.0  ;;  %v944_v5 = vadd.f32 %v927_v58, %v916_v2  ;;  %v891_v8 = vmul.f32 %v886_v3, %v1375_v11 }
 0x533   : > { %v1087_v6 = vpack.c.bf16 %v949_v4, %v949_v4  ;;  %v948_v7 = vmax.f32 %v944_v5, 0.0  ;;  %v919_v15 = vmul.f32 %v914_v57, %v891_v8 }
 0x534   : > { %v881_v9 = vpop.permute.xlu1 %880 }
 0x535   : > { %970 = vst.msk [vmem:[%s251_s7 + $0x4] sm:$0xf] %vm968_vm3, %v1087_v6  ;;  %v1086_v10 = vpack.c.bf16 %v948_v7, %v948_v7  ;;  %v890_v12 = vmul.f32 %v881_v9, %v1380_v14 }
 0x537   : > { %969 = vst.msk [vmem:[%s251_s7] sm:$0xf] %vm968_vm3, %v1086_v10  ;;  %v918_v13 = vmul.f32 %v909_v56, %v890_v12 }
 0x538   : > { %v942_v17 = vpop.permute.xlu1 %941 }
 0x539   : > { %v946_v18 = vadd.f32 %v937_v16, %v918_v13  ;;  %v947_v19 = vadd.f32 %v942_v17, %v919_v15 }
 0x53b   : > { %v950_v20 = vmax.f32 %v946_v18, 0.0  ;;  %v951_v21 = vmax.f32 %v947_v19, 0.0 }
 0x53d   : > { %v1088_v22 = vpack.c.bf16 %v950_v20, %v950_v20  ;;  %v1089_v23 = vpack.c.bf16 %v951_v21, %v951_v21 }
 0x53f   : > { %971 = vst.msk [vmem:[%s251_s7 + $0x8] sm:$0xf] %vm968_vm3, %v1088_v22  ;;  %972 = vst.msk [vmem:[%s251_s7 + $0xc] sm:$0xf] %vm968_vm3, %v1089_v23 }
 0x540 PF: > { %s16_s21 = sadd.s32 1, %s1246_s21  }
 0x541   : > { %p13_p4 = scmp.ge.s32.totalorder %s16_s21, 4  }
 0x543   :  { %15 = sbr.rel (!%p13_p4) target bundleno = 1 (0x1), region = 77 }

// kernel: encoder_forward.15
= control target key start
LH: loop header
LB: loop body
LE: loop exit
PB: predicated region body
PF: predicated region fallthrough
CT: control target
= control target key end

     0   :  { %s1752_s21 = smov 0   ;;  %s1941_s0 = inlined_call_operand.vmem [shape: bf16[2,32,42], index: 0, kind: input, shape index: {}]   ;;  %s1942_s1 = inlined_call_operand.vmem [shape: bf16[9,32,32], index: 1, kind: input, shape index: {}]   ;;  %s1943_s2 = inlined_call_operand.vmem [shape: f32[32,32], index: 2, kind: input, shape index: {}]   ;;  %s1944_s3 = inlined_call_operand.vmem [shape: f32[32,1], index: 3, kind: input, shape index: {}]   ;;  %s1945_s4 = inlined_call_operand.vmem [shape: f32[32,1], index: 4, kind: input, shape index: {}]   ;;  %s1946_s5 = inlined_call_operand.vmem [shape: f32[1,24], index: 5, kind: input, shape index: {}]   ;;  %s1947_s6 = inlined_call_operand.vmem [shape: bf16[2,32,24], index: 6, kind: output, shape index: {}]  }
   0x1 LB: > { %s1393_s22 = sadd.s32 4294967295, %s1706_s21   ;;  %p1397_p0 = scmp.ge.s32.totalorder %s1706_s21, 1  ;;  %s1706_s21 = sphi %s1752_s21, %s16_s21  }
   0x2   : > { %p212_p1 = scmp.lt.s32.totalorder %s1706_s21, 3 }
   0x4   : > { %p213_p2 = pnand %p1397_p0, %p212_p1 }
   0x5   : > { %p242_p3 = scmp.lt.s32.totalorder (!%p213_p2), %s1393_s22, 1  ;;  %s1708_s7 = smov (!%p213_p2), 127  }
   0x6   : > { %216 = sbr.rel (%p213_p2) target bundleno = 1349 (0x545), region = 44  ;;  %s1709_s8 = smov (!%p213_p2), 126  }
   0x7   : > { %s1710_s13 = smov (!%p213_p2), 122   ;;  %s1711_s14 = smov (!%p213_p2), 121  }
   0x8   : > { %s1712_s15 = smov (!%p213_p2), 120   ;;  %s1713_s16 = smov (!%p213_p2), 116  }
   0x9   : > { %s1714_s17 = smov (!%p213_p2), 115   ;;  %s1715_s18 = smov (!%p213_p2), 114  }
   0xb   : > { %v1674_v0 = vld [vmem:[%s1942_s1 + $0x10] sm:$0xff]   ;;  %vm292_vm0 = vcmask 261120   ;;  %s1949_s22 = smov (!%p242_p3, %s1393_s22), 1  ;;  %v1675_v1 = vld [vmem:[%s1942_s1] sm:$0xff]   ;;  %v1677_v4 = vld [vmem:[%s1942_s1 + $0x8] sm:$0xff]   ;;  %vm986_vm1 = vcmask 195584  }
   0xc   : > { %1549 = vmatprep.mubr.msk.bf16.mxu0 %vm292_vm0, %v1674_v0  ;;  %s1487_s27 = sshll.u32 %s1949_s22, 4  ;;  %1557 = vmatprep.mubr.msk.bf16.mxu1 %vm292_vm0, %v1675_v1  ;;  %v1679_v5 = vld [vmem:[%s1942_s1 + $0x30] sm:$0xff]   ;;  %v1676_v10 = vld [vmem:[%s1942_s1 + $0x18] sm:$0xff]   ;;  %v1678_v11 = vld [vmem:[%s1942_s1 + $0x20] sm:$0xff]   ;;  %vm1333_vm2 = vcmask 191488  }
   0xd   : > { %s246_s30 = scalar_lea.vmem %s1941_s0, %s1487_s27  ;;  %v1680_v16 = vld [vmem:[%s1942_s1 + $0x28] sm:$0xff]   ;;  %v1681_v17 = vld [vmem:[%s1942_s1 + $0x38] sm:$0xff]   ;;  %v1682_v20 = vld [vmem:[%s1942_s1 + $0x40] sm:$0xff]   ;;  %s251_s12 = scalar_lea.vmem %s1947_s6, %s1487_s27 }
   0xe   : > { %v1672_v2 = vld [vmem:[%s246_s30 + $0x8] sm:$0xff]   ;;  %v1673_v3 = vld [vmem:[%s246_s30] sm:$0xff]   ;;  %v1683_v21 = vld [vmem:[%s1942_s1 + $0x50] sm:$0xff]  }
   0xf   : > { %288 = vrot.lane.b32.xlu0 %v1672_v2, %s1708_s7  ;;  %432 = vrot.lane.b32.xlu1 %v1672_v2, %s1709_s8  ;;  %v1684_v24 = vld [vmem:[%s1942_s1 + $0x48] sm:$0xff]   ;;  %v1685_v25 = vld [vmem:[%s1942_s1 + $0x58] sm:$0xff]  }
  0x10   : > { %1553 = vmatprep.subr.bf16.mxu1 %v1672_v2  ;;  %v1686_v27 = vld [vmem:[%s1942_s1 + $0x60] sm:$0xff]   ;;  %v1687_v28 = vld [vmem:[%s1942_s1 + $0x70] sm:$0xff]   ;;  %v1688_v31 = vld [vmem:[%s1942_s1 + $0x68] sm:$0xff]  }
  0x11   : > { %1554 = vmatpush3.bf16.msra.mxu1 %v1672_v2  ;;  %v1689_v32 = vld [vmem:[%s1942_s1 + $0x78] sm:$0xff]   ;;  %v1690_v33 = vld [vmem:[%s1942_s1 + $0x80] sm:$0xff]   ;;  %v1691_v35 = vld [vmem:[%s1942_s1 + $0x88] sm:$0xff]  }
  0x12   : > { %1555 = vmatprep.subr.bf16.mxu1 %v1673_v3 }
  0x13   : > { %286 = vrot.lane.b32.xlu0 %v1673_v3, %s1708_s7  ;;  %430 = vrot.lane.b32.xlu1 %v1673_v3, %s1709_s8 }
  0x15   : > { %1556 = vmatpush3.bf16.msra.mxu1 %v1673_v3 }
  0x17   : > { %512 = vrot.lane.b32.xlu0 %v1672_v2, %s1710_s13  ;;  %592 = vrot.lane.b32.xlu1 %v1672_v2, %s1711_s14 }
  0x18   : > { %1558 = vmatmul.mubr.msk.bf16.vlgmr.msra.gmra.mxu1 %vm292_vm0, %v1677_v4 }
  0x19   : > { %1573 = vmatprep.mubr.msk.bf16.mxu1 %vm292_vm0, %v1679_v5 }
  0x1b   : > { %510 = vrot.lane.b32.xlu0 %v1673_v3, %s1710_s13  ;;  %590 = vrot.lane.b32.xlu1 %v1673_v3, %s1711_s14 }
  0x1f   : > { %672 = vrot.lane.b32.xlu0 %v1672_v2, %s1712_s15  ;;  %752 = vrot.lane.b32.xlu1 %v1672_v2, %s1713_s16 }
  0x23   : > { %670 = vrot.lane.b32.xlu0 %v1673_v3, %s1712_s15  ;;  %750 = vrot.lane.b32.xlu1 %v1673_v3, %s1713_s16 }
  0x27   : > { %832 = vrot.lane.b32.xlu0 %v1672_v2, %s1714_s17  ;;  %912 = vrot.lane.b32.xlu1 %v1672_v2, %s1715_s18 }
  0x2b   : > { %830 = vrot.lane.b32.xlu0 %v1673_v3, %s1714_s17  ;;  %910 = vrot.lane.b32.xlu1 %v1673_v3, %s1715_s18 }
  0x81   : > { %v289_v6 = vpop.permute.xlu0 %288  ;;  %v433_v7 = vpop.permute.xlu1 %432 }
  0x82   : > { %1545 = vmatprep.subr.bf16.mxu0 %v289_v6 }
  0x83   : > { %1546 = vmatpush3.bf16.msra.mxu0 %v289_v6 }
  0x85   : > { %v287_v8 = vpop.permute.xlu0 %286  ;;  %v431_v9 = vpop.permute.xlu1 %430 }
  0x86   : > { %1547 = vmatprep.subr.bf16.mxu0 %v287_v8 }
  0x87   : > { %1548 = vmatpush3.bf16.msra.mxu0 %v287_v8 }
  0x88   : > { %1561 = vmatprep.subr.bf16.mxu0 %v433_v7 }
  0x89   : > { %v513_v12 = vpop.permute.xlu0 %512  ;;  %v593_v13 = vpop.permute.xlu1 %592 }
  0x8a   : > { %1550 = vmatmul.mubr.msk.bf16.vlgmr.msra.gmra.mxu0 %vm292_vm0, %v1676_v10  ;;  %1569 = vmatprep.subr.bf16.mxu1 %v513_v12 }
  0x8b   : > { %1562 = vmatpush3.bf16.msra.mxu0 %v433_v7  ;;  %1570 = vmatpush3.bf16.msra.mxu1 %v513_v12 }
  0x8c   : > { %1563 = vmatprep.subr.bf16.mxu0 %v431_v9  ;;  %1565 = vmatprep.mubr.msk.bf16.mxu0 %vm292_vm0, %v1678_v11 }
  0x8d   : > { %v511_v14 = vpop.permute.xlu0 %510  ;;  %v591_v15 = vpop.permute.xlu1 %590 }
  0x8e   : > { %1571 = vmatprep.subr.bf16.mxu1 %v511_v14 }
  0x8f   : > { %1564 = vmatpush3.bf16.msra.mxu0 %v431_v9  ;;  %1572 = vmatpush3.bf16.msra.mxu1 %v511_v14 }
  0x90   : > { %1577 = vmatprep.subr.bf16.mxu0 %v593_v13 }
  0x91   : > { %v673_v18 = vpop.permute.xlu0 %672  ;;  %v753_v19 = vpop.permute.xlu1 %752 }
  0x92   : > { %1566 = vmatmul.mubr.msk.bf16.vlgmr.msra.gmra.mxu0 %vm292_vm0, %v1680_v16  ;;  %1574 = vmatmul.mubr.msk.bf16.vlgmr.msra.gmra.mxu1 %vm292_vm0, %v1681_v17 }
  0x93   : > { %1585 = vmatprep.subr.bf16.mxu1 %v673_v18  ;;  %1578 = vmatpush3.bf16.msra.mxu0 %v593_v13 }
  0x94   : > { %1586 = vmatpush3.bf16.msra.mxu1 %v673_v18  ;;  %1579 = vmatprep.subr.bf16.mxu0 %v591_v15 }
  0x95   : > { %v671_v22 = vpop.permute.xlu0 %670  ;;  %1581 = vmatprep.mubr.msk.bf16.mxu0 %vm292_vm0, %v1682_v20  ;;  %1589 = vmatprep.mubr.msk.bf16.mxu1 %vm292_vm0, %v1683_v21  ;;  %v751_v23 = vpop.permute.xlu1 %750 }
  0x96   : > { %1587 = vmatprep.subr.bf16.mxu1 %v671_v22 }
  0x97   : > { %1580 = vmatpush3.bf16.msra.mxu0 %v591_v15 }
  0x98   : > { %1588 = vmatpush3.bf16.msra.mxu1 %v671_v22  ;;  %1593 = vmatprep.subr.bf16.mxu0 %v753_v19 }
  0x99   : > { %v833_v26 = vpop.permute.xlu0 %832  ;;  %v913_v29 = vpop.permute.xlu1 %912 }
  0x9a   : > { %1582 = vmatmul.mubr.msk.bf16.vlgmr.msra.gmra.mxu0 %vm292_vm0, %v1684_v24  ;;  %1601 = vmatprep.subr.bf16.mxu1 %v833_v26 }
  0x9b   : > { %1590 = vmatmul.mubr.msk.bf16.vlgmr.msra.gmra.mxu1 %vm292_vm0, %v1685_v25  ;;  %1594 = vmatpush3.bf16.msra.mxu0 %v753_v19 }
  0x9c   : > { %1602 = vmatpush3.bf16.msra.mxu1 %v833_v26  ;;  %1595 = vmatprep.subr.bf16.mxu0 %v751_v23  ;;  %v1843_v26 = vld [vmem:[%s1946_s5] ss:$0 sm:$0xff] }
  0x9d   : > { %v831_v30 = vpop.permute.xlu0 %830  ;;  %1597 = vmatprep.mubr.msk.bf16.mxu0 %vm292_vm0, %v1686_v27  ;;  %1605 = vmatprep.mubr.msk.bf16.mxu1 %vm292_vm0, %v1687_v28  ;;  %v911_v34 = vpop.permute.xlu1 %910 }
  0x9e   : > { %1603 = vmatprep.subr.bf16.mxu1 %v831_v30 }
  0x9f   : > { %1596 = vmatpush3.bf16.msra.mxu0 %v751_v23 }
  0xa0   : > { %1604 = vmatpush3.bf16.msra.mxu1 %v831_v30  ;;  %1609 = vmatprep.subr.bf16.mxu0 %v913_v29 }
  0xa2   : > { %1598 = vmatmul.mubr.msk.bf16.vlgmr.msra.gmra.mxu0 %vm292_vm0, %v1688_v31 }
  0xa3   : > { %1606 = vmatmul.mubr.msk.bf16.vlgmr.msra.gmra.mxu1 %vm292_vm0, %v1689_v32  ;;  %1610 = vmatpush3.bf16.msra.mxu0 %v913_v29 }
  0xa4   : > { %1611 = vmatprep.subr.bf16.mxu0 %v911_v34  ;;  %1613 = vmatprep.mubr.msk.bf16.mxu0 %vm292_vm0, %v1690_v33 }
  0xa7   : > { %1612 = vmatpush3.bf16.msra.mxu0 %v911_v34 }
  0xaa   : > { %1614 = vmatmul.mubr.msk.bf16.vlgmr.msra.gmra.mxu0 %vm292_vm0, %v1691_v35 }
  0xd8   : > { %v1559_v36 = vpop.f32.mrf.mxu1 }
  0xda   : > { %v400_v37 = vpop.f32.mrf.mxu1 }
  0xdc   : > { %v1560_v39 = vpop.f32.mrf.mxu1 }
  0xde   : > { %v403_v42 = vpop.f32.mrf.mxu1 }
 0x14a   : > { %v1551_v38 = vpop.f32.mrf.mxu0 }
 0x14b   : > { %v409_v50 = vadd.f32 %v1559_v36, %v1551_v38 }
 0x14c   : > { %v333_v40 = vpop.f32.mrf.mxu0 }
 0x14d   : > { %v401_v63 = vadd.f32 %v400_v37, %v333_v40 }
 0x14e   : > { %v1552_v41 = vpop.f32.mrf.mxu0 }
 0x14f   : > { %v412_v55 = vadd.f32 %v1560_v39, %v1552_v41 }
 0x150   : > { %v336_v43 = vpop.f32.mrf.mxu0 }
 0x151   : > { %v404_v58 = vadd.f32 %v403_v42, %v336_v43 }
 0x152   : > { %v1567_v44 = vpop.f32.mrf.mxu0  ;;  %v1575_v45 = vpop.f32.mrf.mxu1 }
 0x153   : > { %v493_v53 = vadd.f32 %v1567_v44, %v409_v50 }
 0x154   : > { %v476_v46 = vpop.f32.mrf.mxu0  ;;  %v556_v47 = vpop.f32.mrf.mxu1 }
 0x155   : > { %v573_v59 = vadd.f32 %v1575_v45, %v493_v53  ;;  %v491_v4 = vadd.f32 %v476_v46, %v401_v63 }
 0x156   : > { %v1568_v48 = vpop.f32.mrf.mxu0  ;;  %v1576_v49 = vpop.f32.mrf.mxu1 }
 0x157   : > { %v494_v60 = vadd.f32 %v1568_v48, %v412_v55  ;;  %v571_v13 = vadd.f32 %v556_v47, %v491_v4  ;;  %v1001_v55 = vld [vmem:[%s1943_s2 + $0x10] sm:$0xff] }
 0x158   : > { %v479_v51 = vpop.f32.mrf.mxu0  ;;  %v559_v52 = vpop.f32.mrf.mxu1 }
 0x159   : > { %v492_v0 = vadd.f32 %v479_v51, %v404_v58  ;;  %v574_v5 = vadd.f32 %v1576_v49, %v494_v60  ;;  %v999_v49 = vld [vmem:[%s1943_s2] sm:$0xff] }
 0x15a   : > { %v1583_v54 = vpop.f32.mrf.mxu0  ;;  %1625 = vmatprep.mubr.msk.f32.mxu1 %vm292_vm0, %v999_v49  ;;  %1639 = vmatprep.mubr.msk.f32.mxu0 %vm292_vm0, %v999_v49 }
 0x15b   : > { %v1591_v56 = vpop.f32.mrf.mxu1  ;;  %v653_v1 = vadd.f32 %v1583_v54, %v573_v59  ;;  %v572_v8 = vadd.f32 %v559_v52, %v492_v0  ;;  %v1861_v54 = vld [vmem:[%s1943_s2 + $0x8] sm:$0xff] }
 0x15c   : > { %v636_v57 = vpop.f32.mrf.mxu0 }
 0x15d   : > { %v716_v61 = vpop.f32.mrf.mxu1  ;;  %v733_v9 = vadd.f32 %v1591_v56, %v653_v1  ;;  %v651_v18 = vadd.f32 %v636_v57, %v571_v13  ;;  %v1872_v56 = vld [vmem:[%s1943_s2 + $0x18] sm:$0xff]  ;;  %v1716_v57 = vmov 0  }
 0x15e   : > { %v1584_v62 = vpop.f32.mrf.mxu0  ;;  %1670 = vset.pattern.permute.xlu1 %v1716_v57  ;;  %1671 = vset.pattern.permute.xlu0 %v1716_v57 }
 0x15f   : > { %v1592_v2 = vpop.f32.mrf.mxu1  ;;  %v654_v10 = vadd.f32 %v1584_v62, %v574_v5  ;;  %v731_v27 = vadd.f32 %v716_v61, %v651_v18  ;;  %v1259_v18 = vld [vmem:[%s1944_s3 + $0x10] sm:$0xff] }
 0x160   : > { %v639_v3 = vpop.f32.mrf.mxu0 }
 0x161   : > { %v719_v6 = vpop.f32.mrf.mxu1  ;;  %v652_v14 = vadd.f32 %v639_v3, %v572_v8  ;;  %v734_v19 = vadd.f32 %v1592_v2, %v654_v10 }
 0x162   : > { %v1599_v7 = vpop.f32.mrf.mxu0 }
 0x163   : > { %v1607_v11 = vpop.f32.mrf.mxu1  ;;  %v813_v15 = vadd.f32 %v1599_v7, %v733_v9  ;;  %v732_v21 = vadd.f32 %v719_v6, %v652_v14 }
 0x164   : > { %v796_v12 = vpop.f32.mrf.mxu0 }
 0x165   : > { %v876_v16 = vpop.f32.mrf.mxu1  ;;  %v893_v22 = vadd.f32 %v1607_v11, %v813_v15  ;;  %v811_v31 = vadd.f32 %v796_v12, %v731_v27 }
 0x166   : > { %v1600_v17 = vpop.f32.mrf.mxu0 }
 0x167   : > { %v814_v23 = vadd.f32 %v1600_v17, %v734_v19  ;;  %v1608_v24 = vpop.f32.mrf.mxu1  ;;  %v891_v40 = vadd.f32 %v876_v16, %v811_v31  ;;  %v1257_v19 = vld [vmem:[%s1944_s3] sm:$0xff] }
 0x168   : > { %v799_v20 = vpop.f32.mrf.mxu0 }
 0x169   : > { %v812_v28 = vadd.f32 %v799_v20, %v732_v21  ;;  %v894_v32 = vadd.f32 %v1608_v24, %v814_v23  ;;  %v879_v34 = vpop.f32.mrf.mxu1  ;;  %v1285_v20 = vld [vmem:[%s1945_s4] sm:$0xff]  ;;  %v1258_v21 = vld [vmem:[%s1944_s3 + $0x8] sm:$0xff] }
 0x16a   : > { %v1615_v25 = vpop.f32.mrf.mxu0  ;;  %v1286_v23 = vld [vmem:[%s1945_s4 + $0x8] sm:$0xff] }
 0x16b   : > { %v973_v29 = vadd.f32 %v1615_v25, %v893_v22  ;;  %v892_v36 = vadd.f32 %v879_v34, %v812_v28  ;;  %v1260_v22 = vld [vmem:[%s1944_s3 + $0x18] sm:$0xff] }
 0x16c   : > { %v956_v30 = vpop.f32.mrf.mxu0 }
 0x16d   : > { %v984_v33 = vmul.f32 %v1843_v26, %v973_v29  ;;  %v971_v43 = vadd.f32 %v956_v30, %v891_v40 }
 0x16e   : > { %v1616_v35 = vpop.f32.mrf.mxu0 }
 0x16f   : > { %v974_v37 = vadd.f32 %v1616_v35, %v894_v32  ;;  %v993_v38 = vsel %vm986_vm1, %v984_v33, 0.0  ;;  %v982_v47 = vmul.f32 %v1843_v26, %v971_v43 }
 0x170   : > { %v959_v39 = vpop.f32.mrf.mxu0  ;;  %994 = vadd.xlane.f32.xlu1 %v993_v38  ;;  %v1287_v38 = vld [vmem:[%s1945_s4 + $0x10] sm:$0xff] }
 0x171   : > { %v972_v41 = vadd.f32 %v959_v39, %v892_v36  ;;  %v985_v42 = vmul.f32 %v1843_v26, %v974_v37  ;;  %v987_v48 = vsel %vm986_vm1, %v982_v47, 0.0 }
 0x173   : > { %v996_v44 = vsel %vm986_vm1, %v985_v42, 0.0  ;;  %v983_v45 = vmul.f32 %v1843_v26, %v972_v41 }
 0x174   : > { %997 = vadd.xlane.f32.xlu0 %v996_v44 }
 0x175   : > { %v990_v46 = vsel %vm986_vm1, %v983_v45, 0.0 }
 0x178   : > { %991 = vadd.xlane.f32.xlu0 %v990_v46 }
 0x17c   : > { %988 = vadd.xlane.f32.xlu0 %v987_v48 }
 0x1f9   : > { %v995_v51 = vpop.xlane.xlu1 %994 }
 0x1fd   : > { %v998_v50 = vpop.xlane.xlu0 %997 }
 0x1fe   : > { %1617 = vmatprep.subr.mxu1 %v998_v50 }
 0x1ff   : > { %1618 = vmatpush3.msra.mxu1 %v998_v50 }
 0x200   : > { %1619 = vmatprep.subr.mxu1 %v995_v51 }
 0x201   : > { %1620 = vmatpush3.msra.mxu1 %v995_v51  ;;  %v992_v52 = vpop.xlane.xlu0 %991 }
 0x202   : > { %1621 = vmatprep.subr.mxu1 %v992_v52 }
 0x203   : > { %1622 = vmatpush3.msra.mxu1 %v992_v52 }
 0x205   : > { %v989_v53 = vpop.xlane.xlu0 %988 }
 0x206   : > { %1623 = vmatprep.subr.mxu1 %v989_v53 }
 0x207   : > { %1624 = vmatpush3.msra.mxu1 %v989_v53 }
 0x208   : > { %1626 = vmatmul.mubr.msk.f32.vlgmr.msra.gmra.mxu1 %vm292_vm0, %v1861_v54 }
 0x209   : > { %1628 = vmatprep.mubr.msk.f32.mxu1 %vm292_vm0, %v1001_v55 }
 0x20c   : > { %1629 = vmatmul.mubr.msk.f32.gmra.mxu1 %vm292_vm0, %v1872_v56 }
 0x20d   : > { %1642 = vmatprep.mubr.msk.f32.mxu1 %vm292_vm0, %v1001_v55 }
 0x2c8   : > { %v1627_v58 = vpop.f32.mrf.mxu1 }
 0x2ca   : > { %v1081_v59 = vpop.f32.mrf.mxu1 }
 0x2cc   : > { %v1630_v60 = vpop.f32.mrf.mxu1 }
 0x2cd   : > { %1117 = vperm.xlu1 %1670, %v1630_v60  }
 0x2ce   : > { %v1091_v61 = vpop.f32.mrf.mxu1 }
 0x2cf   : > { %1112 = vperm.xlu0 %1671, %v1091_v61  }
 0x2d1   : > { %1107 = vperm.xlu1 %1670, %v1627_v58  }
 0x2d5   : > { %1102 = vperm.xlu1 %1670, %v1081_v59  }
 0x348   : > { %v1118_v62 = vpop.permute.xlu1 %1117 }
 0x349   : > { %v1877_v63 = vsub.f32 %v974_v37, %v1118_v62 }
 0x34a   : > { %v1113_v0 = vpop.permute.xlu0 %1112 }
 0x34b   : > { %v1127_v1 = vmul.f32 %v1843_v26, %v1877_v63  ;;  %v1881_v2 = vsub.f32 %v973_v29, %v1113_v0 }
 0x34c   : > { %v1108_v3 = vpop.permute.xlu1 %1107 }
 0x34d   : > { %v1126_v4 = vmul.f32 %v1843_v26, %v1881_v2  ;;  %v1885_v5 = vsub.f32 %v972_v41, %v1108_v3  ;;  %v1131_v6 = vmul.f32 %v1127_v1, %v1127_v1  ;;  %v1288_v41 = vld [vmem:[%s1945_s4 + $0x18] sm:$0xff] }
 0x34f   : > { %v1125_v7 = vmul.f32 %v1843_v26, %v1885_v5  ;;  %v1141_v8 = vsel %vm986_vm1, %v1131_v6, 0.0  ;;  %v1130_v9 = vmul.f32 %v1126_v4, %v1126_v4 }
 0x350   : > { %1142 = vadd.xlane.f32.xlu1 %v1141_v8  ;;  %v1103_v10 = vpop.permute.xlu1 %1102 }
 0x351   : > { %v1890_v11 = vsub.f32 %v971_v43, %v1103_v10  ;;  %v1138_v12 = vsel %vm986_vm1, %v1130_v9, 0.0  ;;  %v1129_v13 = vmul.f32 %v1125_v7, %v1125_v7 }
 0x352   : > { %1139 = vadd.xlane.f32.xlu0 %v1138_v12 }
 0x353   : > { %v1124_v14 = vmul.f32 %v1843_v26, %v1890_v11  ;;  %v1135_v15 = vsel %vm986_vm1, %v1129_v13, 0.0 }
 0x354   : > { %1136 = vadd.xlane.f32.xlu1 %v1135_v15 }
 0x355   : > { %v1128_v16 = vmul.f32 %v1124_v14, %v1124_v14 }
 0x357   : > { %v1132_v17 = vsel %vm986_vm1, %v1128_v16, 0.0 }
 0x358   : > { %1133 = vadd.xlane.f32.xlu1 %v1132_v17 }
 0x368   : > { %1273 = vperm.xlu0 %1671, %v1259_v18  }
 0x369   : > { %1263 = vperm.xlu1 %1670, %v1257_v19  }
 0x36c   : > { %1291 = vperm.xlu0 %1671, %v1285_v20  }
 0x36d   : > { %1268 = vperm.xlu1 %1670, %v1258_v21  }
 0x371   : > { %1278 = vperm.xlu1 %1670, %v1260_v22  }
 0x375   : > { %1296 = vperm.xlu1 %1670, %v1286_v23  }
 0x3d9   : > { %v1143_v24 = vpop.xlane.xlu1 %1142 }
 0x3da   : > { %1631 = vmatprep.subr.mxu0 %v1143_v24  ;;  %1645 = vmatprep.subr.mxu1 %v1143_v24 }
 0x3db   : > { %1632 = vmatpush3.msra.mxu0 %v1143_v24  ;;  %1649 = vmatpush3.msra.mxu1 %v1143_v24  ;;  %v1140_v25 = vpop.xlane.xlu0 %1139 }
 0x3dc   : > { %1633 = vmatprep.subr.mxu0 %v1140_v25  ;;  %1646 = vmatprep.subr.mxu1 %v1140_v25 }
 0x3dd   : > { %v1137_v26 = vpop.xlane.xlu1 %1136  ;;  %1634 = vmatpush3.msra.mxu0 %v1140_v25  ;;  %1650 = vmatpush3.msra.mxu1 %v1140_v25 }
 0x3de   : > { %1635 = vmatprep.subr.mxu0 %v1137_v26  ;;  %1647 = vmatprep.subr.mxu1 %v1137_v26 }
 0x3df   : > { %1636 = vmatpush3.msra.mxu0 %v1137_v26  ;;  %1651 = vmatpush3.msra.mxu1 %v1137_v26 }
 0x3e1   : > { %v1134_v27 = vpop.xlane.xlu1 %1133 }
 0x3e2   : > { %1637 = vmatprep.subr.mxu0 %v1134_v27  ;;  %1648 = vmatprep.subr.mxu1 %v1134_v27 }
 0x3e3   : > { %1638 = vmatpush3.msra.mxu0 %v1134_v27  ;;  %1652 = vmatpush3.msra.mxu1 %v1134_v27  ;;  %v1274_v44 = vpop.permute.xlu0 %1273 }
 0x3e4   : > { %1640 = vmatmul.mubr.msk.f32.vlgmr.msra.gmra.mxu0 %vm292_vm0, %v1861_v54  ;;  %1643 = vmatmul.mubr.msk.f32.vlgmr.msra.gmra.mxu1 %vm292_vm0, %v1872_v56 }
 0x3e5   : > { %v1264_v42 = vpop.permute.xlu1 %1263 }
 0x3e7   : > { %v1292_v46 = vpop.permute.xlu0 %1291 }
 0x3e9   : > { %v1269_v43 = vpop.permute.xlu1 %1268 }
 0x3ed   : > { %v1279_v45 = vpop.permute.xlu1 %1278 }
 0x3f1   : > { %v1297_v47 = vpop.permute.xlu1 %1296 }
 0x4a4   : > { %v1641_v28 = vpop.f32.mrf.mxu0  ;;  %v1644_v29 = vpop.f32.mrf.mxu1 }
 0x4a5   : > { %v1216_v30 = vadd.f32 1e-05, %v1641_v28  ;;  %v1226_v31 = vadd.f32 1e-05, %v1644_v29 }
 0x4a6   : > { %v1210_v32 = vpop.f32.mrf.mxu0  ;;  %v1220_v34 = vpop.f32.mrf.mxu1 }
 0x4a7   : > { %1692 = vrsqrt.f32 %v1216_v30  ;;  %v1211_v33 = vadd.f32 1e-05, %v1210_v32  ;;  %v1221_v35 = vadd.f32 1e-05, %v1220_v34 }
 0x4a8   : > { %1694 = vrsqrt.f32 %v1226_v31 }
 0x4a9   : > { %1696 = vrsqrt.f32 %v1211_v33 }
 0x4aa   : > { %1698 = vrsqrt.f32 %v1221_v35 }
 0x4b4   : > { %v1693_v36 = vpop.eup %1692 }
 0x4b5   : > { %v1695_v37 = vpop.eup %1694  ;;  %1240 = vperm.xlu0 %1671, %v1693_v36  }
 0x4b6   : > { %1250 = vperm.xlu1 %1670, %v1695_v37   ;;  %v1697_v39 = vpop.eup %1696 }
 0x4b7   : > { %v1699_v40 = vpop.eup %1698 }
 0x4b9   : > { %1301 = vperm.xlu0 %1671, %v1287_v38  }
 0x4ba   : > { %1235 = vperm.xlu1 %1670, %v1697_v39  }
 0x4be   : > { %1245 = vperm.xlu1 %1670, %v1699_v40  }
 0x4c2   : > { %1306 = vperm.xlu1 %1670, %v1288_v41  }
 0x530   : > { %v1241_v48 = vpop.permute.xlu0 %1240 }
 0x531   : > { %v1251_v49 = vpop.permute.xlu1 %1250  ;;  %v1254_v50 = vmul.f32 %v1241_v48, %v1885_v5 }
 0x532   : > { %v1256_v56 = vmul.f32 %v1251_v49, %v1877_v63 }
 0x533   : > { %v1282_v51 = vmul.f32 %v1269_v43, %v1254_v50 }
 0x534   : > { %v1284_v1 = vmul.f32 %v1279_v45, %v1256_v56  ;;  %v1302_v3 = vpop.permute.xlu0 %1301 }
 0x535   : > { %v1310_v52 = vadd.f32 %v1297_v47, %v1282_v51  ;;  %v1236_v53 = vpop.permute.xlu1 %1235 }
 0x536   : > { %v1253_v54 = vmul.f32 %v1236_v53, %v1890_v11 }
 0x537   : > { %v1314_v55 = vmax.f32 %v1310_v52, 0.0 }
 0x538   : > { %v1281_v57 = vmul.f32 %v1264_v42, %v1253_v54 }
 0x539   : > { %v1490_v58 = vpack.c.bf16 %v1314_v55, %v1314_v55  ;;  %v1246_v59 = vpop.permute.xlu1 %1245 }
 0x53a   : > { %v1309_v60 = vadd.f32 %v1292_v46, %v1281_v57  ;;  %v1255_v61 = vmul.f32 %v1246_v59, %v1881_v2 }
 0x53b   : > { %1335 = vst.msk [vmem:[%s251_s12 + $0x4] sm:$0xf] %vm1333_vm2, %v1490_v58 }
 0x53c   : > { %v1313_v62 = vmax.f32 %v1309_v60, 0.0  ;;  %v1283_v0 = vmul.f32 %v1274_v44, %v1255_v61 }
 0x53d   : > { %v1307_v4 = vpop.permute.xlu1 %1306 }
 0x53e   : > { %v1489_v63 = vpack.c.bf16 %v1313_v62, %v1313_v62  ;;  %v1311_v5 = vadd.f32 %v1302_v3, %v1283_v0  ;;  %v1312_v6 = vadd.f32 %v1307_v4, %v1284_v1 }
 0x540   : > { %1334 = vst.msk [vmem:[%s251_s12] sm:$0xf] %vm1333_vm2, %v1489_v63  ;;  %v1315_v7 = vmax.f32 %v1311_v5, 0.0  ;;  %v1316_v8 = vmax.f32 %v1312_v6, 0.0 }
 0x542   : > { %v1491_v9 = vpack.c.bf16 %v1315_v7, %v1315_v7  ;;  %v1492_v10 = vpack.c.bf16 %v1316_v8, %v1316_v8 }
 0x544   : > { %1336 = vst.msk [vmem:[%s251_s12 + $0x8] sm:$0xf] %vm1333_vm2, %v1491_v9  ;;  %1337 = vst.msk [vmem:[%s251_s12 + $0xc] sm:$0xf] %vm1333_vm2, %v1492_v10 }
 0x545 PF: > { %s16_s21 = sadd.s32 1, %s1706_s21  }
 0x546   : > { %p13_p4 = scmp.ge.s32.totalorder %s16_s21, 4  }
 0x548   :  { %15 = sbr.rel (!%p13_p4) target bundleno = 1 (0x1), region = 82 }

// kernel: encoder_forward.16
= control target key start
LH: loop header
LB: loop body
LE: loop exit
PB: predicated region body
PF: predicated region fallthrough
CT: control target
= control target key end

     0   :  { %s1866_s21 = smov 0   ;;  %s2181_s0 = inlined_call_operand.vmem [shape: bf16[2,128,12], index: 0, kind: input, shape index: {}]   ;;  %s2182_s1 = inlined_call_operand.vmem [shape: bf16[4,64,128], index: 1, kind: input, shape index: {}]   ;;  %s2183_s2 = inlined_call_operand.vmem [shape: f32[64,64], index: 2, kind: input, shape index: {}]   ;;  %s2184_s3 = inlined_call_operand.vmem [shape: f32[64,1], index: 3, kind: input, shape index: {}]   ;;  %s2185_s4 = inlined_call_operand.vmem [shape: f32[64,1], index: 4, kind: input, shape index: {}]   ;;  %s2186_s5 = inlined_call_operand.vmem [shape: f32[1,6], index: 5, kind: input, shape index: {}]   ;;  %s2187_s6 = inlined_call_operand.vmem [shape: bf16[2,64,6], index: 6, kind: output, shape index: {}]  }
   0x1 LB: > { %s1439_s22 = sadd.s32 4294967295, %s1825_s21   ;;  %p1443_p0 = scmp.ge.s32.totalorder %s1825_s21, 1  ;;  %s1825_s21 = sphi %s1866_s21, %s16_s21  }
   0x2   : > { %p212_p1 = scmp.lt.s32.totalorder %s1825_s21, 3 }
   0x4   : > { %p213_p2 = pnand %p1443_p0, %p212_p1 }
   0x5   : > { %p242_p3 = scmp.lt.s32.totalorder (!%p213_p2), %s1439_s22, 1  ;;  %s1827_s27 = smov (!%p213_p2), 127  }
   0x6   : > { %216 = sbr.rel (%p213_p2) target bundleno = 1424 (0x590), region = 44  ;;  %s1828_s30 = smov (!%p213_p2), 125  }
   0x7   : > { %s1829_s9 = smov (!%p213_p2), 124  }
   0xb   : > { %s2189_s22 = smov (!%p242_p3, %s1439_s22), 1  ;;  %v1787_v8 = vld [vmem:[%s2182_s1] sm:$0xff]   ;;  %v1788_v10 = vld [vmem:[%s2182_s1 + $0x8] sm:$0xff]   ;;  %v1792_v11 = vld [vmem:[%s2182_s1 + $0x10] sm:$0xff]   ;;  %vm811_vm0 = vcmask 48128   ;;  %vm844_vm1 = vcmask 523264  }
   0xc   : > { %s1523_s23 = sshll.u32 %s2189_s22, 6  ;;  %1653 = vmatprep.mubr.bf16.mxu1 %v1787_v8  ;;  %v1789_v9 = vld [vmem:[%s2182_s1 + $0x20] sm:$0xff]   ;;  %v1794_v12 = vld [vmem:[%s2182_s1 + $0x18] sm:$0xff]   ;;  %v1790_v28 = vld [vmem:[%s2182_s1 + $0x28] sm:$0xff]   ;;  %s1524_s24 = sshll.u32 %s2189_s22, 5  ;;  %vm1375_vm2 = vcmask 44032  }
   0xd   : > { %s246_s26 = scalar_lea.vmem %s2181_s0, %s1523_s23  ;;  %1629 = vmatprep.mubr.bf16.mxu0 %v1789_v9  ;;  %v1795_v13 = vld [vmem:[%s2182_s1 + $0x60] sm:$0xff]   ;;  %v1791_v30 = vld [vmem:[%s2182_s1 + $0x30] sm:$0xff]   ;;  %v1793_v33 = vld [vmem:[%s2182_s1 + $0x38] sm:$0xff]  }
   0xe   : > { %v1779_v0 = vld [vmem:[%s246_s26 + $0x38] sm:$0xff]   ;;  %v1780_v1 = vld [vmem:[%s246_s26 + $0x30] sm:$0xff]   ;;  %v1781_v2 = vld [vmem:[%s246_s26 + $0x28] sm:$0xff]  }
   0xf   : > { %364 = vrot.lane.b32.xlu0 %v1779_v0, %s1827_s27  ;;  %1637 = vmatprep.subr.bf16.mxu1 %v1779_v0  ;;  %v1782_v3 = vld [vmem:[%s246_s26 + $0x20] sm:$0xff]   ;;  %v1783_v4 = vld [vmem:[%s246_s26 + $0x18] sm:$0xff]   ;;  %v1784_v5 = vld [vmem:[%s246_s26 + $0x10] sm:$0xff]  }
  0x10   : > { %1638 = vmatpush3.bf16.msra.mxu1 %v1779_v0  ;;  %360 = vrot.lane.b32.xlu1 %v1781_v2, %s1827_s27  ;;  %v1785_v6 = vld [vmem:[%s246_s26 + $0x8] sm:$0xff]   ;;  %v1786_v7 = vld [vmem:[%s246_s26] sm:$0xff]   ;;  %v1799_v41 = vld [vmem:[%s2182_s1 + $0x70] sm:$0xff]  }
  0x11   : > { %1639 = vmatprep.subr.bf16.mxu1 %v1780_v1  ;;  %v1797_v36 = vld [vmem:[%s2182_s1 + $0x40] sm:$0xff]   ;;  %v1796_v40 = vld [vmem:[%s2182_s1 + $0x68] sm:$0xff]   ;;  %v1800_v43 = vld [vmem:[%s2182_s1 + $0x78] sm:$0xff]  }
  0x12   : > { %v1798_v45 = vld [vmem:[%s2182_s1 + $0x48] sm:$0xff]   ;;  %v1801_v46 = vld [vmem:[%s2182_s1 + $0x50] sm:$0xff]   ;;  %v1802_v47 = vld [vmem:[%s2182_s1 + $0x58] sm:$0xff]  }
  0x13   : > { %362 = vrot.lane.b32.xlu0 %v1780_v1, %s1827_s27 }
  0x14   : > { %1640 = vmatpush3.bf16.msra.mxu1 %v1780_v1  ;;  %358 = vrot.lane.b32.xlu1 %v1782_v3, %s1827_s27 }
  0x15   : > { %1641 = vmatprep.subr.bf16.mxu1 %v1781_v2 }
  0x17   : > { %356 = vrot.lane.b32.xlu0 %v1783_v4, %s1827_s27 }
  0x18   : > { %1642 = vmatpush3.bf16.msra.mxu1 %v1781_v2  ;;  %354 = vrot.lane.b32.xlu1 %v1784_v5, %s1827_s27 }
  0x19   : > { %1643 = vmatprep.subr.bf16.mxu1 %v1782_v3 }
  0x1b   : > { %352 = vrot.lane.b32.xlu0 %v1785_v6, %s1827_s27 }
  0x1c   : > { %1644 = vmatpush3.bf16.msra.mxu1 %v1782_v3  ;;  %350 = vrot.lane.b32.xlu1 %v1786_v7, %s1827_s27  ;;  %s2155_s27 = scalar_lea.vmem %s2187_s6, %s1524_s24 }
  0x1d   : > { %1645 = vmatprep.subr.bf16.mxu1 %v1783_v4 }
  0x1f   : > { %583 = vrot.lane.b32.xlu0 %v1779_v0, %s1828_s30 }
  0x20   : > { %1646 = vmatpush3.bf16.msra.mxu1 %v1783_v4  ;;  %713 = vrot.lane.b32.xlu1 %v1779_v0, %s1829_s9 }
  0x21   : > { %1647 = vmatprep.subr.bf16.mxu1 %v1784_v5 }
  0x23   : > { %581 = vrot.lane.b32.xlu0 %v1780_v1, %s1828_s30 }
  0x24   : > { %1648 = vmatpush3.bf16.msra.mxu1 %v1784_v5  ;;  %711 = vrot.lane.b32.xlu1 %v1780_v1, %s1829_s9 }
  0x25   : > { %1649 = vmatprep.subr.bf16.mxu1 %v1785_v6 }
  0x27   : > { %579 = vrot.lane.b32.xlu0 %v1781_v2, %s1828_s30 }
  0x28   : > { %1650 = vmatpush3.bf16.msra.mxu1 %v1785_v6  ;;  %709 = vrot.lane.b32.xlu1 %v1781_v2, %s1829_s9 }
  0x29   : > { %1651 = vmatprep.subr.bf16.mxu1 %v1786_v7 }
  0x2b   : > { %577 = vrot.lane.b32.xlu0 %v1782_v3, %s1828_s30 }
  0x2c   : > { %1652 = vmatpush3.bf16.msra.mxu1 %v1786_v7  ;;  %707 = vrot.lane.b32.xlu1 %v1782_v3, %s1829_s9 }
  0x2f   : > { %575 = vrot.lane.b32.xlu0 %v1783_v4, %s1828_s30  ;;  %1654 = vmatmul.mubr.bf16.vlgmr.msra.gmra.mxu1 %v1788_v10 }
  0x30   : > { %705 = vrot.lane.b32.xlu1 %v1783_v4, %s1829_s9  ;;  %1657 = vmatprep.mubr.bf16.mxu1 %v1792_v11 }
  0x33   : > { %573 = vrot.lane.b32.xlu0 %v1784_v5, %s1828_s30 }
  0x34   : > { %703 = vrot.lane.b32.xlu1 %v1784_v5, %s1829_s9 }
  0x37   : > { %571 = vrot.lane.b32.xlu0 %v1785_v6, %s1828_s30  ;;  %1658 = vmatmul.mubr.bf16.gmra.mxu1 %v1794_v12 }
  0x38   : > { %701 = vrot.lane.b32.xlu1 %v1785_v6, %s1829_s9  ;;  %1701 = vmatprep.mubr.bf16.mxu1 %v1795_v13 }
  0x3b   : > { %569 = vrot.lane.b32.xlu0 %v1786_v7, %s1828_s30 }
  0x3c   : > { %699 = vrot.lane.b32.xlu1 %v1786_v7, %s1829_s9 }
  0x81   : > { %v365_v14 = vpop.permute.xlu0 %364 }
  0x82   : > { %1613 = vmatprep.subr.bf16.mxu0 %v365_v14  ;;  %v361_v15 = vpop.permute.xlu1 %360 }
  0x83   : > { %1614 = vmatpush3.bf16.msra.mxu0 %v365_v14 }
  0x85   : > { %v363_v16 = vpop.permute.xlu0 %362 }
  0x86   : > { %1615 = vmatprep.subr.bf16.mxu0 %v363_v16  ;;  %v359_v17 = vpop.permute.xlu1 %358 }
  0x87   : > { %1616 = vmatpush3.bf16.msra.mxu0 %v363_v16 }
  0x88   : > { %1617 = vmatprep.subr.bf16.mxu0 %v361_v15 }
  0x89   : > { %v357_v18 = vpop.permute.xlu0 %356 }
  0x8a   : > { %v355_v19 = vpop.permute.xlu1 %354 }
  0x8b   : > { %1618 = vmatpush3.bf16.msra.mxu0 %v361_v15 }
  0x8c   : > { %1619 = vmatprep.subr.bf16.mxu0 %v359_v17 }
  0x8d   : > { %v353_v20 = vpop.permute.xlu0 %352 }
  0x8e   : > { %v351_v21 = vpop.permute.xlu1 %350 }
  0x8f   : > { %1620 = vmatpush3.bf16.msra.mxu0 %v359_v17 }
  0x90   : > { %1621 = vmatprep.subr.bf16.mxu0 %v357_v18 }
  0x91   : > { %v584_v22 = vpop.permute.xlu0 %583 }
  0x92   : > { %v714_v23 = vpop.permute.xlu1 %713 }
  0x93   : > { %1622 = vmatpush3.bf16.msra.mxu0 %v357_v18  ;;  %1685 = vmatprep.subr.bf16.mxu1 %v714_v23 }
  0x94   : > { %1623 = vmatprep.subr.bf16.mxu0 %v355_v19  ;;  %1686 = vmatpush3.bf16.msra.mxu1 %v714_v23  ;;  %v1945_v23 = vld [vmem:[%s2186_s5] ss:$0 sm:$0xff] }
  0x95   : > { %v582_v24 = vpop.permute.xlu0 %581 }
  0x96   : > { %v712_v25 = vpop.permute.xlu1 %711 }
  0x97   : > { %1624 = vmatpush3.bf16.msra.mxu0 %v355_v19  ;;  %1687 = vmatprep.subr.bf16.mxu1 %v712_v25 }
  0x98   : > { %1625 = vmatprep.subr.bf16.mxu0 %v353_v20  ;;  %1688 = vmatpush3.bf16.msra.mxu1 %v712_v25 }
  0x99   : > { %v580_v27 = vpop.permute.xlu0 %579 }
  0x9a   : > { %v710_v26 = vpop.permute.xlu1 %709 }
  0x9b   : > { %1626 = vmatpush3.bf16.msra.mxu0 %v353_v20  ;;  %1689 = vmatprep.subr.bf16.mxu1 %v710_v26 }
  0x9c   : > { %1627 = vmatprep.subr.bf16.mxu0 %v351_v21  ;;  %1690 = vmatpush3.bf16.msra.mxu1 %v710_v26 }
  0x9d   : > { %v578_v31 = vpop.permute.xlu0 %577 }
  0x9e   : > { %v708_v29 = vpop.permute.xlu1 %707 }
  0x9f   : > { %1628 = vmatpush3.bf16.msra.mxu0 %v351_v21  ;;  %1691 = vmatprep.subr.bf16.mxu1 %v708_v29 }
  0xa0   : > { %1661 = vmatprep.subr.bf16.mxu0 %v584_v22  ;;  %1692 = vmatpush3.bf16.msra.mxu1 %v708_v29 }
  0xa1   : > { %v576_v34 = vpop.permute.xlu0 %575 }
  0xa2   : > { %1630 = vmatmul.mubr.bf16.vlgmr.msra.gmra.mxu0 %v1790_v28  ;;  %v706_v32 = vpop.permute.xlu1 %705 }
  0xa3   : > { %1662 = vmatpush3.bf16.msra.mxu0 %v584_v22  ;;  %1633 = vmatprep.mubr.bf16.mxu0 %v1791_v30 }
  0xa4   : > { %1663 = vmatprep.subr.bf16.mxu0 %v582_v24  ;;  %1693 = vmatprep.subr.bf16.mxu1 %v706_v32 }
  0xa5   : > { %1694 = vmatpush3.bf16.msra.mxu1 %v706_v32  ;;  %v574_v38 = vpop.permute.xlu0 %573 }
  0xa6   : > { %v704_v35 = vpop.permute.xlu1 %703 }
  0xa7   : > { %1664 = vmatpush3.bf16.msra.mxu0 %v582_v24  ;;  %1695 = vmatprep.subr.bf16.mxu1 %v704_v35 }
  0xa8   : > { %1665 = vmatprep.subr.bf16.mxu0 %v580_v27 }
  0xa9   : > { %1696 = vmatpush3.bf16.msra.mxu1 %v704_v35  ;;  %v572_v42 = vpop.permute.xlu0 %571 }
  0xaa   : > { %1634 = vmatmul.mubr.bf16.gmra.mxu0 %v1793_v33  ;;  %v702_v37 = vpop.permute.xlu1 %701 }
  0xab   : > { %1666 = vmatpush3.bf16.msra.mxu0 %v580_v27  ;;  %1677 = vmatprep.mubr.bf16.mxu0 %v1797_v36 }
  0xac   : > { %1667 = vmatprep.subr.bf16.mxu0 %v578_v31  ;;  %1697 = vmatprep.subr.bf16.mxu1 %v702_v37 }
  0xad   : > { %1698 = vmatpush3.bf16.msra.mxu1 %v702_v37  ;;  %v570_v44 = vpop.permute.xlu0 %569 }
  0xae   : > { %v700_v39 = vpop.permute.xlu1 %699 }
  0xaf   : > { %1668 = vmatpush3.bf16.msra.mxu0 %v578_v31  ;;  %1699 = vmatprep.subr.bf16.mxu1 %v700_v39 }
  0xb0   : > { %1669 = vmatprep.subr.bf16.mxu0 %v576_v34 }
  0xb1   : > { %1700 = vmatpush3.bf16.msra.mxu1 %v700_v39 }
  0xb3   : > { %1670 = vmatpush3.bf16.msra.mxu0 %v576_v34 }
  0xb4   : > { %1671 = vmatprep.subr.bf16.mxu0 %v574_v38  ;;  %1702 = vmatmul.mubr.bf16.vlgmr.msra.gmra.mxu1 %v1796_v40 }
  0xb5   : > { %1705 = vmatprep.mubr.bf16.mxu1 %v1799_v41 }
  0xb7   : > { %1672 = vmatpush3.bf16.msra.mxu0 %v574_v38 }
  0xb8   : > { %1673 = vmatprep.subr.bf16.mxu0 %v572_v42 }
  0xbb   : > { %1674 = vmatpush3.bf16.msra.mxu0 %v572_v42 }
  0xbc   : > { %1675 = vmatprep.subr.bf16.mxu0 %v570_v44  ;;  %1706 = vmatmul.mubr.bf16.gmra.mxu1 %v1800_v43 }
  0xbf   : > { %1676 = vmatpush3.bf16.msra.mxu0 %v570_v44 }
  0xc2   : > { %1678 = vmatmul.mubr.bf16.vlgmr.msra.gmra.mxu0 %v1798_v45 }
  0xc3   : > { %1681 = vmatprep.mubr.bf16.mxu0 %v1801_v46 }
  0xca   : > { %1682 = vmatmul.mubr.bf16.gmra.mxu0 %v1802_v47 }
  0xef   : > { %v1655_v48 = vpop.f32.mrf.mxu1 }
  0xf1   : > { %v1936_v49 = vpop.f32.mrf.mxu1 }
  0xf3   : > { %v1656_v50 = vpop.f32.mrf.mxu1 }
  0xf5   : > { %v508_v52 = vpop.f32.mrf.mxu1 }
  0xf7   : > { %v1659_v53 = vpop.f32.mrf.mxu1 }
  0xf9   : > { %v521_v55 = vpop.f32.mrf.mxu1 }
  0xfb   : > { %v1660_v57 = vpop.f32.mrf.mxu1 }
  0xfd   : > { %v524_v60 = vpop.f32.mrf.mxu1 }
 0x162   : > { %v1631_v51 = vpop.f32.mrf.mxu0 }
 0x163   : > { %v514_v35 = vadd.f32 %v1655_v48, %v1631_v51 }
 0x164   : > { %v408_v54 = vpop.f32.mrf.mxu0 }
 0x165   : > { %v506_v45 = vadd.f32 %v1936_v49, %v408_v54 }
 0x166   : > { %v1632_v56 = vpop.f32.mrf.mxu0 }
 0x167   : > { %v517_v6 = vadd.f32 %v1656_v50, %v1632_v56 }
 0x168   : > { %v411_v58 = vpop.f32.mrf.mxu0 }
 0x169   : > { %v509_v12 = vadd.f32 %v508_v52, %v411_v58 }
 0x16a   : > { %v1635_v59 = vpop.f32.mrf.mxu0 }
 0x16b   : > { %v530_v11 = vadd.f32 %v1659_v53, %v1635_v59 }
 0x16c   : > { %v424_v62 = vpop.f32.mrf.mxu0 }
 0x16d   : > { %v522_v24 = vadd.f32 %v521_v55, %v424_v62 }
 0x16e   : > { %v1636_v0 = vpop.f32.mrf.mxu0 }
 0x16f   : > { %v533_v19 = vadd.f32 %v1660_v57, %v1636_v0  ;;  %v836_v57 = vld [vmem:[%s2183_s2] sm:$0xff] }
 0x170   : > { %v427_v2 = vpop.f32.mrf.mxu0  ;;  %1725 = vmatprep.mubr.msk.f32.mxu0 %vm844_vm1, %v836_v57  ;;  %1753 = vmatprep.mubr.msk.f32.mxu1 %vm844_vm1, %v836_v57 }
 0x171   : > { %v525_v25 = vadd.f32 %v524_v60, %v427_v2  ;;  %v1992_v2 = vld [vmem:[%s2183_s2 + $0x8] sm:$0xff] }
 0x174   : > { %v1703_v61 = vpop.f32.mrf.mxu1 }
 0x176   : > { %v757_v63 = vpop.f32.mrf.mxu1 }
 0x178   : > { %v1704_v1 = vpop.f32.mrf.mxu1 }
 0x17a   : > { %v760_v4 = vpop.f32.mrf.mxu1 }
 0x17c   : > { %v1707_v8 = vpop.f32.mrf.mxu1 }
 0x17e   : > { %v773_v13 = vpop.f32.mrf.mxu1 }
 0x180   : > { %v1708_v21 = vpop.f32.mrf.mxu1 }
 0x182   : > { %v1679_v3 = vpop.f32.mrf.mxu0  ;;  %v776_v36 = vpop.f32.mrf.mxu1 }
 0x183   : > { %v660_v39 = vadd.f32 %v1679_v3, %v514_v35  ;;  %v1997_v3 = vld [vmem:[%s2183_s2 + $0x10] sm:$0xff] }
 0x184   : > { %v627_v5 = vpop.f32.mrf.mxu0 }
 0x185   : > { %v1969_v46 = vadd.f32 %v1703_v61, %v660_v39  ;;  %v658_v47 = vadd.f32 %v627_v5, %v506_v45  ;;  %v2011_v5 = vld [vmem:[%s2183_s2 + $0x20] sm:$0xff] }
 0x186   : > { %v1680_v7 = vpop.f32.mrf.mxu0 }
 0x187   : > { %v661_v9 = vadd.f32 %v1680_v7, %v517_v6  ;;  %v1975_v52 = vadd.f32 %v757_v63, %v658_v47  ;;  %v805_v55 = vmul.f32 %v1945_v23, %v1969_v46  ;;  %v2020_v6 = vld [vmem:[%s2183_s2 + $0x28] sm:$0xff]  ;;  %v2025_v7 = vld [vmem:[%s2183_s2 + $0x30] sm:$0xff] }
 0x188   : > { %v630_v10 = vpop.f32.mrf.mxu0 }
 0x189   : > { %v1938_v16 = vadd.f32 %v1704_v1, %v661_v9  ;;  %v659_v17 = vadd.f32 %v630_v10, %v509_v12  ;;  %v818_v49 = vsel %vm811_vm0, %v805_v55, 0.0  ;;  %v803_v54 = vmul.f32 %v1945_v23, %v1975_v52 }
 0x18a   : > { %v1683_v14 = vpop.f32.mrf.mxu0  ;;  %v1830_v9 = vmov 0  }
 0x18b   : > { %v664_v15 = vadd.f32 %v1683_v14, %v530_v11  ;;  %v1949_v28 = vadd.f32 %v760_v4, %v659_v17  ;;  %v806_v30 = vmul.f32 %v1945_v23, %v1938_v16  ;;  %v812_v56 = vsel %vm811_vm0, %v803_v54, 0.0  ;;  %v2006_v4 = vld [vmem:[%s2183_s2 + $0x18] sm:$0xff]  ;;  %1777 = vset.pattern.permute.xlu1 %v1830_v9  ;;  %1778 = vset.pattern.permute.xlu0 %v1830_v9 }
 0x18c   : > { %v643_v18 = vpop.f32.mrf.mxu0  ;;  %v1282_v9 = vld [vmem:[%s2185_s4 + $0x18] sm:$0xff] }
 0x18d   : > { %v1940_v20 = vadd.f32 %v1707_v8, %v664_v15  ;;  %v662_v31 = vadd.f32 %v643_v18, %v522_v24  ;;  %v821_v40 = vsel %vm811_vm0, %v806_v30, 0.0  ;;  %v804_v44 = vmul.f32 %v1945_v23, %v1949_v28  ;;  %v2034_v8 = vld [vmem:[%s2183_s2 + $0x38] sm:$0xff] }
 0x18e   : > { %v1684_v22 = vpop.f32.mrf.mxu0 }
 0x18f   : > { %v665_v26 = vadd.f32 %v1684_v22, %v533_v19  ;;  %v809_v27 = vmul.f32 %v1945_v23, %v1940_v20  ;;  %v1961_v41 = vadd.f32 %v773_v13, %v662_v31  ;;  %v815_v50 = vsel %vm811_vm0, %v804_v44, 0.0 }
 0x190   : > { %v646_v29 = vpop.f32.mrf.mxu0 }
 0x191   : > { %v1953_v32 = vadd.f32 %v1708_v21, %v665_v26  ;;  %v663_v33 = vadd.f32 %v646_v29, %v525_v25  ;;  %v830_v34 = vsel %vm811_vm0, %v809_v27, 0.0  ;;  %v807_v51 = vmul.f32 %v1945_v23, %v1961_v41 }
 0x192   : > { %831 = vadd.xlane.f32.xlu1 %v830_v34 }
 0x193   : > { %v1956_v37 = vadd.f32 %v776_v36, %v663_v33  ;;  %v810_v38 = vmul.f32 %v1945_v23, %v1953_v32  ;;  %v824_v53 = vsel %vm811_vm0, %v807_v51, 0.0 }
 0x195   : > { %v833_v42 = vsel %vm811_vm0, %v810_v38, 0.0  ;;  %v808_v43 = vmul.f32 %v1945_v23, %v1956_v37 }
 0x196   : > { %822 = vadd.xlane.f32.xlu1 %v821_v40  ;;  %834 = vadd.xlane.f32.xlu0 %v833_v42 }
 0x197   : > { %v827_v48 = vsel %vm811_vm0, %v808_v43, 0.0 }
 0x19a   : > { %828 = vadd.xlane.f32.xlu0 %v827_v48  ;;  %816 = vadd.xlane.f32.xlu1 %v815_v50 }
 0x19e   : > { %825 = vadd.xlane.f32.xlu0 %v824_v53 }
 0x1a2   : > { %819 = vadd.xlane.f32.xlu0 %v818_v49 }
 0x1a6   : > { %813 = vadd.xlane.f32.xlu0 %v812_v56 }
 0x21b   : > { %v832_v59 = vpop.xlane.xlu1 %831 }
 0x21f   : > { %v835_v58 = vpop.xlane.xlu0 %834  ;;  %v823_v61 = vpop.xlane.xlu1 %822 }
 0x220   : > { %1709 = vmatprep.subr.mxu0 %v835_v58 }
 0x221   : > { %1710 = vmatpush3.msra.mxu0 %v835_v58 }
 0x222   : > { %1711 = vmatprep.subr.mxu0 %v832_v59 }
 0x223   : > { %1712 = vmatpush3.msra.mxu0 %v832_v59  ;;  %v829_v60 = vpop.xlane.xlu0 %828  ;;  %v817_v0 = vpop.xlane.xlu1 %816 }
 0x224   : > { %1713 = vmatprep.subr.mxu0 %v829_v60 }
 0x225   : > { %1714 = vmatpush3.msra.mxu0 %v829_v60  ;;  %v1224_v60 = vld [vmem:[%s2184_s3 + $0x8] sm:$0xff] }
 0x227   : > { %v826_v62 = vpop.xlane.xlu0 %825 }
 0x228   : > { %1715 = vmatprep.subr.mxu0 %v826_v62 }
 0x229   : > { %1716 = vmatpush3.msra.mxu0 %v826_v62  ;;  %v1230_v62 = vld [vmem:[%s2184_s3 + $0x38] sm:$0xff] }
 0x22a   : > { %1717 = vmatprep.subr.mxu0 %v823_v61 }
 0x22b   : > { %1718 = vmatpush3.msra.mxu0 %v823_v61  ;;  %v820_v63 = vpop.xlane.xlu0 %819  ;;  %v1223_v61 = vld [vmem:[%s2184_s3] sm:$0xff] }
 0x22c   : > { %1719 = vmatprep.subr.mxu0 %v820_v63 }
 0x22d   : > { %1720 = vmatpush3.msra.mxu0 %v820_v63  ;;  %v1225_v63 = vld [vmem:[%s2184_s3 + $0x10] sm:$0xff] }
 0x22e   : > { %1721 = vmatprep.subr.mxu0 %v817_v0 }
 0x22f   : > { %1722 = vmatpush3.msra.mxu0 %v817_v0  ;;  %v814_v1 = vpop.xlane.xlu0 %813  ;;  %v1280_v0 = vld [vmem:[%s2185_s4 + $0x8] sm:$0xff] }
 0x230   : > { %1723 = vmatprep.subr.mxu0 %v814_v1 }
 0x231   : > { %1724 = vmatpush3.msra.mxu0 %v814_v1  ;;  %v1227_v1 = vld [vmem:[%s2184_s3 + $0x20] sm:$0xff] }
 0x232   : > { %1726 = vmatmul.mubr.msk.f32.vlgmr.msra.gmra.mxu0 %vm844_vm1, %v1992_v2 }
 0x233   : > { %1728 = vmatprep.mubr.msk.f32.mxu0 %vm844_vm1, %v1997_v3 }
 0x236   : > { %1729 = vmatmul.mubr.msk.f32.gmra.mxu0 %vm844_vm1, %v2006_v4 }
 0x237   : > { %1731 = vmatprep.mubr.msk.f32.mxu0 %vm844_vm1, %v2011_v5 }
 0x23a   : > { %1732 = vmatmul.mubr.msk.f32.gmra.mxu0 %vm844_vm1, %v2020_v6 }
 0x23b   : > { %1734 = vmatprep.mubr.msk.f32.mxu0 %vm844_vm1, %v2025_v7 }
 0x23e   : > { %1735 = vmatmul.mubr.msk.f32.gmra.mxu0 %vm844_vm1, %v2034_v8 }
 0x2f2   : > { %v1727_v10 = vpop.f32.mrf.mxu0 }
 0x2f4   : > { %v935_v11 = vpop.f32.mrf.mxu0 }
 0x2f6   : > { %v1730_v12 = vpop.f32.mrf.mxu0 }
 0x2f8   : > { %v945_v13 = vpop.f32.mrf.mxu0 }
 0x2fa   : > { %v1733_v14 = vpop.f32.mrf.mxu0 }
 0x2fc   : > { %v955_v15 = vpop.f32.mrf.mxu0 }
 0x2fe   : > { %v1736_v17 = vpop.f32.mrf.mxu0 }
 0x2ff   : > { %1011 = vperm.xlu1 %1777, %v1736_v17  }
 0x300   : > { %v965_v18 = vpop.f32.mrf.mxu0 }
 0x301   : > { %1006 = vperm.xlu0 %1778, %v965_v18  }
 0x303   : > { %1001 = vperm.xlu1 %1777, %v1733_v14   ;;  %v1283_v14 = vld [vmem:[%s2185_s4 + $0x20] sm:$0xff] }
 0x307   : > { %996 = vperm.xlu1 %1777, %v955_v15  }
 0x30b   : > { %991 = vperm.xlu1 %1777, %v1730_v12   ;;  %v1279_v12 = vld [vmem:[%s2185_s4] sm:$0xff] }
 0x30f   : > { %986 = vperm.xlu1 %1777, %v945_v13   ;;  %v1281_v13 = vld [vmem:[%s2185_s4 + $0x10] sm:$0xff] }
 0x313   : > { %981 = vperm.xlu1 %1777, %v1727_v10   ;;  %v1229_v10 = vld [vmem:[%s2184_s3 + $0x30] sm:$0xff] }
 0x317   : > { %976 = vperm.xlu1 %1777, %v935_v11   ;;  %v1284_v11 = vld [vmem:[%s2185_s4 + $0x28] sm:$0xff] }
 0x37a   : > { %v1012_v19 = vpop.permute.xlu1 %1011 }
 0x37b   : > { %v2039_v21 = vsub.f32 %v1953_v32, %v1012_v19 }
 0x37c   : > { %v1007_v22 = vpop.permute.xlu0 %1006 }
 0x37d   : > { %v1029_v24 = vmul.f32 %v1945_v23, %v2039_v21  ;;  %v2044_v25 = vsub.f32 %v1940_v20, %v1007_v22 }
 0x37e   : > { %v1002_v26 = vpop.permute.xlu1 %1001 }
 0x37f   : > { %v1028_v27 = vmul.f32 %v1945_v23, %v2044_v25  ;;  %v2049_v29 = vsub.f32 %v1956_v37, %v1002_v26  ;;  %v1037_v30 = vmul.f32 %v1029_v24, %v1029_v24 }
 0x381   : > { %v1027_v31 = vmul.f32 %v1945_v23, %v2049_v29  ;;  %v1059_v32 = vsel %vm811_vm0, %v1037_v30, 0.0  ;;  %v1036_v33 = vmul.f32 %v1028_v27, %v1028_v27 }
 0x382   : > { %1060 = vadd.xlane.f32.xlu1 %v1059_v32  ;;  %v997_v34 = vpop.permute.xlu1 %996 }
 0x383   : > { %v2055_v35 = vsub.f32 %v1961_v41, %v997_v34  ;;  %v1056_v20 = vsel %vm811_vm0, %v1036_v33, 0.0  ;;  %v1035_v36 = vmul.f32 %v1027_v31, %v1027_v31 }
 0x384   : > { %1057 = vadd.xlane.f32.xlu0 %v1056_v20 }
 0x385   : > { %v1026_v37 = vmul.f32 %v1945_v23, %v2055_v35  ;;  %v1053_v38 = vsel %vm811_vm0, %v1035_v36, 0.0 }
 0x386   : > { %1054 = vadd.xlane.f32.xlu1 %v1053_v38  ;;  %v992_v39 = vpop.permute.xlu1 %991 }
 0x387   : > { %v2062_v40 = vsub.f32 %v1938_v16, %v992_v39  ;;  %v1034_v42 = vmul.f32 %v1026_v37, %v1026_v37 }
 0x389   : > { %v1025_v43 = vmul.f32 %v1945_v23, %v2062_v40  ;;  %v1050_v41 = vsel %vm811_vm0, %v1034_v42, 0.0 }
 0x38a   : > { %v987_v44 = vpop.permute.xlu1 %986  ;;  %1051 = vadd.xlane.f32.xlu0 %v1050_v41 }
 0x38b   : > { %v2068_v45 = vsub.f32 %v1969_v46, %v987_v44  ;;  %v1033_v47 = vmul.f32 %v1025_v43, %v1025_v43 }
 0x38d   : > { %v1024_v48 = vmul.f32 %v1945_v23, %v2068_v45  ;;  %v1047_v50 = vsel %vm811_vm0, %v1033_v47, 0.0 }
 0x38e   : > { %1048 = vadd.xlane.f32.xlu1 %v1047_v50  ;;  %v982_v16 = vpop.permute.xlu1 %981  ;;  %v1285_v50 = vld [vmem:[%s2185_s4 + $0x30] sm:$0xff] }
 0x38f   : > { %v2074_v51 = vsub.f32 %v1949_v28, %v982_v16  ;;  %v1032_v53 = vmul.f32 %v1024_v48, %v1024_v48 }
 0x391   : > { %v1023_v55 = vmul.f32 %v1945_v23, %v2074_v51  ;;  %v1044_v49 = vsel %vm811_vm0, %v1032_v53, 0.0  ;;  %v1286_v53 = vld [vmem:[%s2185_s4 + $0x38] sm:$0xff] }
 0x392   : > { %v977_v54 = vpop.permute.xlu1 %976  ;;  %1045 = vadd.xlane.f32.xlu0 %v1044_v49 }
 0x393   : > { %v2080_v46 = vsub.f32 %v1975_v52, %v977_v54  ;;  %v1031_v56 = vmul.f32 %v1023_v55, %v1023_v55  ;;  %v1226_v52 = vld [vmem:[%s2184_s3 + $0x18] sm:$0xff] }
 0x395   : > { %v1022_v57 = vmul.f32 %v1945_v23, %v2080_v46  ;;  %v1041_v58 = vsel %vm811_vm0, %v1031_v56, 0.0  ;;  %v1228_v23 = vld [vmem:[%s2184_s3 + $0x28] sm:$0xff] }
 0x396   : > { %1042 = vadd.xlane.f32.xlu1 %v1041_v58 }
 0x397   : > { %v1030_v28 = vmul.f32 %v1022_v57, %v1022_v57 }
 0x399   : > { %v1038_v59 = vsel %vm811_vm0, %v1030_v28, 0.0 }
 0x39a   : > { %1039 = vadd.xlane.f32.xlu0 %v1038_v59 }
 0x3a7   : > { %1238 = vperm.xlu1 %1777, %v1224_v60  }
 0x3ab   : > { %1248 = vperm.xlu1 %1777, %v1226_v52  }
 0x3af   : > { %1258 = vperm.xlu1 %1777, %v1228_v23  }
 0x3b0   : > { %1233 = vperm.xlu0 %1778, %v1223_v61  }
 0x3b3   : > { %1268 = vperm.xlu1 %1777, %v1230_v62  }
 0x3b4   : > { %1243 = vperm.xlu0 %1778, %v1225_v63  }
 0x3b7   : > { %1294 = vperm.xlu1 %1777, %v1280_v0  }
 0x3b8   : > { %1253 = vperm.xlu0 %1778, %v1227_v1  }
 0x3bb   : > { %1304 = vperm.xlu1 %1777, %v1282_v9  }
 0x3bc   : > { %1263 = vperm.xlu0 %1778, %v1229_v10  }
 0x3bf   : > { %1314 = vperm.xlu1 %1777, %v1284_v11  }
 0x3c0   : > { %1289 = vperm.xlu0 %1778, %v1279_v12  }
 0x3c4   : > { %1299 = vperm.xlu0 %1778, %v1281_v13  }
 0x3c8   : > { %1309 = vperm.xlu0 %1778, %v1283_v14  }
 0x40b   : > { %v1061_v15 = vpop.xlane.xlu1 %1060 }
 0x40c   : > { %1737 = vmatprep.subr.mxu1 %v1061_v15 }
 0x40d   : > { %1738 = vmatpush3.msra.mxu1 %v1061_v15  ;;  %v1058_v17 = vpop.xlane.xlu0 %1057 }
 0x40e   : > { %1739 = vmatprep.subr.mxu1 %v1058_v17 }
 0x40f   : > { %v1055_v18 = vpop.xlane.xlu1 %1054  ;;  %1740 = vmatpush3.msra.mxu1 %v1058_v17 }
 0x410   : > { %1741 = vmatprep.subr.mxu1 %v1055_v18 }
 0x411   : > { %1742 = vmatpush3.msra.mxu1 %v1055_v18 }
 0x413   : > { %v1052_v19 = vpop.xlane.xlu0 %1051 }
 0x414   : > { %1743 = vmatprep.subr.mxu1 %v1052_v19 }
 0x415   : > { %1744 = vmatpush3.msra.mxu1 %v1052_v19 }
 0x417   : > { %v1049_v22 = vpop.xlane.xlu1 %1048 }
 0x418   : > { %1745 = vmatprep.subr.mxu1 %v1049_v22 }
 0x419   : > { %1746 = vmatpush3.msra.mxu1 %v1049_v22 }
 0x41b   : > { %v1046_v24 = vpop.xlane.xlu0 %1045 }
 0x41c   : > { %1747 = vmatprep.subr.mxu1 %v1046_v24 }
 0x41d   : > { %1748 = vmatpush3.msra.mxu1 %v1046_v24 }
 0x41f   : > { %v1043_v26 = vpop.xlane.xlu1 %1042 }
 0x420   : > { %1749 = vmatprep.subr.mxu1 %v1043_v26 }
 0x421   : > { %1750 = vmatpush3.msra.mxu1 %v1043_v26 }
 0x423   : > { %v1040_v27 = vpop.xlane.xlu0 %1039  ;;  %v1239_v49 = vpop.permute.xlu1 %1238 }
 0x424   : > { %1751 = vmatprep.subr.mxu1 %v1040_v27 }
 0x425   : > { %1752 = vmatpush3.msra.mxu1 %v1040_v27 }
 0x426   : > { %1754 = vmatmul.mubr.msk.f32.vlgmr.msra.gmra.mxu1 %vm844_vm1, %v1992_v2 }
 0x427   : > { %1756 = vmatprep.mubr.msk.f32.mxu1 %vm844_vm1, %v1997_v3  ;;  %v1249_v56 = vpop.permute.xlu1 %1248 }
 0x42a   : > { %1757 = vmatmul.mubr.msk.f32.gmra.mxu1 %vm844_vm1, %v2006_v4 }
 0x42b   : > { %1759 = vmatprep.mubr.msk.f32.mxu1 %vm844_vm1, %v2011_v5  ;;  %v1234_v55 = vpop.permute.xlu0 %1233  ;;  %v1259_v58 = vpop.permute.xlu1 %1258 }
 0x42e   : > { %1760 = vmatmul.mubr.msk.f32.gmra.mxu1 %vm844_vm1, %v2020_v6 }
 0x42f   : > { %1762 = vmatprep.mubr.msk.f32.mxu1 %vm844_vm1, %v2025_v7  ;;  %v1244_v54 = vpop.permute.xlu0 %1243  ;;  %v1269_v59 = vpop.permute.xlu1 %1268 }
 0x432   : > { %1763 = vmatmul.mubr.msk.f32.gmra.mxu1 %vm844_vm1, %v2034_v8 }
 0x433   : > { %v1254_v57 = vpop.permute.xlu0 %1253  ;;  %v1295_v52 = vpop.permute.xlu1 %1294 }
 0x437   : > { %v1264_v28 = vpop.permute.xlu0 %1263  ;;  %v1305_v61 = vpop.permute.xlu1 %1304 }
 0x43b   : > { %v1290_v60 = vpop.permute.xlu0 %1289  ;;  %v1315_v63 = vpop.permute.xlu1 %1314 }
 0x43f   : > { %v1300_v23 = vpop.permute.xlu0 %1299 }
 0x443   : > { %v1310_v62 = vpop.permute.xlu0 %1309 }
 0x4e6   : > { %v1755_v30 = vpop.f32.mrf.mxu1 }
 0x4e7   : > { %v1134_v2 = vadd.f32 1e-05, %v1755_v30 }
 0x4e8   : > { %v1128_v31 = vpop.f32.mrf.mxu1 }
 0x4e9   : > { %1803 = vrsqrt.f32 %v1134_v2  ;;  %v1129_v3 = vadd.f32 1e-05, %v1128_v31 }
 0x4ea   : > { %v1758_v32 = vpop.f32.mrf.mxu1 }
 0x4eb   : > { %1805 = vrsqrt.f32 %v1129_v3  ;;  %v1144_v4 = vadd.f32 1e-05, %v1758_v32 }
 0x4ec   : > { %v1138_v33 = vpop.f32.mrf.mxu1 }
 0x4ed   : > { %1807 = vrsqrt.f32 %v1144_v4  ;;  %v1139_v5 = vadd.f32 1e-05, %v1138_v33 }
 0x4ee   : > { %v1761_v34 = vpop.f32.mrf.mxu1 }
 0x4ef   : > { %1809 = vrsqrt.f32 %v1139_v5  ;;  %v1154_v36 = vadd.f32 1e-05, %v1761_v34 }
 0x4f0   : > { %v1148_v20 = vpop.f32.mrf.mxu1 }
 0x4f1   : > { %v1149_v6 = vadd.f32 1e-05, %v1148_v20 }
 0x4f2   : > { %v1764_v7 = vpop.f32.mrf.mxu1 }
 0x4f3   : > { %1811 = vrsqrt.f32 %v1149_v6  ;;  %v1164_v39 = vadd.f32 1e-05, %v1764_v7 }
 0x4f4   : > { %v1158_v37 = vpop.f32.mrf.mxu1  ;;  %1813 = vrsqrt.f32 %v1154_v36 }
 0x4f5   : > { %v1159_v8 = vadd.f32 1e-05, %v1158_v37 }
 0x4f6   : > { %v1804_v38 = vpop.eup %1803 }
 0x4f7   : > { %1815 = vrsqrt.f32 %v1159_v8  ;;  %1182 = vperm.xlu0 %1778, %v1804_v38  }
 0x4f8   : > { %v1806_v42 = vpop.eup %1805  ;;  %1817 = vrsqrt.f32 %v1164_v39 }
 0x4f9   : > { %1177 = vperm.xlu1 %1777, %v1806_v42  }
 0x4fa   : > { %v1808_v43 = vpop.eup %1807 }
 0x4fc   : > { %v1810_v41 = vpop.eup %1809 }
 0x4fd   : > { %1192 = vperm.xlu1 %1777, %v1808_v43  }
 0x500   : > { %v1812_v44 = vpop.eup %1811 }
 0x501   : > { %1197 = vperm.xlu0 %1778, %v1812_v44   ;;  %1187 = vperm.xlu1 %1777, %v1810_v41   ;;  %v1814_v47 = vpop.eup %1813 }
 0x504   : > { %v1816_v48 = vpop.eup %1815 }
 0x505   : > { %1207 = vperm.xlu0 %1778, %v1816_v48   ;;  %1202 = vperm.xlu1 %1777, %v1814_v47   ;;  %v1818_v16 = vpop.eup %1817 }
 0x509   : > { %1319 = vperm.xlu0 %1778, %v1285_v50   ;;  %1212 = vperm.xlu1 %1777, %v1818_v16  }
 0x50d   : > { %1324 = vperm.xlu1 %1777, %v1286_v53  }
 0x572   : > { %v1183_v0 = vpop.permute.xlu0 %1182 }
 0x573   : > { %v1216_v1 = vmul.f32 %v1183_v0, %v2074_v51 }
 0x574   : > { %v1178_v9 = vpop.permute.xlu1 %1177 }
 0x575   : > { %v1272_v10 = vmul.f32 %v1239_v49, %v1216_v1  ;;  %v1215_v11 = vmul.f32 %v1178_v9, %v2080_v46 }
 0x577   : > { %v1328_v12 = vadd.f32 %v1295_v52, %v1272_v10  ;;  %v1271_v13 = vmul.f32 %v1234_v55, %v1215_v11 }
 0x578   : > { %v1193_v14 = vpop.permute.xlu1 %1192 }
 0x579   : > { %v1336_v15 = vmax.f32 %v1328_v12, 0.0  ;;  %v1327_v17 = vadd.f32 %v1290_v60, %v1271_v13  ;;  %v1218_v18 = vmul.f32 %v1193_v14, %v2062_v40 }
 0x57b   : > { %v1526_v51 = vpack.c.bf16 %v1336_v15, %v1336_v15  ;;  %v1335_v19 = vmax.f32 %v1327_v17, 0.0  ;;  %v1274_v22 = vmul.f32 %v1249_v56, %v1218_v18 }
 0x57c   : > { %v1188_v46 = vpop.permute.xlu1 %1187  ;;  %v1198_v24 = vpop.permute.xlu0 %1197 }
 0x57d   : > { %1377 = vst.msk [vmem:[%s2155_s27 + $0x4] sm:$0xf] %vm1375_vm2, %v1526_v51  ;;  %v1525_v26 = vpack.c.bf16 %v1335_v19, %v1335_v19  ;;  %v1330_v27 = vadd.f32 %v1305_v61, %v1274_v22  ;;  %v1217_v40 = vmul.f32 %v1188_v46, %v2068_v45  ;;  %v1219_v30 = vmul.f32 %v1198_v24, %v2055_v35 }
 0x57f   : > { %1376 = vst.msk [vmem:[%s2155_s27] sm:$0xf] %vm1375_vm2, %v1525_v26  ;;  %v1338_v2 = vmax.f32 %v1330_v27, 0.0  ;;  %v1273_v31 = vmul.f32 %v1244_v54, %v1217_v40  ;;  %v1275_v3 = vmul.f32 %v1254_v57, %v1219_v30 }
 0x580   : > { %v1203_v32 = vpop.permute.xlu1 %1202  ;;  %v1208_v4 = vpop.permute.xlu0 %1207 }
 0x581   : > { %v1528_v33 = vpack.c.bf16 %v1338_v2, %v1338_v2  ;;  %v1329_v5 = vadd.f32 %v1300_v23, %v1273_v31  ;;  %v1331_v34 = vadd.f32 %v1310_v62, %v1275_v3  ;;  %v1220_v20 = vmul.f32 %v1203_v32, %v2049_v29 }
 0x582   : > { %v1221_v6 = vmul.f32 %v1208_v4, %v2044_v25 }
 0x583   : > { %1379 = vst.msk [vmem:[%s2155_s27 + $0xc] sm:$0xf] %vm1375_vm2, %v1528_v33  ;;  %v1337_v45 = vmax.f32 %v1329_v5, 0.0  ;;  %v1339_v35 = vmax.f32 %v1331_v34, 0.0  ;;  %v1276_v36 = vmul.f32 %v1259_v58, %v1220_v20 }
 0x584   : > { %v1213_v7 = vpop.permute.xlu1 %1212  ;;  %v1277_v37 = vmul.f32 %v1264_v28, %v1221_v6  ;;  %v1320_v8 = vpop.permute.xlu0 %1319 }
 0x585   : > { %v1527_v38 = vpack.c.bf16 %v1337_v45, %v1337_v45  ;;  %v1529_v39 = vpack.c.bf16 %v1339_v35, %v1339_v35  ;;  %v1332_v42 = vadd.f32 %v1315_v63, %v1276_v36  ;;  %v1222_v43 = vmul.f32 %v1213_v7, %v2039_v21 }
 0x586   : > { %v1333_v41 = vadd.f32 %v1320_v8, %v1277_v37 }
 0x587   : > { %1378 = vst.msk [vmem:[%s2155_s27 + $0x8] sm:$0xf] %vm1375_vm2, %v1527_v38  ;;  %1380 = vst.msk [vmem:[%s2155_s27 + $0x10] sm:$0xf] %vm1375_vm2, %v1529_v39  ;;  %v1340_v25 = vmax.f32 %v1332_v42, 0.0  ;;  %v1278_v29 = vmul.f32 %v1269_v59, %v1222_v43 }
 0x588   : > { %v1341_v44 = vmax.f32 %v1333_v41, 0.0  ;;  %v1325_v47 = vpop.permute.xlu1 %1324 }
 0x589   : > { %v1530_v48 = vpack.c.bf16 %v1340_v25, %v1340_v25  ;;  %v1334_v50 = vadd.f32 %v1325_v47, %v1278_v29 }
 0x58a   : > { %v1531_v16 = vpack.c.bf16 %v1341_v44, %v1341_v44 }
 0x58b   : > { %1381 = vst.msk [vmem:[%s2155_s27 + $0x14] sm:$0xf] %vm1375_vm2, %v1530_v48  ;;  %v1342_v53 = vmax.f32 %v1334_v50, 0.0 }
 0x58c   : > { %1382 = vst.msk [vmem:[%s2155_s27 + $0x18] sm:$0xf] %vm1375_vm2, %v1531_v16 }
 0x58d   : > { %v1532_v55 = vpack.c.bf16 %v1342_v53, %v1342_v53 }
 0x58f   : > { %1383 = vst.msk [vmem:[%s2155_s27 + $0x1c] sm:$0xf] %vm1375_vm2, %v1532_v55 }
 0x590 PF: > { %s16_s21 = sadd.s32 1, %s1825_s21  }
 0x591   : > { %p13_p4 = scmp.ge.s32.totalorder %s16_s21, 4  }
 0x593   :  { %15 = sbr.rel (!%p13_p4) target bundleno = 1 (0x1), region = 77 }

// kernel: encoder_forward.17
= control target key start
LH: loop header
LB: loop body
LE: loop exit
PB: predicated region body
PF: predicated region fallthrough
CT: control target
= control target key end

     0   :  { %s2666_s21 = smov 0   ;;  %s3125_s0 = inlined_call_operand.vmem [shape: bf16[2,64,20], index: 0, kind: input, shape index: {}]   ;;  %s3126_s1 = inlined_call_operand.vmem [shape: bf16[9,64,64], index: 1, kind: input, shape index: {}]   ;;  %s3127_s2 = inlined_call_operand.vmem [shape: f32[64,64], index: 2, kind: input, shape index: {}]   ;;  %s3128_s3 = inlined_call_operand.vmem [shape: f32[64,1], index: 3, kind: input, shape index: {}]   ;;  %s3129_s4 = inlined_call_operand.vmem [shape: f32[64,1], index: 4, kind: input, shape index: {}]   ;;  %s3130_s5 = inlined_call_operand.vmem [shape: f32[1,8], index: 5, kind: input, shape index: {}]   ;;  %s3131_s6 = inlined_call_operand.vmem [shape: bf16[2,64,8], index: 6, kind: output, shape index: {}]  }
   0x1 LB: > { %s2033_s22 = sadd.s32 4294967295, %s2620_s21   ;;  %p2037_p0 = scmp.ge.s32.totalorder %s2620_s21, 1  ;;  %s2620_s21 = sphi %s2666_s21, %s16_s21  }
   0x2   : > { %p212_p1 = scmp.lt.s32.totalorder %s2620_s21, 3 }
   0x4   : > { %p213_p2 = pnand %p2037_p0, %p212_p1 }
   0x6   : > { %216 = sbr.rel (%p213_p2) target bundleno = 1439 (0x59f), region = 44 }
   0xb   : > { %p242_p3 = scmp.lt.s32.totalorder %s2033_s22, 1  ;;  %s2622_s27 = smov 127   ;;  %vm330_vm0 = vcmask 523264   ;;  %v2562_v4 = vld [vmem:[%s3126_s1 + $0x20] sm:$0xff]   ;;  %v2565_v6 = vld [vmem:[%s3126_s1 + $0x8] sm:$0xff]   ;;  %v2567_v7 = vld [vmem:[%s3126_s1 + $0x10] sm:$0xff]  }
   0xc   : > { %v2563_v5 = vld [vmem:[%s3126_s1] sm:$0xff]   ;;  %2331 = vmatprep.mubr.msk.bf16.mxu0 %vm330_vm0, %v2562_v4  ;;  %s2623_s8 = smov 126   ;;  %s2624_s13 = smov 124   ;;  %v2569_v8 = vld [vmem:[%s3126_s1 + $0x18] sm:$0xff]   ;;  %v2564_v17 = vld [vmem:[%s3126_s1 + $0x28] sm:$0xff]   ;;  %vm1406_vm1 = vcmask 64512  }
   0xd   : > { %s3149_s22 = smov (!%p242_p3, %s2033_s22), 1  ;;  %2347 = vmatprep.mubr.msk.bf16.mxu1 %vm330_vm0, %v2563_v5  ;;  %s2625_s14 = smov 123   ;;  %v2572_v9 = vld [vmem:[%s3126_s1 + $0x60] sm:$0xff]   ;;  %v2566_v19 = vld [vmem:[%s3126_s1 + $0x30] sm:$0xff]   ;;  %v2568_v23 = vld [vmem:[%s3126_s1 + $0x38] sm:$0xff]   ;;  %vm1969_vm2 = vcmask 60416  }
   0xe   : > { %s2209_s23 = sshll.u32 %s3149_s22, 5  ;;  %s2626_s19 = smov 122   ;;  %v2570_v25 = vld [vmem:[%s3126_s1 + $0x40] sm:$0xff]   ;;  %v2571_v29 = vld [vmem:[%s3126_s1 + $0x48] sm:$0xff]   ;;  %v2574_v33 = vld [vmem:[%s3126_s1 + $0x50] sm:$0xff]  }
   0xf   : > { %s246_s26 = scalar_lea.vmem %s3125_s0, %s2209_s23  ;;  %s2627_s20 = smov 120   ;;  %v2573_v30 = vld [vmem:[%s3126_s1 + $0x68] sm:$0xff]   ;;  %v2576_v34 = vld [vmem:[%s3126_s1 + $0x70] sm:$0xff]   ;;  %v2575_v37 = vld [vmem:[%s3126_s1 + $0x58] sm:$0xff]  }
  0x10   : > { %v2558_v0 = vld [vmem:[%s246_s26 + $0x18] sm:$0xff]   ;;  %v2559_v1 = vld [vmem:[%s246_s26 + $0x10] sm:$0xff]   ;;  %v2560_v2 = vld [vmem:[%s246_s26 + $0x8] sm:$0xff]   ;;  %s2628_s24 = smov 119   ;;  %s2629_s25 = smov 118  }
  0x11   : > { %324 = vrot.lane.b32.xlu0 %v2558_v0, %s2622_s27  ;;  %2339 = vmatprep.subr.bf16.mxu1 %v2558_v0  ;;  %v2561_v3 = vld [vmem:[%s246_s26] sm:$0xff]   ;;  %v2577_v38 = vld [vmem:[%s3126_s1 + $0x78] sm:$0xff]   ;;  %v2579_v45 = vld [vmem:[%s3126_s1 + $0x88] sm:$0xff]   ;;  %s3100_s9 = scalar_lea.vmem %s3131_s6, %s2209_s23 }
  0x12   : > { %2340 = vmatpush3.bf16.msra.mxu1 %v2558_v0  ;;  %320 = vrot.lane.b32.xlu1 %v2560_v2, %s2622_s27  ;;  %v2578_v41 = vld [vmem:[%s3126_s1 + $0x80] sm:$0xff]   ;;  %v2581_v46 = vld [vmem:[%s3126_s1 + $0xa8] sm:$0xff]   ;;  %v2582_v48 = vld [vmem:[%s3126_s1 + $0x90] sm:$0xff]  }
  0x13   : > { %2341 = vmatprep.subr.bf16.mxu1 %v2559_v1  ;;  %v2580_v42 = vld [vmem:[%s3126_s1 + $0xa0] sm:$0xff]   ;;  %v2584_v49 = vld [vmem:[%s3126_s1 + $0xb0] sm:$0xff]   ;;  %v2583_v52 = vld [vmem:[%s3126_s1 + $0x98] sm:$0xff]  }
  0x14   : > { %v2585_v53 = vld [vmem:[%s3126_s1 + $0xb8] sm:$0xff]   ;;  %v2586_v56 = vld [vmem:[%s3126_s1 + $0xc0] sm:$0xff]   ;;  %v2587_v60 = vld [vmem:[%s3126_s1 + $0xc8] sm:$0xff]  }
  0x15   : > { %322 = vrot.lane.b32.xlu0 %v2559_v1, %s2622_s27  ;;  %v2588_v57 = vld [vmem:[%s3126_s1 + $0xe0] sm:$0xff]   ;;  %v2589_v61 = vld [vmem:[%s3126_s1 + $0xe8] sm:$0xff]   ;;  %v2590_v62 = vld [vmem:[%s3126_s1 + $0xd0] sm:$0xff]  }
  0x16   : > { %2342 = vmatpush3.bf16.msra.mxu1 %v2559_v1  ;;  %318 = vrot.lane.b32.xlu1 %v2561_v3, %s2622_s27  ;;  %v2592_v63 = vld [vmem:[%s3126_s1 + $0xf0] sm:$0xff]   ;;  %v2595_v5 = vld [vmem:[%s3126_s1 + $0x108] sm:$0xff]  }
  0x17   : > { %2343 = vmatprep.subr.bf16.mxu1 %v2560_v2 }
  0x19   : > { %544 = vrot.lane.b32.xlu0 %v2558_v0, %s2623_s8 }
  0x1a   : > { %2344 = vmatpush3.bf16.msra.mxu1 %v2560_v2  ;;  %542 = vrot.lane.b32.xlu1 %v2559_v1, %s2623_s8 }
  0x1b   : > { %2345 = vmatprep.subr.bf16.mxu1 %v2561_v3 }
  0x1d   : > { %540 = vrot.lane.b32.xlu0 %v2560_v2, %s2623_s8 }
  0x1e   : > { %2346 = vmatpush3.bf16.msra.mxu1 %v2561_v3  ;;  %538 = vrot.lane.b32.xlu1 %v2561_v3, %s2623_s8 }
  0x21   : > { %670 = vrot.lane.b32.xlu0 %v2558_v0, %s2624_s13  ;;  %2348 = vmatmul.mubr.msk.bf16.vlgmr.msra.gmra.mxu1 %vm330_vm0, %v2565_v6  ;;  %v2596_v6 = vld [vmem:[%s3126_s1 + $0x110] sm:$0xff]  }
  0x22   : > { %2351 = vmatprep.mubr.msk.bf16.mxu1 %vm330_vm0, %v2567_v7  ;;  %796 = vrot.lane.b32.xlu1 %v2558_v0, %s2625_s14  ;;  %v2597_v7 = vld [vmem:[%s3126_s1 + $0x118] sm:$0xff]  }
  0x25   : > { %668 = vrot.lane.b32.xlu0 %v2559_v1, %s2624_s13 }
  0x26   : > { %794 = vrot.lane.b32.xlu1 %v2559_v1, %s2625_s14 }
  0x29   : > { %666 = vrot.lane.b32.xlu0 %v2560_v2, %s2624_s13  ;;  %2352 = vmatmul.mubr.msk.bf16.gmra.mxu1 %vm330_vm0, %v2569_v8 }
  0x2a   : > { %2379 = vmatprep.mubr.msk.bf16.mxu1 %vm330_vm0, %v2572_v9  ;;  %792 = vrot.lane.b32.xlu1 %v2560_v2, %s2625_s14 }
  0x2d   : > { %664 = vrot.lane.b32.xlu0 %v2561_v3, %s2624_s13 }
  0x2e   : > { %790 = vrot.lane.b32.xlu1 %v2561_v3, %s2625_s14 }
  0x31   : > { %922 = vrot.lane.b32.xlu0 %v2558_v0, %s2626_s19 }
  0x32   : > { %1048 = vrot.lane.b32.xlu1 %v2558_v0, %s2627_s20 }
  0x35   : > { %920 = vrot.lane.b32.xlu0 %v2559_v1, %s2626_s19 }
  0x36   : > { %1046 = vrot.lane.b32.xlu1 %v2559_v1, %s2627_s20 }
  0x39   : > { %918 = vrot.lane.b32.xlu0 %v2560_v2, %s2626_s19 }
  0x3a   : > { %1044 = vrot.lane.b32.xlu1 %v2560_v2, %s2627_s20 }
  0x3d   : > { %916 = vrot.lane.b32.xlu0 %v2561_v3, %s2626_s19 }
  0x3e   : > { %1042 = vrot.lane.b32.xlu1 %v2561_v3, %s2627_s20 }
  0x41   : > { %1174 = vrot.lane.b32.xlu0 %v2558_v0, %s2628_s24 }
  0x42   : > { %1300 = vrot.lane.b32.xlu1 %v2558_v0, %s2629_s25 }
  0x45   : > { %1172 = vrot.lane.b32.xlu0 %v2559_v1, %s2628_s24 }
  0x46   : > { %1298 = vrot.lane.b32.xlu1 %v2559_v1, %s2629_s25  ;;  %v2591_v1 = vld [vmem:[%s3126_s1 + $0xd8] sm:$0xff]  }
  0x49   : > { %1170 = vrot.lane.b32.xlu0 %v2560_v2, %s2628_s24 }
  0x4a   : > { %1296 = vrot.lane.b32.xlu1 %v2560_v2, %s2629_s25  ;;  %v2593_v2 = vld [vmem:[%s3126_s1 + $0xf8] sm:$0xff]  }
  0x4d   : > { %1168 = vrot.lane.b32.xlu0 %v2561_v3, %s2628_s24 }
  0x4e   : > { %1294 = vrot.lane.b32.xlu1 %v2561_v3, %s2629_s25  ;;  %v2594_v3 = vld [vmem:[%s3126_s1 + $0x100] sm:$0xff]  }
  0x83   : > { %v325_v10 = vpop.permute.xlu0 %324 }
  0x84   : > { %2323 = vmatprep.subr.bf16.mxu0 %v325_v10  ;;  %v321_v11 = vpop.permute.xlu1 %320 }
  0x85   : > { %2324 = vmatpush3.bf16.msra.mxu0 %v325_v10 }
  0x87   : > { %v323_v12 = vpop.permute.xlu0 %322 }
  0x88   : > { %2325 = vmatprep.subr.bf16.mxu0 %v323_v12  ;;  %v319_v13 = vpop.permute.xlu1 %318 }
  0x89   : > { %2326 = vmatpush3.bf16.msra.mxu0 %v323_v12 }
  0x8a   : > { %2327 = vmatprep.subr.bf16.mxu0 %v321_v11 }
  0x8b   : > { %v545_v14 = vpop.permute.xlu0 %544 }
  0x8c   : > { %v543_v15 = vpop.permute.xlu1 %542 }
  0x8d   : > { %2328 = vmatpush3.bf16.msra.mxu0 %v321_v11 }
  0x8e   : > { %2329 = vmatprep.subr.bf16.mxu0 %v319_v13 }
  0x8f   : > { %v541_v16 = vpop.permute.xlu0 %540 }
  0x90   : > { %v539_v18 = vpop.permute.xlu1 %538 }
  0x91   : > { %2330 = vmatpush3.bf16.msra.mxu0 %v319_v13 }
  0x92   : > { %2355 = vmatprep.subr.bf16.mxu0 %v545_v14 }
  0x93   : > { %v671_v20 = vpop.permute.xlu0 %670 }
  0x94   : > { %2332 = vmatmul.mubr.msk.bf16.vlgmr.msra.gmra.mxu0 %vm330_vm0, %v2564_v17  ;;  %2371 = vmatprep.subr.bf16.mxu1 %v671_v20  ;;  %v797_v21 = vpop.permute.xlu1 %796 }
  0x95   : > { %2356 = vmatpush3.bf16.msra.mxu0 %v545_v14  ;;  %2372 = vmatpush3.bf16.msra.mxu1 %v671_v20 }
  0x96   : > { %2357 = vmatprep.subr.bf16.mxu0 %v543_v15  ;;  %2335 = vmatprep.mubr.msk.bf16.mxu0 %vm330_vm0, %v2566_v19 }
  0x97   : > { %v669_v22 = vpop.permute.xlu0 %668 }
  0x98   : > { %2373 = vmatprep.subr.bf16.mxu1 %v669_v22  ;;  %v795_v24 = vpop.permute.xlu1 %794 }
  0x99   : > { %2358 = vmatpush3.bf16.msra.mxu0 %v543_v15  ;;  %2374 = vmatpush3.bf16.msra.mxu1 %v669_v22 }
  0x9a   : > { %2359 = vmatprep.subr.bf16.mxu0 %v541_v16 }
  0x9b   : > { %v667_v26 = vpop.permute.xlu0 %666 }
  0x9c   : > { %2336 = vmatmul.mubr.msk.bf16.gmra.mxu0 %vm330_vm0, %v2568_v23  ;;  %2375 = vmatprep.subr.bf16.mxu1 %v667_v26  ;;  %v793_v27 = vpop.permute.xlu1 %792 }
  0x9d   : > { %2360 = vmatpush3.bf16.msra.mxu0 %v541_v16  ;;  %2376 = vmatpush3.bf16.msra.mxu1 %v667_v26 }
  0x9e   : > { %2361 = vmatprep.subr.bf16.mxu0 %v539_v18  ;;  %2363 = vmatprep.mubr.msk.bf16.mxu0 %vm330_vm0, %v2570_v25 }
  0x9f   : > { %v665_v28 = vpop.permute.xlu0 %664 }
  0xa0   : > { %2377 = vmatprep.subr.bf16.mxu1 %v665_v28  ;;  %v791_v31 = vpop.permute.xlu1 %790 }
  0xa1   : > { %2362 = vmatpush3.bf16.msra.mxu0 %v539_v18  ;;  %2378 = vmatpush3.bf16.msra.mxu1 %v665_v28 }
  0xa2   : > { %2387 = vmatprep.subr.bf16.mxu0 %v797_v21 }
  0xa3   : > { %v923_v32 = vpop.permute.xlu0 %922 }
  0xa4   : > { %2364 = vmatmul.mubr.msk.bf16.vlgmr.msra.gmra.mxu0 %vm330_vm0, %v2571_v29  ;;  %2380 = vmatmul.mubr.msk.bf16.vlgmr.msra.gmra.mxu1 %vm330_vm0, %v2573_v30  ;;  %v1049_v35 = vpop.permute.xlu1 %1048 }
  0xa5   : > { %2388 = vmatpush3.bf16.msra.mxu0 %v797_v21  ;;  %2403 = vmatprep.subr.bf16.mxu1 %v923_v32 }
  0xa6   : > { %2404 = vmatpush3.bf16.msra.mxu1 %v923_v32  ;;  %2389 = vmatprep.subr.bf16.mxu0 %v795_v24 }
  0xa7   : > { %v921_v36 = vpop.permute.xlu0 %920  ;;  %2367 = vmatprep.mubr.msk.bf16.mxu0 %vm330_vm0, %v2574_v33  ;;  %2383 = vmatprep.mubr.msk.bf16.mxu1 %vm330_vm0, %v2576_v34 }
  0xa8   : > { %2405 = vmatprep.subr.bf16.mxu1 %v921_v36  ;;  %v1047_v39 = vpop.permute.xlu1 %1046 }
  0xa9   : > { %2390 = vmatpush3.bf16.msra.mxu0 %v795_v24 }
  0xaa   : > { %2406 = vmatpush3.bf16.msra.mxu1 %v921_v36  ;;  %2391 = vmatprep.subr.bf16.mxu0 %v793_v27 }
  0xab   : > { %v919_v40 = vpop.permute.xlu0 %918 }
  0xac   : > { %2368 = vmatmul.mubr.msk.bf16.gmra.mxu0 %vm330_vm0, %v2575_v37  ;;  %2384 = vmatmul.mubr.msk.bf16.gmra.mxu1 %vm330_vm0, %v2577_v38  ;;  %v1045_v43 = vpop.permute.xlu1 %1044 }
  0xad   : > { %2392 = vmatpush3.bf16.msra.mxu0 %v793_v27  ;;  %2407 = vmatprep.subr.bf16.mxu1 %v919_v40 }
  0xae   : > { %2408 = vmatpush3.bf16.msra.mxu1 %v919_v40  ;;  %2393 = vmatprep.subr.bf16.mxu0 %v791_v31 }
  0xaf   : > { %v917_v44 = vpop.permute.xlu0 %916  ;;  %2395 = vmatprep.mubr.msk.bf16.mxu0 %vm330_vm0, %v2578_v41  ;;  %2411 = vmatprep.mubr.msk.bf16.mxu1 %vm330_vm0, %v2580_v42 }
  0xb0   : > { %2409 = vmatprep.subr.bf16.mxu1 %v917_v44  ;;  %v1043_v50 = vpop.permute.xlu1 %1042 }
  0xb1   : > { %2394 = vmatpush3.bf16.msra.mxu0 %v791_v31 }
  0xb2   : > { %2410 = vmatpush3.bf16.msra.mxu1 %v917_v44  ;;  %2419 = vmatprep.subr.bf16.mxu0 %v1049_v35 }
  0xb3   : > { %v1175_v47 = vpop.permute.xlu0 %1174 }
  0xb4   : > { %2396 = vmatmul.mubr.msk.bf16.vlgmr.msra.gmra.mxu0 %vm330_vm0, %v2579_v45  ;;  %2435 = vmatprep.subr.bf16.mxu1 %v1175_v47  ;;  %v1301_v54 = vpop.permute.xlu1 %1300 }
  0xb5   : > { %2420 = vmatpush3.bf16.msra.mxu0 %v1049_v35  ;;  %2412 = vmatmul.mubr.msk.bf16.vlgmr.msra.gmra.mxu1 %vm330_vm0, %v2581_v46 }
  0xb6   : > { %2436 = vmatpush3.bf16.msra.mxu1 %v1175_v47  ;;  %2421 = vmatprep.subr.bf16.mxu0 %v1047_v39 }
  0xb7   : > { %v1173_v51 = vpop.permute.xlu0 %1172  ;;  %2399 = vmatprep.mubr.msk.bf16.mxu0 %vm330_vm0, %v2582_v48  ;;  %2415 = vmatprep.mubr.msk.bf16.mxu1 %vm330_vm0, %v2584_v49 }
  0xb8   : > { %2437 = vmatprep.subr.bf16.mxu1 %v1173_v51  ;;  %v1299_v59 = vpop.permute.xlu1 %1298 }
  0xb9   : > { %2422 = vmatpush3.bf16.msra.mxu0 %v1047_v39 }
  0xba   : > { %2438 = vmatpush3.bf16.msra.mxu1 %v1173_v51  ;;  %2423 = vmatprep.subr.bf16.mxu0 %v1045_v43 }
  0xbb   : > { %v1171_v55 = vpop.permute.xlu0 %1170 }
  0xbc   : > { %2400 = vmatmul.mubr.msk.bf16.gmra.mxu0 %vm330_vm0, %v2583_v52  ;;  %2439 = vmatprep.subr.bf16.mxu1 %v1171_v55  ;;  %v1297_v0 = vpop.permute.xlu1 %1296 }
  0xbd   : > { %2424 = vmatpush3.bf16.msra.mxu0 %v1045_v43  ;;  %2416 = vmatmul.mubr.msk.bf16.gmra.mxu1 %vm330_vm0, %v2585_v53 }
  0xbe   : > { %2440 = vmatpush3.bf16.msra.mxu1 %v1171_v55  ;;  %2425 = vmatprep.subr.bf16.mxu0 %v1043_v50 }
  0xbf   : > { %v1169_v58 = vpop.permute.xlu0 %1168  ;;  %2427 = vmatprep.mubr.msk.bf16.mxu0 %vm330_vm0, %v2586_v56  ;;  %2443 = vmatprep.mubr.msk.bf16.mxu1 %vm330_vm0, %v2588_v57 }
  0xc0   : > { %2441 = vmatprep.subr.bf16.mxu1 %v1169_v58  ;;  %v1295_v4 = vpop.permute.xlu1 %1294 }
  0xc1   : > { %2426 = vmatpush3.bf16.msra.mxu0 %v1043_v50 }
  0xc2   : > { %2442 = vmatpush3.bf16.msra.mxu1 %v1169_v58  ;;  %2451 = vmatprep.subr.bf16.mxu0 %v1301_v54 }
  0xc4   : > { %2428 = vmatmul.mubr.msk.bf16.vlgmr.msra.gmra.mxu0 %vm330_vm0, %v2587_v60 }
  0xc5   : > { %2452 = vmatpush3.bf16.msra.mxu0 %v1301_v54  ;;  %2444 = vmatmul.mubr.msk.bf16.vlgmr.msra.gmra.mxu1 %vm330_vm0, %v2589_v61 }
  0xc6   : > { %2453 = vmatprep.subr.bf16.mxu0 %v1299_v59  ;;  %2431 = vmatprep.mubr.msk.bf16.mxu0 %vm330_vm0, %v2590_v62 }
  0xc7   : > { %2447 = vmatprep.mubr.msk.bf16.mxu1 %vm330_vm0, %v2592_v63 }
  0xc9   : > { %2454 = vmatpush3.bf16.msra.mxu0 %v1299_v59 }
  0xca   : > { %2455 = vmatprep.subr.bf16.mxu0 %v1297_v0 }
  0xcc   : > { %2432 = vmatmul.mubr.msk.bf16.gmra.mxu0 %vm330_vm0, %v2591_v1 }
  0xcd   : > { %2456 = vmatpush3.bf16.msra.mxu0 %v1297_v0  ;;  %2448 = vmatmul.mubr.msk.bf16.gmra.mxu1 %vm330_vm0, %v2593_v2 }
  0xce   : > { %2457 = vmatprep.subr.bf16.mxu0 %v1295_v4  ;;  %2459 = vmatprep.mubr.msk.bf16.mxu0 %vm330_vm0, %v2594_v3 }
  0xd1   : > { %2458 = vmatpush3.bf16.msra.mxu0 %v1295_v4 }
  0xd4   : > { %2460 = vmatmul.mubr.msk.bf16.vlgmr.msra.gmra.mxu0 %vm330_vm0, %v2595_v5 }
  0xd5   : > { %2463 = vmatprep.mubr.msk.bf16.mxu0 %vm330_vm0, %v2596_v6 }
  0xdc   : > { %2464 = vmatmul.mubr.msk.bf16.gmra.mxu0 %vm330_vm0, %v2597_v7 }
  0xe1   : > { %v2826_v8 = vpop.f32.mrf.mxu1 }
  0xe3   : > { %v2828_v9 = vpop.f32.mrf.mxu1 }
  0xe5   : > { %v2350_v10 = vpop.f32.mrf.mxu1 }
  0xe7   : > { %v481_v11 = vpop.f32.mrf.mxu1 }
  0xe9   : > { %v2353_v14 = vpop.f32.mrf.mxu1 }
  0xeb   : > { %v494_v17 = vpop.f32.mrf.mxu1 }
  0xed   : > { %v2354_v20 = vpop.f32.mrf.mxu1 }
  0xef   : > { %v497_v23 = vpop.f32.mrf.mxu1 }
 0x154   : > { %v2830_v12 = vpop.f32.mrf.mxu0 }
 0x156   : > { %v2832_v13 = vpop.f32.mrf.mxu0 }
 0x158   : > { %v2334_v15 = vpop.f32.mrf.mxu0 }
 0x159   : > { %v490_v60 = vadd.f32 %v2350_v10, %v2334_v15 }
 0x15a   : > { %v380_v16 = vpop.f32.mrf.mxu0 }
 0x15b   : > { %v482_v4 = vadd.f32 %v481_v11, %v380_v16  ;;  %v487_v11 = vadd.f32 %v2826_v8, %v2830_v12  ;;  %v479_v8 = vadd.f32 %v2828_v9, %v2832_v13 }
 0x15c   : > { %v2337_v18 = vpop.f32.mrf.mxu0 }
 0x15d   : > { %v503_v62 = vadd.f32 %v2353_v14, %v2337_v18 }
 0x15e   : > { %v393_v19 = vpop.f32.mrf.mxu0 }
 0x160   : > { %v2338_v21 = vpop.f32.mrf.mxu0 }
 0x161   : > { %v506_v5 = vadd.f32 %v2354_v20, %v2338_v21 }
 0x162   : > { %v396_v22 = vpop.f32.mrf.mxu0 }
 0x164   : > { %v2834_v24 = vpop.f32.mrf.mxu0  ;;  %v2836_v25 = vpop.f32.mrf.mxu1 }
 0x166   : > { %v2838_v26 = vpop.f32.mrf.mxu0  ;;  %v2840_v27 = vpop.f32.mrf.mxu1 }
 0x167   : > { %3132 = vst [vmem:[#allocation2_spill] sm:$0xff] %v2840_v27 }
 0x168   : > { %v2366_v28 = vpop.f32.mrf.mxu0  ;;  %v2382_v29 = vpop.f32.mrf.mxu1 }
 0x169   : > { %v630_v63 = vadd.f32 %v2366_v28, %v490_v60 }
 0x16a   : > { %v599_v30 = vpop.f32.mrf.mxu0  ;;  %v725_v31 = vpop.f32.mrf.mxu1 }
 0x16b   : > { %v756_v6 = vadd.f32 %v2382_v29, %v630_v63 }
 0x16c   : > { %v2369_v32 = vpop.f32.mrf.mxu0  ;;  %v2385_v33 = vpop.f32.mrf.mxu1 }
 0x16d   : > { %v633_v2 = vadd.f32 %v2369_v32, %v503_v62 }
 0x16e   : > { %v612_v34 = vpop.f32.mrf.mxu0  ;;  %v2842_v35 = vpop.f32.mrf.mxu1 }
 0x170   : > { %v2370_v36 = vpop.f32.mrf.mxu0  ;;  %v2386_v37 = vpop.f32.mrf.mxu1 }
 0x172   : > { %v615_v38 = vpop.f32.mrf.mxu0  ;;  %v741_v39 = vpop.f32.mrf.mxu1 }
 0x174   : > { %v2844_v40 = vpop.f32.mrf.mxu0 }
 0x175   : > { %v2846_v41 = vpop.f32.mrf.mxu1 }
 0x176   : > { %3133 = vst [vmem:[#allocation3_spill] sm:$0xff] %v2846_v41  ;;  %v2848_v42 = vpop.f32.mrf.mxu0  ;;  %v628_v41 = vadd.f32 %v599_v30, %v482_v4  ;;  %v629_v30 = vadd.f32 %v2834_v24, %v487_v11 }
 0x177   : > { %3134 = vst [vmem:[#allocation4_spill] sm:$0xff] %v2848_v42  ;;  %v2850_v43 = vpop.f32.mrf.mxu1  ;;  %v634_v42 = vadd.f32 %v2370_v36, %v506_v5 }
 0x178   : > { %3135 = vst [vmem:[#allocation5_spill] sm:$0xff] %v2850_v43  ;;  %v2398_v44 = vpop.f32.mrf.mxu0  ;;  %v754_v28 = vadd.f32 %v725_v31, %v628_v41  ;;  %v627_v41 = vadd.f32 %v2838_v26, %v479_v8  ;;  %v3140_v26 = vld [vmem:[#allocation2_spill] sm:$0xff] }
 0x179   : > { %v2414_v45 = vpop.f32.mrf.mxu1  ;;  %v760_v32 = vadd.f32 %v2386_v37, %v634_v42  ;;  %v755_v42 = vadd.f32 %v2836_v25, %v629_v30 }
 0x17a   : > { %v851_v46 = vpop.f32.mrf.mxu0 }
 0x17b   : > { %v977_v47 = vpop.f32.mrf.mxu1 }
 0x17c   : > { %v2401_v48 = vpop.f32.mrf.mxu0 }
 0x17d   : > { %v2417_v49 = vpop.f32.mrf.mxu1 }
 0x17e   : > { %v864_v50 = vpop.f32.mrf.mxu0 }
 0x17f   : > { %v2852_v51 = vpop.f32.mrf.mxu1 }
 0x180   : > { %v2402_v52 = vpop.f32.mrf.mxu0 }
 0x181   : > { %v2418_v53 = vpop.f32.mrf.mxu1  ;;  %v886_v29 = vadd.f32 %v2402_v52, %v760_v32  ;;  %v881_v52 = vadd.f32 %v2844_v40, %v755_v42 }
 0x182   : > { %v867_v54 = vpop.f32.mrf.mxu0 }
 0x183   : > { %v993_v55 = vpop.f32.mrf.mxu1 }
 0x184   : > { %v2854_v56 = vpop.f32.mrf.mxu0 }
 0x185   : > { %3136 = vst [vmem:[#allocation6_spill] sm:$0xff] %v2854_v56  ;;  %v2856_v57 = vpop.f32.mrf.mxu1  ;;  %v498_v56 = vadd.f32 %v497_v23, %v396_v22  ;;  %v880_v22 = vadd.f32 %v851_v46, %v754_v28 }
 0x186   : > { %3137 = vst [vmem:[#allocation7_spill] sm:$0xff] %v2856_v57  ;;  %v2858_v58 = vpop.f32.mrf.mxu0  ;;  %v759_v57 = vadd.f32 %v2385_v33, %v633_v2 }
 0x187   : > { %3138 = vst [vmem:[#allocation8_spill] sm:$0xff] %v2858_v58  ;;  %v2860_v59 = vpop.f32.mrf.mxu1  ;;  %v882_v58 = vadd.f32 %v2398_v44, %v756_v6  ;;  %v632_v10 = vadd.f32 %v615_v38, %v498_v56  ;;  %v1006_v37 = vadd.f32 %v977_v47, %v880_v22 }
 0x188   : > { %3139 = vst [vmem:[#allocation9_spill] sm:$0xff] %v2860_v59  ;;  %v2430_v61 = vpop.f32.mrf.mxu0  ;;  %v495_v59 = vadd.f32 %v494_v17, %v393_v19  ;;  %v885_v15 = vadd.f32 %v2401_v48, %v759_v57 }
 0x189   : > { %v2446_v1 = vpop.f32.mrf.mxu1  ;;  %v1008_v16 = vadd.f32 %v2414_v45, %v882_v58  ;;  %v758_v21 = vadd.f32 %v741_v39, %v632_v10  ;;  %v1012_v39 = vadd.f32 %v2418_v53, %v886_v29  ;;  %v753_v53 = vadd.f32 %v3140_v26, %v627_v41  ;;  %v2969_v26 = vld [vmem:[%s3127_s2 + $0x30] sm:$0xff] }
 0x18a   : > { %v1103_v0 = vpop.f32.mrf.mxu0  ;;  %v631_v60 = vadd.f32 %v612_v34, %v495_v59  ;;  %v1011_v23 = vadd.f32 %v2417_v49, %v885_v15  ;;  %v3141_v59 = vld [vmem:[#allocation4_spill] sm:$0xff] }
 0x18b   : > { %v1229_v7 = vpop.f32.mrf.mxu1  ;;  %v1134_v17 = vadd.f32 %v2430_v61, %v1008_v16  ;;  %v884_v34 = vadd.f32 %v867_v54, %v758_v21  ;;  %v1132_v48 = vadd.f32 %v1103_v0, %v1006_v37  ;;  %v3142_v61 = vld [vmem:[#allocation3_spill] sm:$0xff] }
 0x18c   : > { %v2433_v3 = vpop.f32.mrf.mxu0  ;;  %v757_v31 = vadd.f32 %v2842_v35, %v631_v60  ;;  %v1007_v62 = vadd.f32 %v3142_v61, %v881_v52  ;;  %v3143_v5 = vld [vmem:[#allocation6_spill] sm:$0xff]  ;;  %v2944_v52 = vld [vmem:[%s3127_s2 + $0x10] sm:$0xff] }
 0x18d   : > { %v2449_v14 = vpop.f32.mrf.mxu1  ;;  %v1137_v36 = vadd.f32 %v2433_v3, %v1011_v23  ;;  %v1260_v24 = vadd.f32 %v2446_v1, %v1134_v17  ;;  %v1010_v46 = vadd.f32 %v993_v55, %v884_v34  ;;  %v2884_v55 = vld [vmem:[%s3130_s5] ss:$0 sm:$0xff]  ;;  %v3146_v23 = vld [vmem:[#allocation7_spill] sm:$0xff] }
 0x18e   : > { %v1116_v43 = vpop.f32.mrf.mxu0  ;;  %v883_v38 = vadd.f32 %v864_v50, %v757_v31  ;;  %v1133_v6 = vadd.f32 %v3143_v5, %v1007_v62  ;;  %v3145_v21 = vld [vmem:[#allocation8_spill] sm:$0xff] }
 0x18f   : > { %v1242_v19 = vpop.f32.mrf.mxu1  ;;  %v1263_v49 = vadd.f32 %v2449_v14, %v1137_v36  ;;  %v3144_v14 = vld [vmem:[#allocation5_spill] sm:$0xff] }
 0x190   : > { %v2434_v27 = vpop.f32.mrf.mxu0  ;;  %v1009_v13 = vadd.f32 %v2852_v51, %v883_v38  ;;  %v879_v51 = vadd.f32 %v3141_v59, %v753_v53  ;;  %v1259_v29 = vadd.f32 %v3146_v23, %v1133_v6  ;;  %v3147_v34 = vld [vmem:[#allocation9_spill] sm:$0xff] }
 0x191   : > { %v2450_v44 = vpop.f32.mrf.mxu1  ;;  %v1138_v35 = vadd.f32 %v2434_v27, %v1012_v39  ;;  %v1258_v27 = vadd.f32 %v1229_v7, %v1132_v48  ;;  %v2978_v53 = vld [vmem:[%s3127_s2 + $0x38] sm:$0xff] }
 0x192   : > { %v1119_v18 = vpop.f32.mrf.mxu0  ;;  %v1135_v57 = vadd.f32 %v1116_v43, %v1009_v13  ;;  %v1435_v13 = vld [vmem:[%s3127_s2 + $0x20] sm:$0xff] }
 0x193   : > { %v1136_v47 = vadd.f32 %v1119_v18, %v1010_v46  ;;  %v1245_v25 = vpop.f32.mrf.mxu1  ;;  %v1264_v40 = vadd.f32 %v2450_v44, %v1138_v35  ;;  %v1005_v18 = vadd.f32 %v3144_v14, %v879_v51  ;;  %v2939_v35 = vld [vmem:[%s3127_s2 + $0x8] sm:$0xff] }
 0x194   : > { %v2864_v20 = vpop.f32.mrf.mxu0  ;;  %v1261_v7 = vadd.f32 %v1242_v19, %v1135_v57 }
 0x195   : > { %v1262_v1 = vadd.f32 %v1245_v25, %v1136_v47  ;;  %v1131_v22 = vadd.f32 %v3145_v21, %v1005_v18  ;;  %v2914_v30 = vadd.f32 %v2864_v20, %v1259_v29  ;;  %v2964_v47 = vld [vmem:[%s3127_s2 + $0x28] sm:$0xff]  ;;  %v2630_v25 = vmov 0  }
 0x196   : > { %v2867_v33 = vpop.f32.mrf.mxu0  ;;  %2556 = vset.pattern.permute.xlu1 %v2630_v25  ;;  %2557 = vset.pattern.permute.xlu0 %v2630_v25  ;;  %v1823_v25 = vld [vmem:[%s3128_s3 + $0x30] sm:$0xff] }
 0x197   : > { %v1257_v36 = vadd.f32 %v3147_v34, %v1131_v22  ;;  %v1400_v20 = vmul.f32 %v2884_v55, %v2914_v30 }
 0x198   : > { %v2462_v12 = vpop.f32.mrf.mxu0 }
 0x199   : > { %v2875_v54 = vadd.f32 %v2462_v12, %v1260_v24  ;;  %v2922_v8 = vadd.f32 %v2867_v33, %v1257_v36  ;;  %v1413_v37 = vsel %vm1406_vm1, %v1400_v20, 0.0  ;;  %v1431_v33 = vld [vmem:[%s3127_s2] sm:$0xff] }
 0x19a   : > { %v1355_v45 = vpop.f32.mrf.mxu0  ;;  %2483 = vmatprep.mubr.msk.f32.mxu1 %vm330_vm0, %v1431_v33  ;;  %2511 = vmatprep.mubr.msk.f32.mxu0 %vm330_vm0, %v1431_v33 }
 0x19b   : > { %v1401_v0 = vmul.f32 %v2884_v55, %v2875_v54  ;;  %v2892_v2 = vadd.f32 %v1355_v45, %v1258_v27  ;;  %v1398_v38 = vmul.f32 %v2884_v55, %v2922_v8 }
 0x19c   : > { %v2465_v9 = vpop.f32.mrf.mxu0 }
 0x19d   : > { %v2878_v50 = vadd.f32 %v2465_v9, %v1263_v49  ;;  %v1416_v28 = vsel %vm1406_vm1, %v1401_v0, 0.0  ;;  %v1399_v16 = vmul.f32 %v2884_v55, %v2892_v2  ;;  %v1407_v39 = vsel %vm1406_vm1, %v1398_v38, 0.0  ;;  %v2953_v9 = vld [vmem:[%s3127_s2 + $0x18] sm:$0xff] }
 0x19e   : > { %v1368_v56 = vpop.f32.mrf.mxu0 }
 0x19f   : > { %v1404_v58 = vmul.f32 %v2884_v55, %v2878_v50  ;;  %v2904_v60 = vadd.f32 %v1368_v56, %v1261_v7  ;;  %v1410_v19 = vsel %vm1406_vm1, %v1399_v16, 0.0 }
 0x1a0   : > { %v2466_v63 = vpop.f32.mrf.mxu0 }
 0x1a1   : > { %v2894_v3 = vadd.f32 %v2466_v63, %v1264_v40  ;;  %v1425_v43 = vsel %vm1406_vm1, %v1404_v58, 0.0  ;;  %v1402_v31 = vmul.f32 %v2884_v55, %v2904_v60 }
 0x1a2   : > { %v1371_v4 = vpop.f32.mrf.mxu0  ;;  %1426 = vadd.xlane.f32.xlu1 %v1425_v43 }
 0x1a3   : > { %v2898_v10 = vadd.f32 %v1371_v4, %v1262_v1  ;;  %v1405_v15 = vmul.f32 %v2884_v55, %v2894_v3  ;;  %v1419_v12 = vsel %vm1406_vm1, %v1402_v31, 0.0 }
 0x1a5   : > { %v1428_v32 = vsel %vm1406_vm1, %v1405_v15, 0.0  ;;  %v1403_v11 = vmul.f32 %v2884_v55, %v2898_v10 }
 0x1a6   : > { %1417 = vadd.xlane.f32.xlu1 %v1416_v28  ;;  %1429 = vadd.xlane.f32.xlu0 %v1428_v32 }
 0x1a7   : > { %v1422_v17 = vsel %vm1406_vm1, %v1403_v11, 0.0 }
 0x1aa   : > { %1423 = vadd.xlane.f32.xlu0 %v1422_v17  ;;  %1411 = vadd.xlane.f32.xlu1 %v1410_v19 }
 0x1ae   : > { %1420 = vadd.xlane.f32.xlu0 %v1419_v12 }
 0x1b2   : > { %1414 = vadd.xlane.f32.xlu0 %v1413_v37 }
 0x1b6   : > { %1408 = vadd.xlane.f32.xlu0 %v1407_v39 }
 0x22b   : > { %v1427_v42 = vpop.xlane.xlu1 %1426 }
 0x22f   : > { %v1430_v41 = vpop.xlane.xlu0 %1429  ;;  %v1418_v44 = vpop.xlane.xlu1 %1417 }
 0x230   : > { %2467 = vmatprep.subr.mxu1 %v1430_v41 }
 0x231   : > { %2468 = vmatpush3.msra.mxu1 %v1430_v41 }
 0x232   : > { %2469 = vmatprep.subr.mxu1 %v1427_v42 }
 0x233   : > { %2470 = vmatpush3.msra.mxu1 %v1427_v42  ;;  %v1424_v24 = vpop.xlane.xlu0 %1423  ;;  %v1412_v48 = vpop.xlane.xlu1 %1411 }
 0x234   : > { %2471 = vmatprep.subr.mxu1 %v1424_v24 }
 0x235   : > { %2472 = vmatpush3.msra.mxu1 %v1424_v24  ;;  %v1818_v24 = vld [vmem:[%s3128_s3 + $0x8] sm:$0xff] }
 0x237   : > { %v1421_v45 = vpop.xlane.xlu0 %1420 }
 0x238   : > { %2473 = vmatprep.subr.mxu1 %v1421_v45 }
 0x239   : > { %2474 = vmatpush3.msra.mxu1 %v1421_v45  ;;  %v1824_v45 = vld [vmem:[%s3128_s3 + $0x38] sm:$0xff] }
 0x23a   : > { %2475 = vmatprep.subr.mxu1 %v1418_v44 }
 0x23b   : > { %2476 = vmatpush3.msra.mxu1 %v1418_v44  ;;  %v1415_v46 = vpop.xlane.xlu0 %1414  ;;  %v1817_v44 = vld [vmem:[%s3128_s3] sm:$0xff] }
 0x23c   : > { %2477 = vmatprep.subr.mxu1 %v1415_v46 }
 0x23d   : > { %2478 = vmatpush3.msra.mxu1 %v1415_v46  ;;  %v1819_v46 = vld [vmem:[%s3128_s3 + $0x10] sm:$0xff] }
 0x23e   : > { %2479 = vmatprep.subr.mxu1 %v1412_v48 }
 0x23f   : > { %2480 = vmatpush3.msra.mxu1 %v1412_v48  ;;  %v1409_v49 = vpop.xlane.xlu0 %1408  ;;  %v1874_v48 = vld [vmem:[%s3129_s4 + $0x8] sm:$0xff] }
 0x240   : > { %2481 = vmatprep.subr.mxu1 %v1409_v49 }
 0x241   : > { %2482 = vmatpush3.msra.mxu1 %v1409_v49  ;;  %v1821_v49 = vld [vmem:[%s3128_s3 + $0x20] sm:$0xff] }
 0x242   : > { %2484 = vmatmul.mubr.msk.f32.vlgmr.msra.gmra.mxu1 %vm330_vm0, %v2939_v35 }
 0x243   : > { %2486 = vmatprep.mubr.msk.f32.mxu1 %vm330_vm0, %v2944_v52 }
 0x246   : > { %2487 = vmatmul.mubr.msk.f32.gmra.mxu1 %vm330_vm0, %v2953_v9 }
 0x247   : > { %2489 = vmatprep.mubr.msk.f32.mxu1 %vm330_vm0, %v1435_v13 }
 0x24a   : > { %2490 = vmatmul.mubr.msk.f32.gmra.mxu1 %vm330_vm0, %v2964_v47 }
 0x24b   : > { %2492 = vmatprep.mubr.msk.f32.mxu1 %vm330_vm0, %v2969_v26 }
 0x24e   : > { %2493 = vmatmul.mubr.msk.f32.gmra.mxu1 %vm330_vm0, %v2978_v53 }
 0x24f   : > { %2517 = vmatprep.mubr.msk.f32.mxu1 %vm330_vm0, %v1435_v13  ;;  %v1876_v13 = vld [vmem:[%s3129_s4 + $0x18] sm:$0xff] }
 0x302   : > { %v2485_v56 = vpop.f32.mrf.mxu1 }
 0x304   : > { %v1529_v27 = vpop.f32.mrf.mxu1 }
 0x306   : > { %v2488_v57 = vpop.f32.mrf.mxu1 }
 0x308   : > { %v1539_v40 = vpop.f32.mrf.mxu1 }
 0x30a   : > { %v2491_v58 = vpop.f32.mrf.mxu1 }
 0x30c   : > { %v1549_v59 = vpop.f32.mrf.mxu1 }
 0x30e   : > { %v2494_v51 = vpop.f32.mrf.mxu1 }
 0x30f   : > { %1605 = vperm.xlu1 %2556, %v2494_v51  }
 0x310   : > { %v1559_v61 = vpop.f32.mrf.mxu1 }
 0x311   : > { %1600 = vperm.xlu0 %2557, %v1559_v61  }
 0x313   : > { %1595 = vperm.xlu1 %2556, %v2491_v58  }
 0x317   : > { %1590 = vperm.xlu1 %2556, %v1549_v59  }
 0x31b   : > { %1585 = vperm.xlu1 %2556, %v2488_v57   ;;  %v1875_v57 = vld [vmem:[%s3129_s4 + $0x10] sm:$0xff] }
 0x31f   : > { %1580 = vperm.xlu1 %2556, %v1539_v40   ;;  %v1877_v40 = vld [vmem:[%s3129_s4 + $0x20] sm:$0xff] }
 0x323   : > { %1575 = vperm.xlu1 %2556, %v2485_v56   ;;  %v1878_v56 = vld [vmem:[%s3129_s4 + $0x28] sm:$0xff] }
 0x327   : > { %1570 = vperm.xlu1 %2556, %v1529_v27   ;;  %v1873_v27 = vld [vmem:[%s3129_s4] sm:$0xff] }
 0x38a   : > { %v1606_v62 = vpop.permute.xlu1 %1605 }
 0x38b   : > { %v2984_v63 = vsub.f32 %v2894_v3, %v1606_v62 }
 0x38c   : > { %v1601_v0 = vpop.permute.xlu0 %1600 }
 0x38d   : > { %v1623_v1 = vmul.f32 %v2884_v55, %v2984_v63  ;;  %v2989_v43 = vsub.f32 %v2878_v50, %v1601_v0 }
 0x38e   : > { %v1596_v4 = vpop.permute.xlu1 %1595 }
 0x38f   : > { %v1622_v5 = vmul.f32 %v2884_v55, %v2989_v43  ;;  %v2994_v6 = vsub.f32 %v2898_v10, %v1596_v4  ;;  %v1631_v7 = vmul.f32 %v1623_v1, %v1623_v1 }
 0x391   : > { %v1621_v15 = vmul.f32 %v2884_v55, %v2994_v6  ;;  %v1653_v3 = vsel %vm1406_vm1, %v1631_v7, 0.0  ;;  %v1630_v14 = vmul.f32 %v1622_v5, %v1622_v5 }
 0x392   : > { %1654 = vadd.xlane.f32.xlu1 %v1653_v3  ;;  %v1591_v18 = vpop.permute.xlu1 %1590 }
 0x393   : > { %v3000_v28 = vsub.f32 %v2904_v60, %v1591_v18  ;;  %v1650_v50 = vsel %vm1406_vm1, %v1630_v14, 0.0  ;;  %v1629_v32 = vmul.f32 %v1621_v15, %v1621_v15 }
 0x394   : > { %1651 = vadd.xlane.f32.xlu0 %v1650_v50 }
 0x395   : > { %v1620_v10 = vmul.f32 %v2884_v55, %v3000_v28  ;;  %v1647_v11 = vsel %vm1406_vm1, %v1629_v32, 0.0 }
 0x396   : > { %1648 = vadd.xlane.f32.xlu1 %v1647_v11  ;;  %v1586_v16 = vpop.permute.xlu1 %1585 }
 0x397   : > { %v3007_v21 = vsub.f32 %v2875_v54, %v1586_v16  ;;  %v1628_v22 = vmul.f32 %v1620_v10, %v1620_v10 }
 0x399   : > { %v1619_v23 = vmul.f32 %v2884_v55, %v3007_v21  ;;  %v1644_v60 = vsel %vm1406_vm1, %v1628_v22, 0.0 }
 0x39a   : > { %v1581_v29 = vpop.permute.xlu1 %1580  ;;  %1645 = vadd.xlane.f32.xlu0 %v1644_v60 }
 0x39b   : > { %v3013_v17 = vsub.f32 %v2914_v30, %v1581_v29  ;;  %v1627_v19 = vmul.f32 %v1619_v23, %v1619_v23 }
 0x39d   : > { %v1618_v31 = vmul.f32 %v2884_v55, %v3013_v17  ;;  %v1641_v34 = vsel %vm1406_vm1, %v1627_v19, 0.0 }
 0x39e   : > { %1642 = vadd.xlane.f32.xlu1 %v1641_v34  ;;  %v1576_v54 = vpop.permute.xlu1 %1575 }
 0x39f   : > { %v3019_v36 = vsub.f32 %v2892_v2, %v1576_v54  ;;  %v1626_v12 = vmul.f32 %v1618_v31, %v1618_v31  ;;  %v1879_v31 = vld [vmem:[%s3129_s4 + $0x30] sm:$0xff] }
 0x3a1   : > { %v1617_v20 = vmul.f32 %v2884_v55, %v3019_v36  ;;  %v1638_v37 = vsel %vm1406_vm1, %v1626_v12, 0.0  ;;  %v1880_v12 = vld [vmem:[%s3129_s4 + $0x38] sm:$0xff] }
 0x3a2   : > { %v1571_v38 = vpop.permute.xlu1 %1570  ;;  %1639 = vadd.xlane.f32.xlu0 %v1638_v37 }
 0x3a3   : > { %v3025_v30 = vsub.f32 %v2922_v8, %v1571_v38  ;;  %v1625_v39 = vmul.f32 %v1617_v20, %v1617_v20  ;;  %v1820_v8 = vld [vmem:[%s3128_s3 + $0x18] sm:$0xff] }
 0x3a5   : > { %v1616_v33 = vmul.f32 %v2884_v55, %v3025_v30  ;;  %v1635_v41 = vsel %vm1406_vm1, %v1625_v39, 0.0  ;;  %v1822_v55 = vld [vmem:[%s3128_s3 + $0x28] sm:$0xff] }
 0x3a6   : > { %1636 = vadd.xlane.f32.xlu1 %v1635_v41 }
 0x3a7   : > { %v1624_v2 = vmul.f32 %v1616_v33, %v1616_v33 }
 0x3a9   : > { %v1632_v42 = vsel %vm1406_vm1, %v1624_v2, 0.0 }
 0x3aa   : > { %1633 = vadd.xlane.f32.xlu0 %v1632_v42 }
 0x3b7   : > { %1832 = vperm.xlu1 %2556, %v1818_v24  }
 0x3bb   : > { %1842 = vperm.xlu1 %2556, %v1820_v8  }
 0x3bf   : > { %1852 = vperm.xlu1 %2556, %v1822_v55  }
 0x3c0   : > { %1827 = vperm.xlu0 %2557, %v1817_v44  }
 0x3c3   : > { %1862 = vperm.xlu1 %2556, %v1824_v45  }
 0x3c4   : > { %1837 = vperm.xlu0 %2557, %v1819_v46  }
 0x3c7   : > { %1888 = vperm.xlu1 %2556, %v1874_v48  }
 0x3c8   : > { %1847 = vperm.xlu0 %2557, %v1821_v49  }
 0x3cb   : > { %1898 = vperm.xlu1 %2556, %v1876_v13  }
 0x3cc   : > { %1857 = vperm.xlu0 %2557, %v1823_v25  }
 0x3cf   : > { %1908 = vperm.xlu1 %2556, %v1878_v56  }
 0x3d0   : > { %1883 = vperm.xlu0 %2557, %v1873_v27  }
 0x3d4   : > { %1893 = vperm.xlu0 %2557, %v1875_v57  }
 0x3d8   : > { %1903 = vperm.xlu0 %2557, %v1877_v40  }
 0x41b   : > { %v1655_v58 = vpop.xlane.xlu1 %1654 }
 0x41c   : > { %2495 = vmatprep.subr.mxu0 %v1655_v58  ;;  %2523 = vmatprep.subr.mxu1 %v1655_v58 }
 0x41d   : > { %2496 = vmatpush3.msra.mxu0 %v1655_v58  ;;  %2531 = vmatpush3.msra.mxu1 %v1655_v58  ;;  %v1652_v59 = vpop.xlane.xlu0 %1651 }
 0x41e   : > { %2497 = vmatprep.subr.mxu0 %v1652_v59  ;;  %2524 = vmatprep.subr.mxu1 %v1652_v59 }
 0x41f   : > { %v1649_v51 = vpop.xlane.xlu1 %1648  ;;  %2498 = vmatpush3.msra.mxu0 %v1652_v59  ;;  %2532 = vmatpush3.msra.mxu1 %v1652_v59 }
 0x420   : > { %2499 = vmatprep.subr.mxu0 %v1649_v51  ;;  %2525 = vmatprep.subr.mxu1 %v1649_v51 }
 0x421   : > { %2500 = vmatpush3.msra.mxu0 %v1649_v51  ;;  %2533 = vmatpush3.msra.mxu1 %v1649_v51 }
 0x423   : > { %v1646_v61 = vpop.xlane.xlu0 %1645 }
 0x424   : > { %2501 = vmatprep.subr.mxu0 %v1646_v61  ;;  %2526 = vmatprep.subr.mxu1 %v1646_v61 }
 0x425   : > { %2502 = vmatpush3.msra.mxu0 %v1646_v61  ;;  %2534 = vmatpush3.msra.mxu1 %v1646_v61 }
 0x427   : > { %v1643_v62 = vpop.xlane.xlu1 %1642 }
 0x428   : > { %2503 = vmatprep.subr.mxu0 %v1643_v62  ;;  %2527 = vmatprep.subr.mxu1 %v1643_v62 }
 0x429   : > { %2504 = vmatpush3.msra.mxu0 %v1643_v62  ;;  %2535 = vmatpush3.msra.mxu1 %v1643_v62 }
 0x42b   : > { %v1640_v0 = vpop.xlane.xlu0 %1639 }
 0x42c   : > { %2505 = vmatprep.subr.mxu0 %v1640_v0  ;;  %2528 = vmatprep.subr.mxu1 %v1640_v0 }
 0x42d   : > { %2506 = vmatpush3.msra.mxu0 %v1640_v0  ;;  %2536 = vmatpush3.msra.mxu1 %v1640_v0 }
 0x42f   : > { %v1637_v1 = vpop.xlane.xlu1 %1636 }
 0x430   : > { %2507 = vmatprep.subr.mxu0 %v1637_v1  ;;  %2529 = vmatprep.subr.mxu1 %v1637_v1 }
 0x431   : > { %2508 = vmatpush3.msra.mxu0 %v1637_v1  ;;  %2537 = vmatpush3.msra.mxu1 %v1637_v1 }
 0x433   : > { %v1634_v4 = vpop.xlane.xlu0 %1633  ;;  %v1833_v37 = vpop.permute.xlu1 %1832 }
 0x434   : > { %2509 = vmatprep.subr.mxu0 %v1634_v4  ;;  %2530 = vmatprep.subr.mxu1 %v1634_v4 }
 0x435   : > { %2510 = vmatpush3.msra.mxu0 %v1634_v4  ;;  %2538 = vmatpush3.msra.mxu1 %v1634_v4 }
 0x436   : > { %2512 = vmatmul.mubr.msk.f32.vlgmr.msra.gmra.mxu0 %vm330_vm0, %v2939_v35  ;;  %2518 = vmatmul.mubr.msk.f32.vlgmr.msra.gmra.mxu1 %vm330_vm0, %v2964_v47 }
 0x437   : > { %2520 = vmatprep.mubr.msk.f32.mxu1 %vm330_vm0, %v2969_v26  ;;  %2514 = vmatprep.mubr.msk.f32.mxu0 %vm330_vm0, %v2944_v52  ;;  %v1843_v39 = vpop.permute.xlu1 %1842 }
 0x43a   : > { %2521 = vmatmul.mubr.msk.f32.gmra.mxu1 %vm330_vm0, %v2978_v53  ;;  %2515 = vmatmul.mubr.msk.f32.gmra.mxu0 %vm330_vm0, %v2953_v9 }
 0x43b   : > { %v1828_v20 = vpop.permute.xlu0 %1827  ;;  %v1853_v41 = vpop.permute.xlu1 %1852 }
 0x43f   : > { %v1838_v38 = vpop.permute.xlu0 %1837  ;;  %v1863_v42 = vpop.permute.xlu1 %1862 }
 0x443   : > { %v1848_v33 = vpop.permute.xlu0 %1847  ;;  %v1889_v8 = vpop.permute.xlu1 %1888 }
 0x447   : > { %v1858_v2 = vpop.permute.xlu0 %1857  ;;  %v1899_v44 = vpop.permute.xlu1 %1898 }
 0x44b   : > { %v1884_v24 = vpop.permute.xlu0 %1883  ;;  %v1909_v46 = vpop.permute.xlu1 %1908 }
 0x44f   : > { %v1894_v55 = vpop.permute.xlu0 %1893 }
 0x453   : > { %v1904_v45 = vpop.permute.xlu0 %1903 }
 0x4f6   : > { %v2513_v5 = vpop.f32.mrf.mxu0  ;;  %v2519_v7 = vpop.f32.mrf.mxu1 }
 0x4f7   : > { %v1728_v15 = vadd.f32 1e-05, %v2513_v5  ;;  %v1748_v3 = vadd.f32 1e-05, %v2519_v7 }
 0x4f8   : > { %v1742_v35 = vpop.f32.mrf.mxu1  ;;  %v1722_v14 = vpop.f32.mrf.mxu0 }
 0x4f9   : > { %2598 = vrsqrt.f32 %v1728_v15  ;;  %v1743_v47 = vadd.f32 1e-05, %v1742_v35  ;;  %v1723_v18 = vadd.f32 1e-05, %v1722_v14 }
 0x4fa   : > { %2600 = vrsqrt.f32 %v1748_v3  ;;  %v2522_v26 = vpop.f32.mrf.mxu1  ;;  %v2516_v50 = vpop.f32.mrf.mxu0 }
 0x4fb   : > { %v1738_v32 = vadd.f32 1e-05, %v2516_v50  ;;  %2602 = vrsqrt.f32 %v1743_v47  ;;  %v1758_v53 = vadd.f32 1e-05, %v2522_v26 }
 0x4fc   : > { %v1752_v52 = vpop.f32.mrf.mxu1  ;;  %2604 = vrsqrt.f32 %v1723_v18  ;;  %v1732_v9 = vpop.f32.mrf.mxu0 }
 0x4fd   : > { %v1753_v10 = vadd.f32 1e-05, %v1752_v52  ;;  %v1733_v16 = vadd.f32 1e-05, %v1732_v9 }
 0x4ff   : > { %2606 = vrsqrt.f32 %v1753_v10 }
 0x500   : > { %2608 = vrsqrt.f32 %v1738_v32 }
 0x501   : > { %2610 = vrsqrt.f32 %v1758_v53 }
 0x502   : > { %2612 = vrsqrt.f32 %v1733_v16 }
 0x506   : > { %v2599_v11 = vpop.eup %2598 }
 0x507   : > { %v2601_v22 = vpop.eup %2600  ;;  %1776 = vperm.xlu0 %2557, %v2599_v11  }
 0x508   : > { %1796 = vperm.xlu1 %2556, %v2601_v22   ;;  %v2603_v23 = vpop.eup %2602 }
 0x509   : > { %v2605_v60 = vpop.eup %2604 }
 0x50b   : > { %1791 = vperm.xlu0 %2557, %v2603_v23  }
 0x50c   : > { %v2607_v29 = vpop.eup %2606  ;;  %1771 = vperm.xlu1 %2556, %v2605_v60  }
 0x50d   : > { %v2609_v19 = vpop.eup %2608 }
 0x50e   : > { %v2611_v34 = vpop.eup %2610 }
 0x50f   : > { %1801 = vperm.xlu0 %2557, %v2607_v29   ;;  %v2613_v54 = vpop.eup %2612 }
 0x510   : > { %1786 = vperm.xlu1 %2556, %v2609_v19  }
 0x513   : > { %1913 = vperm.xlu0 %2557, %v1879_v31  }
 0x514   : > { %1806 = vperm.xlu1 %2556, %v2611_v34  }
 0x518   : > { %1781 = vperm.xlu1 %2556, %v2613_v54  }
 0x51c   : > { %1918 = vperm.xlu1 %2556, %v1880_v12  }
 0x582   : > { %v1777_v48 = vpop.permute.xlu0 %1776 }
 0x583   : > { %v1797_v49 = vpop.permute.xlu1 %1796  ;;  %v1810_v13 = vmul.f32 %v1777_v48, %v3019_v36 }
 0x584   : > { %v1814_v25 = vmul.f32 %v1797_v49, %v2994_v6 }
 0x585   : > { %v1866_v56 = vmul.f32 %v1833_v37, %v1810_v13 }
 0x586   : > { %v1870_v27 = vmul.f32 %v1853_v41, %v1814_v25  ;;  %v1792_v57 = vpop.permute.xlu0 %1791 }
 0x587   : > { %v1922_v40 = vadd.f32 %v1889_v8, %v1866_v56  ;;  %v1772_v58 = vpop.permute.xlu1 %1771  ;;  %v1813_v59 = vmul.f32 %v1792_v57, %v3000_v28 }
 0x588   : > { %v1926_v51 = vadd.f32 %v1909_v46, %v1870_v27  ;;  %v1809_v61 = vmul.f32 %v1772_v58, %v3025_v30 }
 0x589   : > { %v1930_v62 = vmax.f32 %v1922_v40, 0.0  ;;  %v1869_v0 = vmul.f32 %v1848_v33, %v1813_v59 }
 0x58a   : > { %v1934_v6 = vmax.f32 %v1926_v51, 0.0  ;;  %v1865_v36 = vmul.f32 %v1828_v20, %v1809_v61  ;;  %v1802_v1 = vpop.permute.xlu0 %1801 }
 0x58b   : > { %v2212_v4 = vpack.c.bf16 %v1930_v62, %v1930_v62  ;;  %v1925_v5 = vadd.f32 %v1904_v45, %v1869_v0  ;;  %v1787_v28 = vpop.permute.xlu1 %1786  ;;  %v1815_v7 = vmul.f32 %v1802_v1, %v2989_v43 }
 0x58c   : > { %v2216_v30 = vpack.c.bf16 %v1934_v6, %v1934_v6  ;;  %v1921_v15 = vadd.f32 %v1884_v24, %v1865_v36  ;;  %v1812_v3 = vmul.f32 %v1787_v28, %v3007_v21 }
 0x58d   : > { %1971 = vst.msk [vmem:[%s3100_s9 + $0x4] sm:$0xf] %vm1969_vm2, %v2212_v4  ;;  %v1933_v35 = vmax.f32 %v1925_v5, 0.0  ;;  %v1871_v14 = vmul.f32 %v1858_v2, %v1815_v7 }
 0x58e   : > { %1975 = vst.msk [vmem:[%s3100_s9 + $0x14] sm:$0xf] %vm1969_vm2, %v2216_v30  ;;  %v1929_v47 = vmax.f32 %v1921_v15, 0.0  ;;  %v1868_v18 = vmul.f32 %v1843_v39, %v1812_v3  ;;  %v1914_v26 = vpop.permute.xlu0 %1913 }
 0x58f   : > { %v2215_v50 = vpack.c.bf16 %v1933_v35, %v1933_v35  ;;  %v1807_v32 = vpop.permute.xlu1 %1806  ;;  %v1927_v43 = vadd.f32 %v1914_v26, %v1871_v14 }
 0x590   : > { %v2211_v52 = vpack.c.bf16 %v1929_v47, %v1929_v47  ;;  %v1924_v10 = vadd.f32 %v1899_v44, %v1868_v18  ;;  %v1816_v9 = vmul.f32 %v1807_v32, %v2984_v63 }
 0x591   : > { %1974 = vst.msk [vmem:[%s3100_s9 + $0x10] sm:$0xf] %vm1969_vm2, %v2215_v50  ;;  %v1935_v53 = vmax.f32 %v1927_v43, 0.0 }
 0x592   : > { %1970 = vst.msk [vmem:[%s3100_s9] sm:$0xf] %vm1969_vm2, %v2211_v52  ;;  %v1932_v21 = vmax.f32 %v1924_v10, 0.0  ;;  %v1872_v29 = vmul.f32 %v1863_v42, %v1816_v9 }
 0x593   : > { %v2217_v11 = vpack.c.bf16 %v1935_v53, %v1935_v53  ;;  %v1782_v16 = vpop.permute.xlu1 %1781 }
 0x594   : > { %v2214_v22 = vpack.c.bf16 %v1932_v21, %v1932_v21  ;;  %v1811_v23 = vmul.f32 %v1782_v16, %v3013_v17 }
 0x595   : > { %1976 = vst.msk [vmem:[%s3100_s9 + $0x18] sm:$0xf] %vm1969_vm2, %v2217_v11 }
 0x596   : > { %1973 = vst.msk [vmem:[%s3100_s9 + $0xc] sm:$0xf] %vm1969_vm2, %v2214_v22  ;;  %v1867_v60 = vmul.f32 %v1838_v38, %v1811_v23 }
 0x597   : > { %v1919_v19 = vpop.permute.xlu1 %1918 }
 0x598   : > { %v1923_v31 = vadd.f32 %v1894_v55, %v1867_v60  ;;  %v1928_v34 = vadd.f32 %v1919_v19, %v1872_v29 }
 0x59a   : > { %v1931_v54 = vmax.f32 %v1923_v31, 0.0  ;;  %v1936_v12 = vmax.f32 %v1928_v34, 0.0 }
 0x59c   : > { %v2213_v20 = vpack.c.bf16 %v1931_v54, %v1931_v54  ;;  %v2218_v63 = vpack.c.bf16 %v1936_v12, %v1936_v12 }
 0x59e   : > { %1972 = vst.msk [vmem:[%s3100_s9 + $0x8] sm:$0xf] %vm1969_vm2, %v2213_v20  ;;  %1977 = vst.msk [vmem:[%s3100_s9 + $0x1c] sm:$0xf] %vm1969_vm2, %v2218_v63 }
 0x59f PF: > { %s16_s21 = sadd.s32 1, %s2620_s21  }
 0x5a0   : > { %p13_p4 = scmp.ge.s32.totalorder %s16_s21, 4  }
 0x5a2   :  { %15 = sbr.rel (!%p13_p4) target bundleno = 1 (0x1), region = 82 }

</bundles_post_ra>
